<compile_context>
chip_gen: v6e
topology: v6e:2x2x1
jax: 0.10.0
libtpu: 0.0.40
codegen_flags: <defaults>
</compile_context>

<pallas_src>
import math

import numpy as np
import jax
import jax.numpy as jnp
from jax.experimental import pallas as pl
from jax.experimental.pallas import tpu as pltpu

SELU_ALPHA = 1.6732632423543772
SELU_SCALE = 1.0507009873554805
VMEM_LIMIT = 32 * 1024 * 1024    # comfortably inside v5e/v6e/v7x scoped VMEM

KH = KW = 5
STRIDE = 2
# (C_in, C_out, H_in, W_in, H_out, W_out) for conv1/conv2/conv3
_GEOM = [(3, 16, 40, 80, 18, 38),
         (16, 32, 18, 38, 7, 17),
         (32, 32, 7, 17, 2, 7)]


# ----------------------------------------------------------------------------
# Kernel
# ----------------------------------------------------------------------------
def _selu_f32(x):
    # exp only on the non-positive branch so the untaken lane never overflows.
    return SELU_SCALE * jnp.where(
        x > 0.0, x, SELU_ALPHA * (jnp.exp(jnp.minimum(x, 0.0)) - 1.0))


def _conv_rows(a_perm, r_ref, b_ref, *, oh, n_even):
    """One conv layer.  a_perm: (H_in, W_in*C_in) bf16 with even input rows first
    (n_even of them, odd rows after).  r_ref: (5, W_in*C_in, W_out*C_out) bf16
    per-kernel-row banded weights.  b_ref: (1, W_out*C_out) f32 bias row.
    Returns SELU(conv) as (oh, W_out*C_out) bf16.  Every row selection is a
    contiguous static slice (the stride-2 is absorbed by the even/odd order)."""
    acc = b_ref[...]                                # (1, N) f32, broadcasts on add
    for i in range(KH):
        base = (i % 2) * n_even + i // 2            # original rows 2*oh + i
        lhs = a_perm[base:base + oh, :]
        acc = acc + jnp.dot(lhs, r_ref[i], preferred_element_type=jnp.float32)
    return _selu_f32(acc).astype(jnp.bfloat16)


def _fused_forward_kernel(x_ref, p2_ref, p3_ref,
                          r1_ref, b1_ref, r2_ref, b2_ref, r3_ref, b3_ref,
                          wh_ref, bh_ref, o_ref):
    # conv1: input sample (40, 80*3) bf16, even-h rows first (host-side reorder)
    x = x_ref[0]                                                    # (40, 240)
    a1 = _conv_rows(x, r1_ref, b1_ref, oh=18, n_even=20)            # (18, 608)

    # conv2: even-rows-first reorder of a1 via a tiny exact 0/1 permutation matmul
    a1p = jnp.dot(p2_ref[...], a1,
                  preferred_element_type=jnp.float32).astype(jnp.bfloat16)
    a2 = _conv_rows(a1p, r2_ref, b2_ref, oh=7, n_even=9)            # (7, 544)

    # conv3
    a2p = jnp.dot(p3_ref[...], a2,
                  preferred_element_type=jnp.float32).astype(jnp.bfloat16)
    a3 = _conv_rows(a2p, r3_ref, b3_ref, oh=2, n_even=4)            # (2, 224)

    # head (+ torch channel-major .view baked into wh at init) + stable softmax
    logits = (bh_ref[...]
              + jnp.dot(a3[0:1, :], wh_ref[0], preferred_element_type=jnp.float32)
              + jnp.dot(a3[1:2, :], wh_ref[1], preferred_element_type=jnp.float32))
    z = logits - jnp.max(logits, axis=-1, keepdims=True)
    e = jnp.exp(z)
    o_ref[0] = e / jnp.sum(e, axis=-1, keepdims=True)


# ----------------------------------------------------------------------------
# Forward wrapper: one pallas_call for the whole network
# ----------------------------------------------------------------------------
def convolutional_softmax_forward(kp, x):
    """x: (N, 3, 40, 80) f32 NCHW (PyTorch convention) -> softmax probs (N, OS)."""
    n = x.shape[0]
    os_ = kp["bh"].shape[-1]
    # NCHW -> (N, H, W*C) with even-h rows first; single bf16 cast.
    xh = jnp.transpose(x, (0, 2, 3, 1)).reshape(n, 40, 240)
    xp = jnp.concatenate([xh[:, 0::2, :], xh[:, 1::2, :]], axis=1).astype(jnp.bfloat16)

    def _const_spec(a):
        nd = a.ndim
        return pl.BlockSpec(tuple(a.shape), lambda i: (0,) * nd)

    out = pl.pallas_call(
        _fused_forward_kernel,
        out_shape=jax.ShapeDtypeStruct((n, 1, os_), jnp.float32),
        grid=(n,),
        in_specs=[
            pl.BlockSpec((1, 40, 240), lambda i: (i, 0, 0)),
            _const_spec(kp["p2"]), _const_spec(kp["p3"]),
            _const_spec(kp["r1"]), _const_spec(kp["b1"]),
            _const_spec(kp["r2"]), _const_spec(kp["b2"]),
            _const_spec(kp["r3"]), _const_spec(kp["b3"]),
            _const_spec(kp["wh"]), _const_spec(kp["bh"]),
        ],
        out_specs=pl.BlockSpec((1, 1, os_), lambda i: (i, 0, 0)),
        compiler_params=pltpu.CompilerParams(
            dimension_semantics=("parallel",),
            vmem_limit_bytes=VMEM_LIMIT),
    )(xp, kp["p2"], kp["p3"], kp["r1"], kp["b1"], kp["r2"], kp["b2"],
      kp["r3"], kp["b3"], kp["wh"], kp["bh"])
    return out.reshape(n, os_)


# ----------------------------------------------------------------------------
# Parameters: torch-layout init, then ONE-TIME re-layout into kernel-ready form
# ----------------------------------------------------------------------------
def _xavier_uniform(key, shape, fan_in, fan_out):
    bound = math.sqrt(6.0 / (fan_in + fan_out))
    return jax.random.uniform(key, shape, jnp.float32, -bound, bound)


def _bias_init(key, shape, fan_in):
    bound = 1.0 / math.sqrt(fan_in)
    return jax.random.uniform(key, shape, jnp.float32, -bound, bound)


def init_torch_params(key, output_size):
    """Parameters in PyTorch layouts (Conv2d: (OC, C, KH, KW); Linear: (out, in))."""
    ks = jax.random.split(key, 8)
    p = {}
    p["conv1_w"] = _xavier_uniform(ks[0], (16, 3, 5, 5), 3 * 25, 16 * 25)
    p["conv1_b"] = _bias_init(ks[1], (16,), 3 * 25)
    p["conv2_w"] = _xavier_uniform(ks[2], (32, 16, 5, 5), 16 * 25, 32 * 25)
    p["conv2_b"] = _bias_init(ks[3], (32,), 16 * 25)
    p["conv3_w"] = _xavier_uniform(ks[4], (32, 32, 5, 5), 32 * 25, 32 * 25)
    p["conv3_b"] = _bias_init(ks[5], (32,), 32 * 25)
    p["head_w"] = _xavier_uniform(ks[6], (output_size, 448), 448, output_size)
    p["head_b"] = _bias_init(ks[7], (output_size,), 448)
    return p


def _banded_weights(w_torch, w_in, w_out):
    """Per-kernel-row banded matrices: R[i, w1*Cin + c, ow*OC + oc] =
    W[oc, c, i, w1 - 2*ow] inside the band, 0 elsewhere."""
    oc_n, cin, kh, kw = w_torch.shape
    r = np.zeros((kh, w_in * cin, w_out * oc_n), np.float32)
    for i in range(kh):
        for ow in range(w_out):
            for j in range(kw):
                w1 = STRIDE * ow + j
                r[i, w1 * cin:(w1 + 1) * cin, ow * oc_n:(ow + 1) * oc_n] = \
                    w_torch[:, :, i, j].T
    return r


def _even_odd_perm(h):
    """0/1 matrix P with (P @ A)[k] = A[2k] for k < ceil(h/2), else A[2(k-ne)+1]."""
    ne = (h + 1) // 2
    p = np.zeros((h, h), np.float32)
    for k in range(h):
        p[k, 2 * k if k < ne else 2 * (k - ne) + 1] = 1.0
    return p


def prepare_kernel_params(p, output_size):
    """One-time static re-layout (done at init, never per forward)."""
    pn = {k: np.asarray(v, np.float32) for k, v in p.items()}
    kp = {}
    for li, (cin, cout, _h_in, w_in, _h_out, w_out) in enumerate(_GEOM, start=1):
        assert pn[f"conv{li}_w"].shape == (cout, cin, KH, KW)
        kp[f"r{li}"] = jnp.asarray(
            _banded_weights(pn[f"conv{li}_w"], w_in, w_out), jnp.bfloat16)
        kp[f"b{li}"] = jnp.asarray(
            np.tile(pn[f"conv{li}_b"], w_out)[None, :], jnp.float32)
    kp["p2"] = jnp.asarray(_even_odd_perm(18), jnp.bfloat16)
    kp["p3"] = jnp.asarray(_even_odd_perm(7), jnp.bfloat16)
    # Head: torch flattens conv3 NCHW (N,32,2,7) channel-major (idx = c*14+oh*7+ow);
    # the kernel consumes a3[oh, ow*32 + c] -> bake the permutation into wh.
    wh = pn["head_w"].reshape(output_size, 32, 2, 7)          # [o, c, oh, ow]
    wh = np.transpose(wh, (2, 3, 1, 0)).reshape(2, 7 * 32, output_size)
    kp["wh"] = jnp.asarray(wh, jnp.bfloat16)
    kp["bh"] = jnp.asarray(pn["head_b"][None, :], jnp.float32)
    return kp


# ----------------------------------------------------------------------------
# Pure-JAX (XLA, f32) reference of the PyTorch module, for in-script validation
# ----------------------------------------------------------------------------
def reference_forward(p, x):
    def conv(z, w, b):
        z = jax.lax.conv_general_dilated(
            z, w, window_strides=(STRIDE, STRIDE), padding="VALID",
            dimension_numbers=("NCHW", "OIHW", "NCHW"))
        return jax.nn.selu(z + b[None, :, None, None])
    z = conv(x, p["conv1_w"], p["conv1_b"])
    z = conv(z, p["conv2_w"], p["conv2_b"])
    z = conv(z, p["conv3_w"], p["conv3_b"])
    logits = z.reshape(z.shape[0], -1) @ p["head_w"].T + p["head_b"]
    return jax.nn.softmax(logits, axis=-1)


if __name__ == "__main__":
    OUTPUT_SIZE = 4
    key = jax.random.PRNGKey(0)
    k_params, k_x = jax.random.split(key)
    torch_params = init_torch_params(k_params, OUTPUT_SIZE)
    kparams = prepare_kernel_params(torch_params, OUTPUT_SIZE)

    # Linear(448,.) hard-codes the 32*2*7 conv3 output -> input spatial (40, 80).
    x = jax.random.normal(k_x, (2, 3, 40, 80), jnp.float32)

    fwd = jax.jit(convolutional_softmax_forward)
    y = jax.block_until_ready(fwd(kparams, x))

    assert y.shape == (2, OUTPUT_SIZE), y.shape
    assert y.dtype == jnp.float32
    assert bool(jnp.all(jnp.isfinite(y)))
    assert bool(jnp.allclose(jnp.sum(y, axis=-1), 1.0, atol=1e-3))
    # bf16-activation kernel vs f32 XLA reference (absolute error on probabilities).
    y_ref = reference_forward(torch_params, x)
    assert bool(jnp.allclose(y, y_ref, atol=3e-2)), float(jnp.max(jnp.abs(y - y_ref)))
    print("KERNEL_OK")
</pallas_src>

<mosaic_0001>
module attributes {stable_mosaic.version = 11 : i64} {
  func.func @_fused_forward_kernel(%arg0: i32, %arg1: memref<1x40x240xbf16, #tpu.memory_space<vmem>>, %arg2: memref<18x18xbf16, #tpu.memory_space<vmem>>, %arg3: memref<7x7xbf16, #tpu.memory_space<vmem>>, %arg4: memref<5x240x608xbf16, #tpu.memory_space<vmem>>, %arg5: memref<1x608xf32, #tpu.memory_space<vmem>>, %arg6: memref<5x608x544xbf16, #tpu.memory_space<vmem>>, %arg7: memref<1x544xf32, #tpu.memory_space<vmem>>, %arg8: memref<5x544x224xbf16, #tpu.memory_space<vmem>>, %arg9: memref<1x224xf32, #tpu.memory_space<vmem>>, %arg10: memref<2x224x4xbf16, #tpu.memory_space<vmem>>, %arg11: memref<1x4xf32, #tpu.memory_space<vmem>>, %arg12: memref<1x1x4xf32, #tpu.memory_space<vmem>>) attributes {dimension_semantics = [#tpu.dimension_semantics<parallel>], iteration_bounds = array<i64: 2>, scalar_prefetch = 0 : i64, scratch_operands = 0 : i64, tpu.core_type = #tpu.core_type<tc>, window_params = [{transform_indices = @transform_0, window_bounds = array<i64: 1, 40, 240>}, {pipeline_mode = #tpu.pipeline_mode<synchronous>, transform_indices = @transform_1, window_bounds = array<i64: 18, 18>}, {pipeline_mode = #tpu.pipeline_mode<synchronous>, transform_indices = @transform_2, window_bounds = array<i64: 7, 7>}, {pipeline_mode = #tpu.pipeline_mode<synchronous>, transform_indices = @transform_3, window_bounds = array<i64: 5, 240, 608>}, {pipeline_mode = #tpu.pipeline_mode<synchronous>, transform_indices = @transform_4, window_bounds = array<i64: 1, 608>}, {pipeline_mode = #tpu.pipeline_mode<synchronous>, transform_indices = @transform_5, window_bounds = array<i64: 5, 608, 544>}, {pipeline_mode = #tpu.pipeline_mode<synchronous>, transform_indices = @transform_6, window_bounds = array<i64: 1, 544>}, {pipeline_mode = #tpu.pipeline_mode<synchronous>, transform_indices = @transform_7, window_bounds = array<i64: 5, 544, 224>}, {pipeline_mode = #tpu.pipeline_mode<synchronous>, transform_indices = @transform_8, window_bounds = array<i64: 1, 224>}, {pipeline_mode = #tpu.pipeline_mode<synchronous>, transform_indices = @transform_9, window_bounds = array<i64: 2, 224, 4>}, {pipeline_mode = #tpu.pipeline_mode<synchronous>, transform_indices = @transform_10, window_bounds = array<i64: 1, 4>}, {transform_indices = @transform_11, window_bounds = array<i64: 1, 1, 4>}]} {
    %c0 = arith.constant 0 : index
    %c0_0 = arith.constant 0 : index
    %c0_1 = arith.constant 0 : index
    %0 = vector.load %arg1[%c0, %c0_0, %c0_1] : memref<1x40x240xbf16, #tpu.memory_space<vmem>>, vector<1x40x240xbf16>
    %1 = vector.shape_cast %0 : vector<1x40x240xbf16> to vector<40x240xbf16>
    %c0_2 = arith.constant 0 : index
    %c0_3 = arith.constant 0 : index
    %2 = vector.load %arg5[%c0_2, %c0_3] : memref<1x608xf32, #tpu.memory_space<vmem>>, vector<1x608xf32>
    %3 = vector.extract_strided_slice %1 {offsets = [0, 0], sizes = [18, 240], strides = [1, 1]} : vector<40x240xbf16> to vector<18x240xbf16>
    %c0_4 = arith.constant 0 : index
    %c0_5 = arith.constant 0 : index
    %c0_6 = arith.constant 0 : index
    %4 = vector.load %arg4[%c0_4, %c0_5, %c0_6] : memref<5x240x608xbf16, #tpu.memory_space<vmem>>, vector<1x240x608xbf16>
    %5 = vector.shape_cast %4 : vector<1x240x608xbf16> to vector<240x608xbf16>
    %cst = arith.constant dense<0.000000e+00> : vector<18x608xf32>
    %6 = tpu.matmul %3, %5, %cst {dimension_numbers = #tpu.dot_dimension_numbers<[1], [0], [0], [1], [0, 0, 1, 1], [], []>} : vector<18x240xbf16>, vector<240x608xbf16>, vector<18x608xf32> -> vector<18x608xf32>
    %7 = vector.broadcast %2 : vector<1x608xf32> to vector<18x608xf32>
    %8 = arith.addf %7, %6 : vector<18x608xf32>
    %9 = vector.extract_strided_slice %1 {offsets = [20, 0], sizes = [18, 240], strides = [1, 1]} : vector<40x240xbf16> to vector<18x240xbf16>
    %c1 = arith.constant 1 : index
    %c0_7 = arith.constant 0 : index
    %c0_8 = arith.constant 0 : index
    %10 = vector.load %arg4[%c1, %c0_7, %c0_8] : memref<5x240x608xbf16, #tpu.memory_space<vmem>>, vector<1x240x608xbf16>
    %11 = vector.shape_cast %10 : vector<1x240x608xbf16> to vector<240x608xbf16>
    %cst_9 = arith.constant dense<0.000000e+00> : vector<18x608xf32>
    %12 = tpu.matmul %9, %11, %cst_9 {dimension_numbers = #tpu.dot_dimension_numbers<[1], [0], [0], [1], [0, 0, 1, 1], [], []>} : vector<18x240xbf16>, vector<240x608xbf16>, vector<18x608xf32> -> vector<18x608xf32>
    %13 = arith.addf %8, %12 : vector<18x608xf32>
    %14 = vector.extract_strided_slice %1 {offsets = [1, 0], sizes = [18, 240], strides = [1, 1]} : vector<40x240xbf16> to vector<18x240xbf16>
    %c2 = arith.constant 2 : index
    %c0_10 = arith.constant 0 : index
    %c0_11 = arith.constant 0 : index
    %15 = vector.load %arg4[%c2, %c0_10, %c0_11] : memref<5x240x608xbf16, #tpu.memory_space<vmem>>, vector<1x240x608xbf16>
    %16 = vector.shape_cast %15 : vector<1x240x608xbf16> to vector<240x608xbf16>
    %cst_12 = arith.constant dense<0.000000e+00> : vector<18x608xf32>
    %17 = tpu.matmul %14, %16, %cst_12 {dimension_numbers = #tpu.dot_dimension_numbers<[1], [0], [0], [1], [0, 0, 1, 1], [], []>} : vector<18x240xbf16>, vector<240x608xbf16>, vector<18x608xf32> -> vector<18x608xf32>
    %18 = arith.addf %13, %17 : vector<18x608xf32>
    %19 = vector.extract_strided_slice %1 {offsets = [21, 0], sizes = [18, 240], strides = [1, 1]} : vector<40x240xbf16> to vector<18x240xbf16>
    %c3 = arith.constant 3 : index
    %c0_13 = arith.constant 0 : index
    %c0_14 = arith.constant 0 : index
    %20 = vector.load %arg4[%c3, %c0_13, %c0_14] : memref<5x240x608xbf16, #tpu.memory_space<vmem>>, vector<1x240x608xbf16>
    %21 = vector.shape_cast %20 : vector<1x240x608xbf16> to vector<240x608xbf16>
    %cst_15 = arith.constant dense<0.000000e+00> : vector<18x608xf32>
    %22 = tpu.matmul %19, %21, %cst_15 {dimension_numbers = #tpu.dot_dimension_numbers<[1], [0], [0], [1], [0, 0, 1, 1], [], []>} : vector<18x240xbf16>, vector<240x608xbf16>, vector<18x608xf32> -> vector<18x608xf32>
    %23 = arith.addf %18, %22 : vector<18x608xf32>
    %24 = vector.extract_strided_slice %1 {offsets = [2, 0], sizes = [18, 240], strides = [1, 1]} : vector<40x240xbf16> to vector<18x240xbf16>
    %c4 = arith.constant 4 : index
    %c0_16 = arith.constant 0 : index
    %c0_17 = arith.constant 0 : index
    %25 = vector.load %arg4[%c4, %c0_16, %c0_17] : memref<5x240x608xbf16, #tpu.memory_space<vmem>>, vector<1x240x608xbf16>
    %26 = vector.shape_cast %25 : vector<1x240x608xbf16> to vector<240x608xbf16>
    %cst_18 = arith.constant dense<0.000000e+00> : vector<18x608xf32>
    %27 = tpu.matmul %24, %26, %cst_18 {dimension_numbers = #tpu.dot_dimension_numbers<[1], [0], [0], [1], [0, 0, 1, 1], [], []>} : vector<18x240xbf16>, vector<240x608xbf16>, vector<18x608xf32> -> vector<18x608xf32>
    %28 = arith.addf %23, %27 : vector<18x608xf32>
    %cst_19 = arith.constant 0.000000e+00 : f32
    %29 = vector.broadcast %cst_19 : f32 to vector<18x608xf32>
    %30 = arith.cmpf ogt, %28, %29 : vector<18x608xf32>
    %cst_20 = arith.constant 0.000000e+00 : f32
    %31 = vector.broadcast %cst_20 : f32 to vector<18x608xf32>
    %32 = arith.minimumf %28, %31 : vector<18x608xf32>
    %33 = math.exp %32 : vector<18x608xf32>
    %cst_21 = arith.constant 1.000000e+00 : f32
    %34 = vector.broadcast %cst_21 : f32 to vector<18x608xf32>
    %35 = arith.subf %33, %34 : vector<18x608xf32>
    %cst_22 = arith.constant 1.67326319 : f32
    %36 = vector.broadcast %cst_22 : f32 to vector<18x608xf32>
    %37 = arith.mulf %36, %35 : vector<18x608xf32>
    %38 = arith.select %30, %28, %37 : vector<18x608xi1>, vector<18x608xf32>
    %cst_23 = arith.constant 1.05070102 : f32
    %39 = vector.broadcast %cst_23 : f32 to vector<18x608xf32>
    %40 = arith.mulf %39, %38 : vector<18x608xf32>
    %41 = arith.truncf %40 : vector<18x608xf32> to vector<18x608xbf16>
    %c0_24 = arith.constant 0 : index
    %c0_25 = arith.constant 0 : index
    %42 = vector.load %arg2[%c0_24, %c0_25] : memref<18x18xbf16, #tpu.memory_space<vmem>>, vector<18x18xbf16>
    %cst_26 = arith.constant dense<0.000000e+00> : vector<18x608xf32>
    %43 = tpu.matmul %42, %41, %cst_26 {dimension_numbers = #tpu.dot_dimension_numbers<[1], [0], [0], [1], [0, 0, 1, 1], [], []>} : vector<18x18xbf16>, vector<18x608xbf16>, vector<18x608xf32> -> vector<18x608xf32>
    %44 = arith.truncf %43 : vector<18x608xf32> to vector<18x608xbf16>
    %c0_27 = arith.constant 0 : index
    %c0_28 = arith.constant 0 : index
    %45 = vector.load %arg7[%c0_27, %c0_28] : memref<1x544xf32, #tpu.memory_space<vmem>>, vector<1x544xf32>
    %46 = vector.extract_strided_slice %44 {offsets = [0, 0], sizes = [7, 608], strides = [1, 1]} : vector<18x608xbf16> to vector<7x608xbf16>
    %c0_29 = arith.constant 0 : index
    %c0_30 = arith.constant 0 : index
    %c0_31 = arith.constant 0 : index
    %47 = vector.load %arg6[%c0_29, %c0_30, %c0_31] : memref<5x608x544xbf16, #tpu.memory_space<vmem>>, vector<1x608x544xbf16>
    %48 = vector.shape_cast %47 : vector<1x608x544xbf16> to vector<608x544xbf16>
    %cst_32 = arith.constant dense<0.000000e+00> : vector<7x544xf32>
    %49 = tpu.matmul %46, %48, %cst_32 {dimension_numbers = #tpu.dot_dimension_numbers<[1], [0], [0], [1], [0, 0, 1, 1], [], []>} : vector<7x608xbf16>, vector<608x544xbf16>, vector<7x544xf32> -> vector<7x544xf32>
    %50 = vector.broadcast %45 : vector<1x544xf32> to vector<7x544xf32>
    %51 = arith.addf %50, %49 : vector<7x544xf32>
    %52 = vector.extract_strided_slice %44 {offsets = [9, 0], sizes = [7, 608], strides = [1, 1]} : vector<18x608xbf16> to vector<7x608xbf16>
    %c1_33 = arith.constant 1 : index
    %c0_34 = arith.constant 0 : index
    %c0_35 = arith.constant 0 : index
    %53 = vector.load %arg6[%c1_33, %c0_34, %c0_35] : memref<5x608x544xbf16, #tpu.memory_space<vmem>>, vector<1x608x544xbf16>
    %54 = vector.shape_cast %53 : vector<1x608x544xbf16> to vector<608x544xbf16>
    %cst_36 = arith.constant dense<0.000000e+00> : vector<7x544xf32>
    %55 = tpu.matmul %52, %54, %cst_36 {dimension_numbers = #tpu.dot_dimension_numbers<[1], [0], [0], [1], [0, 0, 1, 1], [], []>} : vector<7x608xbf16>, vector<608x544xbf16>, vector<7x544xf32> -> vector<7x544xf32>
    %56 = arith.addf %51, %55 : vector<7x544xf32>
    %57 = vector.extract_strided_slice %44 {offsets = [1, 0], sizes = [7, 608], strides = [1, 1]} : vector<18x608xbf16> to vector<7x608xbf16>
    %c2_37 = arith.constant 2 : index
    %c0_38 = arith.constant 0 : index
    %c0_39 = arith.constant 0 : index
    %58 = vector.load %arg6[%c2_37, %c0_38, %c0_39] : memref<5x608x544xbf16, #tpu.memory_space<vmem>>, vector<1x608x544xbf16>
    %59 = vector.shape_cast %58 : vector<1x608x544xbf16> to vector<608x544xbf16>
    %cst_40 = arith.constant dense<0.000000e+00> : vector<7x544xf32>
    %60 = tpu.matmul %57, %59, %cst_40 {dimension_numbers = #tpu.dot_dimension_numbers<[1], [0], [0], [1], [0, 0, 1, 1], [], []>} : vector<7x608xbf16>, vector<608x544xbf16>, vector<7x544xf32> -> vector<7x544xf32>
    %61 = arith.addf %56, %60 : vector<7x544xf32>
    %62 = vector.extract_strided_slice %44 {offsets = [10, 0], sizes = [7, 608], strides = [1, 1]} : vector<18x608xbf16> to vector<7x608xbf16>
    %c3_41 = arith.constant 3 : index
    %c0_42 = arith.constant 0 : index
    %c0_43 = arith.constant 0 : index
    %63 = vector.load %arg6[%c3_41, %c0_42, %c0_43] : memref<5x608x544xbf16, #tpu.memory_space<vmem>>, vector<1x608x544xbf16>
    %64 = vector.shape_cast %63 : vector<1x608x544xbf16> to vector<608x544xbf16>
    %cst_44 = arith.constant dense<0.000000e+00> : vector<7x544xf32>
    %65 = tpu.matmul %62, %64, %cst_44 {dimension_numbers = #tpu.dot_dimension_numbers<[1], [0], [0], [1], [0, 0, 1, 1], [], []>} : vector<7x608xbf16>, vector<608x544xbf16>, vector<7x544xf32> -> vector<7x544xf32>
    %66 = arith.addf %61, %65 : vector<7x544xf32>
    %67 = vector.extract_strided_slice %44 {offsets = [2, 0], sizes = [7, 608], strides = [1, 1]} : vector<18x608xbf16> to vector<7x608xbf16>
    %c4_45 = arith.constant 4 : index
    %c0_46 = arith.constant 0 : index
    %c0_47 = arith.constant 0 : index
    %68 = vector.load %arg6[%c4_45, %c0_46, %c0_47] : memref<5x608x544xbf16, #tpu.memory_space<vmem>>, vector<1x608x544xbf16>
    %69 = vector.shape_cast %68 : vector<1x608x544xbf16> to vector<608x544xbf16>
    %cst_48 = arith.constant dense<0.000000e+00> : vector<7x544xf32>
    %70 = tpu.matmul %67, %69, %cst_48 {dimension_numbers = #tpu.dot_dimension_numbers<[1], [0], [0], [1], [0, 0, 1, 1], [], []>} : vector<7x608xbf16>, vector<608x544xbf16>, vector<7x544xf32> -> vector<7x544xf32>
    %71 = arith.addf %66, %70 : vector<7x544xf32>
    %cst_49 = arith.constant 0.000000e+00 : f32
    %72 = vector.broadcast %cst_49 : f32 to vector<7x544xf32>
    %73 = arith.cmpf ogt, %71, %72 : vector<7x544xf32>
    %cst_50 = arith.constant 0.000000e+00 : f32
    %74 = vector.broadcast %cst_50 : f32 to vector<7x544xf32>
    %75 = arith.minimumf %71, %74 : vector<7x544xf32>
    %76 = math.exp %75 : vector<7x544xf32>
    %cst_51 = arith.constant 1.000000e+00 : f32
    %77 = vector.broadcast %cst_51 : f32 to vector<7x544xf32>
    %78 = arith.subf %76, %77 : vector<7x544xf32>
    %cst_52 = arith.constant 1.67326319 : f32
    %79 = vector.broadcast %cst_52 : f32 to vector<7x544xf32>
    %80 = arith.mulf %79, %78 : vector<7x544xf32>
    %81 = arith.select %73, %71, %80 : vector<7x544xi1>, vector<7x544xf32>
    %cst_53 = arith.constant 1.05070102 : f32
    %82 = vector.broadcast %cst_53 : f32 to vector<7x544xf32>
    %83 = arith.mulf %82, %81 : vector<7x544xf32>
    %84 = arith.truncf %83 : vector<7x544xf32> to vector<7x544xbf16>
    %c0_54 = arith.constant 0 : index
    %c0_55 = arith.constant 0 : index
    %85 = vector.load %arg3[%c0_54, %c0_55] : memref<7x7xbf16, #tpu.memory_space<vmem>>, vector<7x7xbf16>
    %cst_56 = arith.constant dense<0.000000e+00> : vector<7x544xf32>
    %86 = tpu.matmul %85, %84, %cst_56 {dimension_numbers = #tpu.dot_dimension_numbers<[1], [0], [0], [1], [0, 0, 1, 1], [], []>} : vector<7x7xbf16>, vector<7x544xbf16>, vector<7x544xf32> -> vector<7x544xf32>
    %87 = arith.truncf %86 : vector<7x544xf32> to vector<7x544xbf16>
    %c0_57 = arith.constant 0 : index
    %c0_58 = arith.constant 0 : index
    %88 = vector.load %arg9[%c0_57, %c0_58] : memref<1x224xf32, #tpu.memory_space<vmem>>, vector<1x224xf32>
    %89 = vector.extract_strided_slice %87 {offsets = [0, 0], sizes = [2, 544], strides = [1, 1]} : vector<7x544xbf16> to vector<2x544xbf16>
    %c0_59 = arith.constant 0 : index
    %c0_60 = arith.constant 0 : index
    %c0_61 = arith.constant 0 : index
    %90 = vector.load %arg8[%c0_59, %c0_60, %c0_61] : memref<5x544x224xbf16, #tpu.memory_space<vmem>>, vector<1x544x224xbf16>
    %91 = vector.shape_cast %90 : vector<1x544x224xbf16> to vector<544x224xbf16>
    %cst_62 = arith.constant dense<0.000000e+00> : vector<2x224xf32>
    %92 = tpu.matmul %89, %91, %cst_62 {dimension_numbers = #tpu.dot_dimension_numbers<[1], [0], [0], [1], [0, 0, 1, 1], [], []>} : vector<2x544xbf16>, vector<544x224xbf16>, vector<2x224xf32> -> vector<2x224xf32>
    %93 = vector.broadcast %88 : vector<1x224xf32> to vector<2x224xf32>
    %94 = arith.addf %93, %92 : vector<2x224xf32>
    %95 = vector.extract_strided_slice %87 {offsets = [4, 0], sizes = [2, 544], strides = [1, 1]} : vector<7x544xbf16> to vector<2x544xbf16>
    %c1_63 = arith.constant 1 : index
    %c0_64 = arith.constant 0 : index
    %c0_65 = arith.constant 0 : index
    %96 = vector.load %arg8[%c1_63, %c0_64, %c0_65] : memref<5x544x224xbf16, #tpu.memory_space<vmem>>, vector<1x544x224xbf16>
    %97 = vector.shape_cast %96 : vector<1x544x224xbf16> to vector<544x224xbf16>
    %cst_66 = arith.constant dense<0.000000e+00> : vector<2x224xf32>
    %98 = tpu.matmul %95, %97, %cst_66 {dimension_numbers = #tpu.dot_dimension_numbers<[1], [0], [0], [1], [0, 0, 1, 1], [], []>} : vector<2x544xbf16>, vector<544x224xbf16>, vector<2x224xf32> -> vector<2x224xf32>
    %99 = arith.addf %94, %98 : vector<2x224xf32>
    %100 = vector.extract_strided_slice %87 {offsets = [1, 0], sizes = [2, 544], strides = [1, 1]} : vector<7x544xbf16> to vector<2x544xbf16>
    %c2_67 = arith.constant 2 : index
    %c0_68 = arith.constant 0 : index
    %c0_69 = arith.constant 0 : index
    %101 = vector.load %arg8[%c2_67, %c0_68, %c0_69] : memref<5x544x224xbf16, #tpu.memory_space<vmem>>, vector<1x544x224xbf16>
    %102 = vector.shape_cast %101 : vector<1x544x224xbf16> to vector<544x224xbf16>
    %cst_70 = arith.constant dense<0.000000e+00> : vector<2x224xf32>
    %103 = tpu.matmul %100, %102, %cst_70 {dimension_numbers = #tpu.dot_dimension_numbers<[1], [0], [0], [1], [0, 0, 1, 1], [], []>} : vector<2x544xbf16>, vector<544x224xbf16>, vector<2x224xf32> -> vector<2x224xf32>
    %104 = arith.addf %99, %103 : vector<2x224xf32>
    %105 = vector.extract_strided_slice %87 {offsets = [5, 0], sizes = [2, 544], strides = [1, 1]} : vector<7x544xbf16> to vector<2x544xbf16>
    %c3_71 = arith.constant 3 : index
    %c0_72 = arith.constant 0 : index
    %c0_73 = arith.constant 0 : index
    %106 = vector.load %arg8[%c3_71, %c0_72, %c0_73] : memref<5x544x224xbf16, #tpu.memory_space<vmem>>, vector<1x544x224xbf16>
    %107 = vector.shape_cast %106 : vector<1x544x224xbf16> to vector<544x224xbf16>
    %cst_74 = arith.constant dense<0.000000e+00> : vector<2x224xf32>
    %108 = tpu.matmul %105, %107, %cst_74 {dimension_numbers = #tpu.dot_dimension_numbers<[1], [0], [0], [1], [0, 0, 1, 1], [], []>} : vector<2x544xbf16>, vector<544x224xbf16>, vector<2x224xf32> -> vector<2x224xf32>
    %109 = arith.addf %104, %108 : vector<2x224xf32>
    %110 = vector.extract_strided_slice %87 {offsets = [2, 0], sizes = [2, 544], strides = [1, 1]} : vector<7x544xbf16> to vector<2x544xbf16>
    %c4_75 = arith.constant 4 : index
    %c0_76 = arith.constant 0 : index
    %c0_77 = arith.constant 0 : index
    %111 = vector.load %arg8[%c4_75, %c0_76, %c0_77] : memref<5x544x224xbf16, #tpu.memory_space<vmem>>, vector<1x544x224xbf16>
    %112 = vector.shape_cast %111 : vector<1x544x224xbf16> to vector<544x224xbf16>
    %cst_78 = arith.constant dense<0.000000e+00> : vector<2x224xf32>
    %113 = tpu.matmul %110, %112, %cst_78 {dimension_numbers = #tpu.dot_dimension_numbers<[1], [0], [0], [1], [0, 0, 1, 1], [], []>} : vector<2x544xbf16>, vector<544x224xbf16>, vector<2x224xf32> -> vector<2x224xf32>
    %114 = arith.addf %109, %113 : vector<2x224xf32>
    %cst_79 = arith.constant 0.000000e+00 : f32
    %115 = vector.broadcast %cst_79 : f32 to vector<2x224xf32>
    %116 = arith.cmpf ogt, %114, %115 : vector<2x224xf32>
    %cst_80 = arith.constant 0.000000e+00 : f32
    %117 = vector.broadcast %cst_80 : f32 to vector<2x224xf32>
    %118 = arith.minimumf %114, %117 : vector<2x224xf32>
    %119 = math.exp %118 : vector<2x224xf32>
    %cst_81 = arith.constant 1.000000e+00 : f32
    %120 = vector.broadcast %cst_81 : f32 to vector<2x224xf32>
    %121 = arith.subf %119, %120 : vector<2x224xf32>
    %cst_82 = arith.constant 1.67326319 : f32
    %122 = vector.broadcast %cst_82 : f32 to vector<2x224xf32>
    %123 = arith.mulf %122, %121 : vector<2x224xf32>
    %124 = arith.select %116, %114, %123 : vector<2x224xi1>, vector<2x224xf32>
    %cst_83 = arith.constant 1.05070102 : f32
    %125 = vector.broadcast %cst_83 : f32 to vector<2x224xf32>
    %126 = arith.mulf %125, %124 : vector<2x224xf32>
    %127 = arith.truncf %126 : vector<2x224xf32> to vector<2x224xbf16>
    %c0_84 = arith.constant 0 : index
    %c0_85 = arith.constant 0 : index
    %128 = vector.load %arg11[%c0_84, %c0_85] : memref<1x4xf32, #tpu.memory_space<vmem>>, vector<1x4xf32>
    %129 = vector.extract_strided_slice %127 {offsets = [0, 0], sizes = [1, 224], strides = [1, 1]} : vector<2x224xbf16> to vector<1x224xbf16>
    %c0_86 = arith.constant 0 : index
    %c0_87 = arith.constant 0 : index
    %c0_88 = arith.constant 0 : index
    %130 = vector.load %arg10[%c0_86, %c0_87, %c0_88] : memref<2x224x4xbf16, #tpu.memory_space<vmem>>, vector<1x224x4xbf16>
    %131 = vector.shape_cast %130 : vector<1x224x4xbf16> to vector<224x4xbf16>
    %cst_89 = arith.constant dense<0.000000e+00> : vector<1x4xf32>
    %132 = tpu.matmul %129, %131, %cst_89 {dimension_numbers = #tpu.dot_dimension_numbers<[1], [0], [0], [1], [0, 0, 1, 1], [], []>} : vector<1x224xbf16>, vector<224x4xbf16>, vector<1x4xf32> -> vector<1x4xf32>
    %133 = arith.addf %128, %132 : vector<1x4xf32>
    %134 = vector.extract_strided_slice %127 {offsets = [1, 0], sizes = [1, 224], strides = [1, 1]} : vector<2x224xbf16> to vector<1x224xbf16>
    %c1_90 = arith.constant 1 : index
    %c0_91 = arith.constant 0 : index
    %c0_92 = arith.constant 0 : index
    %135 = vector.load %arg10[%c1_90, %c0_91, %c0_92] : memref<2x224x4xbf16, #tpu.memory_space<vmem>>, vector<1x224x4xbf16>
    %136 = vector.shape_cast %135 : vector<1x224x4xbf16> to vector<224x4xbf16>
    %cst_93 = arith.constant dense<0.000000e+00> : vector<1x4xf32>
    %137 = tpu.matmul %134, %136, %cst_93 {dimension_numbers = #tpu.dot_dimension_numbers<[1], [0], [0], [1], [0, 0, 1, 1], [], []>} : vector<1x224xbf16>, vector<224x4xbf16>, vector<1x4xf32> -> vector<1x4xf32>
    %138 = arith.addf %133, %137 : vector<1x4xf32>
    %cst_94 = arith.constant dense<0xFF800000> : vector<1xf32>
    %139 = vector.multi_reduction <maximumf>, %138, %cst_94 [1] : vector<1x4xf32> to vector<1xf32>
    %140 = vector.shape_cast %139 : vector<1xf32> to vector<1x1xf32>
    %141 = vector.broadcast %140 : vector<1x1xf32> to vector<1x4xf32>
    %142 = arith.subf %138, %141 : vector<1x4xf32>
    %143 = math.exp %142 : vector<1x4xf32>
    %cst_95 = arith.constant dense<0.000000e+00> : vector<1xf32>
    %144 = vector.multi_reduction <add>, %143, %cst_95 [1] : vector<1x4xf32> to vector<1xf32>
    %145 = vector.shape_cast %144 : vector<1xf32> to vector<1x1xf32>
    %146 = vector.broadcast %145 : vector<1x1xf32> to vector<1x4xf32>
    %147 = arith.divf %143, %146 : vector<1x4xf32>
    %c0_96 = arith.constant 0 : index
    %c0_97 = arith.constant 0 : index
    %c0_98 = arith.constant 0 : index
    %148 = vector.load %arg12[%c0_96, %c0_97, %c0_98] : memref<1x1x4xf32, #tpu.memory_space<vmem>>, vector<1x1x4xf32>
    %149 = vector.shape_cast %148 : vector<1x1x4xf32> to vector<1x4xf32>
    %150 = vector.shape_cast %147 : vector<1x4xf32> to vector<1x1x4xf32>
    tpu.vector_store %arg12[%c0_96, %c0_97, %c0_98], %150 {strides = array<i32>} : memref<1x1x4xf32, #tpu.memory_space<vmem>>, vector<1x1x4xf32>,
    return
  }
  func.func @transform_0(%arg0: i32) -> (i32, i32, i32) {
    %c0_i32 = arith.constant 0 : i32
    %c0_i32_0 = arith.constant 0 : i32
    %c0_i32_1 = arith.constant 0 : i32
    return %arg0, %c0_i32, %c0_i32_0 : i32, i32, i32
  }
  func.func @transform_1(%arg0: i32) -> (i32, i32) {
    %c0_i32 = arith.constant 0 : i32
    %c0_i32_0 = arith.constant 0 : i32
    %c0_i32_1 = arith.constant 0 : i32
    return %c0_i32, %c0_i32_0 : i32, i32
  }
  func.func @transform_2(%arg0: i32) -> (i32, i32) {
    %c0_i32 = arith.constant 0 : i32
    %c0_i32_0 = arith.constant 0 : i32
    %c0_i32_1 = arith.constant 0 : i32
    return %c0_i32, %c0_i32_0 : i32, i32
  }
  func.func @transform_3(%arg0: i32) -> (i32, i32, i32) {
    %c0_i32 = arith.constant 0 : i32
    %c0_i32_0 = arith.constant 0 : i32
    %c0_i32_1 = arith.constant 0 : i32
    %c0_i32_2 = arith.constant 0 : i32
    return %c0_i32, %c0_i32_0, %c0_i32_1 : i32, i32, i32
  }
  func.func @transform_4(%arg0: i32) -> (i32, i32) {
    %c0_i32 = arith.constant 0 : i32
    %c0_i32_0 = arith.constant 0 : i32
    %c0_i32_1 = arith.constant 0 : i32
    return %c0_i32, %c0_i32_0 : i32, i32
  }
  func.func @transform_5(%arg0: i32) -> (i32, i32, i32) {
    %c0_i32 = arith.constant 0 : i32
    %c0_i32_0 = arith.constant 0 : i32
    %c0_i32_1 = arith.constant 0 : i32
    %c0_i32_2 = arith.constant 0 : i32
    return %c0_i32, %c0_i32_0, %c0_i32_1 : i32, i32, i32
  }
  func.func @transform_6(%arg0: i32) -> (i32, i32) {
    %c0_i32 = arith.constant 0 : i32
    %c0_i32_0 = arith.constant 0 : i32
    %c0_i32_1 = arith.constant 0 : i32
    return %c0_i32, %c0_i32_0 : i32, i32
  }
  func.func @transform_7(%arg0: i32) -> (i32, i32, i32) {
    %c0_i32 = arith.constant 0 : i32
    %c0_i32_0 = arith.constant 0 : i32
    %c0_i32_1 = arith.constant 0 : i32
    %c0_i32_2 = arith.constant 0 : i32
    return %c0_i32, %c0_i32_0, %c0_i32_1 : i32, i32, i32
  }
  func.func @transform_8(%arg0: i32) -> (i32, i32) {
    %c0_i32 = arith.constant 0 : i32
    %c0_i32_0 = arith.constant 0 : i32
    %c0_i32_1 = arith.constant 0 : i32
    return %c0_i32, %c0_i32_0 : i32, i32
  }
  func.func @transform_9(%arg0: i32) -> (i32, i32, i32) {
    %c0_i32 = arith.constant 0 : i32
    %c0_i32_0 = arith.constant 0 : i32
    %c0_i32_1 = arith.constant 0 : i32
    %c0_i32_2 = arith.constant 0 : i32
    return %c0_i32, %c0_i32_0, %c0_i32_1 : i32, i32, i32
  }
  func.func @transform_10(%arg0: i32) -> (i32, i32) {
    %c0_i32 = arith.constant 0 : i32
    %c0_i32_0 = arith.constant 0 : i32
    %c0_i32_1 = arith.constant 0 : i32
    return %c0_i32, %c0_i32_0 : i32, i32
  }
  func.func @transform_11(%arg0: i32) -> (i32, i32, i32) {
    %c0_i32 = arith.constant 0 : i32
    %c0_i32_0 = arith.constant 0 : i32
    %c0_i32_1 = arith.constant 0 : i32
    return %arg0, %c0_i32, %c0_i32_0 : i32, i32, i32
  }
}

</mosaic_0001>

<bundles_post_ra>
// kernel: convolutional_softmax_forward.1
= control target key start
LH: loop header
LB: loop body
LE: loop exit
PB: predicated region body
PF: predicated region fallthrough
CT: control target
= control target key end

     0   :  { %16 = vsyncpa [#allocation3], 0  ;;  %s28260_s0 = inlined_call_operand.vmem [shape: bf16[2,40,240], index: 0, kind: input, shape index: {}]   ;;  %s28261_s1 = inlined_call_operand.vmem [shape: bf16[18,18], index: 1, kind: input, shape index: {}]   ;;  %s28262_s2 = inlined_call_operand.vmem [shape: bf16[7,7], index: 2, kind: input, shape index: {}]   ;;  %s28263_s3 = inlined_call_operand.vmem [shape: bf16[5,240,608], index: 3, kind: input, shape index: {}]   ;;  %s28264_s4 = inlined_call_operand.vmem [shape: f32[1,608], index: 4, kind: input, shape index: {}]   ;;  %s28265_s5 = inlined_call_operand.vmem [shape: bf16[5,608,544], index: 5, kind: input, shape index: {}]   ;;  %s28266_s6 = inlined_call_operand.vmem [shape: f32[1,544], index: 6, kind: input, shape index: {}]   ;;  %s28267_s7 = inlined_call_operand.vmem [shape: bf16[5,544,224], index: 7, kind: input, shape index: {}]   ;;  %s28268_s8 = inlined_call_operand.vmem [shape: f32[1,224], index: 8, kind: input, shape index: {}]   ;;  %s28269_s9 = inlined_call_operand.vmem [shape: bf16[2,224,4], index: 9, kind: input, shape index: {}]   ;;  %s28270_s10 = inlined_call_operand.vmem [shape: f32[1,4], index: 10, kind: input, shape index: {}]   ;;  %s28271_s11 = inlined_call_operand.hbm [shape: f32[2,1,4], index: 11, kind: output, shape index: {}]  }
   0x1   :  { %18 = vsyncpa [#allocation3 + $0x1], 0  ;;  %s21933_s17 = smov 0   ;;  %s21935_s18 = smov 0  }
   0x2   :  { %s21937_s19 = smov 0   ;;  %s21939_s20 = smov 0  }
   0x3 LB: > { %28273 = sst [smem:[#allocation5_spill]] %s21862_s19  ;;  %s21954_s21 = sadd.s32 4294967295, %s21866_s20   ;;  %s21866_s20 = sphi %s21939_s20, %s28281_s20   ;;  %s21862_s19 = sphi %s21937_s19, %s28278_s19   ;;  %s21858_s18 = sphi %s21935_s18, %s28280_s18   ;;  %s21854_s17 = sphi %s21933_s17, %s28279_s17  }
   0x4   : > { %s15582_s22 = sadd.s32 4294967294, %s21866_s20   ;;  %s21958_s23 = sadd.s32 1, %s21866_s20  }
   0x5   : > { %s267_s24 = sadd.s32 1, %s21862_s19  ;;  %s264_s25 = ssub.s32 %s21866_s20, %s21958_s23 }
   0x6   : > { %p277_p0 = scmp.ne.s32.totalorder %s21862_s19, %s21858_s18  ;;  %p265_p1 = scmp.eq.s32.totalorder %s264_s25, 0 }
   0x7   : > { %p278_p2 = scmp.eq.s32.totalorder %s21954_s21, 1  ;;  %p283_p3 = scmp.ne.s32.totalorder %s21858_s18, %s21854_s17 }
   0x8   : > { %p284_p4 = scmp.eq.s32.totalorder %s15582_s22, 1  ;;  %p15585_p7 = scmp.ge.s32.totalorder %s21866_s20, 1 }
   0x9   : > { %s21969_s26 = scalar_select %p265_p1, %s21862_s19, %s267_s24  }
   0xa   : > { %p21971_p5 = por %p278_p2, %p277_p0  ;;  %p21975_p6 = por %p284_p4, %p283_p3 }
   0xb   : > { %28274 = sst [smem:[#allocation6_spill]] %s21969_s26  ;;  %p340_p8 = scmp.lt.s32.totalorder %s21866_s20, 3 }
   0xd   : > { %p341_p9 = pnand %p15585_p7, %p340_p8 }
   0xe   : > { %p379_p10 = scmp.lt.s32.totalorder (!%p341_p9), %s21954_s21, 1  ;;  %s377_s26 = sand.u32 (!%p341_p9), 1, %s21858_s18  }
   0xf   : > { %344 = sbr.rel (%p341_p9) target bundleno = 3289 (0xcd9), region = 64  ;;  %s378_s29 = scalar_lea.vmem (!%p341_p9), [#allocation2], %s377_s26 }
  0x10   : > { %s15527_s30 = sshll.u32 (!%p341_p9), %s378_s29, 4  ;;  %s15515_s14 = scalar_lea.sflag (!%p341_p9), [#allocation3], %s377_s26  ;;  %s15528_s30 = int_to_ptr.vmem [resolvable:$true] %s15527_s30 }
  0x11   : > { %s21872_s19 = smov (!%p341_p9), [#allocation2]  }
  0x12   : > { %s21810_s15 = sshll.u32 (!%p341_p9), %s21872_s19, 4  ;;  %s21811_s15 = int_to_ptr.vmem [resolvable:$false] %s21810_s15 }
  0x13   : > { %p21813_p0 = scmp.lt.s32.totalorder (!%p341_p9), %s15528_s30, %s21811_s15 }
  0x14   : > { %v19350_v0 = vld [vmem:[%s28263_s3 + $0x11c] ss:$20 sps:$4 sm:$0xff]   ;;  %v19352_v1 = vld [vmem:[%s28263_s3 + $0x124] ss:$20 sps:$4 sm:$0xff]   ;;  %v19355_v3 = vld [vmem:[%s28263_s3 + $0x120] ss:$20 sps:$4 sm:$0xff]  }
  0x15   : > { %893 = vmatprep.subr.bf16.mxu0 %v19350_v0  ;;  %v19354_v2 = vld [vmem:[%s28263_s3 + $0x118] ss:$20 sps:$4 sm:$0xff]   ;;  %944 = vmatprep.subr.bf16.mxu1 %v19352_v1  ;;  %v19356_v4 = vld [vmem:[%s28263_s3 + $0xf4] ss:$20 sps:$4 sm:$0xff]   ;;  %v19358_v5 = vld [vmem:[%s28263_s3 + $0xfc] ss:$20 sps:$4 sm:$0xff]  }
  0x16   : > { %894 = vmatpush1.bf16.msra.mxu0 %v19354_v2  ;;  %945 = vmatpush1.bf16.msra.mxu1 %v19355_v3  ;;  %v19360_v6 = vld [vmem:[%s28263_s3 + $0xf0] ss:$20 sps:$4 sm:$0xff]   ;;  %v19361_v7 = vld [vmem:[%s28263_s3 + $0xf8] ss:$20 sps:$4 sm:$0xff]   ;;  %v19364_v9 = vld [vmem:[%s28263_s3 + $0xd4] ss:$20 sps:$4 sm:$0xff]  }
  0x17   : > { %895 = vmatprep.subr.bf16.mxu0 %v19356_v4  ;;  %946 = vmatprep.subr.bf16.mxu1 %v19358_v5  ;;  %v19362_v8 = vld [vmem:[%s28263_s3 + $0xcc] ss:$20 sps:$4 sm:$0xff]   ;;  %v19366_v10 = vld [vmem:[%s28263_s3 + $0xc8] ss:$20 sps:$4 sm:$0xff]   ;;  %v19367_v11 = vld [vmem:[%s28263_s3 + $0xd0] ss:$20 sps:$4 sm:$0xff]  }
  0x18   : > { %v19368_v12 = vld [vmem:[%s28263_s3 + $0xa4] ss:$20 sps:$4 sm:$0xff]   ;;  %v19370_v13 = vld [vmem:[%s28263_s3 + $0xac] ss:$20 sps:$4 sm:$0xff]   ;;  %v19373_v15 = vld [vmem:[%s28263_s3 + $0xa8] ss:$20 sps:$4 sm:$0xff]  }
  0x19   : > { %v19372_v14 = vld [vmem:[%s28263_s3 + $0xa0] ss:$20 sps:$4 sm:$0xff]   ;;  %v19374_v16 = vld [vmem:[%s28263_s3 + $0x7c] ss:$20 sps:$4 sm:$0xff]   ;;  %v19376_v17 = vld [vmem:[%s28263_s3 + $0x84] ss:$20 sps:$4 sm:$0xff]  }
  0x1a   : > { %896 = vmatpush1.bf16.msra.mxu0 %v19360_v6  ;;  %947 = vmatpush1.bf16.msra.mxu1 %v19361_v7  ;;  %v19378_v18 = vld [vmem:[%s28263_s3 + $0x78] ss:$20 sps:$4 sm:$0xff]   ;;  %v19379_v19 = vld [vmem:[%s28263_s3 + $0x80] ss:$20 sps:$4 sm:$0xff]   ;;  %v19382_v21 = vld [vmem:[%s28263_s3 + $0x5c] ss:$20 sps:$4 sm:$0xff]  }
  0x1b   : > { %897 = vmatprep.subr.bf16.mxu0 %v19362_v8  ;;  %948 = vmatprep.subr.bf16.mxu1 %v19364_v9  ;;  %v19380_v20 = vld [vmem:[%s28263_s3 + $0x54] ss:$20 sps:$4 sm:$0xff]   ;;  %v19384_v22 = vld [vmem:[%s28263_s3 + $0x50] ss:$20 sps:$4 sm:$0xff]   ;;  %v19385_v23 = vld [vmem:[%s28263_s3 + $0x58] ss:$20 sps:$4 sm:$0xff]  }
  0x1c   : > { %v19386_v24 = vld [vmem:[%s28263_s3 + $0x2c] ss:$20 sps:$4 sm:$0xff]   ;;  %v19388_v25 = vld [vmem:[%s28263_s3 + $0x34] ss:$20 sps:$4 sm:$0xff]   ;;  %v19391_v27 = vld [vmem:[%s28263_s3 + $0x30] ss:$20 sps:$4 sm:$0xff]  }
  0x1d   : > { %v19390_v26 = vld [vmem:[%s28263_s3 + $0x28] ss:$20 sps:$4 sm:$0xff]   ;;  %v19392_v28 = vld [vmem:[%s28263_s3 + $0x4] ss:$20 sps:$4 sm:$0xff]   ;;  %v19394_v29 = vld [vmem:[%s28263_s3 + $0xc] ss:$20 sps:$4 sm:$0xff]  }
  0x1e   : > { %898 = vmatpush1.bf16.msra.mxu0 %v19366_v10  ;;  %949 = vmatpush1.bf16.msra.mxu1 %v19367_v11  ;;  %v19396_v30 = vld [vmem:[%s28263_s3] ss:$20 sps:$4 sm:$0xff]   ;;  %v19397_v31 = vld [vmem:[%s28263_s3 + $0x8] ss:$20 sps:$4 sm:$0xff]   ;;  %s380_s24 = scalar_select %p379_p10, %s21954_s21, 1  ;;  %vm886_vm0 = vcmask 916480  }
  0x1f   : > { %899 = vmatprep.subr.bf16.mxu0 %v19368_v12  ;;  %950 = vmatprep.subr.bf16.mxu1 %v19370_v13  ;;  %v19398_v32 = vld [vmem:[%s28263_s3 + $0x234] ss:$20 sps:$4 sm:$0xff]   ;;  %v19400_v33 = vld [vmem:[%s28263_s3 + $0x23c] ss:$20 sps:$4 sm:$0xff]   ;;  %v19403_v35 = vld [vmem:[%s28263_s3 + $0x238] ss:$20 sps:$4 sm:$0xff]  }
  0x20   : > { %v19402_v34 = vld [vmem:[%s28263_s3 + $0x230] ss:$20 sps:$4 sm:$0xff]   ;;  %v19404_v36 = vld [vmem:[%s28263_s3 + $0x20c] ss:$20 sps:$4 sm:$0xff]   ;;  %v19406_v37 = vld [vmem:[%s28263_s3 + $0x214] ss:$20 sps:$4 sm:$0xff]  }
  0x21   : > { %s19306_s16 = smul.u32 40, %s380_s24  ;;  %v19408_v38 = vld [vmem:[%s28263_s3 + $0x208] ss:$20 sps:$4 sm:$0xff]   ;;  %v19409_v39 = vld [vmem:[%s28263_s3 + $0x210] ss:$20 sps:$4 sm:$0xff]   ;;  %v21868_v1 = vmov 0  }
  0x22   : > { %900 = vmatpush1.bf16.msra.mxu0 %v19372_v14  ;;  %951 = vmatpush1.bf16.msra.mxu1 %v19373_v15  ;;  %v19410_v40 = vld [vmem:[%s28263_s3 + $0x1e4] ss:$20 sps:$4 sm:$0xff]   ;;  %v19412_v41 = vld [vmem:[%s28263_s3 + $0x1ec] ss:$20 sps:$4 sm:$0xff]   ;;  %v19415_v43 = vld [vmem:[%s28263_s3 + $0x1e8] ss:$20 sps:$4 sm:$0xff]  }
  0x23   : > { %901 = vmatprep.subr.bf16.mxu0 %v19374_v16  ;;  %952 = vmatprep.subr.bf16.mxu1 %v19376_v17  ;;  %s22112_s22 = scalar_lea.vmem %s28260_s0, %s19306_s16  ;;  %v19414_v42 = vld [vmem:[%s28263_s3 + $0x1e0] ss:$20 sps:$4 sm:$0xff]   ;;  %v19416_v44 = vld [vmem:[%s28263_s3 + $0x1bc] ss:$20 sps:$4 sm:$0xff]   ;;  %v19418_v46 = vld [vmem:[%s28263_s3 + $0x1c4] ss:$20 sps:$4 sm:$0xff]  }
  0x24   : > { %v22124_v45 = vld [vmem:[%s22112_s22 + $0x4] ss:$8 sps:$4 sm:$0xff]   ;;  %v19421_v48 = vld [vmem:[%s28263_s3 + $0x1c0] ss:$20 sps:$4 sm:$0xff]   ;;  %v19424_v50 = vld [vmem:[%s28263_s3 + $0x19c] ss:$20 sps:$4 sm:$0xff]  }
  0x25   : > { %15666 = vmatprep.mubr.msk.bf16.mxu0 %vm886_vm0, %v22124_v45  ;;  %15668 = vmatprep.mubr.msk.bf16.mxu1 %vm886_vm0, %v22124_v45  ;;  %v19420_v47 = vld [vmem:[%s28263_s3 + $0x1b8] ss:$20 sps:$4 sm:$0xff]   ;;  %v19422_v49 = vld [vmem:[%s28263_s3 + $0x194] ss:$20 sps:$4 sm:$0xff]   ;;  %v19426_v51 = vld [vmem:[%s28263_s3 + $0x190] ss:$20 sps:$4 sm:$0xff]  }
  0x26   : > { %902 = vmatpush1.bf16.msra.mxu0 %v19378_v18  ;;  %953 = vmatpush1.bf16.msra.mxu1 %v19379_v19  ;;  %v19427_v52 = vld [vmem:[%s28263_s3 + $0x198] ss:$20 sps:$4 sm:$0xff]   ;;  %v19430_v54 = vld [vmem:[%s28263_s3 + $0x174] ss:$20 sps:$4 sm:$0xff]   ;;  %v19433_v56 = vld [vmem:[%s28263_s3 + $0x170] ss:$20 sps:$4 sm:$0xff]  }
  0x27   : > { %903 = vmatprep.subr.bf16.mxu0 %v19380_v20  ;;  %954 = vmatprep.subr.bf16.mxu1 %v19382_v21  ;;  %v19428_v53 = vld [vmem:[%s28263_s3 + $0x16c] ss:$20 sps:$4 sm:$0xff]   ;;  %v19432_v55 = vld [vmem:[%s28263_s3 + $0x168] ss:$20 sps:$4 sm:$0xff]   ;;  %v19434_v57 = vld [vmem:[%s28263_s3 + $0x144] ss:$20 sps:$4 sm:$0xff]  }
  0x28   : > { %v19436_v58 = vld [vmem:[%s28263_s3 + $0x14c] ss:$20 sps:$4 sm:$0xff]   ;;  %v19439_v60 = vld [vmem:[%s28263_s3 + $0x148] ss:$20 sps:$4 sm:$0xff]   ;;  %v19443_v63 = vld [vmem:[%s28263_s3 + $0x370] ss:$20 sps:$4 sm:$0xff]  }
  0x29   : > { %v19438_v59 = vld [vmem:[%s28263_s3 + $0x140] ss:$20 sps:$4 sm:$0xff]   ;;  %v19446_v0 = vld [vmem:[%s28263_s3 + $0x128] ss:$20 sps:$4 sm:$0xff]   ;;  %v19453_v5 = vld [vmem:[%s28263_s3 + $0x324] ss:$20 sps:$4 sm:$0xff]  }
  0x2a   : > { %904 = vmatpush1.bf16.msra.mxu0 %v19384_v22  ;;  %955 = vmatpush1.bf16.msra.mxu1 %v19385_v23  ;;  %v19445_v61 = vld [vmem:[%s28263_s3 + $0x374] ss:$20 sps:$4 sm:$0xff]   ;;  %v19449_v2 = vld [vmem:[%s28263_s3 + $0x34c] ss:$20 sps:$4 sm:$0xff]   ;;  %v19457_v8 = vld [vmem:[%s28263_s3 + $0x2fc] ss:$20 sps:$4 sm:$0xff]  }
  0x2b   : > { %905 = vmatprep.subr.bf16.mxu0 %v19386_v24  ;;  %956 = vmatprep.subr.bf16.mxu1 %v19388_v25  ;;  %v22179_v62 = vld [vmem:[%s22112_s22] ss:$8 sps:$4 sm:$0xff]   ;;  %v19454_v7 = vld [vmem:[%s28263_s3 + $0xd8] ss:$20 sps:$4 sm:$0xff]   ;;  %v22214_v9 = vld [vmem:[%s22112_s22 + $0x10] sm:$0xff]  ;;  %vm1185_vm1 = vcmask 1045504  }
  0x2c   : > { %v19447_v3 = vld [vmem:[%s28263_s3 + $0x348] ss:$20 sps:$4 sm:$0xff]   ;;  %v19450_v4 = vld [vmem:[%s28263_s3 + $0x100] ss:$20 sps:$4 sm:$0xff]   ;;  %v22218_v10 = vcombine.high %v22214_v9, %v22214_v9  ;;  %v19455_v11 = vld [vmem:[%s28263_s3 + $0x2f8] ss:$20 sps:$4 sm:$0xff]   ;;  %v22225_v12 = vcombine.low %v22214_v9, %v22214_v9 }
  0x2d   : > { %v19451_v6 = vld [vmem:[%s28263_s3 + $0x320] ss:$20 sps:$4 sm:$0xff]   ;;  %v19458_v13 = vld [vmem:[%s28263_s3 + $0xb0] ss:$20 sps:$4 sm:$0xff]   ;;  %v19462_v16 = vld [vmem:[%s28263_s3 + $0x88] ss:$20 sps:$4 sm:$0xff]  }
  0x2e   : > { %906 = vmatpush1.bf16.msra.mxu0 %v19390_v26  ;;  %957 = vmatpush1.bf16.msra.mxu1 %v19391_v27  ;;  %v19461_v14 = vld [vmem:[%s28263_s3 + $0x2d4] ss:$20 sps:$4 sm:$0xff]   ;;  %v19459_v15 = vld [vmem:[%s28263_s3 + $0x2d0] ss:$20 sps:$4 sm:$0xff]   ;;  %v19465_v17 = vld [vmem:[%s28263_s3 + $0x2ac] ss:$20 sps:$4 sm:$0xff]  }
  0x2f   : > { %907 = vmatprep.subr.bf16.mxu0 %v19392_v28  ;;  %958 = vmatprep.subr.bf16.mxu1 %v19394_v29  ;;  %v22250_v18 = vld [vmem:[%s22112_s22 + $0x18] sm:$0xff]  ;;  %v22254_v19 = vld [vmem:[%s22112_s22 + $0x20] sm:$0xff]  ;;  %vm1846_vm2 = vsmask.f32 7424  ;;  %vm2529_vm3 = vsmask.f32 5376 }
  0x30   : > { %v22258_v20 = vcombine.high %v22214_v9, %v22250_v18  ;;  %v22264_v21 = vcombine.high %v22254_v19, %v22254_v19  ;;  %v19463_v22 = vld [vmem:[%s28263_s3 + $0x2a8] ss:$20 sps:$4 sm:$0xff]   ;;  %v19466_v24 = vld [vmem:[%s28263_s3 + $0x60] ss:$20 sps:$4 sm:$0xff]   ;;  %v19469_v26 = vld [vmem:[%s28263_s3 + $0x284] ss:$20 sps:$4 sm:$0xff]  }
  0x31   : > { %v19467_v28 = vld [vmem:[%s28263_s3 + $0x280] ss:$20 sps:$4 sm:$0xff]   ;;  %v19470_v29 = vld [vmem:[%s28263_s3 + $0x38] ss:$20 sps:$4 sm:$0xff]   ;;  %vm3218_vm4 = vcmask 1046528   ;;  %s21806_s24 = scalar_lea.vmem %s15528_s30, 16 }
  0x32   : > { %908 = vmatpush1.bf16.msra.mxu0 %v19396_v30  ;;  %959 = vmatpush1.bf16.msra.mxu1 %v19397_v31  ;;  %v1189_v23 = vrot.slane %v22258_v20, 2  ;;  %v22274_v25 = vrot.slane %v22264_v21, 2  ;;  %v19473_v30 = vld [vmem:[%s28263_s3 + $0x25c] ss:$20 sps:$4 sm:$0xff]   ;;  %v19471_v31 = vld [vmem:[%s28263_s3 + $0x258] ss:$20 sps:$4 sm:$0xff]   ;;  %p21807_p11 = scmp.ne.s32.totalorder %s15528_s30, %s21806_s24 }
  0x33   : > { %911 = vmatprep.subr.bf16.mxu0 %v19398_v32  ;;  %962 = vmatprep.subr.bf16.mxu1 %v19400_v33  ;;  %v19474_v32 = vld [vmem:[%s28263_s3 + $0x10] ss:$20 sps:$4 sm:$0xff]   ;;  %v19477_v33 = vld [vmem:[%s28263_s3 + $0x48c] ss:$20 sps:$4 sm:$0xff]  }
  0x34   : > { %v22282_v27 = vsel %vm1185_vm1, %v1189_v23, %v22274_v25  ;;  %v19537_v23 = vld [vmem:[%s28263_s3 + $0x260] ss:$20 sps:$4 sm:$0xff]   ;;  %p21808_p12 = pnand %p21807_p11, %p21971_p5 }
  0x36   : > { %912 = vmatpush2.bf16.msra.mxu0 %v19402_v34  ;;  %963 = vmatpush2.bf16.msra.mxu1 %v19403_v35  ;;  %v19475_v34 = vld [vmem:[%s28263_s3 + $0x488] ss:$20 sps:$4 sm:$0xff]   ;;  %v19478_v35 = vld [vmem:[%s28263_s3 + $0x240] ss:$20 sps:$4 sm:$0xff]   ;;  %p21809_p13 = pneg %p21808_p12 }
  0x37   : > { %913 = vmatprep.subr.bf16.mxu0 %v19404_v36  ;;  %964 = vmatprep.subr.bf16.mxu1 %v19406_v37  ;;  %v19481_v36 = vld [vmem:[%s28263_s3 + $0x464] ss:$20 sps:$4 sm:$0xff]   ;;  %v19479_v37 = vld [vmem:[%s28263_s3 + $0x460] ss:$20 sps:$4 sm:$0xff]  }
  0x3a   : > { %914 = vmatpush2.bf16.msra.mxu0 %v19408_v38  ;;  %965 = vmatpush2.bf16.msra.mxu1 %v19409_v39  ;;  %v19482_v38 = vld [vmem:[%s28263_s3 + $0x218] ss:$20 sps:$4 sm:$0xff]   ;;  %v19485_v39 = vld [vmem:[%s28263_s3 + $0x43c] ss:$20 sps:$4 sm:$0xff]  }
  0x3b   : > { %915 = vmatprep.subr.bf16.mxu0 %v19410_v40  ;;  %966 = vmatprep.subr.bf16.mxu1 %v19412_v41  ;;  %v19483_v40 = vld [vmem:[%s28263_s3 + $0x438] ss:$20 sps:$4 sm:$0xff]   ;;  %v19486_v41 = vld [vmem:[%s28263_s3 + $0x1f0] ss:$20 sps:$4 sm:$0xff]  }
  0x3e   : > { %916 = vmatpush2.bf16.msra.mxu0 %v19414_v42  ;;  %967 = vmatpush2.bf16.msra.mxu1 %v19415_v43  ;;  %v19489_v42 = vld [vmem:[%s28263_s3 + $0x414] ss:$20 sps:$4 sm:$0xff]   ;;  %v19487_v43 = vld [vmem:[%s28263_s3 + $0x410] ss:$20 sps:$4 sm:$0xff]  }
  0x3f   : > { %917 = vmatprep.subr.bf16.mxu0 %v19416_v44  ;;  %968 = vmatprep.subr.bf16.mxu1 %v19418_v46  ;;  %v19490_v44 = vld [vmem:[%s28263_s3 + $0x1c8] ss:$20 sps:$4 sm:$0xff]   ;;  %v19495_v46 = vld [vmem:[%s28263_s3 + $0x3ec] ss:$20 sps:$4 sm:$0xff]  }
  0x42   : > { %918 = vmatpush2.bf16.msra.mxu0 %v19420_v47  ;;  %969 = vmatpush2.bf16.msra.mxu1 %v19421_v48  ;;  %v19493_v47 = vld [vmem:[%s28263_s3 + $0x3e8] ss:$20 sps:$4 sm:$0xff]   ;;  %v19496_v48 = vld [vmem:[%s28263_s3 + $0x1a0] ss:$20 sps:$4 sm:$0xff]  }
  0x43   : > { %919 = vmatprep.subr.bf16.mxu0 %v19422_v49  ;;  %970 = vmatprep.subr.bf16.mxu1 %v19424_v50  ;;  %v19499_v49 = vld [vmem:[%s28263_s3 + $0x3c4] ss:$20 sps:$4 sm:$0xff]   ;;  %v19497_v50 = vld [vmem:[%s28263_s3 + $0x3c0] ss:$20 sps:$4 sm:$0xff]  }
  0x46   : > { %920 = vmatpush2.bf16.msra.mxu0 %v19426_v51  ;;  %971 = vmatpush2.bf16.msra.mxu1 %v19427_v52  ;;  %v19500_v51 = vld [vmem:[%s28263_s3 + $0x178] ss:$20 sps:$4 sm:$0xff]   ;;  %v22364_v52 = vcombine.low %v22214_v9, %v22250_v18  ;;  %v19527_v9 = vld [vmem:[%s28263_s3 + $0x2dc] ss:$20 sps:$4 sm:$0xff]  }
  0x47   : > { %921 = vmatprep.subr.bf16.mxu0 %v19428_v53  ;;  %972 = vmatprep.subr.bf16.mxu1 %v19430_v54  ;;  %v22368_v53 = vcombine.low %v22254_v19, %v22254_v19  ;;  %v19503_v54 = vld [vmem:[%s28263_s3 + $0x39c] ss:$20 sps:$4 sm:$0xff]  }
  0x48   : > { %v19533_v18 = vld [vmem:[%s28263_s3 + $0x288] ss:$20 sps:$4 sm:$0xff]   ;;  %v19536_v19 = vld [vmem:[%s28263_s3 + $0x290] ss:$20 sps:$4 sm:$0xff]  }
  0x4a   : > { %922 = vmatpush2.bf16.msra.mxu0 %v19432_v55  ;;  %973 = vmatpush2.bf16.msra.mxu1 %v19433_v56  ;;  %v19501_v55 = vld [vmem:[%s28263_s3 + $0x398] ss:$20 sps:$4 sm:$0xff]   ;;  %v19504_v56 = vld [vmem:[%s28263_s3 + $0x150] ss:$20 sps:$4 sm:$0xff]  }
  0x4b   : > { %923 = vmatprep.subr.bf16.mxu0 %v19434_v57  ;;  %974 = vmatprep.subr.bf16.mxu1 %v19436_v58  ;;  %v1186_v57 = vrot.slane %v22364_v52, 2  ;;  %v22382_v58 = vrot.slane %v22368_v53, 2 }
  0x4e   : > { %924 = vmatpush2.bf16.msra.mxu0 %v19438_v59  ;;  %975 = vmatpush2.bf16.msra.mxu1 %v19439_v60  ;;  %v19511_v59 = vld [vmem:[%s28263_s3 + $0x37c] ss:$20 sps:$4 sm:$0xff]   ;;  %v22390_v60 = vsel %vm1185_vm1, %v1186_v57, %v22382_v58  ;;  %v1865_v57 = vshll.u32 %v22218_v10, 16 }
  0x4f   : > { %995 = vmatprep.subr.bf16.mxu0 %v21868_v1  ;;  %1590 = vmatprep.subr.bf16.mxu1 %v19445_v61  ;;  %v19509_v61 = vld [vmem:[%s28263_s3 + $0x378] ss:$20 sps:$4 sm:$0xff]  }
  0x51   : > { %926 = vmatmul.mubr.bf16.vlgmr.msra.gmra.mxu0 %v22179_v62  ;;  %977 = vmatmul.mubr.bf16.vlgmr.msra.gmra.mxu1 %v22179_v62 }
  0x52   : > { %996 = vmatpush1.bf16.msra.mxu0 %v19446_v0  ;;  %1591 = vmatpush1.bf16.msra.mxu1 %v19443_v63  ;;  %v19512_v63 = vld [vmem:[%s28263_s3 + $0x380] ss:$20 sps:$4 sm:$0xff]  }
  0x53   : > { %997 = vmatprep.subr.bf16.mxu0 %v21868_v1  ;;  %1592 = vmatprep.subr.bf16.mxu1 %v19449_v2  ;;  %v19515_v0 = vld [vmem:[%s28263_s3 + $0x354] ss:$20 sps:$4 sm:$0xff]   ;;  %v19513_v2 = vld [vmem:[%s28263_s3 + $0x350] ss:$20 sps:$4 sm:$0xff]  }
  0x54   : > { %15667 = vmatprep.mubr.msk.bf16.mxu0 %vm886_vm0, %v22218_v10  ;;  %15669 = vmatprep.mubr.msk.bf16.mxu1 %vm886_vm0, %v22218_v10 }
  0x56   : > { %998 = vmatpush1.bf16.msra.mxu0 %v19450_v4  ;;  %1593 = vmatpush1.bf16.msra.mxu1 %v19447_v3  ;;  %v19516_v3 = vld [vmem:[%s28263_s3 + $0x358] ss:$20 sps:$4 sm:$0xff]  }
  0x57   : > { %999 = vmatprep.subr.bf16.mxu0 %v21868_v1  ;;  %1594 = vmatprep.subr.bf16.mxu1 %v19453_v5  ;;  %v19519_v4 = vld [vmem:[%s28263_s3 + $0x32c] ss:$20 sps:$4 sm:$0xff]   ;;  %v19520_v5 = vld [vmem:[%s28263_s3 + $0x330] ss:$20 sps:$4 sm:$0xff]  }
  0x59   : > { %936 = vmatmul.mubr.bf16.gmra.mxu0 %v22225_v12  ;;  %987 = vmatmul.mubr.bf16.gmra.mxu1 %v22225_v12 }
  0x5a   : > { %1000 = vmatpush1.bf16.msra.mxu0 %v19454_v7  ;;  %1595 = vmatpush1.bf16.msra.mxu1 %v19451_v6  ;;  %v19523_v6 = vld [vmem:[%s28263_s3 + $0x304] ss:$20 sps:$4 sm:$0xff]   ;;  %v19521_v7 = vld [vmem:[%s28263_s3 + $0x300] ss:$20 sps:$4 sm:$0xff]  }
  0x5b   : > { %1001 = vmatprep.subr.bf16.mxu0 %v21868_v1  ;;  %1596 = vmatprep.subr.bf16.mxu1 %v19457_v8  ;;  %v19524_v8 = vld [vmem:[%s28263_s3 + $0x308] ss:$20 sps:$4 sm:$0xff]  }
  0x5c   : > { %15670 = vmatprep.mubr.msk.bf16.mxu0 %vm886_vm0, %v22124_v45  ;;  %15841 = vmatprep.mubr.msk.bf16.mxu1 %vm886_vm0, %v22282_v27 }
  0x5e   : > { %1002 = vmatpush1.bf16.msra.mxu0 %v19458_v13  ;;  %1597 = vmatpush1.bf16.msra.mxu1 %v19455_v11  ;;  %v19525_v11 = vld [vmem:[%s28263_s3 + $0x2d8] ss:$20 sps:$4 sm:$0xff]   ;;  %v19528_v13 = vld [vmem:[%s28263_s3 + $0x2e0] ss:$20 sps:$4 sm:$0xff]  }
  0x5f   : > { %1003 = vmatprep.subr.bf16.mxu0 %v21868_v1  ;;  %1598 = vmatprep.subr.bf16.mxu1 %v19461_v14  ;;  %v19531_v14 = vld [vmem:[%s28263_s3 + $0x2b4] ss:$20 sps:$4 sm:$0xff]  }
  0x62   : > { %1004 = vmatpush1.bf16.msra.mxu0 %v19462_v16  ;;  %1599 = vmatpush1.bf16.msra.mxu1 %v19459_v15  ;;  %v19529_v15 = vld [vmem:[%s28263_s3 + $0x2b0] ss:$20 sps:$4 sm:$0xff]   ;;  %v19532_v16 = vld [vmem:[%s28263_s3 + $0x2b8] ss:$20 sps:$4 sm:$0xff]  }
  0x63   : > { %1005 = vmatprep.subr.bf16.mxu0 %v21868_v1  ;;  %1600 = vmatprep.subr.bf16.mxu1 %v19465_v17  ;;  %v19535_v17 = vld [vmem:[%s28263_s3 + $0x28c] ss:$20 sps:$4 sm:$0xff]  }
  0x66   : > { %1006 = vmatpush1.bf16.msra.mxu0 %v19466_v24  ;;  %1601 = vmatpush1.bf16.msra.mxu1 %v19463_v22  ;;  %v19539_v22 = vld [vmem:[%s28263_s3 + $0x264] ss:$20 sps:$4 sm:$0xff]   ;;  %v19540_v24 = vld [vmem:[%s28263_s3 + $0x268] ss:$20 sps:$4 sm:$0xff]  }
  0x67   : > { %1007 = vmatprep.subr.bf16.mxu0 %v21868_v1  ;;  %1602 = vmatprep.subr.bf16.mxu1 %v19469_v26  ;;  %v19543_v26 = vld [vmem:[%s28263_s3 + $0x494] ss:$20 sps:$4 sm:$0xff]  }
  0x6a   : > { %1008 = vmatpush1.bf16.msra.mxu0 %v19470_v29  ;;  %1603 = vmatpush1.bf16.msra.mxu1 %v19467_v28  ;;  %v19544_v28 = vld [vmem:[%s28263_s3 + $0x498] ss:$20 sps:$4 sm:$0xff]  }
  0x6b   : > { %1009 = vmatprep.subr.bf16.mxu0 %v21868_v1  ;;  %1604 = vmatprep.subr.bf16.mxu1 %v19473_v30  ;;  %v19547_v29 = vld [vmem:[%s28263_s3 + $0x46c] ss:$20 sps:$4 sm:$0xff]   ;;  %v19545_v30 = vld [vmem:[%s28263_s3 + $0x468] ss:$20 sps:$4 sm:$0xff]  }
  0x6e   : > { %1010 = vmatpush1.bf16.msra.mxu0 %v19474_v32  ;;  %1605 = vmatpush1.bf16.msra.mxu1 %v19471_v31  ;;  %v19548_v31 = vld [vmem:[%s28263_s3 + $0x470] ss:$20 sps:$4 sm:$0xff]  }
  0x6f   : > { %1013 = vmatprep.subr.bf16.mxu0 %v21868_v1  ;;  %1608 = vmatprep.subr.bf16.mxu1 %v19477_v33  ;;  %v19551_v32 = vld [vmem:[%s28263_s3 + $0x444] ss:$20 sps:$4 sm:$0xff]   ;;  %v19549_v33 = vld [vmem:[%s28263_s3 + $0x440] ss:$20 sps:$4 sm:$0xff]  }
  0x72   : > { %1014 = vmatpush2.bf16.msra.mxu0 %v19478_v35  ;;  %1609 = vmatpush2.bf16.msra.mxu1 %v19475_v34  ;;  %v19552_v34 = vld [vmem:[%s28263_s3 + $0x448] ss:$20 sps:$4 sm:$0xff]  }
  0x73   : > { %1015 = vmatprep.subr.bf16.mxu0 %v21868_v1  ;;  %1610 = vmatprep.subr.bf16.mxu1 %v19481_v36  ;;  %v19555_v35 = vld [vmem:[%s28263_s3 + $0x41c] ss:$20 sps:$4 sm:$0xff]   ;;  %v19553_v36 = vld [vmem:[%s28263_s3 + $0x418] ss:$20 sps:$4 sm:$0xff]  }
  0x76   : > { %1016 = vmatpush2.bf16.msra.mxu0 %v19482_v38  ;;  %1611 = vmatpush2.bf16.msra.mxu1 %v19479_v37  ;;  %v19556_v37 = vld [vmem:[%s28263_s3 + $0x420] ss:$20 sps:$4 sm:$0xff]  }
  0x77   : > { %1017 = vmatprep.subr.bf16.mxu0 %v21868_v1  ;;  %1612 = vmatprep.subr.bf16.mxu1 %v19485_v39  ;;  %v19559_v38 = vld [vmem:[%s28263_s3 + $0x3f4] ss:$20 sps:$4 sm:$0xff]   ;;  %v19557_v39 = vld [vmem:[%s28263_s3 + $0x3f0] ss:$20 sps:$4 sm:$0xff]  }
  0x7a   : > { %1018 = vmatpush2.bf16.msra.mxu0 %v19486_v41  ;;  %1613 = vmatpush2.bf16.msra.mxu1 %v19483_v40  ;;  %v19560_v40 = vld [vmem:[%s28263_s3 + $0x3f8] ss:$20 sps:$4 sm:$0xff]  }
  0x7b   : > { %1019 = vmatprep.subr.bf16.mxu0 %v21868_v1  ;;  %1614 = vmatprep.subr.bf16.mxu1 %v19489_v42  ;;  %v19563_v41 = vld [vmem:[%s28263_s3 + $0x3cc] ss:$20 sps:$4 sm:$0xff]   ;;  %v19561_v42 = vld [vmem:[%s28263_s3 + $0x3c8] ss:$20 sps:$4 sm:$0xff]  }
  0x7e   : > { %1020 = vmatpush2.bf16.msra.mxu0 %v19490_v44  ;;  %1615 = vmatpush2.bf16.msra.mxu1 %v19487_v43  ;;  %v19564_v43 = vld [vmem:[%s28263_s3 + $0x3d0] ss:$20 sps:$4 sm:$0xff]  }
  0x7f   : > { %1021 = vmatprep.subr.bf16.mxu0 %v21868_v1  ;;  %1616 = vmatprep.subr.bf16.mxu1 %v19495_v46  ;;  %v19567_v44 = vld [vmem:[%s28263_s3 + $0x3a4] ss:$20 sps:$4 sm:$0xff]   ;;  %v19565_v46 = vld [vmem:[%s28263_s3 + $0x3a0] ss:$20 sps:$4 sm:$0xff]  }
  0x82   : > { %1022 = vmatpush2.bf16.msra.mxu0 %v19496_v48  ;;  %1617 = vmatpush2.bf16.msra.mxu1 %v19493_v47  ;;  %v19568_v47 = vld [vmem:[%s28263_s3 + $0x3a8] ss:$20 sps:$4 sm:$0xff]   ;;  %v19571_v48 = vld [vmem:[%s28263_s3 + $0x5cc] ss:$20 sps:$4 sm:$0xff]  }
  0x83   : > { %1023 = vmatprep.subr.bf16.mxu0 %v21868_v1  ;;  %1618 = vmatprep.subr.bf16.mxu1 %v19499_v49  ;;  %v19574_v49 = vld [vmem:[%s28263_s3 + $0x5d4] ss:$20 sps:$4 sm:$0xff]  }
  0x86   : > { %1024 = vmatpush2.bf16.msra.mxu0 %v19500_v51  ;;  %1619 = vmatpush2.bf16.msra.mxu1 %v19497_v50  ;;  %v19569_v50 = vld [vmem:[%s28263_s3 + $0x5c8] ss:$20 sps:$4 sm:$0xff]   ;;  %v19572_v51 = vld [vmem:[%s28263_s3 + $0x5d0] ss:$20 sps:$4 sm:$0xff]  }
  0x87   : > { %1025 = vmatprep.subr.bf16.mxu0 %v21868_v1  ;;  %1620 = vmatprep.subr.bf16.mxu1 %v19503_v54  ;;  %v1861_v54 = vshll.u32 %v22124_v45, 16  ;;  %v19575_v45 = vld [vmem:[%s28263_s3 + $0x5a0] ss:$20 sps:$4 sm:$0xff]  }
  0x8a   : > { %1026 = vmatpush2.bf16.msra.mxu0 %v19504_v56  ;;  %1621 = vmatpush2.bf16.msra.mxu1 %v19501_v55  ;;  %v19577_v55 = vld [vmem:[%s28263_s3 + $0x5a4] ss:$20 sps:$4 sm:$0xff]   ;;  %v19580_v56 = vld [vmem:[%s28263_s3 + $0x5ac] ss:$20 sps:$4 sm:$0xff]  }
  0x8b   : > { %1641 = vmatprep.subr.bf16.mxu0 %v19511_v59  ;;  %1692 = vmatprep.subr.bf16.mxu1 %v21868_v1  ;;  %v21802_v59 = vld [vmem:[%s22112_s22 + $0x4] ss:$8 sps:$4 sm:$0xff]  }
  0x8d   : > { %1028 = vmatmul.mubr.bf16.vlgmr.msra.gmra.mxu0 %v22179_v62  ;;  %1623 = vmatmul.mubr.bf16.vlgmr.msra.gmra.mxu1 %v22390_v60  ;;  %v19517_v62 = vld [vmem:[%s28263_s3 + $0x328] ss:$20 sps:$4 sm:$0xff]  }
  0x8e   : > { %1642 = vmatpush1.bf16.msra.mxu0 %v19509_v61  ;;  %1693 = vmatpush1.bf16.msra.mxu1 %v19512_v63  ;;  %v1859_v61 = vshrl.u32 %v21802_v59, 16  ;;  %v1863_v63 = vrot.slane %v1861_v54, 1  ;;  %v19652_v54 = vld [vmem:[%s28263_s3 + $0x624] ss:$20 sps:$4 sm:$0xff]  }
  0x8f   : > { %1643 = vmatprep.subr.bf16.mxu0 %v19515_v0  ;;  %1694 = vmatprep.subr.bf16.mxu1 %v21868_v1  ;;  %v19578_v0 = vld [vmem:[%s28263_s3 + $0x5a8] ss:$20 sps:$4 sm:$0xff]  }
  0x90   : > { %15842 = vmatprep.mubr.msk.bf16.mxu1 %vm886_vm0, %v22274_v25  ;;  %15671 = vmatprep.mubr.msk.bf16.mxu0 %vm886_vm0, %v22218_v10 }
  0x92   : > { %1644 = vmatpush1.bf16.msra.mxu0 %v19513_v2  ;;  %1695 = vmatpush1.bf16.msra.mxu1 %v19516_v3  ;;  %v19583_v2 = vld [vmem:[%s28263_s3 + $0x57c] ss:$20 sps:$4 sm:$0xff]   ;;  %v19581_v3 = vld [vmem:[%s28263_s3 + $0x578] ss:$20 sps:$4 sm:$0xff]  }
  0x93   : > { %1645 = vmatprep.subr.bf16.mxu0 %v19519_v4  ;;  %1696 = vmatprep.subr.bf16.mxu1 %v21868_v1  ;;  %v22593_v4 = vrot.slane %v1865_v57, 1  ;;  %v19647_v57 = vld [vmem:[%s28263_s3 + $0x618] ss:$20 sps:$4 sm:$0xff]  }
  0x95   : > { %1633 = vmatmul.mubr.bf16.gmra.mxu1 %v22382_v58  ;;  %1036 = vmatmul.mubr.bf16.gmra.mxu0 %v22225_v12 }
  0x96   : > { %1646 = vmatpush1.bf16.msra.mxu0 %v19517_v62  ;;  %1697 = vmatpush1.bf16.msra.mxu1 %v19520_v5  ;;  %v19584_v62 = vld [vmem:[%s28263_s3 + $0x580] ss:$20 sps:$4 sm:$0xff]   ;;  %v1864_v5 = vor.u32 %v1863_v63, %v1859_v61  ;;  %v1855_v63 = vshll.u32 %v22225_v12, 16 }
  0x97   : > { %1647 = vmatprep.subr.bf16.mxu0 %v19523_v6  ;;  %1698 = vmatprep.subr.bf16.mxu1 %v21868_v1  ;;  %v19589_v6 = vld [vmem:[%s28263_s3 + $0x554] ss:$20 sps:$4 sm:$0xff]  }
  0x98   : > { %15843 = vmatprep.mubr.msk.bf16.mxu0 %vm886_vm0, %v22282_v27  ;;  %15845 = vmatprep.mubr.msk.bf16.mxu1 %vm886_vm0, %v22282_v27  ;;  %v19541_v27 = vld [vmem:[%s28263_s3 + $0x490] ss:$20 sps:$4 sm:$0xff]  }
  0x9a   : > { %1648 = vmatpush1.bf16.msra.mxu0 %v19521_v7  ;;  %1699 = vmatpush1.bf16.msra.mxu1 %v19524_v8  ;;  %v19587_v7 = vld [vmem:[%s28263_s3 + $0x550] ss:$20 sps:$4 sm:$0xff]   ;;  %v22611_v8 = vsel %vm1846_vm2, %v1864_v5, %v22593_v4  ;;  %v1857_v5 = vrot.slane %v1855_v63, 1 }
  0x9b   : > { %1649 = vmatprep.subr.bf16.mxu0 %v19527_v9  ;;  %1700 = vmatprep.subr.bf16.mxu1 %v21868_v1  ;;  %v19590_v9 = vld [vmem:[%s28263_s3 + $0x558] ss:$20 sps:$4 sm:$0xff]  }
  0x9e   : > { %1650 = vmatpush1.bf16.msra.mxu0 %v19525_v11  ;;  %1701 = vmatpush1.bf16.msra.mxu1 %v19528_v13  ;;  %v19598_v11 = vld [vmem:[%s28263_s3 + $0x534] ss:$20 sps:$4 sm:$0xff]  }
  0x9f   : > { %1651 = vmatprep.subr.bf16.mxu0 %v19531_v14  ;;  %1702 = vmatprep.subr.bf16.mxu1 %v21868_v1  ;;  %v19593_v13 = vld [vmem:[%s28263_s3 + $0x528] ss:$20 sps:$4 sm:$0xff]   ;;  %v19596_v14 = vld [vmem:[%s28263_s3 + $0x530] ss:$20 sps:$4 sm:$0xff]  }
  0xa2   : > { %1652 = vmatpush1.bf16.msra.mxu0 %v19529_v15  ;;  %1703 = vmatpush1.bf16.msra.mxu1 %v19532_v16  ;;  %v19601_v15 = vld [vmem:[%s28263_s3 + $0x504] ss:$20 sps:$4 sm:$0xff]   ;;  %v19604_v16 = vld [vmem:[%s28263_s3 + $0x50c] ss:$20 sps:$4 sm:$0xff]  }
  0xa3   : > { %1653 = vmatprep.subr.bf16.mxu0 %v19535_v17  ;;  %1704 = vmatprep.subr.bf16.mxu1 %v21868_v1  ;;  %v19599_v17 = vld [vmem:[%s28263_s3 + $0x500] ss:$20 sps:$4 sm:$0xff]  }
  0xa6   : > { %1654 = vmatpush1.bf16.msra.mxu0 %v19533_v18  ;;  %1705 = vmatpush1.bf16.msra.mxu1 %v19536_v19  ;;  %v19602_v18 = vld [vmem:[%s28263_s3 + $0x508] ss:$20 sps:$4 sm:$0xff]  }
  0xa7   : > { %1655 = vmatprep.subr.bf16.mxu0 %v19539_v22  ;;  %1706 = vmatprep.subr.bf16.mxu1 %v21868_v1  ;;  %v19607_v19 = vld [vmem:[%s28263_s3 + $0x4dc] ss:$20 sps:$4 sm:$0xff]   ;;  %v19610_v22 = vld [vmem:[%s28263_s3 + $0x4e4] ss:$20 sps:$4 sm:$0xff]  }
  0xaa   : > { %1656 = vmatpush1.bf16.msra.mxu0 %v19537_v23  ;;  %1707 = vmatpush1.bf16.msra.mxu1 %v19540_v24  ;;  %v19605_v23 = vld [vmem:[%s28263_s3 + $0x4d8] ss:$20 sps:$4 sm:$0xff]   ;;  %v19608_v24 = vld [vmem:[%s28263_s3 + $0x4e0] ss:$20 sps:$4 sm:$0xff]  }
  0xab   : > { %1659 = vmatprep.subr.bf16.mxu0 %v19543_v26  ;;  %1710 = vmatprep.subr.bf16.mxu1 %v21868_v1  ;;  %v19613_v26 = vld [vmem:[%s28263_s3 + $0x4b4] ss:$20 sps:$4 sm:$0xff]  }
  0xae   : > { %1660 = vmatpush2.bf16.msra.mxu0 %v19541_v27  ;;  %1711 = vmatpush2.bf16.msra.mxu1 %v19544_v28  ;;  %v19616_v27 = vld [vmem:[%s28263_s3 + $0x4bc] ss:$20 sps:$4 sm:$0xff]  }
  0xaf   : > { %1661 = vmatprep.subr.bf16.mxu0 %v19547_v29  ;;  %1712 = vmatprep.subr.bf16.mxu1 %v21868_v1  ;;  %v19611_v28 = vld [vmem:[%s28263_s3 + $0x4b0] ss:$20 sps:$4 sm:$0xff]   ;;  %v19614_v29 = vld [vmem:[%s28263_s3 + $0x4b8] ss:$20 sps:$4 sm:$0xff]  }
  0xb2   : > { %1662 = vmatpush2.bf16.msra.mxu0 %v19545_v30  ;;  %1713 = vmatpush2.bf16.msra.mxu1 %v19548_v31  ;;  %v19619_v30 = vld [vmem:[%s28263_s3 + $0x6e4] ss:$20 sps:$4 sm:$0xff]   ;;  %v19622_v31 = vld [vmem:[%s28263_s3 + $0x6ec] ss:$20 sps:$4 sm:$0xff]  }
  0xb3   : > { %1663 = vmatprep.subr.bf16.mxu0 %v19551_v32  ;;  %1714 = vmatprep.subr.bf16.mxu1 %v21868_v1  ;;  %v19617_v32 = vld [vmem:[%s28263_s3 + $0x6e0] ss:$20 sps:$4 sm:$0xff]  }
  0xb6   : > { %1664 = vmatpush2.bf16.msra.mxu0 %v19549_v33  ;;  %1715 = vmatpush2.bf16.msra.mxu1 %v19552_v34  ;;  %v19620_v33 = vld [vmem:[%s28263_s3 + $0x6e8] ss:$20 sps:$4 sm:$0xff]  }
  0xb7   : > { %1665 = vmatprep.subr.bf16.mxu0 %v19555_v35  ;;  %1716 = vmatprep.subr.bf16.mxu1 %v21868_v1  ;;  %v19625_v34 = vld [vmem:[%s28263_s3 + $0x6bc] ss:$20 sps:$4 sm:$0xff]   ;;  %v19628_v35 = vld [vmem:[%s28263_s3 + $0x6c4] ss:$20 sps:$4 sm:$0xff]  }
  0xba   : > { %1666 = vmatpush2.bf16.msra.mxu0 %v19553_v36  ;;  %1717 = vmatpush2.bf16.msra.mxu1 %v19556_v37  ;;  %v19623_v36 = vld [vmem:[%s28263_s3 + $0x6b8] ss:$20 sps:$4 sm:$0xff]   ;;  %v19626_v37 = vld [vmem:[%s28263_s3 + $0x6c0] ss:$20 sps:$4 sm:$0xff]  }
  0xbb   : > { %1667 = vmatprep.subr.bf16.mxu0 %v19559_v38  ;;  %1718 = vmatprep.subr.bf16.mxu1 %v21868_v1  ;;  %v19631_v38 = vld [vmem:[%s28263_s3 + $0x694] ss:$20 sps:$4 sm:$0xff]  }
  0xbe   : > { %1668 = vmatpush2.bf16.msra.mxu0 %v19557_v39  ;;  %1719 = vmatpush2.bf16.msra.mxu1 %v19560_v40  ;;  %v19634_v39 = vld [vmem:[%s28263_s3 + $0x69c] ss:$20 sps:$4 sm:$0xff]  }
  0xbf   : > { %1669 = vmatprep.subr.bf16.mxu0 %v19563_v41  ;;  %1720 = vmatprep.subr.bf16.mxu1 %v21868_v1  ;;  %v19629_v40 = vld [vmem:[%s28263_s3 + $0x690] ss:$20 sps:$4 sm:$0xff]   ;;  %v19632_v41 = vld [vmem:[%s28263_s3 + $0x698] ss:$20 sps:$4 sm:$0xff]  }
  0xc2   : > { %1670 = vmatpush2.bf16.msra.mxu0 %v19561_v42  ;;  %1721 = vmatpush2.bf16.msra.mxu1 %v19564_v43  ;;  %v19637_v42 = vld [vmem:[%s28263_s3 + $0x66c] ss:$20 sps:$4 sm:$0xff]   ;;  %v19640_v43 = vld [vmem:[%s28263_s3 + $0x674] ss:$20 sps:$4 sm:$0xff]  }
  0xc3   : > { %1671 = vmatprep.subr.bf16.mxu0 %v19567_v44  ;;  %1722 = vmatprep.subr.bf16.mxu1 %v21868_v1  ;;  %v19635_v44 = vld [vmem:[%s28263_s3 + $0x668] ss:$20 sps:$4 sm:$0xff]  }
  0xc6   : > { %1672 = vmatpush2.bf16.msra.mxu0 %v19565_v46  ;;  %1723 = vmatpush2.bf16.msra.mxu1 %v19568_v47  ;;  %v19638_v46 = vld [vmem:[%s28263_s3 + $0x670] ss:$20 sps:$4 sm:$0xff]  }
  0xc7   : > { %2273 = vmatprep.subr.bf16.mxu0 %v19571_v48  ;;  %2324 = vmatprep.subr.bf16.mxu1 %v19574_v49  ;;  %v19643_v47 = vld [vmem:[%s28263_s3 + $0x644] ss:$20 sps:$4 sm:$0xff]   ;;  %v19646_v48 = vld [vmem:[%s28263_s3 + $0x64c] ss:$20 sps:$4 sm:$0xff]  }
  0xc8   : > { %v19641_v49 = vld [vmem:[%s28263_s3 + $0x640] ss:$20 sps:$4 sm:$0xff]  }
  0xc9   : > { %1674 = vmatmul.mubr.bf16.vlgmr.msra.gmra.mxu0 %v22390_v60  ;;  %1725 = vmatmul.mubr.bf16.vlgmr.msra.gmra.mxu1 %v22390_v60  ;;  %v19586_v60 = vld [vmem:[%s28263_s3 + $0x584] ss:$20 sps:$4 sm:$0xff]  }
  0xca   : > { %2274 = vmatpush1.bf16.msra.mxu0 %v19569_v50  ;;  %2325 = vmatpush1.bf16.msra.mxu1 %v19572_v51  ;;  %v19644_v50 = vld [vmem:[%s28263_s3 + $0x648] ss:$20 sps:$4 sm:$0xff]  }
  0xcb   : > { %2275 = vmatprep.subr.bf16.mxu0 %v19577_v55  ;;  %2326 = vmatprep.subr.bf16.mxu1 %v19580_v56  ;;  %v19649_v51 = vld [vmem:[%s28263_s3 + $0x61c] ss:$20 sps:$4 sm:$0xff]   ;;  %v21803_v55 = vld [vmem:[%s22112_s22] ss:$8 sps:$4 sm:$0xff]  }
  0xcc   : > { %15844 = vmatprep.mubr.msk.bf16.mxu0 %vm886_vm0, %v22274_v25  ;;  %15846 = vmatprep.mubr.msk.bf16.mxu1 %vm886_vm0, %v22274_v25  ;;  %v19592_v25 = vld [vmem:[%s28263_s3 + $0x55c] ss:$20 sps:$4 sm:$0xff]   ;;  %v1850_v56 = vshll.u32 %v21803_v55, 16  ;;  %v1848_v59 = vshrl.u32 %v21803_v55, 16 }
  0xce   : > { %2276 = vmatpush1.bf16.msra.mxu0 %v19575_v45  ;;  %2327 = vmatpush1.bf16.msra.mxu1 %v19578_v0  ;;  %v19650_v45 = vld [vmem:[%s28263_s3 + $0x620] ss:$20 sps:$4 sm:$0xff]   ;;  %v1852_v61 = vrot.slane %v1850_v56, 1 }
  0xcf   : > { %2277 = vmatprep.subr.bf16.mxu0 %v19583_v2  ;;  %2328 = vmatprep.subr.bf16.mxu1 %v19586_v60  ;;  %v19655_v0 = vld [vmem:[%s28263_s3 + $0x5f4] ss:$20 sps:$4 sm:$0xff]   ;;  %v19658_v2 = vld [vmem:[%s28263_s3 + $0x5fc] ss:$20 sps:$4 sm:$0xff]  }
  0xd0   : > { %v19653_v60 = vld [vmem:[%s28263_s3 + $0x5f0] ss:$20 sps:$4 sm:$0xff]  }
  0xd1   : > { %1684 = vmatmul.mubr.bf16.gmra.mxu0 %v22382_v58  ;;  %1733 = vmatmul.mubr.bf16.gmra.mxu1 %v22382_v58  ;;  %v19595_v58 = vld [vmem:[%s28263_s3 + $0x52c] ss:$20 sps:$4 sm:$0xff]  }
  0xd2   : > { %2278 = vmatpush1.bf16.msra.mxu0 %v19581_v3  ;;  %2329 = vmatpush1.bf16.msra.mxu1 %v19584_v62  ;;  %v19656_v3 = vld [vmem:[%s28263_s3 + $0x5f8] ss:$20 sps:$4 sm:$0xff]   ;;  %v1853_v62 = vor.u32 %v1852_v61, %v1848_v59  ;;  %v19693_v59 = vld [vmem:[%s28263_s3 + $0x93c] ss:$20 sps:$4 sm:$0xff]  }
  0xd3   : > { %2279 = vmatprep.subr.bf16.mxu0 %v19589_v6  ;;  %2330 = vmatprep.subr.bf16.mxu1 %v19592_v25  ;;  %v19661_v6 = vld [vmem:[%s28263_s3 + $0x824] ss:$20 sps:$4 sm:$0xff]   ;;  %v19659_v25 = vld [vmem:[%s28263_s3 + $0x820] ss:$20 sps:$4 sm:$0xff]  }
  0xd4   : > { %16012 = vmatprep.mubr.msk.bf16.mxu0 %vm886_vm0, %v22611_v8  ;;  %16014 = vmatprep.mubr.msk.bf16.mxu1 %vm886_vm0, %v22611_v8 }
  0xd6   : > { %2280 = vmatpush1.bf16.msra.mxu0 %v19587_v7  ;;  %2331 = vmatpush1.bf16.msra.mxu1 %v19590_v9  ;;  %v19662_v7 = vld [vmem:[%s28263_s3 + $0x5d8] ss:$20 sps:$4 sm:$0xff]   ;;  %v1872_v9 = vshrl.u32 %v22218_v10, 16 }
  0xd7   : > { %2281 = vmatprep.subr.bf16.mxu0 %v19595_v58  ;;  %2332 = vmatprep.subr.bf16.mxu1 %v19598_v11  ;;  %v2548_v58 = vshrl.u32 %v22258_v20, 16  ;;  %v2551_v11 = vshll.u32 %v22258_v20, 16  ;;  %v19663_v20 = vld [vmem:[%s28263_s3 + $0x7f8] ss:$20 sps:$4 sm:$0xff]  }
  0xda   : > { %2282 = vmatpush1.bf16.msra.mxu0 %v19593_v13  ;;  %2333 = vmatpush1.bf16.msra.mxu1 %v19596_v14  ;;  %v2556_v13 = vshrl.u32 %v22264_v21, 16  ;;  %v2559_v14 = vshll.u32 %v22264_v21, 16  ;;  %v19666_v21 = vld [vmem:[%s28263_s3 + $0x5b0] ss:$20 sps:$4 sm:$0xff]  }
  0xdb   : > { %2283 = vmatprep.subr.bf16.mxu0 %v19601_v15  ;;  %2334 = vmatprep.subr.bf16.mxu1 %v19604_v16  ;;  %v22769_v15 = vsel %vm1846_vm2, %v1853_v62, %v1857_v5  ;;  %v19665_v16 = vld [vmem:[%s28263_s3 + $0x7fc] ss:$20 sps:$4 sm:$0xff]   ;;  %v19697_v62 = vld [vmem:[%s28263_s3 + $0x914] ss:$20 sps:$4 sm:$0xff]   ;;  %vm3929_vm2 = vcmask 146432  }
  0xde   : > { %2284 = vmatpush1.bf16.msra.mxu0 %v19599_v17  ;;  %2335 = vmatpush1.bf16.msra.mxu1 %v19602_v18  ;;  %v1869_v17 = vshrl.u32 %v22225_v12, 16  ;;  %v22783_v18 = vor.u32 %v1872_v9, %v22593_v4  ;;  %v19667_v4 = vld [vmem:[%s28263_s3 + $0x7d0] ss:$20 sps:$4 sm:$0xff]   ;;  %v19701_v9 = vld [vmem:[%s28263_s3 + $0x8ec] ss:$20 sps:$4 sm:$0xff]  }
  0xdf   : > { %2285 = vmatprep.subr.bf16.mxu0 %v19607_v19  ;;  %2336 = vmatprep.subr.bf16.mxu1 %v19610_v22  ;;  %v2550_v19 = vrot.slane %v2548_v58, 2  ;;  %v2553_v22 = vrot.slane %v2551_v11, 3  ;;  %v19699_v58 = vld [vmem:[%s28263_s3 + $0x8e8] ss:$20 sps:$4 sm:$0xff]   ;;  %v19702_v11 = vld [vmem:[%s28263_s3 + $0x6a0] ss:$20 sps:$4 sm:$0xff]  }
  0xe2   : > { %2286 = vmatpush1.bf16.msra.mxu0 %v19605_v23  ;;  %2337 = vmatpush1.bf16.msra.mxu1 %v19608_v24  ;;  %v2558_v23 = vrot.slane %v2556_v13, 2  ;;  %v2561_v24 = vrot.slane %v2559_v14, 3  ;;  %v19705_v13 = vld [vmem:[%s28263_s3 + $0x8c4] ss:$20 sps:$4 sm:$0xff]   ;;  %v19703_v14 = vld [vmem:[%s28263_s3 + $0x8c0] ss:$20 sps:$4 sm:$0xff]  }
  0xe3   : > { %2287 = vmatprep.subr.bf16.mxu0 %v19613_v26  ;;  %2338 = vmatprep.subr.bf16.mxu1 %v19616_v27  ;;  %v19669_v26 = vld [vmem:[%s28263_s3 + $0x7d4] ss:$20 sps:$4 sm:$0xff]  }
  0xe4   : > { %v19670_v27 = vld [vmem:[%s28263_s3 + $0x588] ss:$20 sps:$4 sm:$0xff]  }
  0xe6   : > { %2288 = vmatpush1.bf16.msra.mxu0 %v19611_v28  ;;  %2339 = vmatpush1.bf16.msra.mxu1 %v19614_v29  ;;  %v22801_v28 = vor.u32 %v1869_v17, %v1857_v5  ;;  %v2554_v29 = vor.u32 %v2553_v22, %v2550_v19  ;;  %v19709_v17 = vld [vmem:[%s28263_s3 + $0x89c] ss:$20 sps:$4 sm:$0xff]   ;;  %v2534_v22 = vshll.u32 %v22364_v52, 16 }
  0xe7   : > { %2291 = vmatprep.subr.bf16.mxu0 %v19619_v30  ;;  %2342 = vmatprep.subr.bf16.mxu1 %v19622_v31  ;;  %v22803_v30 = vor.u32 %v2561_v24, %v2558_v23  ;;  %v19673_v31 = vld [vmem:[%s28263_s3 + $0x7ac] ss:$20 sps:$4 sm:$0xff]   ;;  %v19710_v19 = vld [vmem:[%s28263_s3 + $0x650] ss:$20 sps:$4 sm:$0xff]   ;;  %v2539_v23 = vshrl.u32 %v22368_v53, 16  ;;  %v2542_v24 = vshll.u32 %v22368_v53, 16 }
  0xea   : > { %2292 = vmatpush2.bf16.msra.mxu0 %v19617_v32  ;;  %2343 = vmatpush2.bf16.msra.mxu1 %v19620_v33  ;;  %v19671_v32 = vld [vmem:[%s28263_s3 + $0x7a8] ss:$20 sps:$4 sm:$0xff]   ;;  %v19674_v33 = vld [vmem:[%s28263_s3 + $0x560] ss:$20 sps:$4 sm:$0xff]  }
  0xeb   : > { %2293 = vmatprep.subr.bf16.mxu0 %v19625_v34  ;;  %2344 = vmatprep.subr.bf16.mxu1 %v19628_v35  ;;  %v22819_v34 = vsel %vm2529_vm3, %v2554_v29, %v22803_v30  ;;  %v19677_v35 = vld [vmem:[%s28263_s3 + $0x784] ss:$20 sps:$4 sm:$0xff]   ;;  %v2536_v29 = vrot.slane %v2534_v22, 3 }
  0xee   : > { %2294 = vmatpush2.bf16.msra.mxu0 %v19623_v36  ;;  %2345 = vmatpush2.bf16.msra.mxu1 %v19626_v37  ;;  %v19675_v36 = vld [vmem:[%s28263_s3 + $0x780] ss:$20 sps:$4 sm:$0xff]   ;;  %v19678_v37 = vld [vmem:[%s28263_s3 + $0x538] ss:$20 sps:$4 sm:$0xff]  }
  0xef   : > { %2295 = vmatprep.subr.bf16.mxu0 %v19631_v38  ;;  %2346 = vmatprep.subr.bf16.mxu1 %v19634_v39 }
  0xf2   : > { %2296 = vmatpush2.bf16.msra.mxu0 %v19629_v40  ;;  %2347 = vmatpush2.bf16.msra.mxu1 %v19632_v41  ;;  %v19681_v41 = vld [vmem:[%s28263_s3 + $0x75c] ss:$20 sps:$4 sm:$0xff]  }
  0xf3   : > { %2297 = vmatprep.subr.bf16.mxu0 %v19637_v42  ;;  %2348 = vmatprep.subr.bf16.mxu1 %v19640_v43  ;;  %v19682_v43 = vld [vmem:[%s28263_s3 + $0x510] ss:$20 sps:$4 sm:$0xff]  }
  0xf6   : > { %2298 = vmatpush2.bf16.msra.mxu0 %v19635_v44  ;;  %2349 = vmatpush2.bf16.msra.mxu1 %v19638_v46  ;;  %v19685_v46 = vld [vmem:[%s28263_s3 + $0x734] ss:$20 sps:$4 sm:$0xff]  }
  0xf7   : > { %2299 = vmatprep.subr.bf16.mxu0 %v19643_v47  ;;  %2350 = vmatprep.subr.bf16.mxu1 %v19646_v48  ;;  %v19683_v48 = vld [vmem:[%s28263_s3 + $0x730] ss:$20 sps:$4 sm:$0xff]  }
  0xfa   : > { %2300 = vmatpush2.bf16.msra.mxu0 %v19641_v49  ;;  %2351 = vmatpush2.bf16.msra.mxu1 %v19644_v50  ;;  %v19686_v49 = vld [vmem:[%s28263_s3 + $0x4e8] ss:$20 sps:$4 sm:$0xff]  }
  0xfb   : > { %2301 = vmatprep.subr.bf16.mxu0 %v19649_v51  ;;  %2352 = vmatprep.subr.bf16.mxu1 %v19652_v54  ;;  %v19689_v51 = vld [vmem:[%s28263_s3 + $0x70c] ss:$20 sps:$4 sm:$0xff]  }
  0xfe   : > { %2302 = vmatpush2.bf16.msra.mxu0 %v19647_v57  ;;  %2353 = vmatpush2.bf16.msra.mxu1 %v19650_v45  ;;  %v19687_v57 = vld [vmem:[%s28263_s3 + $0x708] ss:$20 sps:$4 sm:$0xff]   ;;  %v19690_v45 = vld [vmem:[%s28263_s3 + $0x4c0] ss:$20 sps:$4 sm:$0xff]  }
  0xff   : > { %2303 = vmatprep.subr.bf16.mxu0 %v19655_v0  ;;  %2354 = vmatprep.subr.bf16.mxu1 %v19658_v2 }
 0x102   : > { %2304 = vmatpush2.bf16.msra.mxu0 %v19653_v60  ;;  %2355 = vmatpush2.bf16.msra.mxu1 %v19656_v3  ;;  %v19691_v60 = vld [vmem:[%s28263_s3 + $0x938] ss:$20 sps:$4 sm:$0xff]   ;;  %v19694_v3 = vld [vmem:[%s28263_s3 + $0x6f0] ss:$20 sps:$4 sm:$0xff]  }
 0x103   : > { %2375 = vmatprep.subr.bf16.mxu0 %v21868_v1  ;;  %2962 = vmatprep.subr.bf16.mxu1 %v19661_v6 }
 0x105   : > { %2306 = vmatmul.mubr.bf16.vlgmr.msra.gmra.mxu0 %v22769_v15  ;;  %2357 = vmatmul.mubr.bf16.vlgmr.msra.gmra.mxu1 %v22769_v15 }
 0x106   : > { %2376 = vmatpush1.bf16.msra.mxu0 %v19662_v7  ;;  %2963 = vmatpush1.bf16.msra.mxu1 %v19659_v25  ;;  %v19695_v25 = vld [vmem:[%s28263_s3 + $0x910] ss:$20 sps:$4 sm:$0xff]   ;;  %v19698_v7 = vld [vmem:[%s28263_s3 + $0x6c8] ss:$20 sps:$4 sm:$0xff]  }
 0x107   : > { %2377 = vmatprep.subr.bf16.mxu0 %v21868_v1  ;;  %2964 = vmatprep.subr.bf16.mxu1 %v19665_v16  ;;  %v19706_v16 = vld [vmem:[%s28263_s3 + $0x678] ss:$20 sps:$4 sm:$0xff]  }
 0x108   : > { %16013 = vmatprep.mubr.msk.bf16.mxu0 %vm886_vm0, %v22783_v18  ;;  %16015 = vmatprep.mubr.msk.bf16.mxu1 %vm886_vm0, %v22783_v18 }
 0x10a   : > { %2378 = vmatpush1.bf16.msra.mxu0 %v19666_v21  ;;  %2965 = vmatpush1.bf16.msra.mxu1 %v19663_v20  ;;  %v19707_v20 = vld [vmem:[%s28263_s3 + $0x898] ss:$20 sps:$4 sm:$0xff]   ;;  %v2531_v21 = vshrl.u32 %v22364_v52, 16 }
 0x10b   : > { %2379 = vmatprep.subr.bf16.mxu0 %v21868_v1  ;;  %2966 = vmatprep.subr.bf16.mxu1 %v19669_v26  ;;  %v19713_v26 = vld [vmem:[%s28263_s3 + $0x874] ss:$20 sps:$4 sm:$0xff]   ;;  %v19717_v52 = vld [vmem:[%s28263_s3 + $0x84c] ss:$20 sps:$4 sm:$0xff]  }
 0x10c   : > { %v2533_v53 = vrot.slane %v2531_v21, 2 }
 0x10d   : > { %2316 = vmatmul.mubr.bf16.gmra.mxu0 %v22801_v28  ;;  %2367 = vmatmul.mubr.bf16.gmra.mxu1 %v22801_v28 }
 0x10e   : > { %2380 = vmatpush1.bf16.msra.mxu0 %v19670_v27  ;;  %2967 = vmatpush1.bf16.msra.mxu1 %v19667_v4  ;;  %v19711_v4 = vld [vmem:[%s28263_s3 + $0x870] ss:$20 sps:$4 sm:$0xff]   ;;  %v19714_v27 = vld [vmem:[%s28263_s3 + $0x628] ss:$20 sps:$4 sm:$0xff]  }
 0x10f   : > { %2381 = vmatprep.subr.bf16.mxu0 %v21868_v1  ;;  %2968 = vmatprep.subr.bf16.mxu1 %v19673_v31  ;;  %v2541_v31 = vrot.slane %v2539_v23, 2 }
 0x110   : > { %16016 = vmatprep.mubr.msk.bf16.mxu0 %vm886_vm0, %v22611_v8  ;;  %16183 = vmatprep.mubr.msk.bf16.mxu1 %vm886_vm0, %v22819_v34  ;;  %v19679_v8 = vld [vmem:[%s28263_s3 + $0x758] ss:$20 sps:$4 sm:$0xff]  }
 0x111   : > { %v22835_v38 = vpop.f32.mrf.mxu0  ;;  %v22837_v39 = vpop.f32.mrf.mxu1 }
 0x112   : > { %2382 = vmatpush1.bf16.msra.mxu0 %v19674_v33  ;;  %2969 = vmatpush1.bf16.msra.mxu1 %v19671_v32  ;;  %v2544_v32 = vrot.slane %v2542_v24, 3  ;;  %v19715_v33 = vld [vmem:[%s28263_s3 + $0x848] ss:$20 sps:$4 sm:$0xff]  }
 0x113   : > { %v22839_v40 = vpop.f32.mrf.mxu0  ;;  %2383 = vmatprep.subr.bf16.mxu0 %v21868_v1  ;;  %2970 = vmatprep.subr.bf16.mxu1 %v19677_v35  ;;  %v22845_v42 = vpop.f32.mrf.mxu1  ;;  %v19718_v35 = vld [vmem:[%s28263_s3 + $0x600] ss:$20 sps:$4 sm:$0xff]  }
 0x115   : > { %v22853_v44 = vpop.f32.mrf.mxu0  ;;  %v22859_v47 = vpop.f32.mrf.mxu1 }
 0x116   : > { %2384 = vmatpush1.bf16.msra.mxu0 %v19678_v37  ;;  %2971 = vmatpush1.bf16.msra.mxu1 %v19675_v36  ;;  %v2537_v36 = vor.u32 %v2536_v29, %v2533_v53  ;;  %v22963_v37 = vor.u32 %v2544_v32, %v2541_v31  ;;  %v19746_v53 = vld [vmem:[%s28263_s3 + $0x740] ss:$20 sps:$4 sm:$0xff]  }
 0x117   : > { %2385 = vmatprep.subr.bf16.mxu0 %v21868_v1  ;;  %2972 = vmatprep.subr.bf16.mxu1 %v19681_v41  ;;  %v22867_v50 = vpop.f32.mrf.mxu0  ;;  %v22873_v54 = vpop.f32.mrf.mxu1  ;;  %v19721_v41 = vld [vmem:[%s28263_s3 + $0x82c] ss:$20 sps:$4 sm:$0xff]  }
 0x119   : > { %v22875_v55 = vpop.f32.mrf.mxu0  ;;  %v22877_v56 = vpop.f32.mrf.mxu1 }
 0x11a   : > { %2386 = vmatpush1.bf16.msra.mxu0 %v19682_v43  ;;  %2973 = vmatpush1.bf16.msra.mxu1 %v19679_v8  ;;  %v1044_v8 = vlaneseq  ;;  %v19719_v43 = vld [vmem:[%s28263_s3 + $0x828] ss:$20 sps:$4 sm:$0xff]  }
 0x11b   : > { %2387 = vmatprep.subr.bf16.mxu0 %v21868_v1  ;;  %2974 = vmatprep.subr.bf16.mxu1 %v19685_v46  ;;  %v22889_v61 = vpop.f32.mrf.mxu0  ;;  %v22891_v63 = vpop.f32.mrf.mxu1  ;;  %v19722_v46 = vld [vmem:[%s28263_s3 + $0x830] ss:$20 sps:$4 sm:$0xff]  }
 0x11d   : > { %v941_v0 = vpop.f32.mrf.mxu0  ;;  %v992_v2 = vpop.f32.mrf.mxu1 }
 0x11e   : > { %2388 = vmatpush1.bf16.msra.mxu0 %v19686_v49  ;;  %2975 = vmatpush1.bf16.msra.mxu1 %v19683_v48  ;;  %v19725_v48 = vld [vmem:[%s28263_s3 + $0x804] ss:$20 sps:$4 sm:$0xff]   ;;  %v22980_v49 = vsel %vm2529_vm3, %v2537_v36, %v22963_v37 }
 0x11f   : > { %2389 = vmatprep.subr.bf16.mxu0 %v21868_v1  ;;  %2976 = vmatprep.subr.bf16.mxu1 %v19689_v51  ;;  %v942_v5 = vpop.f32.mrf.mxu0  ;;  %v993_v6 = vpop.f32.mrf.mxu1  ;;  %v22983_v51 = vshrl.u32 %v1044_v8, 7  ;;  %v22999_v0 = vld [vmem:[%s28264_s4] sm:$0x1f] }
 0x120   : > { %v19731_v5 = vld [vmem:[%s28263_s3 + $0x7b0] ss:$20 sps:$4 sm:$0xff]   ;;  %v19734_v6 = vld [vmem:[%s28263_s3 + $0x7b8] ss:$20 sps:$4 sm:$0xff]  }
 0x121   : > { %v23003_v2 = vsub.s32 0, %v22983_v51  ;;  %v19747_v8 = vld [vmem:[%s28263_s3 + $0x710] ss:$20 sps:$4 sm:$0xff]  }
 0x122   : > { %2390 = vmatpush1.bf16.msra.mxu0 %v19690_v45  ;;  %2977 = vmatpush1.bf16.msra.mxu1 %v19687_v57  ;;  %v19723_v57 = vld [vmem:[%s28263_s3 + $0x800] ss:$20 sps:$4 sm:$0xff]   ;;  %v19726_v45 = vld [vmem:[%s28263_s3 + $0x808] ss:$20 sps:$4 sm:$0xff]  }
 0x123   : > { %2393 = vmatprep.subr.bf16.mxu0 %v21868_v1  ;;  %2980 = vmatprep.subr.bf16.mxu1 %v19693_v59  ;;  %v19729_v59 = vld [vmem:[%s28263_s3 + $0x7dc] ss:$20 sps:$4 sm:$0xff]  }
 0x126   : > { %2394 = vmatpush2.bf16.msra.mxu0 %v19694_v3  ;;  %2981 = vmatpush2.bf16.msra.mxu1 %v19691_v60  ;;  %v19730_v60 = vld [vmem:[%s28263_s3 + $0x7e0] ss:$20 sps:$4 sm:$0xff]  }
 0x127   : > { %2395 = vmatprep.subr.bf16.mxu0 %v21868_v1  ;;  %2982 = vmatprep.subr.bf16.mxu1 %v19697_v62  ;;  %v19733_v3 = vld [vmem:[%s28263_s3 + $0x7b4] ss:$20 sps:$4 sm:$0xff]   ;;  %v23019_v62 = vsub.s32 1, %v22983_v51 }
 0x12a   : > { %2396 = vmatpush2.bf16.msra.mxu0 %v19698_v7  ;;  %2983 = vmatpush2.bf16.msra.mxu1 %v19695_v25  ;;  %v19737_v25 = vld [vmem:[%s28263_s3 + $0x78c] ss:$20 sps:$4 sm:$0xff]   ;;  %v23037_v7 = vrot.slane %v22999_v0, %v23019_v62 }
 0x12b   : > { %2397 = vmatprep.subr.bf16.mxu0 %v21868_v1  ;;  %2984 = vmatprep.subr.bf16.mxu1 %v19701_v9 }
 0x12c   : > { %v1080_v32 = vadd.f32 %v23037_v7, %v22889_v61  ;;  %v19750_v61 = vld [vmem:[%s28263_s3 + $0x718] ss:$20 sps:$4 sm:$0xff]  }
 0x12e   : > { %2398 = vmatpush2.bf16.msra.mxu0 %v19702_v11  ;;  %2985 = vmatpush2.bf16.msra.mxu1 %v19699_v58  ;;  %v19738_v58 = vld [vmem:[%s28263_s3 + $0x790] ss:$20 sps:$4 sm:$0xff]  }
 0x12f   : > { %2399 = vmatprep.subr.bf16.mxu0 %v21868_v1  ;;  %2986 = vmatprep.subr.bf16.mxu1 %v19705_v13 }
 0x132   : > { %2400 = vmatpush2.bf16.msra.mxu0 %v19706_v16  ;;  %2987 = vmatpush2.bf16.msra.mxu1 %v19703_v14  ;;  %v1070_v14 = vadd.f32 %v23037_v7, %v22839_v40  ;;  %v19742_v40 = vld [vmem:[%s28263_s3 + $0x768] ss:$20 sps:$4 sm:$0xff]  }
 0x133   : > { %2401 = vmatprep.subr.bf16.mxu0 %v21868_v1  ;;  %2988 = vmatprep.subr.bf16.mxu1 %v19709_v17 }
 0x136   : > { %2402 = vmatpush2.bf16.msra.mxu0 %v19710_v19  ;;  %2989 = vmatpush2.bf16.msra.mxu1 %v19707_v20  ;;  %v19739_v19 = vld [vmem:[%s28263_s3 + $0x760] ss:$20 sps:$4 sm:$0xff]  }
 0x137   : > { %2403 = vmatprep.subr.bf16.mxu0 %v21868_v1  ;;  %2990 = vmatprep.subr.bf16.mxu1 %v19713_v26 }
 0x13a   : > { %2404 = vmatpush2.bf16.msra.mxu0 %v19714_v27  ;;  %2991 = vmatpush2.bf16.msra.mxu1 %v19711_v4 }
 0x13b   : > { %2405 = vmatprep.subr.bf16.mxu0 %v21868_v1  ;;  %2992 = vmatprep.subr.bf16.mxu1 %v19717_v52  ;;  %v19743_v52 = vld [vmem:[%s28263_s3 + $0x738] ss:$20 sps:$4 sm:$0xff]  }
 0x13e   : > { %2406 = vmatpush2.bf16.msra.mxu0 %v19718_v35  ;;  %2993 = vmatpush2.bf16.msra.mxu1 %v19715_v33 }
 0x13f   : > { %3013 = vmatprep.subr.bf16.mxu0 %v19721_v41  ;;  %3064 = vmatprep.subr.bf16.mxu1 %v21868_v1 }
 0x141   : > { %2408 = vmatmul.mubr.bf16.vlgmr.msra.gmra.mxu0 %v22769_v15  ;;  %2995 = vmatmul.mubr.bf16.vlgmr.msra.gmra.mxu1 %v22980_v49  ;;  %v19727_v15 = vld [vmem:[%s28263_s3 + $0x7d8] ss:$20 sps:$4 sm:$0xff]  }
 0x142   : > { %3014 = vmatpush1.bf16.msra.mxu0 %v19719_v43  ;;  %3065 = vmatpush1.bf16.msra.mxu1 %v19722_v46 }
 0x143   : > { %3015 = vmatprep.subr.bf16.mxu0 %v19725_v48  ;;  %3066 = vmatprep.subr.bf16.mxu1 %v21868_v1  ;;  %v19753_v48 = vld [vmem:[%s28263_s3 + $0x944] ss:$20 sps:$4 sm:$0xff]  }
 0x144   : > { %16017 = vmatprep.mubr.msk.bf16.mxu0 %vm886_vm0, %v22783_v18  ;;  %16184 = vmatprep.mubr.msk.bf16.mxu1 %vm886_vm0, %v22803_v30  ;;  %v1047_v18 = vrot.slane %v22999_v0, %v23003_v2 }
 0x146   : > { %3016 = vmatpush1.bf16.msra.mxu0 %v19723_v57  ;;  %3067 = vmatpush1.bf16.msra.mxu1 %v19726_v45  ;;  %v1069_v9 = vadd.f32 %v1047_v18, %v22835_v38  ;;  %v19741_v38 = vld [vmem:[%s28263_s3 + $0x764] ss:$20 sps:$4 sm:$0xff]   ;;  %v1079_v27 = vadd.f32 %v1047_v18, %v22875_v55  ;;  %v19749_v55 = vld [vmem:[%s28263_s3 + $0x714] ss:$20 sps:$4 sm:$0xff]  }
 0x147   : > { %3017 = vmatprep.subr.bf16.mxu0 %v19729_v59  ;;  %3068 = vmatprep.subr.bf16.mxu1 %v21868_v1  ;;  %v19751_v59 = vld [vmem:[%s28263_s3 + $0x940] ss:$20 sps:$4 sm:$0xff]  }
 0x149   : > { %2416 = vmatmul.mubr.bf16.gmra.mxu0 %v22801_v28  ;;  %3005 = vmatmul.mubr.bf16.gmra.mxu1 %v22963_v37  ;;  %v19735_v28 = vld [vmem:[%s28263_s3 + $0x788] ss:$20 sps:$4 sm:$0xff]  }
 0x14a   : > { %3018 = vmatpush1.bf16.msra.mxu0 %v19727_v15  ;;  %3069 = vmatpush1.bf16.msra.mxu1 %v19730_v60  ;;  %v19754_v15 = vld [vmem:[%s28263_s3 + $0x948] ss:$20 sps:$4 sm:$0xff]  }
 0x14b   : > { %3019 = vmatprep.subr.bf16.mxu0 %v19733_v3  ;;  %3070 = vmatprep.subr.bf16.mxu1 %v21868_v1  ;;  %v19757_v60 = vld [vmem:[%s28263_s3 + $0x91c] ss:$20 sps:$4 sm:$0xff]   ;;  %v19755_v3 = vld [vmem:[%s28263_s3 + $0x918] ss:$20 sps:$4 sm:$0xff]  }
 0x14c   : > { %16185 = vmatprep.mubr.msk.bf16.mxu0 %vm886_vm0, %v22819_v34  ;;  %16187 = vmatprep.mubr.msk.bf16.mxu1 %vm886_vm0, %v22819_v34  ;;  %v1074_v34 = vadd.f32 %v1047_v18, %v22853_v44  ;;  %v19745_v44 = vld [vmem:[%s28263_s3 + $0x73c] ss:$20 sps:$4 sm:$0xff]   ;;  %v19758_v18 = vld [vmem:[%s28263_s3 + $0x920] ss:$20 sps:$4 sm:$0xff]  }
 0x14d   : > { %v23051_v11 = vpop.f32.mrf.mxu0  ;;  %v1624_v13 = vpop.f32.mrf.mxu1 }
 0x14e   : > { %v23058_v16 = vadd.f32 %v1624_v13, %v1069_v9  ;;  %3020 = vmatpush1.bf16.msra.mxu0 %v19731_v5  ;;  %3071 = vmatpush1.bf16.msra.mxu1 %v19734_v6  ;;  %v19761_v5 = vld [vmem:[%s28263_s3 + $0x8f4] ss:$20 sps:$4 sm:$0xff]   ;;  %v19759_v6 = vld [vmem:[%s28263_s3 + $0x8f0] ss:$20 sps:$4 sm:$0xff]   ;;  %v19765_v9 = vld [vmem:[%s28263_s3 + $0x8cc] ss:$20 sps:$4 sm:$0xff]  }
 0x14f   : > { %v1031_v17 = vpop.f32.mrf.mxu0  ;;  %v1626_v20 = vpop.f32.mrf.mxu1  ;;  %3021 = vmatprep.subr.bf16.mxu0 %v19737_v25  ;;  %3072 = vmatprep.subr.bf16.mxu1 %v21868_v1  ;;  %v19762_v25 = vld [vmem:[%s28263_s3 + $0x8f8] ss:$20 sps:$4 sm:$0xff]  }
 0x150   : > { %v23062_v21 = vadd.f32 %v1626_v20, %v1070_v14  ;;  %v19769_v13 = vld [vmem:[%s28263_s3 + $0x8a4] ss:$20 sps:$4 sm:$0xff]   ;;  %v19770_v14 = vld [vmem:[%s28263_s3 + $0x8a8] ss:$20 sps:$4 sm:$0xff]  }
 0x151   : > { %v23070_v22 = vpop.f32.mrf.mxu0  ;;  %v1628_v23 = vpop.f32.mrf.mxu1  ;;  %v19773_v17 = vld [vmem:[%s28263_s3 + $0x87c] ss:$20 sps:$4 sm:$0xff]   ;;  %v19771_v20 = vld [vmem:[%s28263_s3 + $0x878] ss:$20 sps:$4 sm:$0xff]  }
 0x152   : > { %v23072_v24 = vadd.f32 %v1628_v23, %v1074_v34  ;;  %3022 = vmatpush1.bf16.msra.mxu0 %v19735_v28  ;;  %3073 = vmatpush1.bf16.msra.mxu1 %v19738_v58  ;;  %v19763_v28 = vld [vmem:[%s28263_s3 + $0x8c8] ss:$20 sps:$4 sm:$0xff]   ;;  %v19766_v58 = vld [vmem:[%s28263_s3 + $0x8d0] ss:$20 sps:$4 sm:$0xff]   ;;  %v19774_v34 = vld [vmem:[%s28263_s3 + $0x880] ss:$20 sps:$4 sm:$0xff]  }
 0x153   : > { %v1034_v26 = vpop.f32.mrf.mxu0  ;;  %v23074_v4 = vpop.f32.mrf.mxu1  ;;  %3023 = vmatprep.subr.bf16.mxu0 %v19741_v38  ;;  %3074 = vmatprep.subr.bf16.mxu1 %v21868_v1  ;;  %v19767_v38 = vld [vmem:[%s28263_s3 + $0x8a0] ss:$20 sps:$4 sm:$0xff]   ;;  %v19778_v23 = vld [vmem:[%s28263_s3 + $0x858] ss:$20 sps:$4 sm:$0xff]  }
 0x154   : > { %v19781_v26 = vld [vmem:[%s28263_s3 + $0xa7c] ss:$20 sps:$4 sm:$0xff]  }
 0x155   : > { %v1634_v29 = vpop.f32.mrf.mxu1  ;;  %v23087_v31 = vpop.f32.mrf.mxu0 }
 0x156   : > { %v23091_v33 = vadd.f32 %v1634_v29, %v1079_v27  ;;  %3024 = vmatpush1.bf16.msra.mxu0 %v19739_v19  ;;  %3075 = vmatpush1.bf16.msra.mxu1 %v19742_v40  ;;  %v19777_v19 = vld [vmem:[%s28263_s3 + $0x854] ss:$20 sps:$4 sm:$0xff]   ;;  %v19775_v40 = vld [vmem:[%s28263_s3 + $0x850] ss:$20 sps:$4 sm:$0xff]   ;;  %v19779_v27 = vld [vmem:[%s28263_s3 + $0xa78] ss:$20 sps:$4 sm:$0xff]  }
 0x157   : > { %v1636_v35 = vpop.f32.mrf.mxu1  ;;  %3025 = vmatprep.subr.bf16.mxu0 %v19745_v44  ;;  %3076 = vmatprep.subr.bf16.mxu1 %v21868_v1  ;;  %v1039_v36 = vpop.f32.mrf.mxu0  ;;  %v19784_v44 = vld [vmem:[%s28263_s3 + $0xa84] ss:$20 sps:$4 sm:$0xff]   ;;  %v19790_v29 = vld [vmem:[%s28263_s3 + $0xa5c] ss:$20 sps:$4 sm:$0xff]  }
 0x158   : > { %v23097_v41 = vadd.f32 %v1636_v35, %v1080_v32  ;;  %v19785_v32 = vld [vmem:[%s28263_s3 + $0xa50] ss:$20 sps:$4 sm:$0xff]   ;;  %v19788_v35 = vld [vmem:[%s28263_s3 + $0xa58] ss:$20 sps:$4 sm:$0xff]   ;;  %v19796_v36 = vld [vmem:[%s28263_s3 + $0xa34] ss:$20 sps:$4 sm:$0xff]  }
 0x159   : > { %v1040_v43 = vpop.f32.mrf.mxu0  ;;  %v1638_v46 = vpop.f32.mrf.mxu1 }
 0x15a   : > { %3026 = vmatpush1.bf16.msra.mxu0 %v19743_v52  ;;  %3077 = vmatpush1.bf16.msra.mxu1 %v19746_v53  ;;  %v19782_v52 = vld [vmem:[%s28263_s3 + $0xa80] ss:$20 sps:$4 sm:$0xff]   ;;  %v19794_v43 = vld [vmem:[%s28263_s3 + $0xa30] ss:$20 sps:$4 sm:$0xff]  }
 0x15b   : > { %3027 = vmatprep.subr.bf16.mxu0 %v19749_v55  ;;  %3078 = vmatprep.subr.bf16.mxu1 %v21868_v1  ;;  %v1041_v57 = vpop.f32.mrf.mxu0  ;;  %v1639_v45 = vpop.f32.mrf.mxu1  ;;  %v19787_v53 = vld [vmem:[%s28263_s3 + $0xa54] ss:$20 sps:$4 sm:$0xff]   ;;  %v19793_v55 = vld [vmem:[%s28263_s3 + $0xa2c] ss:$20 sps:$4 sm:$0xff]   ;;  %v19799_v46 = vld [vmem:[%s28263_s3 + $0xa04] ss:$20 sps:$4 sm:$0xff]  }
 0x15c   : > { %v21804_v57 = vld [vmem:[%s22112_s22 + $0x4] ss:$8 sps:$4 sm:$0xff]  }
 0x15d   : > { %v3222_v45 = vrot.slane %v21804_v57, 1 }
 0x15e   : > { %3028 = vmatpush1.bf16.msra.mxu0 %v19747_v8  ;;  %3079 = vmatpush1.bf16.msra.mxu1 %v19750_v61  ;;  %v1054_v8 = vsub.s32 2, %v22983_v51  ;;  %v1062_v61 = vsub.s32 4, %v22983_v51 }
 0x15f   : > { %3031 = vmatprep.subr.bf16.mxu0 %v19753_v48  ;;  %3082 = vmatprep.subr.bf16.mxu1 %v21868_v1  ;;  %v19802_v48 = vld [vmem:[%s28263_s3 + $0xa0c] ss:$20 sps:$4 sm:$0xff]  }
 0x162   : > { %3032 = vmatpush2.bf16.msra.mxu0 %v19751_v59  ;;  %3083 = vmatpush2.bf16.msra.mxu1 %v19754_v15  ;;  %v1058_v59 = vsub.s32 3, %v22983_v51  ;;  %v1055_v15 = vrot.slane %v22999_v0, %v1054_v8  ;;  %v20709_v51 = vld [vmem:[%s28265_s5 + $0x1118] ss:$20 sps:$4 sm:$0xff]  }
 0x163   : > { %3033 = vmatprep.subr.bf16.mxu0 %v19757_v60  ;;  %3084 = vmatprep.subr.bf16.mxu1 %v21868_v1  ;;  %v1063_v60 = vrot.slane %v22999_v0, %v1062_v61 }
 0x166   : > { %3034 = vmatpush2.bf16.msra.mxu0 %v19755_v3  ;;  %3085 = vmatpush2.bf16.msra.mxu1 %v19758_v18  ;;  %v19800_v3 = vld [vmem:[%s28263_s3 + $0xa08] ss:$20 sps:$4 sm:$0xff]  }
 0x167   : > { %3035 = vmatprep.subr.bf16.mxu0 %v19761_v5  ;;  %3086 = vmatprep.subr.bf16.mxu1 %v21868_v1  ;;  %v19805_v18 = vld [vmem:[%s28263_s3 + $0x9dc] ss:$20 sps:$4 sm:$0xff]   ;;  %v19808_v5 = vld [vmem:[%s28263_s3 + $0x9e4] ss:$20 sps:$4 sm:$0xff]  }
 0x16a   : > { %3036 = vmatpush2.bf16.msra.mxu0 %v19759_v6  ;;  %3087 = vmatpush2.bf16.msra.mxu1 %v19762_v25  ;;  %v23258_v25 = vrot.slane %v22999_v0, %v1058_v59 }
 0x16b   : > { %3037 = vmatprep.subr.bf16.mxu0 %v19765_v9  ;;  %3088 = vmatprep.subr.bf16.mxu1 %v21868_v1  ;;  %v1073_v9 = vadd.f32 %v1063_v60, %v23051_v11  ;;  %v19814_v11 = vld [vmem:[%s28263_s3 + $0x9bc] ss:$20 sps:$4 sm:$0xff]  }
 0x16e   : > { %3038 = vmatpush2.bf16.msra.mxu0 %v19763_v28  ;;  %3089 = vmatpush2.bf16.msra.mxu1 %v19766_v58  ;;  %v19803_v28 = vld [vmem:[%s28263_s3 + $0x9d8] ss:$20 sps:$4 sm:$0xff]   ;;  %v19806_v58 = vld [vmem:[%s28263_s3 + $0x9e0] ss:$20 sps:$4 sm:$0xff]  }
 0x16f   : > { %3039 = vmatprep.subr.bf16.mxu0 %v19769_v13  ;;  %3090 = vmatprep.subr.bf16.mxu1 %v21868_v1 }
 0x172   : > { %3040 = vmatpush2.bf16.msra.mxu0 %v19767_v38  ;;  %3091 = vmatpush2.bf16.msra.mxu1 %v19770_v14  ;;  %v1072_v38 = vadd.f32 %v23258_v25, %v22845_v42  ;;  %v19809_v42 = vld [vmem:[%s28263_s3 + $0x9b0] ss:$20 sps:$4 sm:$0xff]  }
 0x173   : > { %3041 = vmatprep.subr.bf16.mxu0 %v19773_v17  ;;  %3092 = vmatprep.subr.bf16.mxu1 %v21868_v1 }
 0x176   : > { %3042 = vmatpush2.bf16.msra.mxu0 %v19771_v20  ;;  %3093 = vmatpush2.bf16.msra.mxu1 %v19774_v34 }
 0x177   : > { %3043 = vmatprep.subr.bf16.mxu0 %v19777_v19  ;;  %3094 = vmatprep.subr.bf16.mxu1 %v21868_v1  ;;  %v1076_v19 = vadd.f32 %v1055_v15, %v22859_v47  ;;  %v19820_v47 = vld [vmem:[%s28263_s3 + $0x994] ss:$20 sps:$4 sm:$0xff]  }
 0x17a   : > { %3044 = vmatpush2.bf16.msra.mxu0 %v19775_v40  ;;  %3095 = vmatpush2.bf16.msra.mxu1 %v19778_v23  ;;  %v1078_v40 = vadd.f32 %v1063_v60, %v23070_v22 }
 0x17b   : > { %3623 = vmatprep.subr.bf16.mxu0 %v19781_v26  ;;  %3674 = vmatprep.subr.bf16.mxu1 %v19784_v44  ;;  %v19812_v26 = vld [vmem:[%s28263_s3 + $0x9b8] ss:$20 sps:$4 sm:$0xff]  }
 0x17d   : > { %3046 = vmatmul.mubr.bf16.vlgmr.msra.gmra.mxu0 %v22980_v49  ;;  %3097 = vmatmul.mubr.bf16.vlgmr.msra.gmra.mxu1 %v22980_v49  ;;  %v19791_v49 = vld [vmem:[%s28263_s3 + $0xa28] ss:$20 sps:$4 sm:$0xff]  }
 0x17e   : > { %3624 = vmatpush1.bf16.msra.mxu0 %v19779_v27  ;;  %3675 = vmatpush1.bf16.msra.mxu1 %v19782_v52  ;;  %v19817_v52 = vld [vmem:[%s28263_s3 + $0x98c] ss:$20 sps:$4 sm:$0xff]  }
 0x17f   : > { %3625 = vmatprep.subr.bf16.mxu0 %v19787_v53  ;;  %3676 = vmatprep.subr.bf16.mxu1 %v19790_v29 }
 0x180   : > { %16186 = vmatprep.mubr.msk.bf16.mxu0 %vm886_vm0, %v22803_v30  ;;  %16188 = vmatprep.mubr.msk.bf16.mxu1 %vm886_vm0, %v22803_v30  ;;  %v23228_v30 = vrot.slane %v22218_v10, 1  ;;  %v19797_v10 = vld [vmem:[%s28263_s3 + $0xa00] ss:$20 sps:$4 sm:$0xff]  }
 0x182   : > { %3626 = vmatpush1.bf16.msra.mxu0 %v19785_v32  ;;  %3677 = vmatpush1.bf16.msra.mxu1 %v19788_v35  ;;  %v23253_v6 = vsel %vm3218_vm4, %v3222_v45, %v23228_v30  ;;  %v1081_v35 = vadd.f32 %v1055_v15, %v22877_v56  ;;  %v19826_v56 = vld [vmem:[%s28263_s3 + $0x96c] ss:$20 sps:$4 sm:$0xff]  }
 0x183   : > { %3627 = vmatprep.subr.bf16.mxu0 %v19793_v55  ;;  %3678 = vmatprep.subr.bf16.mxu1 %v19796_v36  ;;  %v1083_v55 = vadd.f32 %v1063_v60, %v23087_v31  ;;  %v19815_v36 = vld [vmem:[%s28263_s3 + $0x988] ss:$20 sps:$4 sm:$0xff]   ;;  %v1082_v31 = vadd.f32 %v23258_v25, %v22891_v63 }
 0x184   : > { %v19824_v63 = vld [vmem:[%s28263_s3 + $0x968] ss:$20 sps:$4 sm:$0xff]  }
 0x185   : > { %3056 = vmatmul.mubr.bf16.gmra.mxu0 %v22963_v37  ;;  %3105 = vmatmul.mubr.bf16.gmra.mxu1 %v22963_v37  ;;  %v1071_v37 = vadd.f32 %v1055_v15, %v22837_v39  ;;  %v19811_v39 = vld [vmem:[%s28263_s3 + $0x9b4] ss:$20 sps:$4 sm:$0xff]  }
 0x186   : > { %3628 = vmatpush1.bf16.msra.mxu0 %v19791_v49  ;;  %3679 = vmatpush1.bf16.msra.mxu1 %v19794_v43  ;;  %v19818_v49 = vld [vmem:[%s28263_s3 + $0x990] ss:$20 sps:$4 sm:$0xff]  }
 0x187   : > { %3629 = vmatprep.subr.bf16.mxu0 %v19799_v46  ;;  %3680 = vmatprep.subr.bf16.mxu1 %v19802_v48  ;;  %v19823_v48 = vld [vmem:[%s28263_s3 + $0x964] ss:$20 sps:$4 sm:$0xff]  }
 0x188   : > { %16354 = vmatprep.mubr.msk.bf16.mxu0 %vm886_vm0, %v23253_v6  ;;  %16356 = vmatprep.mubr.msk.bf16.mxu1 %vm886_vm0, %v23253_v6 }
 0x189   : > { %v1675_v0 = vpop.f32.mrf.mxu0  ;;  %v1726_v13 = vpop.f32.mrf.mxu1 }
 0x18a   : > { %v23280_v14 = vadd.f32 %v1675_v0, %v1071_v37  ;;  %v23282_v17 = vadd.f32 %v1726_v13, %v1073_v9  ;;  %3630 = vmatpush1.bf16.msra.mxu0 %v19797_v10  ;;  %3681 = vmatpush1.bf16.msra.mxu1 %v19800_v3  ;;  %v19821_v3 = vld [vmem:[%s28263_s3 + $0x960] ss:$20 sps:$4 sm:$0xff]   ;;  %v19827_v0 = vld [vmem:[%s28263_s3 + $0xb90] ss:$20 sps:$4 sm:$0xff]   ;;  %v19830_v13 = vld [vmem:[%s28263_s3 + $0xb98] ss:$20 sps:$4 sm:$0xff]  }
 0x18b   : > { %v1677_v20 = vpop.f32.mrf.mxu0  ;;  %v1728_v34 = vpop.f32.mrf.mxu1  ;;  %3631 = vmatprep.subr.bf16.mxu0 %v19805_v18  ;;  %3682 = vmatprep.subr.bf16.mxu1 %v19808_v5  ;;  %v19829_v18 = vld [vmem:[%s28263_s3 + $0xb94] ss:$20 sps:$4 sm:$0xff]   ;;  %v19832_v5 = vld [vmem:[%s28263_s3 + $0xb9c] ss:$20 sps:$4 sm:$0xff]  }
 0x18c   : > { %v23286_v23 = vadd.f32 %v1677_v20, %v1072_v38  ;;  %v19833_v38 = vld [vmem:[%s28263_s3 + $0xb68] ss:$20 sps:$4 sm:$0xff]   ;;  %v19836_v20 = vld [vmem:[%s28263_s3 + $0xb70] ss:$20 sps:$4 sm:$0xff]  }
 0x18d   : > { %v1679_v44 = vpop.f32.mrf.mxu0  ;;  %v1729_v27 = vpop.f32.mrf.mxu1  ;;  %v19841_v34 = vld [vmem:[%s28263_s3 + $0xb44] ss:$20 sps:$4 sm:$0xff]  }
 0x18e   : > { %v23300_v22 = vadd.f32 %v1679_v44, %v1076_v19  ;;  %v23302_v53 = vadd.f32 %v1729_v27, %v1078_v40  ;;  %3632 = vmatpush1.bf16.msra.mxu0 %v19803_v28  ;;  %3683 = vmatpush1.bf16.msra.mxu1 %v19806_v58  ;;  %v19844_v19 = vld [vmem:[%s28263_s3 + $0xb4c] ss:$20 sps:$4 sm:$0xff]   ;;  %v19850_v44 = vld [vmem:[%s28263_s3 + $0xb24] ss:$20 sps:$4 sm:$0xff]  }
 0x18f   : > { %v23304_v29 = vpop.f32.mrf.mxu0  ;;  %v1731_v32 = vpop.f32.mrf.mxu1  ;;  %3633 = vmatprep.subr.bf16.mxu0 %v19811_v39  ;;  %3684 = vmatprep.subr.bf16.mxu1 %v19814_v11  ;;  %v19835_v39 = vld [vmem:[%s28263_s3 + $0xb6c] ss:$20 sps:$4 sm:$0xff]   ;;  %v19838_v11 = vld [vmem:[%s28263_s3 + $0xb74] ss:$20 sps:$4 sm:$0xff]  }
 0x190   : > { %v19839_v40 = vld [vmem:[%s28263_s3 + $0xb40] ss:$20 sps:$4 sm:$0xff]   ;;  %v19845_v27 = vld [vmem:[%s28263_s3 + $0xb18] ss:$20 sps:$4 sm:$0xff]   ;;  %v19856_v32 = vld [vmem:[%s28263_s3 + $0xafc] ss:$20 sps:$4 sm:$0xff]  }
 0x191   : > { %v1685_v43 = vpop.f32.mrf.mxu0  ;;  %v1734_v46 = vpop.f32.mrf.mxu1 }
 0x192   : > { %v23322_v57 = vadd.f32 %v1685_v43, %v1081_v35  ;;  %v23324_v45 = vadd.f32 %v1734_v46, %v1083_v55  ;;  %3634 = vmatpush1.bf16.msra.mxu0 %v19809_v42  ;;  %3685 = vmatpush1.bf16.msra.mxu1 %v19812_v26  ;;  %v19842_v42 = vld [vmem:[%s28263_s3 + $0xb48] ss:$20 sps:$4 sm:$0xff]   ;;  %v19851_v35 = vld [vmem:[%s28263_s3 + $0xaf0] ss:$20 sps:$4 sm:$0xff]   ;;  %v19854_v55 = vld [vmem:[%s28263_s3 + $0xaf8] ss:$20 sps:$4 sm:$0xff]  }
 0x193   : > { %v1687_v15 = vpop.f32.mrf.mxu0  ;;  %3635 = vmatprep.subr.bf16.mxu0 %v19817_v52  ;;  %3686 = vmatprep.subr.bf16.mxu1 %v19820_v47  ;;  %v1736_v60 = vpop.f32.mrf.mxu1  ;;  %v19847_v26 = vld [vmem:[%s28263_s3 + $0xb1c] ss:$20 sps:$4 sm:$0xff]   ;;  %v19848_v52 = vld [vmem:[%s28263_s3 + $0xb20] ss:$20 sps:$4 sm:$0xff]  }
 0x194   : > { %v23326_v10 = vadd.f32 %v1687_v15, %v1082_v31  ;;  %v19853_v47 = vld [vmem:[%s28263_s3 + $0xaf4] ss:$20 sps:$4 sm:$0xff]   ;;  %v19860_v46 = vld [vmem:[%s28263_s3 + $0xad0] ss:$20 sps:$4 sm:$0xff]  }
 0x195   : > { %v1689_v37 = vpop.f32.mrf.mxu0  ;;  %v1737_v9 = vpop.f32.mrf.mxu1  ;;  %v19857_v43 = vld [vmem:[%s28263_s3 + $0xac8] ss:$20 sps:$4 sm:$0xff]   ;;  %v19863_v31 = vld [vmem:[%s28263_s3 + $0xaa0] ss:$20 sps:$4 sm:$0xff]  }
 0x196   : > { %3636 = vmatpush1.bf16.msra.mxu0 %v19815_v36  ;;  %3687 = vmatpush1.bf16.msra.mxu1 %v19818_v49  ;;  %v19859_v36 = vld [vmem:[%s28263_s3 + $0xacc] ss:$20 sps:$4 sm:$0xff]   ;;  %v19862_v49 = vld [vmem:[%s28263_s3 + $0xad4] ss:$20 sps:$4 sm:$0xff]   ;;  %v19872_v9 = vld [vmem:[%s28263_s3 + $0xa10] ss:$20 sps:$4 sm:$0xff]  }
 0x197   : > { %3637 = vmatprep.subr.bf16.mxu0 %v19823_v48  ;;  %3688 = vmatprep.subr.bf16.mxu1 %v19826_v56  ;;  %v1690_v28 = vpop.f32.mrf.mxu0  ;;  %v1738_v58 = vpop.f32.mrf.mxu1  ;;  %v19865_v48 = vld [vmem:[%s28263_s3 + $0xaa4] ss:$20 sps:$4 sm:$0xff]   ;;  %v19868_v56 = vld [vmem:[%s28263_s3 + $0xaac] ss:$20 sps:$4 sm:$0xff]   ;;  %v19866_v15 = vld [vmem:[%s28263_s3 + $0xaa8] ss:$20 sps:$4 sm:$0xff]  }
 0x198   : > { %v21805_v60 = vld [vmem:[%s22112_s22] ss:$8 sps:$4 sm:$0xff]   ;;  %s18947_s22 = sshll.u32 %s21954_s21, 4  ;;  %s21812_s21 = scalar_lea.vmem %s21811_s15, 32 }
 0x199   : > { %v19870_v37 = vld [vmem:[%s28263_s3 + $0xa60] ss:$20 sps:$4 sm:$0xff]   ;;  %v19873_v28 = vld [vmem:[%s28263_s3 + $0x9e8] ss:$20 sps:$4 sm:$0xff]   ;;  %s15525_s13 = scalar_lea.hbm %s28271_s11, %s18947_s22  ;;  %p21814_p1 = scmp.lt.s32.totalorder %s21812_s21, %s21806_s24 }
 0x19a   : > { %3638 = vmatpush1.bf16.msra.mxu0 %v19821_v3  ;;  %3689 = vmatpush1.bf16.msra.mxu1 %v19824_v63  ;;  %v3219_v3 = vrot.slane %v21805_v60, 1  ;;  %v23420_v63 = vrot.slane %v22225_v12, 1  ;;  %v19871_v12 = vld [vmem:[%s28263_s3 + $0xa38] ss:$20 sps:$4 sm:$0xff]  }
 0x19b   : > { %3641 = vmatprep.subr.bf16.mxu0 %v19829_v18  ;;  %3692 = vmatprep.subr.bf16.mxu1 %v19832_v5  ;;  %v19869_v18 = vld [vmem:[%s28263_s3 + $0xa88] ss:$20 sps:$4 sm:$0xff]   ;;  %p21815_p2 = por %p21814_p1, %p21813_p0 }
 0x19c   : > { %v23427_v5 = vsel %vm3218_vm4, %v3219_v3, %v23420_v63 }
 0x19d   : > { %p21816_p3 = pnand %p21815_p2, %p21809_p13 }
 0x19e   : > { %3642 = vmatpush2.bf16.msra.mxu0 %v19827_v0  ;;  %3693 = vmatpush2.bf16.msra.mxu1 %v19830_v13 }
 0x19f   : > { %3643 = vmatprep.subr.bf16.mxu0 %v19835_v39  ;;  %3694 = vmatprep.subr.bf16.mxu1 %v19838_v11 }
 0x1a2   : > { %3644 = vmatpush2.bf16.msra.mxu0 %v19833_v38  ;;  %3695 = vmatpush2.bf16.msra.mxu1 %v19836_v20 }
 0x1a3   : > { %3645 = vmatprep.subr.bf16.mxu0 %v19841_v34  ;;  %3696 = vmatprep.subr.bf16.mxu1 %v19844_v19  ;;  %v19874_v34 = vld [vmem:[%s28263_s3 + $0x9c0] ss:$20 sps:$4 sm:$0xff]  }
 0x1a6   : > { %3646 = vmatpush2.bf16.msra.mxu0 %v19839_v40  ;;  %3697 = vmatpush2.bf16.msra.mxu1 %v19842_v42 }
 0x1a7   : > { %3647 = vmatprep.subr.bf16.mxu0 %v19847_v26  ;;  %3698 = vmatprep.subr.bf16.mxu1 %v19850_v44 }
 0x1aa   : > { %3648 = vmatpush2.bf16.msra.mxu0 %v19845_v27  ;;  %3699 = vmatpush2.bf16.msra.mxu1 %v19848_v52 }
 0x1ab   : > { %3649 = vmatprep.subr.bf16.mxu0 %v19853_v47  ;;  %3700 = vmatprep.subr.bf16.mxu1 %v19856_v32 }
 0x1ae   : > { %3650 = vmatpush2.bf16.msra.mxu0 %v19851_v35  ;;  %3701 = vmatpush2.bf16.msra.mxu1 %v19854_v55  ;;  %v19876_v35 = vld [vmem:[%s28263_s3 + $0x970] ss:$20 sps:$4 sm:$0xff]  }
 0x1af   : > { %3651 = vmatprep.subr.bf16.mxu0 %v19859_v36  ;;  %3702 = vmatprep.subr.bf16.mxu1 %v19862_v49  ;;  %v19877_v49 = vld [vmem:[%s28263_s3 + $0xba0] ss:$20 sps:$4 sm:$0xff]  }
 0x1b2   : > { %3652 = vmatpush2.bf16.msra.mxu0 %v19857_v43  ;;  %3703 = vmatpush2.bf16.msra.mxu1 %v19860_v46  ;;  %v19880_v43 = vld [vmem:[%s28263_s3 + $0xb28] ss:$20 sps:$4 sm:$0xff]   ;;  %v19881_v46 = vld [vmem:[%s28263_s3 + $0xb00] ss:$20 sps:$4 sm:$0xff]  }
 0x1b3   : > { %3653 = vmatprep.subr.bf16.mxu0 %v19865_v48  ;;  %3704 = vmatprep.subr.bf16.mxu1 %v19868_v56  ;;  %v19882_v48 = vld [vmem:[%s28263_s3 + $0xad8] ss:$20 sps:$4 sm:$0xff]   ;;  %v19883_v56 = vld [vmem:[%s28263_s3 + $0xab0] ss:$20 sps:$4 sm:$0xff]  }
 0x1b6   : > { %3654 = vmatpush2.bf16.msra.mxu0 %v19863_v31  ;;  %3705 = vmatpush2.bf16.msra.mxu1 %v19866_v15 }
 0x1b7   : > { %3725 = vmatprep.subr.bf16.mxu0 %v21868_v1 }
 0x1b9   : > { %3656 = vmatmul.mubr.bf16.vlgmr.msra.gmra.mxu0 %v23427_v5  ;;  %3707 = vmatmul.mubr.bf16.vlgmr.msra.gmra.mxu1 %v23427_v5 }
 0x1ba   : > { %3726 = vmatpush1.bf16.msra.mxu0 %v19869_v18  ;;  %16355 = vmatprep.mubr.msk.bf16.mxu0 %vm886_vm0, %v23228_v30 }
 0x1bb   : > { %3727 = vmatprep.subr.bf16.mxu0 %v21868_v1  ;;  %16357 = vmatprep.mubr.msk.bf16.mxu1 %vm886_vm0, %v23228_v30 }
 0x1be   : > { %3728 = vmatpush1.bf16.msra.mxu0 %v19870_v37 }
 0x1bf   : > { %3729 = vmatprep.subr.bf16.mxu0 %v21868_v1 }
 0x1c1   : > { %3666 = vmatmul.mubr.bf16.gmra.mxu0 %v23420_v63  ;;  %3717 = vmatmul.mubr.bf16.gmra.mxu1 %v23420_v63 }
 0x1c2   : > { %3730 = vmatpush1.bf16.msra.mxu0 %v19871_v12  ;;  %16358 = vmatprep.mubr.msk.bf16.mxu0 %vm886_vm0, %v23253_v6 }
 0x1c3   : > { %3731 = vmatprep.subr.bf16.mxu0 %v21868_v1  ;;  %3984 = vmatprep.mubr.bf16.mxu1 %v21868_v1 }
 0x1c5   : > { %v2307_v58 = vpop.f32.mrf.mxu0  ;;  %v2358_v0 = vpop.f32.mrf.mxu1 }
 0x1c6   : > { %v23457_v13 = vadd.f32 %v2307_v58, %v23058_v16  ;;  %v23460_v39 = vadd.f32 %v2358_v0, %v23280_v14  ;;  %3732 = vmatpush1.bf16.msra.mxu0 %v19872_v9 }
 0x1c7   : > { %v2309_v11 = vpop.f32.mrf.mxu0  ;;  %v2360_v38 = vpop.f32.mrf.mxu1  ;;  %3733 = vmatprep.subr.bf16.mxu0 %v21868_v1 }
 0x1c8   : > { %v2424_v6 = vadd.f32 %v2309_v11, %v23062_v21  ;;  %v23465_v20 = vadd.f32 %v2360_v38, %v23286_v23  ;;  %v19875_v21 = vld [vmem:[%s28263_s3 + $0x998] ss:$20 sps:$4 sm:$0xff]  }
 0x1c9   : > { %v2311_v19 = vpop.f32.mrf.mxu0  ;;  %v2362_v16 = vpop.f32.mrf.mxu1 }
 0x1ca   : > { %v2428_v40 = vadd.f32 %v2311_v19, %v23072_v24  ;;  %v23472_v14 = vadd.f32 %v2362_v16, %v23300_v22  ;;  %3734 = vmatpush1.bf16.msra.mxu0 %v19873_v28 }
 0x1cb   : > { %v23474_v42 = vpop.f32.mrf.mxu0  ;;  %v23476_v26 = vpop.f32.mrf.mxu1  ;;  %3735 = vmatprep.subr.bf16.mxu0 %v21868_v1 }
 0x1cd   : > { %v2317_v23 = vpop.f32.mrf.mxu0  ;;  %v2368_v44 = vpop.f32.mrf.mxu1 }
 0x1ce   : > { %v2433_v27 = vadd.f32 %v2317_v23, %v23091_v33  ;;  %v23484_v24 = vadd.f32 %v2368_v44, %v23322_v57  ;;  %3736 = vmatpush1.bf16.msra.mxu0 %v19874_v34 }
 0x1cf   : > { %v2319_v22 = vpop.f32.mrf.mxu0  ;;  %v2370_v52 = vpop.f32.mrf.mxu1  ;;  %3737 = vmatprep.subr.bf16.mxu0 %v21868_v1 }
 0x1d0   : > { %v2434_v47 = vadd.f32 %v2319_v22, %v23097_v41  ;;  %v23489_v32 = vadd.f32 %v2370_v52, %v23326_v10  ;;  %v19878_v41 = vld [vmem:[%s28263_s3 + $0xb78] ss:$20 sps:$4 sm:$0xff]   ;;  %v19879_v10 = vld [vmem:[%s28263_s3 + $0xb50] ss:$20 sps:$4 sm:$0xff]  }
 0x1d1   : > { %v2321_v55 = vpop.f32.mrf.mxu0  ;;  %v2372_v36 = vpop.f32.mrf.mxu1 }
 0x1d2   : > { %3738 = vmatpush1.bf16.msra.mxu0 %v19875_v21 }
 0x1d3   : > { %3739 = vmatprep.subr.bf16.mxu0 %v21868_v1  ;;  %v2322_v33 = vpop.f32.mrf.mxu0  ;;  %v2373_v57 = vpop.f32.mrf.mxu1 }
 0x1d6   : > { %3740 = vmatpush1.bf16.msra.mxu0 %v19876_v35 }
 0x1d7   : > { %3743 = vmatprep.subr.bf16.mxu0 %v21868_v1 }
 0x1da   : > { %3744 = vmatpush2.bf16.msra.mxu0 %v19877_v49 }
 0x1db   : > { %3745 = vmatprep.subr.bf16.mxu0 %v21868_v1 }
 0x1de   : > { %3746 = vmatpush2.bf16.msra.mxu0 %v19878_v41 }
 0x1df   : > { %3747 = vmatprep.subr.bf16.mxu0 %v21868_v1 }
 0x1e2   : > { %3748 = vmatpush2.bf16.msra.mxu0 %v19879_v10 }
 0x1e3   : > { %3749 = vmatprep.subr.bf16.mxu0 %v21868_v1 }
 0x1e6   : > { %3750 = vmatpush2.bf16.msra.mxu0 %v19880_v43 }
 0x1e7   : > { %3751 = vmatprep.subr.bf16.mxu0 %v21868_v1 }
 0x1ea   : > { %3752 = vmatpush2.bf16.msra.mxu0 %v19881_v46 }
 0x1eb   : > { %3753 = vmatprep.subr.bf16.mxu0 %v21868_v1 }
 0x1ee   : > { %3754 = vmatpush2.bf16.msra.mxu0 %v19882_v48 }
 0x1ef   : > { %3755 = vmatprep.subr.bf16.mxu0 %v21868_v1 }
 0x1f2   : > { %3756 = vmatpush2.bf16.msra.mxu0 %v19883_v56 }
 0x1f5   : > { %3758 = vmatmul.mubr.bf16.vlgmr.msra.gmra.mxu0 %v23427_v5 }
 0x1f6   : > { %16359 = vmatprep.mubr.msk.bf16.mxu0 %vm886_vm0, %v23228_v30  ;;  %vm3936_vm0 = vcmask 1040384  }
 0x1fd   : > { %3766 = vmatmul.mubr.bf16.gmra.mxu0 %v23420_v63 }
 0x201   : > { %v2409_v31 = vpop.f32.mrf.mxu0  ;;  %v2996_v15 = vpop.f32.mrf.mxu1 }
 0x202   : > { %v2427_v60 = vadd.f32 %v2409_v31, %v23282_v17  ;;  %v23529_v3 = vadd.f32 %v2996_v15, %v23457_v13  ;;  %v19886_v15 = vld [vmem:[%s28265_s5 + $0x398] ss:$20 sps:$4 sm:$0xff]  }
 0x203   : > { %v2411_v18 = vpop.f32.mrf.mxu0  ;;  %v2998_v37 = vpop.f32.mrf.mxu1 }
 0x204   : > { %v23531_v12 = vadd.f32 %v2998_v37, %v2424_v6  ;;  %v19900_v18 = vld [vmem:[%s28265_s5 + $0x34c] ss:$20 sps:$4 sm:$0xff]   ;;  %v19898_v37 = vld [vmem:[%s28265_s5 + $0x348] ss:$20 sps:$4 sm:$0xff]  }
 0x205   : > { %v2412_v9 = vpop.f32.mrf.mxu0  ;;  %v3000_v28 = vpop.f32.mrf.mxu1 }
 0x206   : > { %v2432_v5 = vadd.f32 %v2412_v9, %v23302_v53  ;;  %v23534_v58 = vadd.f32 %v3000_v28, %v2428_v40  ;;  %v19906_v9 = vld [vmem:[%s28265_s5 + $0x324] ss:$20 sps:$4 sm:$0xff]   ;;  %v19904_v28 = vld [vmem:[%s28265_s5 + $0x320] ss:$20 sps:$4 sm:$0xff]  }
 0x207   : > { %v2414_v30 = vpop.f32.mrf.mxu0  ;;  %v23536_v0 = vpop.f32.mrf.mxu1 }
 0x208   : > { %v19910_v30 = vld [vmem:[%s28265_s5 + $0x2f8] ss:$20 sps:$4 sm:$0xff]  }
 0x209   : > { %v2417_v63 = vpop.f32.mrf.mxu0  ;;  %v3006_v11 = vpop.f32.mrf.mxu1 }
 0x20a   : > { %v2437_v17 = vadd.f32 %v2417_v63, %v23324_v45  ;;  %v23539_v38 = vadd.f32 %v3006_v11, %v2433_v27  ;;  %v19918_v63 = vld [vmem:[%s28265_s5 + $0x2d4] ss:$20 sps:$4 sm:$0xff]   ;;  %v19916_v11 = vld [vmem:[%s28265_s5 + $0x2d0] ss:$20 sps:$4 sm:$0xff]  }
 0x20b   : > { %v3008_v13 = vpop.f32.mrf.mxu1  ;;  %v2419_v34 = vpop.f32.mrf.mxu0 }
 0x20c   : > { %v23541_v19 = vadd.f32 %v3008_v13, %v2434_v47  ;;  %v1075_v13 = vadd.f32 %v23037_v7, %v22867_v50  ;;  %v1077_v34 = vadd.f32 %v23258_v25, %v22873_v54 }
 0x20d   : > { %v2420_v6 = vpop.f32.mrf.mxu0  ;;  %v3010_v16 = vpop.f32.mrf.mxu1 }
 0x20f   : > { %v2421_v21 = vpop.f32.mrf.mxu0  ;;  %v3011_v23 = vpop.f32.mrf.mxu1 }
 0x210   : > { %v19922_v21 = vld [vmem:[%s28265_s5 + $0x2a8] ss:$20 sps:$4 sm:$0xff]  }
 0x23d   : > { %v3047_v53 = vpop.f32.mrf.mxu0  ;;  %v3098_v40 = vpop.f32.mrf.mxu1 }
 0x23e   : > { %v3114_v44 = vadd.f32 %v3047_v53, %v23460_v39  ;;  %v23544_v22 = vadd.f32 %v3098_v40, %v2427_v60  ;;  %v19894_v60 = vld [vmem:[%s28265_s5 + $0x374] ss:$20 sps:$4 sm:$0xff]   ;;  %v1746_v40 = vadd.f32 %v23074_v4, %v1075_v13 }
 0x23f   : > { %v3049_v52 = vpop.f32.mrf.mxu0  ;;  %v3100_v35 = vpop.f32.mrf.mxu1 }
 0x240   : > { %v3115_v45 = vadd.f32 %v3049_v52, %v23465_v20  ;;  %v1748_v52 = vadd.f32 %v23304_v29, %v1077_v34  ;;  %v2429_v35 = vadd.f32 %v23474_v42, %v1746_v40  ;;  %v19928_v29 = vld [vmem:[%s28265_s5 + $0x280] ss:$20 sps:$4 sm:$0xff]  }
 0x241   : > { %v3051_v27 = vpop.f32.mrf.mxu0  ;;  %v3101_v55 = vpop.f32.mrf.mxu1  ;;  %v19942_v34 = vld [vmem:[%s28265_s5 + $0x4b4] ss:$20 sps:$4 sm:$0xff]  }
 0x242   : > { %v23548_v36 = vadd.f32 %v3051_v27, %v23472_v14  ;;  %v23550_v47 = vadd.f32 %v3101_v55, %v2432_v5  ;;  %v19912_v5 = vld [vmem:[%s28265_s5 + $0x2fc] ss:$20 sps:$4 sm:$0xff]   ;;  %v2431_v27 = vadd.f32 %v23476_v26, %v1748_v52 }
 0x243   : > { %v23552_v33 = vpop.f32.mrf.mxu0  ;;  %v3103_v57 = vpop.f32.mrf.mxu1 }
 0x244   : > { %v19930_v57 = vld [vmem:[%s28265_s5 + $0x284] ss:$20 sps:$4 sm:$0xff]  }
 0x245   : > { %v3057_v49 = vpop.f32.mrf.mxu0  ;;  %v3106_v41 = vpop.f32.mrf.mxu1 }
 0x246   : > { %v23555_v39 = vadd.f32 %v3057_v49, %v23484_v24  ;;  %v23557_v10 = vadd.f32 %v3106_v41, %v2437_v17  ;;  %v19888_v24 = vld [vmem:[%s28265_s5 + $0x39c] ss:$20 sps:$4 sm:$0xff]   ;;  %v19924_v17 = vld [vmem:[%s28265_s5 + $0x2ac] ss:$20 sps:$4 sm:$0xff]  }
 0x247   : > { %v3059_v43 = vpop.f32.mrf.mxu0  ;;  %v3108_v46 = vpop.f32.mrf.mxu1  ;;  %5374 = vmatprep.subr.bf16.mxu0 %v19888_v24 }
 0x248   : > { %v23560_v20 = vadd.f32 %v3059_v43, %v23489_v32  ;;  %v19892_v32 = vld [vmem:[%s28265_s5 + $0x370] ss:$20 sps:$4 sm:$0xff]   ;;  %5375 = vmatpush1.bf16.msra.mxu0 %v19886_v15 }
 0x249   : > { %v3061_v48 = vpop.f32.mrf.mxu0  ;;  %v3109_v14 = vpop.f32.mrf.mxu1  ;;  %5376 = vmatprep.subr.bf16.mxu0 %v19894_v60 }
 0x24a   : > { %v3118_v48 = vadd.f32 %v23536_v0, %v2429_v35  ;;  %v3120_v14 = vadd.f32 %v23552_v33, %v2431_v27  ;;  %v19934_v0 = vld [vmem:[%s28265_s5 + $0x4d8] ss:$20 sps:$4 sm:$0xff]   ;;  %v19936_v33 = vld [vmem:[%s28265_s5 + $0x4dc] ss:$20 sps:$4 sm:$0xff]  }
 0x24b   : > { %v3062_v56 = vpop.f32.mrf.mxu0  ;;  %v3110_v31 = vpop.f32.mrf.mxu1 }
 0x24c   : > { %5377 = vmatpush1.bf16.msra.mxu0 %v19892_v32 }
 0x24d   : > { %5378 = vmatprep.subr.bf16.mxu0 %v19900_v18 }
 0x250   : > { %5379 = vmatpush1.bf16.msra.mxu0 %v19898_v37 }
 0x251   : > { %5380 = vmatprep.subr.bf16.mxu0 %v19906_v9 }
 0x254   : > { %5381 = vmatpush1.bf16.msra.mxu0 %v19904_v28 }
 0x255   : > { %5382 = vmatprep.subr.bf16.mxu0 %v19912_v5 }
 0x258   : > { %5383 = vmatpush1.bf16.msra.mxu0 %v19910_v30 }
 0x259   : > { %5384 = vmatprep.subr.bf16.mxu0 %v19918_v63 }
 0x25c   : > { %5385 = vmatpush1.bf16.msra.mxu0 %v19916_v11 }
 0x25d   : > { %5386 = vmatprep.subr.bf16.mxu0 %v19924_v17 }
 0x260   : > { %5387 = vmatpush1.bf16.msra.mxu0 %v19922_v21 }
 0x261   : > { %5388 = vmatprep.subr.bf16.mxu0 %v19930_v57 }
 0x264   : > { %5389 = vmatpush1.bf16.msra.mxu0 %v19928_v29 }
 0x265   : > { %5390 = vmatprep.subr.bf16.mxu0 %v19936_v33 }
 0x268   : > { %5391 = vmatpush2.bf16.msra.mxu0 %v19934_v0 }
 0x269   : > { %5392 = vmatprep.subr.bf16.mxu0 %v19942_v34 }
 0x279   : > { %v3657_v6 = vpop.f32.mrf.mxu0  ;;  %v3708_v16 = vpop.f32.mrf.mxu1 }
 0x27a   : > { %v23609_v23 = vadd.f32 %v3657_v6, %v23529_v3  ;;  %v23611_v53 = vadd.f32 %v3708_v16, %v3114_v44  ;;  %v19940_v16 = vld [vmem:[%s28265_s5 + $0x4b0] ss:$20 sps:$4 sm:$0xff]  }
 0x27b   : > { %v3659_v50 = vpop.f32.mrf.mxu0  ;;  %v3710_v7 = vpop.f32.mrf.mxu1  ;;  %5393 = vmatpush2.bf16.msra.mxu0 %v19940_v16 }
 0x27c   : > { %v3803_v54 = vmin.f32 %v23609_v23, 0.0  ;;  %v3805_v25 = vmin.f32 %v23611_v53, 0.0  ;;  %v23620_v3 = vadd.f32 %v3659_v50, %v23531_v12  ;;  %v23622_v44 = vadd.f32 %v3710_v7, %v3115_v45 }
 0x27d   : > { %v3661_v55 = vpop.f32.mrf.mxu0  ;;  %v3712_v4 = vpop.f32.mrf.mxu1  ;;  %vm3788_vm5 = vcmp.gt.f32.partialorder %v23609_v23, 0.0  ;;  %vm3790_vm6 = vcmp.gt.f32.partialorder %v23611_v53, 0.0 }
 0x27e   : > { %v3818_v49 = vmul.f32 1.442695, %v3803_v54  ;;  %v3822_v41 = vmul.f32 1.442695, %v3805_v25  ;;  %v23631_v42 = vadd.f32 %v3661_v55, %v23534_v58  ;;  %v23634_v26 = vadd.f32 %v3712_v4, %v23548_v36 }
 0x27f   : > { %v3804_v12 = vmin.f32 %v23620_v3, 0.0  ;;  %v3806_v45 = vmin.f32 %v23622_v44, 0.0  ;;  %v3663_v43 = vpop.f32.mrf.mxu0  ;;  %v3714_v46 = vpop.f32.mrf.mxu1  ;;  %vm3789_vm7 = vcmp.gt.f32.partialorder %v23620_v3, 0.0  ;;  %vm3791_vm8 = vcmp.gt.f32.partialorder %v23622_v44, 0.0 }
 0x280   : > { %21754 = vpow2.f32 %v3818_v49  ;;  %v3808_v56 = vmin.f32 %v23631_v42, 0.0  ;;  %v3810_v36 = vmin.f32 %v23634_v26, 0.0  ;;  %v23642_v32 = vadd.f32 %v3663_v43, %v3118_v48 }
 0x281   : > { %21756 = vpow2.f32 %v3822_v41  ;;  %v3820_v58 = vmul.f32 1.442695, %v3804_v12  ;;  %v3824_v31 = vmul.f32 1.442695, %v3806_v45  ;;  %v3667_v15 = vpop.f32.mrf.mxu0  ;;  %v3718_v24 = vpop.f32.mrf.mxu1  ;;  %v23644_v18 = vadd.f32 %v3714_v46, %v3120_v14 }
 0x282   : > { %v3828_v60 = vmul.f32 1.442695, %v3808_v56  ;;  %v23647_v37 = vadd.f32 %v3667_v15, %v23539_v38  ;;  %v3832_v9 = vmul.f32 1.442695, %v3810_v36  ;;  %v23656_v28 = vadd.f32 %v3718_v24, %v23555_v39 }
 0x283   : > { %21758 = vpow2.f32 %v3820_v58  ;;  %v3669_v5 = vpop.f32.mrf.mxu0  ;;  %v3720_v30 = vpop.f32.mrf.mxu1  ;;  %v3809_v38 = vmin.f32 %v23642_v32, 0.0  ;;  %v3811_v63 = vmin.f32 %v23644_v18, 0.0  ;;  %vm3793_vm9 = vcmp.gt.f32.partialorder %v23631_v42, 0.0 }
 0x284   : > { %21760 = vpow2.f32 %v3824_v31  ;;  %v3813_v11 = vmin.f32 %v23647_v37, 0.0  ;;  %v3815_v6 = vmin.f32 %v23656_v28, 0.0  ;;  %v23669_v52 = vadd.f32 %v3669_v5, %v23541_v19 }
 0x285   : > { %21762 = vpow2.f32 %v3828_v60  ;;  %v3671_v17 = vpop.f32.mrf.mxu0  ;;  %v3722_v13 = vpop.f32.mrf.mxu1  ;;  %v3830_v39 = vmul.f32 1.442695, %v3809_v38  ;;  %v3834_v21 = vmul.f32 1.442695, %v3811_v63  ;;  %v23672_v50 = vadd.f32 %v3720_v30, %v23560_v20 }
 0x286   : > { %21764 = vpow2.f32 %v3832_v9  ;;  %v3838_v40 = vmul.f32 1.442695, %v3813_v11  ;;  %v3842_v25 = vmul.f32 1.442695, %v3815_v6  ;;  %v3814_v35 = vmin.f32 %v23669_v52, 0.0 }
 0x287   : > { %v3672_v7 = vpop.f32.mrf.mxu0  ;;  %v3723_v54 = vpop.f32.mrf.mxu1  ;;  %21766 = vpow2.f32 %v3830_v39  ;;  %v3816_v27 = vmin.f32 %v23672_v50, 0.0  ;;  %vm3795_vm10 = vcmp.gt.f32.partialorder %v23634_v26, 0.0  ;;  %vm3794_vm11 = vcmp.gt.f32.partialorder %v23642_v32, 0.0 }
 0x288   : > { %21768 = vpow2.f32 %v3834_v21  ;;  %v3840_v55 = vmul.f32 1.442695, %v3814_v35  ;;  %vm3798_vm12 = vcmp.gt.f32.partialorder %v23647_v37, 0.0  ;;  %vm3800_vm13 = vcmp.gt.f32.partialorder %v23656_v28, 0.0 }
 0x289   : > { %21770 = vpow2.f32 %v3838_v40  ;;  %v3844_v4 = vmul.f32 1.442695, %v3816_v27  ;;  %vm3799_vm14 = vcmp.gt.f32.partialorder %v23669_v52, 0.0  ;;  %vm3801_vm15 = vcmp.gt.f32.partialorder %v23672_v50, 0.0 }
 0x28a   : > { %21772 = vpow2.f32 %v3842_v25  ;;  %vm3796_vm1 = vcmp.gt.f32.partialorder %v23644_v18, 0.0 }
 0x28b   : > { %21774 = vpow2.f32 %v3840_v55 }
 0x28c   : > { %21776 = vpow2.f32 %v3844_v4 }
 0x28d   : > { %v21755_v19 = vpop.eup %21754 }
 0x28e   : > { %v21757_v29 = vpop.eup %21756  ;;  %v16360_v20 = vadd.f32 -1.0, %v21755_v19 }
 0x28f   : > { %v16362_v57 = vadd.f32 -1.0, %v21757_v29 }
 0x290   : > { %v21759_v49 = vpop.eup %21758  ;;  %v3863_v41 = vmul.f32 1.6732632, %v16360_v20 }
 0x291   : > { %v21761_v12 = vpop.eup %21760  ;;  %v3865_v45 = vmul.f32 1.6732632, %v16362_v57  ;;  %v16361_v43 = vadd.f32 -1.0, %v21759_v49 }
 0x292   : > { %v21763_v46 = vpop.eup %21762  ;;  %v16363_v48 = vadd.f32 -1.0, %v21761_v12  ;;  %v3878_v56 = vsel %vm3788_vm5, %v23609_v23, %v3863_v41 }
 0x293   : > { %v21765_v14 = vpop.eup %21764  ;;  %v3864_v58 = vmul.f32 1.6732632, %v16361_v43  ;;  %v16365_v31 = vadd.f32 -1.0, %v21763_v46  ;;  %v3880_v36 = vsel %vm3790_vm6, %v23611_v53, %v3865_v45  ;;  %v3893_v9 = vmul.f32 1.050701, %v3878_v56 }
 0x294   : > { %v3866_v15 = vmul.f32 1.6732632, %v16363_v48  ;;  %v16367_v24 = vadd.f32 -1.0, %v21765_v14  ;;  %v21767_v60 = vpop.eup %21766  ;;  %v3895_v63 = vmul.f32 1.050701, %v3880_v36  ;;  %vm5329_vm6 = vcmask 785408  }
 0x295   : > { %v3868_v0 = vmul.f32 1.6732632, %v16365_v31  ;;  %v21769_v33 = vpop.eup %21768  ;;  %v3879_v23 = vsel %vm3789_vm7, %v23620_v3, %v3864_v58  ;;  %v16366_v30 = vadd.f32 -1.0, %v21767_v60  ;;  %vm21870_vm7 = vmmov 0  }
 0x296   : > { %v3870_v5 = vmul.f32 1.6732632, %v16367_v24  ;;  %v21771_v38 = vpop.eup %21770  ;;  %v3894_v6 = vmul.f32 1.050701, %v3879_v23  ;;  %v3881_v3 = vsel %vm3791_vm8, %v23622_v44, %v3866_v15  ;;  %vm9208_vm8 = vcmask 1042432  }
 0x297   : > { %v3883_v53 = vsel %vm3793_vm9, %v23631_v42, %v3868_v0  ;;  %v21773_v11 = vpop.eup %21772  ;;  %v16370_v34 = vadd.f32 -1.0, %v21771_v38  ;;  %v3869_v39 = vmul.f32 1.6732632, %v16366_v30  ;;  %v16368_v42 = vadd.f32 -1.0, %v21769_v33 }
 0x298   : > { %v3898_v17 = vmul.f32 1.050701, %v3883_v53  ;;  %v3885_v13 = vsel %vm3795_vm10, %v23634_v26, %v3870_v5  ;;  %v16372_v21 = vadd.f32 -1.0, %v21773_v11  ;;  %v21775_v40 = vpop.eup %21774  ;;  %v3896_v4 = vmul.f32 1.050701, %v3881_v3 }
 0x299   : > { %v3900_v16 = vmul.f32 1.050701, %v3885_v13  ;;  %v3873_v54 = vmul.f32 1.6732632, %v16370_v34  ;;  %v21777_v25 = vpop.eup %21776  ;;  %v16371_v55 = vadd.f32 -1.0, %v21775_v40  ;;  %v3884_v26 = vsel %vm3794_vm11, %v23642_v32, %v3869_v39 }
 0x29a   : > { %v3908_v7 = vpack.c.bf16 %v3898_v17, %v3893_v9  ;;  %v3875_v27 = vmul.f32 1.6732632, %v16372_v21  ;;  %v16373_v44 = vadd.f32 -1.0, %v21777_v25  ;;  %v3899_v41 = vmul.f32 1.050701, %v3884_v26 }
 0x29b   : > { %v3910_v35 = vpack.c.bf16 %v3900_v16, %v3895_v63  ;;  %v3888_v19 = vsel %vm3798_vm12, %v23647_v37, %v3873_v54  ;;  %v3874_v57 = vmul.f32 1.6732632, %v16371_v55  ;;  %v3871_v12 = vmul.f32 1.6732632, %v16368_v42 }
 0x29c   : > { %v3903_v29 = vmul.f32 1.050701, %v3888_v19  ;;  %v3890_v20 = vsel %vm3800_vm13, %v23656_v28, %v3875_v27  ;;  %v3876_v49 = vmul.f32 1.6732632, %v16373_v44  ;;  %v3909_v58 = vpack.c.bf16 %v3899_v41, %v3894_v6  ;;  %v19895_v41 = vld [vmem:[%s28265_s5 + $0xf0] ss:$20 sps:$4 sm:$0xff]  }
 0x29d   : > { %v3905_v45 = vmul.f32 1.050701, %v3890_v20  ;;  %v3889_v32 = vsel %vm3799_vm14, %v23669_v52, %v3874_v57  ;;  %v3886_v14 = vsel %vm3796_vm1, %v23644_v18, %v3871_v12  ;;  %v19884_v52 = vld [vmem:[%s28261_s1] sm:$0xff]   ;;  %v19885_v24 = vld [vmem:[%s28261_s1 + $0x8] ss:$0 sps:$4 sm:$0x11]  }
 0x29e   : > { %v3904_v43 = vmul.f32 1.050701, %v3889_v32  ;;  %v3891_v37 = vsel %vm3801_vm15, %v23672_v50, %v3876_v49  ;;  %v3913_v46 = vpack.c.bf16 %v3903_v29, %v3903_v29  ;;  %v3901_v50 = vmul.f32 1.050701, %v3886_v14  ;;  %v19891_v20 = vld [vmem:[%s28265_s5 + $0x11c] ss:$20 sps:$4 sm:$0xff]  }
 0x29f   : > { %v3906_v48 = vmul.f32 1.050701, %v3891_v37  ;;  %v3915_v31 = vpack.c.bf16 %v3905_v45, %v3905_v45  ;;  %v19889_v57 = vld [vmem:[%s28265_s5 + $0x118] ss:$20 sps:$4 sm:$0xff]   ;;  %v19897_v49 = vld [vmem:[%s28265_s5 + $0xf4] ss:$20 sps:$4 sm:$0xff]  }
 0x2a0   : > { %v3914_v28 = vpack.c.bf16 %v3904_v43, %v3904_v43  ;;  %v3938_v56 = vsel %vm3936_vm0, %v3913_v46, 0  ;;  %v3911_v18 = vpack.c.bf16 %v3901_v50, %v3896_v4  ;;  %v19903_v12 = vld [vmem:[%s28265_s5 + $0xcc] ss:$20 sps:$4 sm:$0xff]   ;;  %v19901_v45 = vld [vmem:[%s28265_s5 + $0xc8] ss:$20 sps:$4 sm:$0xff]   ;;  %vm12241_vm11 = vcmask 1043456  }
 0x2a1   : > { %v3916_v36 = vpack.c.bf16 %v3906_v48, %v3906_v48  ;;  %v3944_v15 = vsel %vm3936_vm0, %v3915_v31, 0  ;;  %v19909_v32 = vld [vmem:[%s28265_s5 + $0xa4] ss:$20 sps:$4 sm:$0xff]   ;;  %v19907_v43 = vld [vmem:[%s28265_s5 + $0xa0] ss:$20 sps:$4 sm:$0xff]   ;;  %vm12236_vm12 = vcmask 56320  }
 0x2a2   : > { %16377 = vmatprep.subr.msk.bf16.mxu1 %vm3936_vm0, %v3914_v28  ;;  %v19915_v37 = vld [vmem:[%s28265_s5 + $0x7c] ss:$20 sps:$4 sm:$0xff]   ;;  %v19948_v48 = vld [vmem:[%s28265_s5 + $0x48c] ss:$20 sps:$4 sm:$0xff]   ;;  %v19921_v14 = vld [vmem:[%s28265_s5 + $0x54] ss:$20 sps:$4 sm:$0xff]  }
 0x2a3   : > { %3965 = vmatpush1.bf16.msra.mxu1 %v3938_v56  ;;  %v19946_v46 = vld [vmem:[%s28265_s5 + $0x488] ss:$20 sps:$4 sm:$0xff]   ;;  %5394 = vmatprep.subr.bf16.mxu0 %v19948_v48  ;;  %v19913_v28 = vld [vmem:[%s28265_s5 + $0x78] ss:$20 sps:$4 sm:$0xff]   ;;  %v19952_v56 = vld [vmem:[%s28265_s5 + $0x460] ss:$20 sps:$4 sm:$0xff]  }
 0x2a4   : > { %3966 = vmatprep.subr.bf16.mxu1 %v3909_v58  ;;  %5395 = vmatpush2.bf16.msra.mxu0 %v19946_v46  ;;  %v19954_v58 = vld [vmem:[%s28265_s5 + $0x464] ss:$20 sps:$4 sm:$0xff]   ;;  %v19960_v50 = vld [vmem:[%s28265_s5 + $0x43c] ss:$20 sps:$4 sm:$0xff]  }
 0x2a5   : > { %v19919_v31 = vld [vmem:[%s28265_s5 + $0x50] ss:$20 sps:$4 sm:$0xff]   ;;  %5396 = vmatprep.subr.bf16.mxu0 %v19954_v58 }
 0x2a7   : > { %3967 = vmatpush1.bf16.msra.mxu1 %v3908_v7 }
 0x2a8   : > { %16380 = vmatprep.subr.msk.bf16.mxu1 %vm3936_vm0, %v3916_v36  ;;  %5397 = vmatpush2.bf16.msra.mxu0 %v19952_v56  ;;  %v19958_v36 = vld [vmem:[%s28265_s5 + $0x438] ss:$20 sps:$4 sm:$0xff]   ;;  %v20017_v56 = vld [vmem:[%s28265_s5 + $0x554] ss:$20 sps:$4 sm:$0xff]  }
 0x2a9   : > { %5398 = vmatprep.subr.bf16.mxu0 %v19960_v50  ;;  %v20023_v50 = vld [vmem:[%s28265_s5 + $0x52c] ss:$20 sps:$4 sm:$0xff]  }
 0x2aa   : > { %16378 = vmatmul.mubr.msk.bf16.vlgmr.msra.gmra.mxu1 %vm3929_vm2, %v19884_v52 }
 0x2ab   : > { %4016 = vmatpush1.bf16.msra.mxu1 %v3944_v15  ;;  %3994 = vmatprep.mubr.bf16.mxu1 %v21868_v1  ;;  %v19925_v15 = vld [vmem:[%s28265_s5 + $0x28] ss:$20 sps:$4 sm:$0xff]  }
 0x2ac   : > { %4017 = vmatprep.subr.bf16.mxu1 %v3911_v18  ;;  %v19933_v18 = vld [vmem:[%s28265_s5 + $0x4] ss:$20 sps:$4 sm:$0xff]   ;;  %5399 = vmatpush2.bf16.msra.mxu0 %v19958_v36 }
 0x2af   : > { %4018 = vmatpush1.bf16.msra.mxu1 %v3910_v35 }
 0x2b2   : > { %16379 = vmatmul.mubr.msk.bf16.gmra.mxu1 %vm3929_vm2, %v19885_v24 }
 0x2b3   : > { %4035 = vmatprep.mubr.bf16.mxu1 %v21868_v1 }
 0x2b5   : > { %v3759_v60 = vpop.f32.mrf.mxu0 }
 0x2b6   : > { %v3777_v0 = vadd.f32 %v3759_v60, %v23544_v22  ;;  %v19966_v60 = vld [vmem:[%s28265_s5 + $0x414] ss:$20 sps:$4 sm:$0xff]  }
 0x2b7   : > { %v3761_v33 = vpop.f32.mrf.mxu0  ;;  %5400 = vmatprep.subr.bf16.mxu0 %v19966_v60  ;;  %v19987_v60 = vld [vmem:[%s28265_s5 + $0xfc] ss:$20 sps:$4 sm:$0xff]  }
 0x2b8   : > { %v3807_v9 = vmin.f32 %v3777_v0, 0.0  ;;  %vm3792_vm3 = vcmp.gt.f32.partialorder %v3777_v0, 0.0  ;;  %v19939_v33 = vld [vmem:[%s28265_s5 + $0x25c] ss:$20 sps:$4 sm:$0xff]  }
 0x2b9   : > { %v3762_v23 = vpop.f32.mrf.mxu0 }
 0x2ba   : > { %v3826_v5 = vmul.f32 1.442695, %v3807_v9  ;;  %v3782_v30 = vadd.f32 %v3762_v23, %v23550_v47  ;;  %16381 = vmatmul.mubr.msk.bf16.vlgmr.msra.gmra.mxu1 %vm3929_vm2, %v19884_v52  ;;  %v19970_v9 = vld [vmem:[%s28265_s5 + $0x3e8] ss:$20 sps:$4 sm:$0xff]   ;;  %v19972_v23 = vld [vmem:[%s28265_s5 + $0x3ec] ss:$20 sps:$4 sm:$0xff]  }
 0x2bb   : > { %v3764_v38 = vpop.f32.mrf.mxu0  ;;  %4045 = vmatprep.mubr.bf16.mxu1 %v21868_v1 }
 0x2bc   : > { %21778 = vpow2.f32 %v3826_v5  ;;  %v3812_v63 = vmin.f32 %v3782_v30, 0.0  ;;  %vm3797_vm4 = vcmp.gt.f32.partialorder %v3782_v30, 0.0  ;;  %v19937_v5 = vld [vmem:[%s28265_s5 + $0x258] ss:$20 sps:$4 sm:$0xff]   ;;  %v19976_v38 = vld [vmem:[%s28265_s5 + $0x3c0] ss:$20 sps:$4 sm:$0xff]  }
 0x2bd   : > { %v3767_v53 = vpop.f32.mrf.mxu0 }
 0x2be   : > { %v3836_v11 = vmul.f32 1.442695, %v3812_v63  ;;  %v3787_v17 = vadd.f32 %v3767_v53, %v23557_v10  ;;  %v19978_v63 = vld [vmem:[%s28265_s5 + $0x3c4] ss:$20 sps:$4 sm:$0xff]  }
 0x2bf   : > { %v3769_v13 = vpop.f32.mrf.mxu0  ;;  %v19943_v53 = vld [vmem:[%s28265_s5 + $0x230] ss:$20 sps:$4 sm:$0xff]  }
 0x2c0   : > { %21780 = vpow2.f32 %v3836_v11  ;;  %v3817_v22 = vmin.f32 %v3787_v17, 0.0  ;;  %vm3802_vm5 = vcmp.gt.f32.partialorder %v3787_v17, 0.0  ;;  %v19951_v11 = vld [vmem:[%s28265_s5 + $0x20c] ss:$20 sps:$4 sm:$0xff]   ;;  %v19949_v13 = vld [vmem:[%s28265_s5 + $0x208] ss:$20 sps:$4 sm:$0xff]  }
 0x2c1   : > { %v3770_v34 = vpop.f32.mrf.mxu0 }
 0x2c2   : > { %v3846_v39 = vmul.f32 1.442695, %v3817_v22  ;;  %16382 = vmatmul.mubr.msk.bf16.gmra.mxu1 %vm3929_vm2, %v19885_v24  ;;  %v19957_v22 = vld [vmem:[%s28265_s5 + $0x1e4] ss:$20 sps:$4 sm:$0xff]   ;;  %v19955_v34 = vld [vmem:[%s28265_s5 + $0x1e0] ss:$20 sps:$4 sm:$0xff]  }
 0x2c3   : > { %v3771_v6 = vpop.f32.mrf.mxu0  ;;  %19215 = vmatprep.mubr.msk.bf16.mxu1 %vm3929_vm2, %v19884_v52  ;;  %v19927_v52 = vld [vmem:[%s28265_s5 + $0x2c] ss:$20 sps:$4 sm:$0xff]  }
 0x2c4   : > { %21782 = vpow2.f32 %v3846_v39  ;;  %v19963_v39 = vld [vmem:[%s28265_s5 + $0x1bc] ss:$20 sps:$4 sm:$0xff]   ;;  %v19961_v6 = vld [vmem:[%s28265_s5 + $0x1b8] ss:$20 sps:$4 sm:$0xff]  }
 0x2c9   : > { %v21779_v47 = vpop.eup %21778 }
 0x2ca   : > { %v16364_v3 = vadd.f32 -1.0, %v21779_v47  ;;  %v19969_v47 = vld [vmem:[%s28265_s5 + $0x194] ss:$20 sps:$4 sm:$0xff]  }
 0x2cc   : > { %v3867_v16 = vmul.f32 1.6732632, %v16364_v3  ;;  %v19967_v3 = vld [vmem:[%s28265_s5 + $0x190] ss:$20 sps:$4 sm:$0xff]  }
 0x2cd   : > { %v21781_v21 = vpop.eup %21780 }
 0x2ce   : > { %v16369_v40 = vadd.f32 -1.0, %v21781_v21  ;;  %v3882_v7 = vsel %vm3792_vm3, %v3777_v0, %v3867_v16  ;;  %v19931_v0 = vld [vmem:[%s28265_s5] ss:$20 sps:$4 sm:$0xff]   ;;  %v19973_v21 = vld [vmem:[%s28265_s5 + $0x168] ss:$20 sps:$4 sm:$0xff]   ;;  %vm15501_vm3 = vcmask 24576  }
 0x2cf   : > { %v3897_v54 = vmul.f32 1.050701, %v3882_v7  ;;  %v19975_v16 = vld [vmem:[%s28265_s5 + $0x16c] ss:$20 sps:$4 sm:$0xff]  }
 0x2d0   : > { %v3872_v42 = vmul.f32 1.6732632, %v16369_v40  ;;  %v19981_v40 = vld [vmem:[%s28265_s5 + $0x144] ss:$20 sps:$4 sm:$0xff]   ;;  %v19979_v7 = vld [vmem:[%s28265_s5 + $0x140] ss:$20 sps:$4 sm:$0xff]  }
 0x2d1   : > { %v21783_v10 = vpop.eup %21782 }
 0x2d2   : > { %v3887_v25 = vsel %vm3797_vm4, %v3782_v30, %v3872_v42  ;;  %v16374_v35 = vadd.f32 -1.0, %v21783_v10  ;;  %v19945_v30 = vld [vmem:[%s28265_s5 + $0x234] ss:$20 sps:$4 sm:$0xff]   ;;  %v19999_v42 = vld [vmem:[%s28265_s5 + $0x5cc] ss:$20 sps:$4 sm:$0xff]  }
 0x2d3   : > { %v3902_v27 = vmul.f32 1.050701, %v3887_v25 }
 0x2d4   : > { %v3877_v55 = vmul.f32 1.6732632, %v16374_v35 }
 0x2d5   : > { %v3912_v26 = vpack.c.bf16 %v3902_v27, %v3897_v54 }
 0x2d6   : > { %v3892_v4 = vsel %vm3802_vm5, %v3787_v17, %v3877_v55  ;;  %v19984_v17 = vld [vmem:[%s28265_s5 + $0x124] ss:$20 sps:$4 sm:$0xff]  }
 0x2d7   : > { %v3907_v19 = vmul.f32 1.050701, %v3892_v4 }
 0x2d9   : > { %v3917_v44 = vpack.c.bf16 %v3907_v19, %v3907_v19  ;;  %v20005_v19 = vld [vmem:[%s28265_s5 + $0x5a4] ss:$20 sps:$4 sm:$0xff]  }
 0x2db   : > { %19305 = vmatprep.subr.msk.bf16.mxu1 %vm3936_vm0, %v3917_v44  ;;  %v3950_v29 = vsel %vm3936_vm0, %v3917_v44, 0  ;;  %vm12795_vm0 = vcmask 261120  }
 0x2dc   : > { %19212 = vmatpush3.bf16.msra.mxu1 %v3950_v29 }
 0x2dd   : > { %19213 = vmatprep.subr.bf16.mxu1 %v3912_v26 }
 0x2e0   : > { %19214 = vmatpush3.bf16.msra.mxu1 %v3912_v26  ;;  %v19997_v26 = vld [vmem:[%s28265_s5 + $0x5c8] ss:$20 sps:$4 sm:$0xff]  }
 0x2e1   : > { %5333 = vmatprep.subr.bf16.mxu1 %v19891_v20 }
 0x2e3   : > { %19216 = vmatmul.mubr.msk.bf16.vlgmr.msra.gmra.mxu1 %vm3929_vm2, %v19885_v24  ;;  %v19964_v24 = vld [vmem:[%s28265_s5 + $0x410] ss:$20 sps:$4 sm:$0xff]  }
 0x2e4   : > { %5334 = vmatpush1.bf16.msra.mxu1 %v19889_v57  ;;  %5401 = vmatpush2.bf16.msra.mxu0 %v19964_v24  ;;  %v19982_v24 = vld [vmem:[%s28265_s5 + $0x120] ss:$20 sps:$4 sm:$0xff]  }
 0x2e5   : > { %5335 = vmatprep.subr.bf16.mxu1 %v19897_v49  ;;  %5402 = vmatprep.subr.bf16.mxu0 %v19972_v23 }
 0x2e8   : > { %5336 = vmatpush1.bf16.msra.mxu1 %v19895_v41  ;;  %5403 = vmatpush2.bf16.msra.mxu0 %v19970_v9 }
 0x2e9   : > { %5337 = vmatprep.subr.bf16.mxu1 %v19903_v12  ;;  %5404 = vmatprep.subr.bf16.mxu0 %v19978_v63  ;;  %v20003_v12 = vld [vmem:[%s28265_s5 + $0x5a0] ss:$20 sps:$4 sm:$0xff]  }
 0x2ec   : > { %5338 = vmatpush1.bf16.msra.mxu1 %v19901_v45  ;;  %5405 = vmatpush2.bf16.msra.mxu0 %v19976_v38 }
 0x2ed   : > { %5339 = vmatprep.subr.bf16.mxu1 %v19909_v32  ;;  %5456 = vmatprep.subr.bf16.mxu0 %v19984_v17  ;;  %v20011_v32 = vld [vmem:[%s28265_s5 + $0x57c] ss:$20 sps:$4 sm:$0xff]   ;;  %v19990_v17 = vld [vmem:[%s28265_s5 + $0xd4] ss:$20 sps:$4 sm:$0xff]  }
 0x2f0   : > { %5340 = vmatpush1.bf16.msra.mxu1 %v19907_v43 }
 0x2f1   : > { %5341 = vmatprep.subr.bf16.mxu1 %v19915_v37 }
 0x2f4   : > { %5342 = vmatpush1.bf16.msra.mxu1 %v19913_v28  ;;  %v20009_v28 = vld [vmem:[%s28265_s5 + $0x578] ss:$20 sps:$4 sm:$0xff]  }
 0x2f5   : > { %5343 = vmatprep.subr.bf16.mxu1 %v19921_v14 }
 0x2f8   : > { %5344 = vmatpush1.bf16.msra.mxu1 %v19919_v31  ;;  %v20015_v31 = vld [vmem:[%s28265_s5 + $0x550] ss:$20 sps:$4 sm:$0xff]  }
 0x2f9   : > { %5345 = vmatprep.subr.bf16.mxu1 %v19927_v52 }
 0x2fc   : > { %5346 = vmatpush1.bf16.msra.mxu1 %v19925_v15 }
 0x2fd   : > { %5347 = vmatprep.subr.bf16.mxu1 %v19933_v18 }
 0x300   : > { %5348 = vmatpush1.bf16.msra.mxu1 %v19931_v0 }
 0x301   : > { %5349 = vmatprep.subr.bf16.mxu1 %v19939_v33  ;;  %v20021_v33 = vld [vmem:[%s28265_s5 + $0x528] ss:$20 sps:$4 sm:$0xff]  }
 0x304   : > { %5350 = vmatpush2.bf16.msra.mxu1 %v19937_v5  ;;  %v20029_v5 = vld [vmem:[%s28265_s5 + $0x504] ss:$20 sps:$4 sm:$0xff]  }
 0x305   : > { %5351 = vmatprep.subr.bf16.mxu1 %v19945_v30 }
 0x308   : > { %5352 = vmatpush2.bf16.msra.mxu1 %v19943_v53 }
 0x309   : > { %5353 = vmatprep.subr.bf16.mxu1 %v19951_v11  ;;  %v19985_v11 = vld [vmem:[%s28265_s5 + $0xf8] ss:$20 sps:$4 sm:$0xff]  }
 0x30c   : > { %5354 = vmatpush2.bf16.msra.mxu1 %v19949_v13 }
 0x30d   : > { %5355 = vmatprep.subr.bf16.mxu1 %v19957_v22  ;;  %v20027_v22 = vld [vmem:[%s28265_s5 + $0x500] ss:$20 sps:$4 sm:$0xff]  }
 0x310   : > { %5356 = vmatpush2.bf16.msra.mxu1 %v19955_v34 }
 0x311   : > { %5357 = vmatprep.subr.bf16.mxu1 %v19963_v39 }
 0x314   : > { %5358 = vmatpush2.bf16.msra.mxu1 %v19961_v6  ;;  %v20035_v6 = vld [vmem:[%s28265_s5 + $0x3a4] ss:$20 sps:$4 sm:$0xff]  }
 0x315   : > { %5359 = vmatprep.subr.bf16.mxu1 %v19969_v47 }
 0x318   : > { %5360 = vmatpush2.bf16.msra.mxu1 %v19967_v3 }
 0x319   : > { %5361 = vmatprep.subr.bf16.mxu1 %v19975_v16  ;;  %v19988_v16 = vld [vmem:[%s28265_s5 + $0xd0] ss:$20 sps:$4 sm:$0xff]  }
 0x31c   : > { %5362 = vmatpush2.bf16.msra.mxu1 %v19973_v21  ;;  %v19993_v21 = vld [vmem:[%s28265_s5 + $0xac] ss:$20 sps:$4 sm:$0xff]  }
 0x31d   : > { %5363 = vmatprep.subr.bf16.mxu1 %v19981_v40  ;;  %v19991_v40 = vld [vmem:[%s28265_s5 + $0xa8] ss:$20 sps:$4 sm:$0xff]  }
 0x320   : > { %5364 = vmatpush2.bf16.msra.mxu1 %v19979_v7  ;;  %v19996_v7 = vld [vmem:[%s28265_s5 + $0x84] ss:$20 sps:$4 sm:$0xff]  }
 0x321   : > { %5419 = vmatprep.subr.bf16.mxu1 %v19999_v42  ;;  %v19994_v42 = vld [vmem:[%s28265_s5 + $0x80] ss:$20 sps:$4 sm:$0xff]  }
 0x36a   : > { %v3986_v10 = vpop.f32.mrf.mxu1 }
 0x36c   : > { %v3988_v54 = vpop.f32.mrf.mxu1 }
 0x36e   : > { %v3990_v25 = vpop.f32.mrf.mxu1 }
 0x36f   : > { %v23882_v35 = vpack.c.bf16 %v3990_v25, %v3986_v10  ;;  %v20002_v10 = vld [vmem:[%s28265_s5 + $0x5c] ss:$20 sps:$4 sm:$0xff]   ;;  %v20008_v25 = vld [vmem:[%s28265_s5 + $0x34] ss:$20 sps:$4 sm:$0xff]  }
 0x370   : > { %v3992_v27 = vpop.f32.mrf.mxu1 }
 0x371   : > { %v23884_v55 = vpack.c.bf16 %v3992_v27, %v3988_v54  ;;  %v5960_v44 = vshrl.u32 %v23882_v35, 16  ;;  %v5963_v29 = vshll.u32 %v23882_v35, 16  ;;  %v20000_v54 = vld [vmem:[%s28265_s5 + $0x58] ss:$20 sps:$4 sm:$0xff]   ;;  %v20006_v27 = vld [vmem:[%s28265_s5 + $0x30] ss:$20 sps:$4 sm:$0xff]  }
 0x372   : > { %v23889_v4 = vpop.f32.mrf.mxu1 }
 0x373   : > { %5365 = vmatprep.mubr.bf16.mxu1 %v23884_v55  ;;  %v5971_v20 = vshll.u32 %v23884_v55, 16  ;;  %v5968_v49 = vshrl.u32 %v23884_v55, 16  ;;  %v7593_v41 = vrot.slane %v5963_v29, 1 }
 0x374   : > { %v23898_v57 = vpop.f32.mrf.mxu1  ;;  %5366 = vmatmul.mubr.bf16.vlgmr.msra.gmra.mxu1 %v23882_v35 }
 0x375   : > { %5420 = vmatpush1.bf16.msra.mxu1 %v19997_v26  ;;  %5447 = vmatprep.mubr.bf16.mxu1 %v21868_v1  ;;  %v7595_v43 = vrot.slane %v5971_v20, 1  ;;  %v23915_v37 = vor.u32 %v7593_v41, %v5960_v44  ;;  %v20014_v26 = vld [vmem:[%s28265_s5 + $0xc] ss:$20 sps:$4 sm:$0xff]   ;;  %v20020_v41 = vld [vmem:[%s28265_s5 + $0x264] ss:$20 sps:$4 sm:$0xff]  }
 0x376   : > { %v4000_v45 = vpop.f32.mrf.mxu1  ;;  %5421 = vmatprep.subr.bf16.mxu1 %v20005_v19  ;;  %v20012_v19 = vld [vmem:[%s28265_s5 + $0x8] ss:$20 sps:$4 sm:$0xff]  }
 0x377   : > { %v23919_v48 = vor.u32 %v7595_v43, %v5968_v49 }
 0x378   : > { %v4001_v46 = vpop.f32.mrf.mxu1 }
 0x379   : > { %5422 = vmatpush1.bf16.msra.mxu1 %v20003_v12  ;;  %v20018_v12 = vld [vmem:[%s28265_s5 + $0x260] ss:$20 sps:$4 sm:$0xff]   ;;  %v20024_v46 = vld [vmem:[%s28265_s5 + $0x238] ss:$20 sps:$4 sm:$0xff]  }
 0x37a   : > { %v4037_v14 = vpop.f32.mrf.mxu1  ;;  %5423 = vmatprep.subr.bf16.mxu1 %v20011_v32  ;;  %v20026_v32 = vld [vmem:[%s28265_s5 + $0x23c] ss:$20 sps:$4 sm:$0xff]  }
 0x37c   : > { %v4039_v58 = vpop.f32.mrf.mxu1 }
 0x37d   : > { %5424 = vmatpush1.bf16.msra.mxu1 %v20009_v28 }
 0x37e   : > { %v4041_v52 = vpop.f32.mrf.mxu1  ;;  %5425 = vmatprep.subr.bf16.mxu1 %v20017_v56 }
 0x37f   : > { %v23933_v36 = vpack.c.bf16 %v4041_v52, %v4037_v14  ;;  %v20032_v14 = vld [vmem:[%s28265_s5 + $0x214] ss:$20 sps:$4 sm:$0xff]   ;;  %v20041_v52 = vld [vmem:[%s28265_s5 + $0x37c] ss:$20 sps:$4 sm:$0xff]  }
 0x380   : > { %v4043_v15 = vpop.f32.mrf.mxu1 }
 0x381   : > { %v23935_v18 = vpack.c.bf16 %v4043_v15, %v4039_v58  ;;  %5426 = vmatpush1.bf16.msra.mxu1 %v20015_v31  ;;  %v5976_v9 = vshrl.u32 %v23933_v36, 16  ;;  %v5979_v23 = vshll.u32 %v23933_v36, 16  ;;  %v20033_v58 = vld [vmem:[%s28265_s5 + $0x3a0] ss:$20 sps:$4 sm:$0xff]  }
 0x382   : > { %v23943_v0 = vpop.f32.mrf.mxu1  ;;  %5427 = vmatprep.subr.bf16.mxu1 %v20023_v50  ;;  %v20030_v50 = vld [vmem:[%s28265_s5 + $0x210] ss:$20 sps:$4 sm:$0xff]   ;;  %v20038_v15 = vld [vmem:[%s28265_s5 + $0x1ec] ss:$20 sps:$4 sm:$0xff]  }
 0x383   : > { %5406 = vmatprep.mubr.bf16.mxu0 %v23935_v18  ;;  %v5987_v30 = vshll.u32 %v23935_v18, 16  ;;  %v5984_v63 = vshrl.u32 %v23935_v18, 16  ;;  %v7597_v53 = vrot.slane %v5979_v23, 1 }
 0x384   : > { %5407 = vmatmul.mubr.bf16.vlgmr.msra.gmra.mxu0 %v23933_v36  ;;  %v23956_v38 = vpop.f32.mrf.mxu1 }
 0x385   : > { %5457 = vmatpush1.bf16.msra.mxu0 %v19982_v24  ;;  %5488 = vmatprep.mubr.bf16.mxu0 %v23884_v55  ;;  %v7599_v34 = vrot.slane %v5987_v30, 1  ;;  %v23975_v39 = vor.u32 %v7597_v53, %v5976_v9 }
 0x386   : > { %5458 = vmatprep.subr.bf16.mxu0 %v19987_v60  ;;  %v4051_v13 = vpop.f32.mrf.mxu1  ;;  %5428 = vmatpush1.bf16.msra.mxu1 %v20021_v33  ;;  %v20039_v60 = vld [vmem:[%s28265_s5 + $0x378] ss:$20 sps:$4 sm:$0xff]   ;;  %v20047_v33 = vld [vmem:[%s28265_s5 + $0x354] ss:$20 sps:$4 sm:$0xff]  }
 0x387   : > { %5429 = vmatprep.subr.bf16.mxu1 %v20029_v5  ;;  %v23982_v3 = vor.u32 %v7599_v34, %v5984_v63  ;;  %v20053_v34 = vld [vmem:[%s28265_s5 + $0x32c] ss:$20 sps:$4 sm:$0xff]  }
 0x388   : > { %v4052_v47 = vpop.f32.mrf.mxu1 }
 0x389   : > { %5459 = vmatpush1.bf16.msra.mxu0 %v19985_v11  ;;  %v20036_v11 = vld [vmem:[%s28265_s5 + $0x1e8] ss:$20 sps:$4 sm:$0xff]  }
 0x38a   : > { %5460 = vmatprep.subr.bf16.mxu0 %v19990_v17  ;;  %5430 = vmatpush1.bf16.msra.mxu1 %v20027_v22  ;;  %v20044_v17 = vld [vmem:[%s28265_s5 + $0x1c4] ss:$20 sps:$4 sm:$0xff]   ;;  %v20050_v47 = vld [vmem:[%s28265_s5 + $0x19c] ss:$20 sps:$4 sm:$0xff]  }
 0x38b   : > { %5497 = vmatprep.subr.bf16.mxu1 %v20035_v6  ;;  %v20045_v22 = vld [vmem:[%s28265_s5 + $0x350] ss:$20 sps:$4 sm:$0xff]   ;;  %v20042_v6 = vld [vmem:[%s28265_s5 + $0x1c0] ss:$20 sps:$4 sm:$0xff]  }
 0x38d   : > { %5461 = vmatpush1.bf16.msra.mxu0 %v19988_v16  ;;  %v20051_v16 = vld [vmem:[%s28265_s5 + $0x328] ss:$20 sps:$4 sm:$0xff]  }
 0x38e   : > { %5462 = vmatprep.subr.bf16.mxu0 %v19993_v21  ;;  %v20059_v21 = vld [vmem:[%s28265_s5 + $0x304] ss:$20 sps:$4 sm:$0xff]  }
 0x391   : > { %5463 = vmatpush1.bf16.msra.mxu0 %v19991_v40  ;;  %v20048_v40 = vld [vmem:[%s28265_s5 + $0x198] ss:$20 sps:$4 sm:$0xff]  }
 0x392   : > { %5464 = vmatprep.subr.bf16.mxu0 %v19996_v7  ;;  %v20056_v7 = vld [vmem:[%s28265_s5 + $0x174] ss:$20 sps:$4 sm:$0xff]  }
 0x395   : > { %5465 = vmatpush1.bf16.msra.mxu0 %v19994_v42  ;;  %v20057_v42 = vld [vmem:[%s28265_s5 + $0x300] ss:$20 sps:$4 sm:$0xff]  }
 0x396   : > { %5466 = vmatprep.subr.bf16.mxu0 %v20002_v10  ;;  %v20065_v10 = vld [vmem:[%s28265_s5 + $0x2dc] ss:$20 sps:$4 sm:$0xff]  }
 0x399   : > { %5467 = vmatpush1.bf16.msra.mxu0 %v20000_v54  ;;  %v20054_v54 = vld [vmem:[%s28265_s5 + $0x170] ss:$20 sps:$4 sm:$0xff]  }
 0x39a   : > { %5468 = vmatprep.subr.bf16.mxu0 %v20008_v25  ;;  %v20062_v25 = vld [vmem:[%s28265_s5 + $0x14c] ss:$20 sps:$4 sm:$0xff]  }
 0x39d   : > { %5469 = vmatpush1.bf16.msra.mxu0 %v20006_v27  ;;  %v20063_v27 = vld [vmem:[%s28265_s5 + $0x2d8] ss:$20 sps:$4 sm:$0xff]  }
 0x39e   : > { %5470 = vmatprep.subr.bf16.mxu0 %v20014_v26  ;;  %v20071_v26 = vld [vmem:[%s28265_s5 + $0x2b4] ss:$20 sps:$4 sm:$0xff]  }
 0x3a1   : > { %5471 = vmatpush1.bf16.msra.mxu0 %v20012_v19  ;;  %v20060_v19 = vld [vmem:[%s28265_s5 + $0x148] ss:$20 sps:$4 sm:$0xff]  }
 0x3a2   : > { %5472 = vmatprep.subr.bf16.mxu0 %v20020_v41  ;;  %v20068_v41 = vld [vmem:[%s28265_s5 + $0x5d4] ss:$20 sps:$4 sm:$0xff]  }
 0x3a3   : > { %v24023_v45 = vpop.f32.mrf.mxu1 }
 0x3a5   : > { %v4088_v43 = vpop.f32.mrf.mxu1  ;;  %5473 = vmatpush2.bf16.msra.mxu0 %v20018_v12  ;;  %v20069_v12 = vld [vmem:[%s28265_s5 + $0x2b0] ss:$20 sps:$4 sm:$0xff]  }
 0x3a6   : > { %5474 = vmatprep.subr.bf16.mxu0 %v20026_v32  ;;  %v20077_v32 = vld [vmem:[%s28265_s5 + $0x28c] ss:$20 sps:$4 sm:$0xff]  }
 0x3a7   : > { %v19218_v28 = vpop.f32.mrf.mxu1 }
 0x3a8   : > { %v20075_v28 = vld [vmem:[%s28265_s5 + $0x288] ss:$20 sps:$4 sm:$0xff]  }
 0x3a9   : > { %v4091_v56 = vpop.f32.mrf.mxu1  ;;  %5475 = vmatpush2.bf16.msra.mxu0 %v20024_v46  ;;  %v20074_v46 = vld [vmem:[%s28265_s5 + $0x5ac] ss:$20 sps:$4 sm:$0xff]  }
 0x3aa   : > { %v24037_v31 = vpack.c.bf16 %v4091_v56, %v4088_v43  ;;  %5476 = vmatprep.subr.bf16.mxu0 %v20032_v14  ;;  %v20066_v43 = vld [vmem:[%s28265_s5 + $0x5d0] ss:$20 sps:$4 sm:$0xff]   ;;  %v20072_v56 = vld [vmem:[%s28265_s5 + $0x5a8] ss:$20 sps:$4 sm:$0xff]  }
 0x3ab   : > { %v20083_v14 = vld [vmem:[%s28265_s5 + $0x4e4] ss:$20 sps:$4 sm:$0xff]  }
 0x3ac   : > { %16575 = vmatmul.mubr.msk.bf16.vlgmr.msra.gmra.mxu1 %vm5329_vm6, %v24037_v31  ;;  %v5994_v24 = vshll.u32 %v24037_v31, 16  ;;  %v5991_v5 = vshrl.u32 %v24037_v31, 16 }
 0x3ad   : > { %5498 = vmatpush1.bf16.msra.mxu1 %v20033_v58  ;;  %5529 = vmatprep.mubr.bf16.mxu1 %v23935_v18  ;;  %v20080_v58 = vld [vmem:[%s28265_s5 + $0x584] ss:$20 sps:$4 sm:$0xff]  }
 0x3ae   : > { %5499 = vmatprep.subr.bf16.mxu1 %v20041_v52  ;;  %v7601_v53 = vrot.slane %v5994_v24, 1  ;;  %5477 = vmatpush2.bf16.msra.mxu0 %v20030_v50  ;;  %v20081_v52 = vld [vmem:[%s28265_s5 + $0x4e0] ss:$20 sps:$4 sm:$0xff]   ;;  %v20089_v50 = vld [vmem:[%s28265_s5 + $0x4bc] ss:$20 sps:$4 sm:$0xff]  }
 0x3af   : > { %5478 = vmatprep.subr.bf16.mxu0 %v20038_v15  ;;  %v20078_v15 = vld [vmem:[%s28265_s5 + $0x580] ss:$20 sps:$4 sm:$0xff]  }
 0x3b0   : > { %v24069_v13 = vor.u32 %v7601_v53, %v5991_v5  ;;  %v20095_v53 = vld [vmem:[%s28265_s5 + $0x494] ss:$20 sps:$4 sm:$0xff]  }
 0x3b1   : > { %5500 = vmatpush1.bf16.msra.mxu1 %v20039_v60  ;;  %v20086_v60 = vld [vmem:[%s28265_s5 + $0x55c] ss:$20 sps:$4 sm:$0xff]  }
 0x3b2   : > { %5501 = vmatprep.subr.bf16.mxu1 %v20047_v33  ;;  %5479 = vmatpush2.bf16.msra.mxu0 %v20036_v11  ;;  %v20087_v33 = vld [vmem:[%s28265_s5 + $0x4b8] ss:$20 sps:$4 sm:$0xff]  }
 0x3b3   : > { %5480 = vmatprep.subr.bf16.mxu0 %v20044_v17  ;;  %v20084_v11 = vld [vmem:[%s28265_s5 + $0x558] ss:$20 sps:$4 sm:$0xff]   ;;  %v20092_v17 = vld [vmem:[%s28265_s5 + $0x534] ss:$20 sps:$4 sm:$0xff]  }
 0x3b5   : > { %5502 = vmatpush1.bf16.msra.mxu1 %v20045_v22  ;;  %v20093_v22 = vld [vmem:[%s28265_s5 + $0x490] ss:$20 sps:$4 sm:$0xff]  }
 0x3b6   : > { %5503 = vmatprep.subr.bf16.mxu1 %v20053_v34  ;;  %5481 = vmatpush2.bf16.msra.mxu0 %v20042_v6  ;;  %v20101_v34 = vld [vmem:[%s28265_s5 + $0x46c] ss:$20 sps:$4 sm:$0xff]   ;;  %v20090_v6 = vld [vmem:[%s28265_s5 + $0x530] ss:$20 sps:$4 sm:$0xff]  }
 0x3b7   : > { %5482 = vmatprep.subr.bf16.mxu0 %v20050_v47  ;;  %v20098_v47 = vld [vmem:[%s28265_s5 + $0x50c] ss:$20 sps:$4 sm:$0xff]  }
 0x3b9   : > { %5504 = vmatpush1.bf16.msra.mxu1 %v20051_v16  ;;  %v20099_v16 = vld [vmem:[%s28265_s5 + $0x468] ss:$20 sps:$4 sm:$0xff]  }
 0x3ba   : > { %5505 = vmatprep.subr.bf16.mxu1 %v20059_v21  ;;  %5483 = vmatpush2.bf16.msra.mxu0 %v20048_v40  ;;  %v20105_v21 = vld [vmem:[%s28265_s5 + $0x444] ss:$20 sps:$4 sm:$0xff]   ;;  %v20096_v40 = vld [vmem:[%s28265_s5 + $0x508] ss:$20 sps:$4 sm:$0xff]  }
 0x3bb   : > { %5484 = vmatprep.subr.bf16.mxu0 %v20056_v7  ;;  %v20102_v7 = vld [vmem:[%s28265_s5 + $0x4e8] ss:$20 sps:$4 sm:$0xff]  }
 0x3bd   : > { %5506 = vmatpush1.bf16.msra.mxu1 %v20057_v42  ;;  %v20103_v42 = vld [vmem:[%s28265_s5 + $0x440] ss:$20 sps:$4 sm:$0xff]  }
 0x3be   : > { %5507 = vmatprep.subr.bf16.mxu1 %v20065_v10  ;;  %5485 = vmatpush2.bf16.msra.mxu0 %v20054_v54  ;;  %v20110_v10 = vld [vmem:[%s28265_s5 + $0x41c] ss:$20 sps:$4 sm:$0xff]  }
 0x3bf   : > { %5486 = vmatprep.subr.bf16.mxu0 %v20062_v25  ;;  %v20106_v54 = vld [vmem:[%s28265_s5 + $0x3a8] ss:$20 sps:$4 sm:$0xff]   ;;  %v20107_v25 = vld [vmem:[%s28265_s5 + $0x4c0] ss:$20 sps:$4 sm:$0xff]  }
 0x3c1   : > { %5508 = vmatpush1.bf16.msra.mxu1 %v20063_v27  ;;  %v20108_v27 = vld [vmem:[%s28265_s5 + $0x418] ss:$20 sps:$4 sm:$0xff]  }
 0x3c2   : > { %5509 = vmatprep.subr.bf16.mxu1 %v20071_v26  ;;  %5487 = vmatpush2.bf16.msra.mxu0 %v20060_v19  ;;  %v20115_v26 = vld [vmem:[%s28265_s5 + $0x3f4] ss:$20 sps:$4 sm:$0xff]  }
 0x3c3   : > { %5542 = vmatprep.subr.bf16.mxu0 %v20068_v41  ;;  %v20111_v19 = vld [vmem:[%s28265_s5 + $0x380] ss:$20 sps:$4 sm:$0xff]   ;;  %v20112_v41 = vld [vmem:[%s28265_s5 + $0x498] ss:$20 sps:$4 sm:$0xff]  }
 0x3c5   : > { %5510 = vmatpush1.bf16.msra.mxu1 %v20069_v12  ;;  %5489 = vmatmul.mubr.bf16.vlgmr.msra.gmra.mxu0 %v23882_v35  ;;  %v20113_v12 = vld [vmem:[%s28265_s5 + $0x3f0] ss:$20 sps:$4 sm:$0xff]  }
 0x3c6   : > { %5511 = vmatprep.subr.bf16.mxu1 %v20077_v32  ;;  %5543 = vmatpush1.bf16.msra.mxu0 %v20066_v43  ;;  %v20120_v32 = vld [vmem:[%s28265_s5 + $0x3cc] ss:$20 sps:$4 sm:$0xff]  }
 0x3c7   : > { %5570 = vmatprep.mubr.bf16.mxu0 %v21868_v1  ;;  %5544 = vmatprep.subr.bf16.mxu0 %v20074_v46  ;;  %v20116_v43 = vld [vmem:[%s28265_s5 + $0x358] ss:$20 sps:$4 sm:$0xff]   ;;  %v20117_v46 = vld [vmem:[%s28265_s5 + $0x470] ss:$20 sps:$4 sm:$0xff]  }
 0x3c9   : > { %5512 = vmatpush1.bf16.msra.mxu1 %v20075_v28  ;;  %v20118_v28 = vld [vmem:[%s28265_s5 + $0x3c8] ss:$20 sps:$4 sm:$0xff]  }
 0x3ca   : > { %5513 = vmatprep.subr.bf16.mxu1 %v20083_v14  ;;  %5545 = vmatpush1.bf16.msra.mxu0 %v20072_v56  ;;  %v20123_v14 = vld [vmem:[%s28265_s5 + $0x268] ss:$20 sps:$4 sm:$0xff]   ;;  %v20121_v56 = vld [vmem:[%s28265_s5 + $0x330] ss:$20 sps:$4 sm:$0xff]  }
 0x3cb   : > { %5546 = vmatprep.subr.bf16.mxu0 %v20080_v58  ;;  %v20122_v58 = vld [vmem:[%s28265_s5 + $0x448] ss:$20 sps:$4 sm:$0xff]  }
 0x3cd   : > { %5514 = vmatpush2.bf16.msra.mxu1 %v20081_v52  ;;  %v20125_v52 = vld [vmem:[%s28265_s5 + $0x128] ss:$20 sps:$4 sm:$0xff]  }
 0x3ce   : > { %5515 = vmatprep.subr.bf16.mxu1 %v20089_v50  ;;  %5547 = vmatpush1.bf16.msra.mxu0 %v20078_v15  ;;  %v20127_v50 = vld [vmem:[%s28265_s5 + $0x240] ss:$20 sps:$4 sm:$0xff]   ;;  %v20124_v15 = vld [vmem:[%s28265_s5 + $0x308] ss:$20 sps:$4 sm:$0xff]  }
 0x3cf   : > { %5548 = vmatprep.subr.bf16.mxu0 %v20086_v60  ;;  %v20126_v60 = vld [vmem:[%s28265_s5 + $0x420] ss:$20 sps:$4 sm:$0xff]  }
 0x3d1   : > { %5516 = vmatpush2.bf16.msra.mxu1 %v20087_v33  ;;  %v20129_v33 = vld [vmem:[%s28265_s5 + $0x100] ss:$20 sps:$4 sm:$0xff]  }
 0x3d2   : > { %5517 = vmatprep.subr.bf16.mxu1 %v20095_v53  ;;  %5549 = vmatpush1.bf16.msra.mxu0 %v20084_v11  ;;  %v20131_v53 = vld [vmem:[%s28265_s5 + $0x218] ss:$20 sps:$4 sm:$0xff]   ;;  %v20128_v11 = vld [vmem:[%s28265_s5 + $0x2e0] ss:$20 sps:$4 sm:$0xff]  }
 0x3d3   : > { %5550 = vmatprep.subr.bf16.mxu0 %v20092_v17  ;;  %v20130_v17 = vld [vmem:[%s28265_s5 + $0x3f8] ss:$20 sps:$4 sm:$0xff]  }
 0x3d5   : > { %5518 = vmatpush2.bf16.msra.mxu1 %v20093_v22  ;;  %v20133_v22 = vld [vmem:[%s28265_s5 + $0xd8] ss:$20 sps:$4 sm:$0xff]  }
 0x3d6   : > { %5519 = vmatprep.subr.bf16.mxu1 %v20101_v34  ;;  %5551 = vmatpush1.bf16.msra.mxu0 %v20090_v6  ;;  %v20135_v34 = vld [vmem:[%s28265_s5 + $0x1f0] ss:$20 sps:$4 sm:$0xff]   ;;  %v20132_v6 = vld [vmem:[%s28265_s5 + $0x2b8] ss:$20 sps:$4 sm:$0xff]  }
 0x3d7   : > { %5552 = vmatprep.subr.bf16.mxu0 %v20098_v47  ;;  %v20134_v47 = vld [vmem:[%s28265_s5 + $0x3d0] ss:$20 sps:$4 sm:$0xff]  }
 0x3d9   : > { %5520 = vmatpush2.bf16.msra.mxu1 %v20099_v16  ;;  %v20137_v16 = vld [vmem:[%s28265_s5 + $0xb0] ss:$20 sps:$4 sm:$0xff]  }
 0x3da   : > { %5521 = vmatprep.subr.bf16.mxu1 %v20105_v21  ;;  %5553 = vmatpush1.bf16.msra.mxu0 %v20096_v40  ;;  %v20141_v21 = vld [vmem:[%s28265_s5 + $0x1c8] ss:$20 sps:$4 sm:$0xff]   ;;  %v20136_v40 = vld [vmem:[%s28265_s5 + $0x290] ss:$20 sps:$4 sm:$0xff]  }
 0x3db   : > { %18976 = vmatprep.subr.bf16.mxu0 %v20102_v7  ;;  %v20140_v7 = vld [vmem:[%s28265_s5 + $0x70c] ss:$20 sps:$4 sm:$0xff]  }
 0x3dd   : > { %5522 = vmatpush2.bf16.msra.mxu1 %v20103_v42  ;;  %16576 = vmatmul.mubr.msk.bf16.vlgmr.msra.gmra.mxu0 %vm5329_vm6, %v24037_v31  ;;  %v5970_v42 = vrot.slane %v5968_v49, 4  ;;  %v20145_v49 = vld [vmem:[%s28265_s5 + $0x6e4] ss:$20 sps:$4 sm:$0xff]  }
 0x3de   : > { %5523 = vmatprep.subr.bf16.mxu1 %v20110_v10  ;;  %18977 = vmatpush3.bf16.msra.mxu0 %v20106_v54  ;;  %v5973_v10 = vrot.slane %v5971_v20, 5  ;;  %v20142_v54 = vld [vmem:[%s28265_s5 + $0x88] ss:$20 sps:$4 sm:$0xff]  }
 0x3df   : > { %5651 = vmatprep.mubr.bf16.mxu0 %v23935_v18  ;;  %18978 = vmatprep.subr.bf16.mxu0 %v20107_v25  ;;  %v20146_v25 = vld [vmem:[%s28265_s5 + $0x1a0] ss:$20 sps:$4 sm:$0xff]  }
 0x3e0   : > { %v24310_v20 = vor.u32 %v5973_v10, %v5970_v42  ;;  %v20181_v42 = vld [vmem:[%s28265_s5 + $0x510] ss:$20 sps:$4 sm:$0xff]   ;;  %v20187_v10 = vld [vmem:[%s28265_s5 + $0x98c] ss:$20 sps:$4 sm:$0xff]  }
 0x3e1   : > { %5524 = vmatpush2.bf16.msra.mxu1 %v20108_v27  ;;  %v20138_v27 = vld [vmem:[%s28265_s5 + $0x708] ss:$20 sps:$4 sm:$0xff]  }
 0x3e2   : > { %5525 = vmatprep.subr.bf16.mxu1 %v20115_v26  ;;  %18979 = vmatpush3.bf16.msra.mxu0 %v20111_v19  ;;  %v20147_v26 = vld [vmem:[%s28265_s5 + $0x60] ss:$20 sps:$4 sm:$0xff]   ;;  %v20151_v19 = vld [vmem:[%s28265_s5 + $0x178] ss:$20 sps:$4 sm:$0xff]  }
 0x3e3   : > { %18980 = vmatprep.subr.bf16.mxu0 %v20112_v41  ;;  %v20143_v41 = vld [vmem:[%s28265_s5 + $0x6e0] ss:$20 sps:$4 sm:$0xff]  }
 0x3e5   : > { %5526 = vmatpush2.bf16.msra.mxu1 %v20113_v12  ;;  %v20150_v12 = vld [vmem:[%s28265_s5 + $0x6bc] ss:$20 sps:$4 sm:$0xff]  }
 0x3e6   : > { %5527 = vmatprep.subr.bf16.mxu1 %v20120_v32  ;;  %18981 = vmatpush3.bf16.msra.mxu0 %v20116_v43  ;;  %v20152_v32 = vld [vmem:[%s28265_s5 + $0x38] ss:$20 sps:$4 sm:$0xff]   ;;  %v20156_v43 = vld [vmem:[%s28265_s5 + $0x150] ss:$20 sps:$4 sm:$0xff]  }
 0x3e7   : > { %18982 = vmatprep.subr.bf16.mxu0 %v20117_v46  ;;  %v20148_v46 = vld [vmem:[%s28265_s5 + $0x6b8] ss:$20 sps:$4 sm:$0xff]  }
 0x3e9   : > { %5528 = vmatpush2.bf16.msra.mxu1 %v20118_v28  ;;  %v20155_v28 = vld [vmem:[%s28265_s5 + $0x694] ss:$20 sps:$4 sm:$0xff]  }
 0x3ea   : > { %18954 = vmatprep.subr.bf16.mxu1 %v20123_v14  ;;  %18983 = vmatpush3.bf16.msra.mxu0 %v20121_v56  ;;  %v20157_v14 = vld [vmem:[%s28265_s5 + $0x10] ss:$20 sps:$4 sm:$0xff]  }
 0x3eb   : > { %18984 = vmatprep.subr.bf16.mxu0 %v20122_v58  ;;  %v20153_v56 = vld [vmem:[%s28265_s5 + $0x690] ss:$20 sps:$4 sm:$0xff]   ;;  %v20160_v58 = vld [vmem:[%s28265_s5 + $0x66c] ss:$20 sps:$4 sm:$0xff]  }
 0x3ec   : > { %5530 = vmatmul.mubr.bf16.vlgmr.msra.gmra.mxu1 %v23933_v36 }
 0x3ed   : > { %18955 = vmatpush3.bf16.msra.mxu1 %v20125_v52  ;;  %5611 = vmatprep.mubr.bf16.mxu1 %v23884_v55  ;;  %v20161_v52 = vld [vmem:[%s28265_s5 + $0x5d8] ss:$20 sps:$4 sm:$0xff]  }
 0x3ee   : > { %18956 = vmatprep.subr.bf16.mxu1 %v20127_v50  ;;  %18985 = vmatpush3.bf16.msra.mxu0 %v20124_v15  ;;  %v21869_v50 = vmov 0.0   ;;  %v20158_v15 = vld [vmem:[%s28265_s5 + $0x668] ss:$20 sps:$4 sm:$0xff]  }
 0x3ef   : > { %18986 = vmatprep.subr.bf16.mxu0 %v20126_v60  ;;  %v20164_v60 = vld [vmem:[%s28265_s5 + $0x644] ss:$20 sps:$4 sm:$0xff]  }
 0x3f1   : > { %18957 = vmatpush3.bf16.msra.mxu1 %v20129_v33  ;;  %v20165_v33 = vld [vmem:[%s28265_s5 + $0x5b0] ss:$20 sps:$4 sm:$0xff]  }
 0x3f2   : > { %18958 = vmatprep.subr.bf16.mxu1 %v20131_v53  ;;  %18987 = vmatpush3.bf16.msra.mxu0 %v20128_v11  ;;  %v20162_v53 = vld [vmem:[%s28265_s5 + $0x640] ss:$20 sps:$4 sm:$0xff]   ;;  %v20168_v11 = vld [vmem:[%s28265_s5 + $0x61c] ss:$20 sps:$4 sm:$0xff]  }
 0x3f3   : > { %18988 = vmatprep.subr.bf16.mxu0 %v20130_v17  ;;  %v20169_v17 = vld [vmem:[%s28265_s5 + $0x588] ss:$20 sps:$4 sm:$0xff]  }
 0x3f5   : > { %18959 = vmatpush3.bf16.msra.mxu1 %v20133_v22  ;;  %v20166_v22 = vld [vmem:[%s28265_s5 + $0x618] ss:$20 sps:$4 sm:$0xff]  }
 0x3f6   : > { %18960 = vmatprep.subr.bf16.mxu1 %v20135_v34  ;;  %18989 = vmatpush3.bf16.msra.mxu0 %v20132_v6  ;;  %v20172_v34 = vld [vmem:[%s28265_s5 + $0x5f4] ss:$20 sps:$4 sm:$0xff]  }
 0x3f7   : > { %18990 = vmatprep.subr.bf16.mxu0 %v20134_v47  ;;  %v20173_v6 = vld [vmem:[%s28265_s5 + $0x560] ss:$20 sps:$4 sm:$0xff]   ;;  %v20170_v47 = vld [vmem:[%s28265_s5 + $0x5f0] ss:$20 sps:$4 sm:$0xff]  }
 0x3f9   : > { %18961 = vmatpush3.bf16.msra.mxu1 %v20137_v16  ;;  %v20176_v16 = vld [vmem:[%s28265_s5 + $0x84c] ss:$20 sps:$4 sm:$0xff]  }
 0x3fa   : > { %18962 = vmatprep.subr.bf16.mxu1 %v20141_v21  ;;  %18991 = vmatpush3.bf16.msra.mxu0 %v20136_v40  ;;  %v20177_v21 = vld [vmem:[%s28265_s5 + $0x538] ss:$20 sps:$4 sm:$0xff]   ;;  %v20174_v40 = vld [vmem:[%s28265_s5 + $0x848] ss:$20 sps:$4 sm:$0xff]  }
 0x3fb   : > { %6993 = vmatprep.subr.bf16.mxu0 %v20140_v7  ;;  %v20180_v7 = vld [vmem:[%s28265_s5 + $0x824] ss:$20 sps:$4 sm:$0xff]  }
 0x3fd   : > { %18963 = vmatpush3.bf16.msra.mxu1 %v20142_v54  ;;  %5652 = vmatmul.mubr.bf16.vlgmr.msra.gmra.mxu0 %v23933_v36  ;;  %v20178_v54 = vld [vmem:[%s28265_s5 + $0x820] ss:$20 sps:$4 sm:$0xff]  }
 0x3fe   : > { %18964 = vmatprep.subr.bf16.mxu1 %v20146_v25  ;;  %6994 = vmatpush1.bf16.msra.mxu0 %v20138_v27  ;;  %v5986_v25 = vrot.slane %v5984_v63, 4  ;;  %v5989_v27 = vrot.slane %v5987_v30, 5  ;;  %v20182_v30 = vld [vmem:[%s28265_s5 + $0x7f8] ss:$20 sps:$4 sm:$0xff]  }
 0x3ff   : > { %7025 = vmatprep.mubr.bf16.mxu0 %v24310_v20  ;;  %6995 = vmatprep.subr.bf16.mxu0 %v20145_v49  ;;  %v20184_v49 = vld [vmem:[%s28265_s5 + $0x7fc] ss:$20 sps:$4 sm:$0xff]  }
 0x400   : > { %v24426_v63 = vor.u32 %v5989_v27, %v5986_v25  ;;  %v20226_v27 = vld [vmem:[%s28265_s5 + $0xb94] ss:$20 sps:$4 sm:$0xff]  }
 0x401   : > { %18965 = vmatpush3.bf16.msra.mxu1 %v20147_v26  ;;  %v20185_v26 = vld [vmem:[%s28265_s5 + $0x988] ss:$20 sps:$4 sm:$0xff]  }
 0x402   : > { %18966 = vmatprep.subr.bf16.mxu1 %v20151_v19  ;;  %6996 = vmatpush1.bf16.msra.mxu0 %v20143_v41  ;;  %v20193_v19 = vld [vmem:[%s28265_s5 + $0x964] ss:$20 sps:$4 sm:$0xff]   ;;  %v20190_v41 = vld [vmem:[%s28265_s5 + $0x7d4] ss:$20 sps:$4 sm:$0xff]  }
 0x403   : > { %6997 = vmatprep.subr.bf16.mxu0 %v20150_v12  ;;  %v20191_v12 = vld [vmem:[%s28265_s5 + $0x960] ss:$20 sps:$4 sm:$0xff]  }
 0x405   : > { %18967 = vmatpush3.bf16.msra.mxu1 %v20152_v32  ;;  %v20199_v32 = vld [vmem:[%s28265_s5 + $0x93c] ss:$20 sps:$4 sm:$0xff]  }
 0x406   : > { %18968 = vmatprep.subr.bf16.mxu1 %v20156_v43  ;;  %6998 = vmatpush1.bf16.msra.mxu0 %v20148_v46  ;;  %v20188_v43 = vld [vmem:[%s28265_s5 + $0x7d0] ss:$20 sps:$4 sm:$0xff]   ;;  %v20196_v46 = vld [vmem:[%s28265_s5 + $0x7ac] ss:$20 sps:$4 sm:$0xff]  }
 0x407   : > { %6999 = vmatprep.subr.bf16.mxu0 %v20155_v28  ;;  %v20197_v28 = vld [vmem:[%s28265_s5 + $0x938] ss:$20 sps:$4 sm:$0xff]  }
 0x409   : > { %18969 = vmatpush3.bf16.msra.mxu1 %v20157_v14  ;;  %v20205_v14 = vld [vmem:[%s28265_s5 + $0x914] ss:$20 sps:$4 sm:$0xff]  }
 0x40a   : > { %19219 = vmatprep.subr.bf16.mxu1 %v21869_v50  ;;  %7000 = vmatpush1.bf16.msra.mxu0 %v20153_v56  ;;  %v20194_v56 = vld [vmem:[%s28265_s5 + $0x7a8] ss:$20 sps:$4 sm:$0xff]  }
 0x40b   : > { %7001 = vmatprep.subr.bf16.mxu0 %v20160_v58  ;;  %v20202_v58 = vld [vmem:[%s28265_s5 + $0x784] ss:$20 sps:$4 sm:$0xff]  }
 0x40c   : > { %5612 = vmatmul.mubr.bf16.vlgmr.msra.gmra.mxu1 %v23882_v35 }
 0x40d   : > { %19220 = vmatpush3.bf16.msra.mxu1 %v20161_v52  ;;  %19231 = vmatprep.mubr.msk.bf16.mxu1 %vm21870_vm7, %v21869_v50  ;;  %v20203_v52 = vld [vmem:[%s28265_s5 + $0x910] ss:$20 sps:$4 sm:$0xff]  }
 0x40e   : > { %19221 = vmatprep.subr.bf16.mxu1 %v21869_v50  ;;  %7002 = vmatpush1.bf16.msra.mxu0 %v20158_v15  ;;  %v20211_v15 = vld [vmem:[%s28265_s5 + $0x8ec] ss:$20 sps:$4 sm:$0xff]  }
 0x40f   : > { %7003 = vmatprep.subr.bf16.mxu0 %v20164_v60  ;;  %v20200_v60 = vld [vmem:[%s28265_s5 + $0x780] ss:$20 sps:$4 sm:$0xff]  }
 0x411   : > { %19222 = vmatpush3.bf16.msra.mxu1 %v20165_v33  ;;  %v20208_v33 = vld [vmem:[%s28265_s5 + $0x75c] ss:$20 sps:$4 sm:$0xff]  }
 0x412   : > { %19223 = vmatprep.subr.bf16.mxu1 %v21869_v50  ;;  %7004 = vmatpush1.bf16.msra.mxu0 %v20162_v53  ;;  %v20209_v53 = vld [vmem:[%s28265_s5 + $0x8e8] ss:$20 sps:$4 sm:$0xff]  }
 0x413   : > { %7005 = vmatprep.subr.bf16.mxu0 %v20168_v11  ;;  %v20217_v11 = vld [vmem:[%s28265_s5 + $0x8c4] ss:$20 sps:$4 sm:$0xff]  }
 0x415   : > { %19224 = vmatpush3.bf16.msra.mxu1 %v20169_v17  ;;  %v20206_v17 = vld [vmem:[%s28265_s5 + $0x758] ss:$20 sps:$4 sm:$0xff]  }
 0x416   : > { %19225 = vmatprep.subr.bf16.mxu1 %v21869_v50  ;;  %7006 = vmatpush1.bf16.msra.mxu0 %v20166_v22  ;;  %v20214_v22 = vld [vmem:[%s28265_s5 + $0x734] ss:$20 sps:$4 sm:$0xff]  }
 0x417   : > { %7007 = vmatprep.subr.bf16.mxu0 %v20172_v34  ;;  %v20215_v34 = vld [vmem:[%s28265_s5 + $0x8c0] ss:$20 sps:$4 sm:$0xff]  }
 0x419   : > { %19226 = vmatpush3.bf16.msra.mxu1 %v20173_v6  ;;  %v20223_v6 = vld [vmem:[%s28265_s5 + $0x89c] ss:$20 sps:$4 sm:$0xff]  }
 0x41a   : > { %19227 = vmatprep.subr.bf16.mxu1 %v21869_v50  ;;  %7008 = vmatpush1.bf16.msra.mxu0 %v20170_v47 }
 0x41b   : > { %7009 = vmatprep.subr.bf16.mxu0 %v20176_v16  ;;  %v20212_v16 = vld [vmem:[%s28265_s5 + $0x730] ss:$20 sps:$4 sm:$0xff]  }
 0x41d   : > { %19228 = vmatpush3.bf16.msra.mxu1 %v20177_v21  ;;  %v5962_v21 = vrot.slane %v5960_v44, 4  ;;  %v20218_v44 = vld [vmem:[%s28265_s5 + $0xbb8] ss:$20 sps:$4 sm:$0xff]  }
 0x41e   : > { %19229 = vmatprep.subr.bf16.mxu1 %v21869_v50  ;;  %7010 = vmatpush2.bf16.msra.mxu0 %v20174_v40  ;;  %v5965_v40 = vrot.slane %v5963_v29, 5 }
 0x41f   : > { %7011 = vmatprep.subr.bf16.mxu0 %v20180_v7  ;;  %v20220_v7 = vld [vmem:[%s28265_s5 + $0xbbc] ss:$20 sps:$4 sm:$0xff]  }
 0x420   : > { %v24507_v29 = vor.u32 %v5965_v40, %v5962_v21  ;;  %v20248_v21 = vld [vmem:[%s28265_s5 + $0xaf0] ss:$20 sps:$4 sm:$0xff]   ;;  %v5993_v40 = vrot.slane %v5991_v5, 4 }
 0x421   : > { %19230 = vmatpush3.bf16.msra.mxu1 %v20181_v42  ;;  %v20254_v5 = vld [vmem:[%s28265_s5 + $0x990] ss:$20 sps:$4 sm:$0xff]  }
 0x422   : > { %7034 = vmatprep.subr.bf16.mxu1 %v20187_v10  ;;  %7012 = vmatpush2.bf16.msra.mxu0 %v20178_v54  ;;  %v20221_v10 = vld [vmem:[%s28265_s5 + $0x898] ss:$20 sps:$4 sm:$0xff]   ;;  %v20229_v54 = vld [vmem:[%s28265_s5 + $0x874] ss:$20 sps:$4 sm:$0xff]  }
 0x423   : > { %7013 = vmatprep.subr.bf16.mxu0 %v20184_v49 }
 0x424   : > { %19232 = vmatmul.mubr.msk.bf16.vlgmr.msra.gmra.mxu1 %vm5329_vm6, %v24037_v31 }
 0x425   : > { %7035 = vmatpush1.bf16.msra.mxu1 %v20185_v26  ;;  %7066 = vmatprep.mubr.bf16.mxu1 %v24426_v63  ;;  %v20227_v26 = vld [vmem:[%s28265_s5 + $0x870] ss:$20 sps:$4 sm:$0xff]  }
 0x426   : > { %7036 = vmatprep.subr.bf16.mxu1 %v20193_v19  ;;  %7014 = vmatpush2.bf16.msra.mxu0 %v20182_v30  ;;  %v20235_v19 = vld [vmem:[%s28265_s5 + $0xacc] ss:$20 sps:$4 sm:$0xff]   ;;  %v20224_v30 = vld [vmem:[%s28265_s5 + $0xb90] ss:$20 sps:$4 sm:$0xff]  }
 0x427   : > { %7015 = vmatprep.subr.bf16.mxu0 %v20190_v41  ;;  %v20232_v41 = vld [vmem:[%s28265_s5 + $0xb6c] ss:$20 sps:$4 sm:$0xff]  }
 0x429   : > { %7037 = vmatpush1.bf16.msra.mxu1 %v20191_v12  ;;  %v20233_v12 = vld [vmem:[%s28265_s5 + $0xac8] ss:$20 sps:$4 sm:$0xff]  }
 0x42a   : > { %7038 = vmatprep.subr.bf16.mxu1 %v20199_v32  ;;  %7016 = vmatpush2.bf16.msra.mxu0 %v20188_v43  ;;  %v20241_v32 = vld [vmem:[%s28265_s5 + $0xaa4] ss:$20 sps:$4 sm:$0xff]   ;;  %v20230_v43 = vld [vmem:[%s28265_s5 + $0xb68] ss:$20 sps:$4 sm:$0xff]  }
 0x42b   : > { %7017 = vmatprep.subr.bf16.mxu0 %v20196_v46  ;;  %v20238_v46 = vld [vmem:[%s28265_s5 + $0xb44] ss:$20 sps:$4 sm:$0xff]  }
 0x42d   : > { %7039 = vmatpush1.bf16.msra.mxu1 %v20197_v28  ;;  %v20239_v28 = vld [vmem:[%s28265_s5 + $0xaa0] ss:$20 sps:$4 sm:$0xff]  }
 0x42e   : > { %7040 = vmatprep.subr.bf16.mxu1 %v20205_v14  ;;  %7018 = vmatpush2.bf16.msra.mxu0 %v20194_v56  ;;  %v20247_v56 = vld [vmem:[%s28265_s5 + $0xa7c] ss:$20 sps:$4 sm:$0xff]  }
 0x42f   : > { %7019 = vmatprep.subr.bf16.mxu0 %v20202_v58  ;;  %v20236_v58 = vld [vmem:[%s28265_s5 + $0xb40] ss:$20 sps:$4 sm:$0xff]  }
 0x431   : > { %7041 = vmatpush1.bf16.msra.mxu1 %v20203_v52 }
 0x432   : > { %7042 = vmatprep.subr.bf16.mxu1 %v20211_v15  ;;  %7020 = vmatpush2.bf16.msra.mxu0 %v20200_v60  ;;  %v20244_v60 = vld [vmem:[%s28265_s5 + $0xb1c] ss:$20 sps:$4 sm:$0xff]  }
 0x433   : > { %7021 = vmatprep.subr.bf16.mxu0 %v20208_v33 }
 0x434   : > { %v5367_v47 = vpop.f32.mrf.mxu1 }
 0x435   : > { %7043 = vmatpush1.bf16.msra.mxu1 %v20209_v53  ;;  %v20245_v53 = vld [vmem:[%s28265_s5 + $0xa78] ss:$20 sps:$4 sm:$0xff]  }
 0x436   : > { %7044 = vmatprep.subr.bf16.mxu1 %v20217_v11  ;;  %7022 = vmatpush2.bf16.msra.mxu0 %v20206_v17  ;;  %v5369_v42 = vpop.f32.mrf.mxu1  ;;  %v20253_v11 = vld [vmem:[%s28265_s5 + $0xa54] ss:$20 sps:$4 sm:$0xff]  }
 0x437   : > { %7023 = vmatprep.subr.bf16.mxu0 %v20214_v22  ;;  %v20242_v22 = vld [vmem:[%s28265_s5 + $0xb18] ss:$20 sps:$4 sm:$0xff]  }
 0x438   : > { %v5371_v25 = vpop.f32.mrf.mxu1 }
 0x439   : > { %7045 = vmatpush1.bf16.msra.mxu1 %v20215_v34  ;;  %v20250_v34 = vld [vmem:[%s28265_s5 + $0xaf4] ss:$20 sps:$4 sm:$0xff]   ;;  %v20262_v25 = vld [vmem:[%s28265_s5 + $0x96c] ss:$20 sps:$4 sm:$0xff]  }
 0x43a   : > { %7046 = vmatprep.subr.bf16.mxu1 %v20223_v6  ;;  %7024 = vmatpush2.bf16.msra.mxu0 %v20212_v16  ;;  %v5372_v49 = vpop.f32.mrf.mxu1  ;;  %v20259_v16 = vld [vmem:[%s28265_s5 + $0xa2c] ss:$20 sps:$4 sm:$0xff]  }
 0x43b   : > { %7079 = vmatprep.subr.bf16.mxu0 %v20220_v7  ;;  %v5996_v7 = vrot.slane %v5994_v24, 5  ;;  %v20260_v49 = vld [vmem:[%s28265_s5 + $0x968] ss:$20 sps:$4 sm:$0xff]  }
 0x43d   : > { %7047 = vmatpush1.bf16.msra.mxu1 %v20221_v10  ;;  %7026 = vmatmul.mubr.bf16.vlgmr.msra.gmra.mxu0 %v24507_v29  ;;  %v20257_v10 = vld [vmem:[%s28265_s5 + $0xa28] ss:$20 sps:$4 sm:$0xff]   ;;  %v24591_v24 = vor.u32 %v5996_v7, %v5993_v40  ;;  %v20299_v7 = vld [vmem:[%s28265_s5 + $0x698] ss:$20 sps:$4 sm:$0xff]  }
 0x43e   : > { %7048 = vmatprep.subr.bf16.mxu1 %v20229_v54  ;;  %7080 = vmatpush1.bf16.msra.mxu0 %v20218_v44  ;;  %v20265_v54 = vld [vmem:[%s28265_s5 + $0xa04] ss:$20 sps:$4 sm:$0xff]   ;;  %v20263_v44 = vld [vmem:[%s28265_s5 + $0xa00] ss:$20 sps:$4 sm:$0xff]  }
 0x43f   : > { %7107 = vmatprep.mubr.bf16.mxu0 %v21868_v1  ;;  %7081 = vmatprep.subr.bf16.mxu0 %v20226_v27  ;;  %v20271_v27 = vld [vmem:[%s28265_s5 + $0x9dc] ss:$20 sps:$4 sm:$0xff]  }
 0x441   : > { %7049 = vmatpush1.bf16.msra.mxu1 %v20227_v26  ;;  %v20268_v26 = vld [vmem:[%s28265_s5 + $0x944] ss:$20 sps:$4 sm:$0xff]  }
 0x442   : > { %7050 = vmatprep.subr.bf16.mxu1 %v20235_v19  ;;  %7082 = vmatpush1.bf16.msra.mxu0 %v20224_v30  ;;  %v20269_v19 = vld [vmem:[%s28265_s5 + $0x9d8] ss:$20 sps:$4 sm:$0xff]   ;;  %v20277_v30 = vld [vmem:[%s28265_s5 + $0x9b4] ss:$20 sps:$4 sm:$0xff]  }
 0x443   : > { %7083 = vmatprep.subr.bf16.mxu0 %v20232_v41  ;;  %v20266_v41 = vld [vmem:[%s28265_s5 + $0x940] ss:$20 sps:$4 sm:$0xff]  }
 0x444   : > { %v5408_v14 = vpop.f32.mrf.mxu0 }
 0x445   : > { %7051 = vmatpush2.bf16.msra.mxu1 %v20233_v12  ;;  %v24547_v52 = vadd.f32 %v5408_v14, %v5367_v47  ;;  %v20251_v47 = vld [vmem:[%s28265_s5 + $0xa50] ss:$20 sps:$4 sm:$0xff]   ;;  %v20272_v14 = vld [vmem:[%s28265_s5 + $0x918] ss:$20 sps:$4 sm:$0xff]  }
 0x446   : > { %7052 = vmatprep.subr.bf16.mxu1 %v20241_v32  ;;  %7084 = vmatpush1.bf16.msra.mxu0 %v20230_v43  ;;  %v5410_v15 = vpop.f32.mrf.mxu0  ;;  %v20274_v12 = vld [vmem:[%s28265_s5 + $0x91c] ss:$20 sps:$4 sm:$0xff]   ;;  %v5978_v43 = vrot.slane %v5976_v9, 4 }
 0x447   : > { %7085 = vmatprep.subr.bf16.mxu0 %v20238_v46  ;;  %v24552_v33 = vadd.f32 %v5410_v15, %v5369_v42  ;;  %v20256_v42 = vld [vmem:[%s28265_s5 + $0x994] ss:$20 sps:$4 sm:$0xff]   ;;  %v20275_v32 = vld [vmem:[%s28265_s5 + $0x9b0] ss:$20 sps:$4 sm:$0xff]   ;;  %v5981_v46 = vrot.slane %v5979_v23, 5 }
 0x448   : > { %v5412_v17 = vpop.f32.mrf.mxu0  ;;  %v20281_v9 = vld [vmem:[%s28265_s5 + $0x710] ss:$20 sps:$4 sm:$0xff]  }
 0x449   : > { %7053 = vmatpush2.bf16.msra.mxu1 %v20239_v28  ;;  %v20283_v28 = vld [vmem:[%s28265_s5 + $0x714] ss:$20 sps:$4 sm:$0xff]   ;;  %v24642_v23 = vor.u32 %v5981_v46, %v5978_v43  ;;  %v20278_v15 = vld [vmem:[%s28265_s5 + $0x8f0] ss:$20 sps:$4 sm:$0xff]  }
 0x44a   : > { %7054 = vmatprep.subr.bf16.mxu1 %v20247_v56  ;;  %7086 = vmatpush1.bf16.msra.mxu0 %v20236_v58  ;;  %v5413_v6 = vpop.f32.mrf.mxu0  ;;  %v20280_v56 = vld [vmem:[%s28265_s5 + $0x8f4] ss:$20 sps:$4 sm:$0xff]   ;;  %v20289_v58 = vld [vmem:[%s28265_s5 + $0x6ec] ss:$20 sps:$4 sm:$0xff]   ;;  %v20325_v43 = vld [vmem:[%s28265_s5 + $0x5fc] ss:$20 sps:$4 sm:$0xff]  }
 0x44b   : > { %7087 = vmatprep.subr.bf16.mxu0 %v20244_v60  ;;  %v20286_v60 = vld [vmem:[%s28265_s5 + $0x8cc] ss:$20 sps:$4 sm:$0xff]   ;;  %v20284_v17 = vld [vmem:[%s28265_s5 + $0x8c8] ss:$20 sps:$4 sm:$0xff]  }
 0x44c   : > { %v20301_v6 = vld [vmem:[%s28265_s5 + $0x69c] ss:$20 sps:$4 sm:$0xff]   ;;  %v20314_v46 = vld [vmem:[%s28265_s5 + $0xa80] ss:$20 sps:$4 sm:$0xff]  }
 0x44d   : > { %7055 = vmatpush2.bf16.msra.mxu1 %v20245_v53  ;;  %v20287_v53 = vld [vmem:[%s28265_s5 + $0x6e8] ss:$20 sps:$4 sm:$0xff]  }
 0x44e   : > { %7056 = vmatprep.subr.bf16.mxu1 %v20253_v11  ;;  %7088 = vmatpush1.bf16.msra.mxu0 %v20242_v22  ;;  %v20295_v11 = vld [vmem:[%s28265_s5 + $0x6c4] ss:$20 sps:$4 sm:$0xff]  }
 0x44f   : > { %7089 = vmatprep.subr.bf16.mxu0 %v20250_v34  ;;  %v20292_v22 = vld [vmem:[%s28265_s5 + $0x8a4] ss:$20 sps:$4 sm:$0xff]   ;;  %v20293_v34 = vld [vmem:[%s28265_s5 + $0x6c0] ss:$20 sps:$4 sm:$0xff]  }
 0x451   : > { %7057 = vmatpush2.bf16.msra.mxu1 %v20251_v47  ;;  %v20290_v47 = vld [vmem:[%s28265_s5 + $0x8a0] ss:$20 sps:$4 sm:$0xff]  }
 0x452   : > { %7058 = vmatprep.subr.bf16.mxu1 %v20259_v16  ;;  %7090 = vmatpush1.bf16.msra.mxu0 %v20248_v21  ;;  %v20298_v21 = vld [vmem:[%s28265_s5 + $0x87c] ss:$20 sps:$4 sm:$0xff]  }
 0x453   : > { %7157 = vmatprep.subr.bf16.mxu0 %v20256_v42 }
 0x455   : > { %7059 = vmatpush2.bf16.msra.mxu1 %v20257_v10  ;;  %16996 = vmatmul.mubr.msk.bf16.vlgmr.msra.gmra.mxu0 %vm5329_vm6, %v24591_v24  ;;  %v20307_v10 = vld [vmem:[%s28265_s5 + $0x674] ss:$20 sps:$4 sm:$0xff]  }
 0x456   : > { %7060 = vmatprep.subr.bf16.mxu1 %v20265_v54  ;;  %7158 = vmatpush1.bf16.msra.mxu0 %v20254_v5 }
 0x457   : > { %7189 = vmatprep.mubr.bf16.mxu0 %v24426_v63  ;;  %7159 = vmatprep.subr.bf16.mxu0 %v20262_v25  ;;  %v20304_v25 = vld [vmem:[%s28265_s5 + $0xad4] ss:$20 sps:$4 sm:$0xff]  }
 0x459   : > { %7061 = vmatpush2.bf16.msra.mxu1 %v20263_v44  ;;  %v20305_v44 = vld [vmem:[%s28265_s5 + $0x670] ss:$20 sps:$4 sm:$0xff]  }
 0x45a   : > { %7062 = vmatprep.subr.bf16.mxu1 %v20271_v27  ;;  %7160 = vmatpush1.bf16.msra.mxu0 %v20260_v49  ;;  %v20302_v49 = vld [vmem:[%s28265_s5 + $0xad0] ss:$20 sps:$4 sm:$0xff]  }
 0x45b   : > { %7161 = vmatprep.subr.bf16.mxu0 %v20268_v26  ;;  %v20310_v26 = vld [vmem:[%s28265_s5 + $0xaac] ss:$20 sps:$4 sm:$0xff]  }
 0x45d   : > { %7063 = vmatpush2.bf16.msra.mxu1 %v20269_v19  ;;  %v20311_v19 = vld [vmem:[%s28265_s5 + $0x648] ss:$20 sps:$4 sm:$0xff]  }
 0x45e   : > { %7064 = vmatprep.subr.bf16.mxu1 %v20277_v30  ;;  %7162 = vmatpush1.bf16.msra.mxu0 %v20266_v41  ;;  %v20319_v30 = vld [vmem:[%s28265_s5 + $0x624] ss:$20 sps:$4 sm:$0xff]   ;;  %v20308_v41 = vld [vmem:[%s28265_s5 + $0xaa8] ss:$20 sps:$4 sm:$0xff]  }
 0x45f   : > { %7163 = vmatprep.subr.bf16.mxu0 %v20274_v12  ;;  %v20316_v12 = vld [vmem:[%s28265_s5 + $0xa84] ss:$20 sps:$4 sm:$0xff]  }
 0x461   : > { %7065 = vmatpush2.bf16.msra.mxu1 %v20275_v32  ;;  %v20317_v32 = vld [vmem:[%s28265_s5 + $0x620] ss:$20 sps:$4 sm:$0xff]  }
 0x462   : > { %7116 = vmatprep.subr.bf16.mxu1 %v20283_v28  ;;  %7164 = vmatpush1.bf16.msra.mxu0 %v20272_v14  ;;  %v20322_v28 = vld [vmem:[%s28265_s5 + $0xa5c] ss:$20 sps:$4 sm:$0xff]   ;;  %v20323_v14 = vld [vmem:[%s28265_s5 + $0x5f8] ss:$20 sps:$4 sm:$0xff]  }
 0x463   : > { %7165 = vmatprep.subr.bf16.mxu0 %v20280_v56  ;;  %v20331_v56 = vld [vmem:[%s28265_s5 + $0x854] ss:$20 sps:$4 sm:$0xff]  }
 0x464   : > { %7067 = vmatmul.mubr.bf16.vlgmr.msra.gmra.mxu1 %v24642_v23 }
 0x465   : > { %7117 = vmatpush1.bf16.msra.mxu1 %v20281_v9  ;;  %7148 = vmatprep.mubr.bf16.mxu1 %v24310_v20  ;;  %v20320_v9 = vld [vmem:[%s28265_s5 + $0xa58] ss:$20 sps:$4 sm:$0xff]  }
 0x466   : > { %7118 = vmatprep.subr.bf16.mxu1 %v20289_v58  ;;  %7166 = vmatpush1.bf16.msra.mxu0 %v20278_v15  ;;  %v20328_v58 = vld [vmem:[%s28265_s5 + $0xa34] ss:$20 sps:$4 sm:$0xff]   ;;  %v20329_v15 = vld [vmem:[%s28265_s5 + $0x850] ss:$20 sps:$4 sm:$0xff]  }
 0x467   : > { %7167 = vmatprep.subr.bf16.mxu0 %v20286_v60  ;;  %v20337_v60 = vld [vmem:[%s28265_s5 + $0x82c] ss:$20 sps:$4 sm:$0xff]  }
 0x469   : > { %7119 = vmatpush1.bf16.msra.mxu1 %v20287_v53  ;;  %v20326_v53 = vld [vmem:[%s28265_s5 + $0xa30] ss:$20 sps:$4 sm:$0xff]  }
 0x46a   : > { %7120 = vmatprep.subr.bf16.mxu1 %v20295_v11  ;;  %7168 = vmatpush1.bf16.msra.mxu0 %v20284_v17  ;;  %v20334_v11 = vld [vmem:[%s28265_s5 + $0xa0c] ss:$20 sps:$4 sm:$0xff]   ;;  %v20335_v17 = vld [vmem:[%s28265_s5 + $0x828] ss:$20 sps:$4 sm:$0xff]  }
 0x46b   : > { %7169 = vmatprep.subr.bf16.mxu0 %v20292_v22 }
 0x46c   : > { %v5449_v16 = vpop.f32.mrf.mxu1 }
 0x46d   : > { %v24680_v40 = vadd.f32 %v5449_v16, %v24547_v52  ;;  %7121 = vmatpush1.bf16.msra.mxu1 %v20293_v34  ;;  %v20296_v52 = vld [vmem:[%s28265_s5 + $0x878] ss:$20 sps:$4 sm:$0xff]  }
 0x46e   : > { %v5451_v42 = vpop.f32.mrf.mxu1  ;;  %7122 = vmatprep.subr.bf16.mxu1 %v20301_v6  ;;  %7170 = vmatpush1.bf16.msra.mxu0 %v20290_v47  ;;  %v20343_v34 = vld [vmem:[%s28265_s5 + $0x804] ss:$20 sps:$4 sm:$0xff]   ;;  %v20332_v6 = vld [vmem:[%s28265_s5 + $0xa08] ss:$20 sps:$4 sm:$0xff]  }
 0x46f   : > { %v24689_v54 = vadd.f32 %v5451_v42, %v24552_v33  ;;  %7171 = vmatprep.subr.bf16.mxu0 %v20298_v21  ;;  %v20313_v33 = vld [vmem:[%s28265_s5 + $0x64c] ss:$20 sps:$4 sm:$0xff]   ;;  %v20340_v16 = vld [vmem:[%s28265_s5 + $0x9e4] ss:$20 sps:$4 sm:$0xff]   ;;  %v20349_v42 = vld [vmem:[%s28265_s5 + $0x7dc] ss:$20 sps:$4 sm:$0xff]  }
 0x470   : > { %v5453_v5 = vpop.f32.mrf.mxu1  ;;  %v20341_v21 = vld [vmem:[%s28265_s5 + $0x800] ss:$20 sps:$4 sm:$0xff]  }
 0x471   : > { %7123 = vmatpush1.bf16.msra.mxu1 %v20299_v7  ;;  %v20346_v5 = vld [vmem:[%s28265_s5 + $0x9bc] ss:$20 sps:$4 sm:$0xff]  }
 0x472   : > { %v5454_v27 = vpop.f32.mrf.mxu1  ;;  %7124 = vmatprep.subr.bf16.mxu1 %v20307_v10  ;;  %7172 = vmatpush1.bf16.msra.mxu0 %v20296_v52  ;;  %v20338_v10 = vld [vmem:[%s28265_s5 + $0x9e0] ss:$20 sps:$4 sm:$0xff]  }
 0x473   : > { %7173 = vmatprep.subr.bf16.mxu0 %v20304_v25  ;;  %v20347_v25 = vld [vmem:[%s28265_s5 + $0x7d8] ss:$20 sps:$4 sm:$0xff]  }
 0x474   : > { %v20344_v27 = vld [vmem:[%s28265_s5 + $0x9b8] ss:$20 sps:$4 sm:$0xff]  }
 0x475   : > { %7125 = vmatpush1.bf16.msra.mxu1 %v20305_v44  ;;  %v20353_v44 = vld [vmem:[%s28265_s5 + $0x7b4] ss:$20 sps:$4 sm:$0xff]  }
 0x476   : > { %7126 = vmatprep.subr.bf16.mxu1 %v20313_v33  ;;  %7174 = vmatpush2.bf16.msra.mxu0 %v20302_v49  ;;  %v20350_v33 = vld [vmem:[%s28265_s5 + $0x858] ss:$20 sps:$4 sm:$0xff]   ;;  %v20351_v49 = vld [vmem:[%s28265_s5 + $0x7b0] ss:$20 sps:$4 sm:$0xff]  }
 0x477   : > { %7175 = vmatprep.subr.bf16.mxu0 %v20310_v26  ;;  %v20358_v26 = vld [vmem:[%s28265_s5 + $0x78c] ss:$20 sps:$4 sm:$0xff]  }
 0x479   : > { %7127 = vmatpush1.bf16.msra.mxu1 %v20311_v19  ;;  %v20354_v19 = vld [vmem:[%s28265_s5 + $0x718] ss:$20 sps:$4 sm:$0xff]  }
 0x47a   : > { %7128 = vmatprep.subr.bf16.mxu1 %v20319_v30  ;;  %7176 = vmatpush2.bf16.msra.mxu0 %v20308_v41  ;;  %v20355_v30 = vld [vmem:[%s28265_s5 + $0x830] ss:$20 sps:$4 sm:$0xff]   ;;  %v20356_v41 = vld [vmem:[%s28265_s5 + $0x788] ss:$20 sps:$4 sm:$0xff]  }
 0x47b   : > { %7177 = vmatprep.subr.bf16.mxu0 %v20316_v12  ;;  %v20363_v12 = vld [vmem:[%s28265_s5 + $0x764] ss:$20 sps:$4 sm:$0xff]  }
 0x47d   : > { %7129 = vmatpush1.bf16.msra.mxu1 %v20317_v32  ;;  %v20359_v32 = vld [vmem:[%s28265_s5 + $0x6f0] ss:$20 sps:$4 sm:$0xff]  }
 0x47e   : > { %7130 = vmatprep.subr.bf16.mxu1 %v20325_v43  ;;  %7178 = vmatpush2.bf16.msra.mxu0 %v20314_v46  ;;  %v20360_v43 = vld [vmem:[%s28265_s5 + $0x808] ss:$20 sps:$4 sm:$0xff]   ;;  %v20361_v46 = vld [vmem:[%s28265_s5 + $0x760] ss:$20 sps:$4 sm:$0xff]  }
 0x47f   : > { %7179 = vmatprep.subr.bf16.mxu0 %v20322_v28  ;;  %v20368_v28 = vld [vmem:[%s28265_s5 + $0x73c] ss:$20 sps:$4 sm:$0xff]  }
 0x481   : > { %7131 = vmatpush1.bf16.msra.mxu1 %v20323_v14  ;;  %v20365_v14 = vld [vmem:[%s28265_s5 + $0x7e0] ss:$20 sps:$4 sm:$0xff]  }
 0x482   : > { %7132 = vmatprep.subr.bf16.mxu1 %v20331_v56  ;;  %7180 = vmatpush2.bf16.msra.mxu0 %v20320_v9  ;;  %v20366_v56 = vld [vmem:[%s28265_s5 + $0x738] ss:$20 sps:$4 sm:$0xff]  }
 0x483   : > { %7181 = vmatprep.subr.bf16.mxu0 %v20328_v58  ;;  %v20373_v58 = vld [vmem:[%s28265_s5 + $0xbc4] ss:$20 sps:$4 sm:$0xff]  }
 0x485   : > { %7133 = vmatpush2.bf16.msra.mxu1 %v20329_v15  ;;  %v24760_v22 = vpop.f32.mrf.mxu0  ;;  %v20369_v15 = vld [vmem:[%s28265_s5 + $0x6a0] ss:$20 sps:$4 sm:$0xff]  }
 0x486   : > { %7134 = vmatprep.subr.bf16.mxu1 %v20337_v60  ;;  %7182 = vmatpush2.bf16.msra.mxu0 %v20326_v53  ;;  %v20370_v53 = vld [vmem:[%s28265_s5 + $0x7b8] ss:$20 sps:$4 sm:$0xff]  }
 0x487   : > { %v24768_v47 = vpop.f32.mrf.mxu0  ;;  %7183 = vmatprep.subr.bf16.mxu0 %v20334_v11  ;;  %v20371_v11 = vld [vmem:[%s28265_s5 + $0xbc0] ss:$20 sps:$4 sm:$0xff]  }
 0x489   : > { %7135 = vmatpush2.bf16.msra.mxu1 %v20335_v17  ;;  %v5494_v7 = vpop.f32.mrf.mxu0 }
 0x48a   : > { %7136 = vmatprep.subr.bf16.mxu1 %v20343_v34  ;;  %7184 = vmatpush2.bf16.msra.mxu0 %v20332_v6  ;;  %v20378_v34 = vld [vmem:[%s28265_s5 + $0xb9c] ss:$20 sps:$4 sm:$0xff]   ;;  %v20374_v6 = vld [vmem:[%s28265_s5 + $0x678] ss:$20 sps:$4 sm:$0xff]  }
 0x48b   : > { %v5495_v52 = vpop.f32.mrf.mxu0  ;;  %7185 = vmatprep.subr.bf16.mxu0 %v20340_v16  ;;  %v20376_v7 = vld [vmem:[%s28265_s5 + $0xb98] ss:$20 sps:$4 sm:$0xff]  }
 0x48c   : > { %v20380_v52 = vld [vmem:[%s28265_s5 + $0x768] ss:$20 sps:$4 sm:$0xff]  }
 0x48d   : > { %7137 = vmatpush2.bf16.msra.mxu1 %v20341_v21  ;;  %v20375_v21 = vld [vmem:[%s28265_s5 + $0x790] ss:$20 sps:$4 sm:$0xff]  }
 0x48e   : > { %7138 = vmatprep.subr.bf16.mxu1 %v20349_v42  ;;  %7186 = vmatpush2.bf16.msra.mxu0 %v20338_v10  ;;  %v20383_v42 = vld [vmem:[%s28265_s5 + $0xb74] ss:$20 sps:$4 sm:$0xff]   ;;  %v20379_v10 = vld [vmem:[%s28265_s5 + $0x650] ss:$20 sps:$4 sm:$0xff]  }
 0x48f   : > { %7187 = vmatprep.subr.bf16.mxu0 %v20346_v5  ;;  %v20381_v5 = vld [vmem:[%s28265_s5 + $0xb70] ss:$20 sps:$4 sm:$0xff]  }
 0x491   : > { %7139 = vmatpush2.bf16.msra.mxu1 %v20347_v25  ;;  %v20388_v25 = vld [vmem:[%s28265_s5 + $0xb4c] ss:$20 sps:$4 sm:$0xff]  }
 0x492   : > { %7140 = vmatprep.subr.bf16.mxu1 %v20353_v44  ;;  %7188 = vmatpush2.bf16.msra.mxu0 %v20344_v27  ;;  %v20384_v44 = vld [vmem:[%s28265_s5 + $0x628] ss:$20 sps:$4 sm:$0xff]  }
 0x493   : > { %19005 = vmatprep.subr.bf16.mxu0 %v20350_v33  ;;  %v20385_v33 = vld [vmem:[%s28265_s5 + $0x740] ss:$20 sps:$4 sm:$0xff]  }
 0x495   : > { %7141 = vmatpush2.bf16.msra.mxu1 %v20351_v49  ;;  %7190 = vmatmul.mubr.bf16.vlgmr.msra.gmra.mxu0 %v24642_v23 }
 0x496   : > { %7142 = vmatprep.subr.bf16.mxu1 %v20358_v26  ;;  %19006 = vmatpush3.bf16.msra.mxu0 %v20354_v19  ;;  %v20386_v26 = vld [vmem:[%s28265_s5 + $0xb48] ss:$20 sps:$4 sm:$0xff]  }
 0x497   : > { %7271 = vmatprep.mubr.bf16.mxu0 %v24310_v20  ;;  %19007 = vmatprep.subr.bf16.mxu0 %v20355_v30  ;;  %v20364_v20 = vld [vmem:[%s28265_s5 + $0x6c8] ss:$20 sps:$4 sm:$0xff]   ;;  %v20392_v30 = vld [vmem:[%s28265_s5 + $0xb24] ss:$20 sps:$4 sm:$0xff]  }
 0x499   : > { %7143 = vmatpush2.bf16.msra.mxu1 %v20356_v41 }
 0x49a   : > { %7144 = vmatprep.subr.bf16.mxu1 %v20363_v12  ;;  %19008 = vmatpush3.bf16.msra.mxu0 %v20359_v32 }
 0x49b   : > { %19009 = vmatprep.subr.bf16.mxu0 %v20360_v43 }
 0x49d   : > { %7145 = vmatpush2.bf16.msra.mxu1 %v20361_v46  ;;  %v5572_v9 = vpop.f32.mrf.mxu0  ;;  %v20390_v46 = vld [vmem:[%s28265_s5 + $0xb20] ss:$20 sps:$4 sm:$0xff]  }
 0x49e   : > { %7146 = vmatprep.subr.bf16.mxu1 %v20368_v28  ;;  %19010 = vmatpush3.bf16.msra.mxu0 %v20364_v20  ;;  %v20396_v20 = vld [vmem:[%s28265_s5 + $0xafc] ss:$20 sps:$4 sm:$0xff]  }
 0x49f   : > { %v5574_v60 = vpop.f32.mrf.mxu0  ;;  %19011 = vmatprep.subr.bf16.mxu0 %v20365_v14  ;;  %v20394_v14 = vld [vmem:[%s28265_s5 + $0xaf8] ss:$20 sps:$4 sm:$0xff]  }
 0x4a1   : > { %7147 = vmatpush2.bf16.msra.mxu1 %v20366_v56  ;;  %v5576_v17 = vpop.f32.mrf.mxu0  ;;  %v20398_v56 = vld [vmem:[%s28265_s5 + $0xad8] ss:$20 sps:$4 sm:$0xff]  }
 0x4a2   : > { %7202 = vmatprep.subr.bf16.mxu1 %v20373_v58  ;;  %19012 = vmatpush3.bf16.msra.mxu0 %v20369_v15  ;;  %v20401_v58 = vld [vmem:[%s28265_s5 + $0xab0] ss:$20 sps:$4 sm:$0xff]   ;;  %v20399_v15 = vld [vmem:[%s28265_s5 + $0xb78] ss:$20 sps:$4 sm:$0xff]  }
 0x4a3   : > { %v5577_v16 = vpop.f32.mrf.mxu0  ;;  %19013 = vmatprep.subr.bf16.mxu0 %v20370_v53  ;;  %v20402_v17 = vld [vmem:[%s28265_s5 + $0xb50] ss:$20 sps:$4 sm:$0xff]  }
 0x4a4   : > { %7149 = vmatmul.mubr.bf16.vlgmr.msra.gmra.mxu1 %v24507_v29 }
 0x4a5   : > { %7203 = vmatpush1.bf16.msra.mxu1 %v20371_v11  ;;  %7230 = vmatprep.mubr.bf16.mxu1 %v21868_v1  ;;  %v20404_v11 = vld [vmem:[%s28265_s5 + $0xa88] ss:$20 sps:$4 sm:$0xff]  }
 0x4a6   : > { %7204 = vmatprep.subr.bf16.mxu1 %v20378_v34  ;;  %19014 = vmatpush3.bf16.msra.mxu0 %v20374_v6 }
 0x4a7   : > { %19015 = vmatprep.subr.bf16.mxu0 %v20375_v21  ;;  %v20407_v21 = vld [vmem:[%s28265_s5 + $0xa60] ss:$20 sps:$4 sm:$0xff]  }
 0x4a9   : > { %7205 = vmatpush1.bf16.msra.mxu1 %v20376_v7  ;;  %v20405_v7 = vld [vmem:[%s28265_s5 + $0xb28] ss:$20 sps:$4 sm:$0xff]  }
 0x4aa   : > { %7206 = vmatprep.subr.bf16.mxu1 %v20383_v42  ;;  %19016 = vmatpush3.bf16.msra.mxu0 %v20379_v10  ;;  %v20409_v10 = vld [vmem:[%s28265_s5 + $0x920] ss:$20 sps:$4 sm:$0xff]  }
 0x4ab   : > { %19017 = vmatprep.subr.bf16.mxu0 %v20380_v52  ;;  %v20413_v52 = vld [vmem:[%s28265_s5 + $0xa38] ss:$20 sps:$4 sm:$0xff]  }
 0x4ac   : > { %v5531_v27 = vpop.f32.mrf.mxu1 }
 0x4ad   : > { %v5532_v49 = vadd.f32 %v5531_v27, %v24760_v22  ;;  %7207 = vmatpush1.bf16.msra.mxu1 %v20381_v5  ;;  %v20389_v22 = vld [vmem:[%s28265_s5 + $0x600] ss:$20 sps:$4 sm:$0xff]   ;;  %v20418_v27 = vld [vmem:[%s28265_s5 + $0xa10] ss:$20 sps:$4 sm:$0xff]  }
 0x4ae   : > { %v5533_v19 = vpop.f32.mrf.mxu1  ;;  %7208 = vmatprep.subr.bf16.mxu1 %v20388_v25  ;;  %19018 = vmatpush3.bf16.msra.mxu0 %v20384_v44  ;;  %v20408_v5 = vld [vmem:[%s28265_s5 + $0xb00] ss:$20 sps:$4 sm:$0xff]   ;;  %v20412_v25 = vld [vmem:[%s28265_s5 + $0xf7c] ss:$20 sps:$4 sm:$0xff]   ;;  %v20414_v44 = vld [vmem:[%s28265_s5 + $0x8f8] ss:$20 sps:$4 sm:$0xff]  }
 0x4af   : > { %v24892_v41 = vadd.f32 %v5572_v9, %v5532_v49  ;;  %v5534_v12 = vadd.f32 %v5533_v19, %v24768_v47  ;;  %19019 = vmatprep.subr.bf16.mxu0 %v20385_v33  ;;  %v20393_v47 = vld [vmem:[%s28265_s5 + $0xbc8] ss:$20 sps:$4 sm:$0xff]   ;;  %v20397_v9 = vld [vmem:[%s28265_s5 + $0xba0] ss:$20 sps:$4 sm:$0xff]   ;;  %v20410_v33 = vld [vmem:[%s28265_s5 + $0xf78] ss:$20 sps:$4 sm:$0xff]  }
 0x4b0   : > { %v5535_v32 = vpop.f32.mrf.mxu1  ;;  %v20419_v19 = vld [vmem:[%s28265_s5 + $0x8d0] ss:$20 sps:$4 sm:$0xff]  }
 0x4b1   : > { %v24898_v43 = vadd.f32 %v5574_v60, %v5534_v12  ;;  %7209 = vmatpush1.bf16.msra.mxu1 %v20386_v26  ;;  %v20403_v60 = vld [vmem:[%s28265_s5 + $0x970] ss:$20 sps:$4 sm:$0xff]   ;;  %v20417_v26 = vld [vmem:[%s28265_s5 + $0xf54] ss:$20 sps:$4 sm:$0xff]  }
 0x4b2   : > { %v5536_v28 = vpop.f32.mrf.mxu1  ;;  %7210 = vmatprep.subr.bf16.mxu1 %v20392_v30  ;;  %19020 = vmatpush3.bf16.msra.mxu0 %v20389_v22  ;;  %v20423_v12 = vld [vmem:[%s28265_s5 + $0x9e8] ss:$20 sps:$4 sm:$0xff]   ;;  %v20415_v32 = vld [vmem:[%s28265_s5 + $0xf50] ss:$20 sps:$4 sm:$0xff]  }
 0x4b3   : > { %19235 = vmatprep.subr.bf16.mxu0 %v21869_v50  ;;  %v20424_v28 = vld [vmem:[%s28265_s5 + $0x8a8] ss:$20 sps:$4 sm:$0xff]  }
 0x4b5   : > { %7211 = vmatpush1.bf16.msra.mxu1 %v20390_v46  ;;  %7272 = vmatmul.mubr.bf16.vlgmr.msra.gmra.mxu0 %v24507_v29  ;;  %v20400_v29 = vld [vmem:[%s28265_s5 + $0x998] ss:$20 sps:$4 sm:$0xff]  }
 0x4b6   : > { %7212 = vmatprep.subr.bf16.mxu1 %v20396_v20  ;;  %19236 = vmatpush3.bf16.msra.mxu0 %v20393_v47 }
 0x4b7   : > { %19247 = vmatprep.mubr.msk.bf16.mxu0 %vm21870_vm7, %v21869_v50  ;;  %19237 = vmatprep.subr.bf16.mxu0 %v21869_v50 }
 0x4b9   : > { %7213 = vmatpush1.bf16.msra.mxu1 %v20394_v14  ;;  %v20428_v14 = vld [vmem:[%s28265_s5 + $0x9c0] ss:$20 sps:$4 sm:$0xff]  }
 0x4ba   : > { %19027 = vmatprep.subr.bf16.mxu1 %v20398_v56  ;;  %19238 = vmatpush3.bf16.msra.mxu0 %v20397_v9  ;;  %v20420_v56 = vld [vmem:[%s28265_s5 + $0xf28] ss:$20 sps:$4 sm:$0xff]   ;;  %v20427_v9 = vld [vmem:[%s28265_s5 + $0xf04] ss:$20 sps:$4 sm:$0xff]  }
 0x4bb   : > { %19239 = vmatprep.subr.bf16.mxu0 %v21869_v50 }
 0x4bc   : > { %16997 = vmatmul.mubr.msk.bf16.vlgmr.msra.gmra.mxu1 %vm5329_vm6, %v24591_v24 }
 0x4bd   : > { %19028 = vmatpush3.bf16.msra.mxu1 %v20400_v29  ;;  %7311 = vmatprep.mubr.bf16.mxu1 %v24426_v63  ;;  %v18992_v53 = vpop.f32.mrf.mxu0  ;;  %v20406_v63 = vld [vmem:[%s28265_s5 + $0x948] ss:$20 sps:$4 sm:$0xff]   ;;  %v20429_v29 = vld [vmem:[%s28265_s5 + $0x880] ss:$20 sps:$4 sm:$0xff]  }
 0x4be   : > { %19029 = vmatprep.subr.bf16.mxu1 %v20401_v58  ;;  %19240 = vmatpush3.bf16.msra.mxu0 %v20399_v15  ;;  %v20435_v58 = vld [vmem:[%s28265_s5 + $0xcfc] ss:$20 sps:$4 sm:$0xff]   ;;  %v20425_v15 = vld [vmem:[%s28265_s5 + $0xf00] ss:$20 sps:$4 sm:$0xff]  }
 0x4bf   : > { %v18993_v34 = vpop.f32.mrf.mxu0  ;;  %19241 = vmatprep.subr.bf16.mxu0 %v21869_v50 }
 0x4c0   : > { %v18994_v6 = vadd.f32 %v18993_v34, %v18992_v53  ;;  %v20433_v53 = vld [vmem:[%s28265_s5 + $0xcf8] ss:$20 sps:$4 sm:$0xff]   ;;  %v20438_v34 = vld [vmem:[%s28265_s5 + $0xeb4] ss:$20 sps:$4 sm:$0xff]  }
 0x4c1   : > { %19030 = vmatpush3.bf16.msra.mxu1 %v20403_v60  ;;  %v18995_v16 = vpop.f32.mrf.mxu0  ;;  %v20432_v60 = vld [vmem:[%s28265_s5 + $0xedc] ss:$20 sps:$4 sm:$0xff]  }
 0x4c2   : > { %19031 = vmatprep.subr.bf16.mxu1 %v20404_v11  ;;  %19242 = vmatpush3.bf16.msra.mxu0 %v20402_v17  ;;  %v20441_v11 = vld [vmem:[%s28265_s5 + $0xcd4] ss:$20 sps:$4 sm:$0xff]   ;;  %v20430_v17 = vld [vmem:[%s28265_s5 + $0xed8] ss:$20 sps:$4 sm:$0xff]  }
 0x4c3   : > { %v18996_v42 = vpop.f32.mrf.mxu0  ;;  %19243 = vmatprep.subr.bf16.mxu0 %v21869_v50  ;;  %v20444_v16 = vld [vmem:[%s28265_s5 + $0xe8c] ss:$20 sps:$4 sm:$0xff]  }
 0x4c4   : > { %v20442_v42 = vld [vmem:[%s28265_s5 + $0xe88] ss:$20 sps:$4 sm:$0xff]  }
 0x4c5   : > { %19032 = vmatpush3.bf16.msra.mxu1 %v20406_v63  ;;  %v20447_v63 = vld [vmem:[%s28265_s5 + $0xcac] ss:$20 sps:$4 sm:$0xff]  }
 0x4c6   : > { %19033 = vmatprep.subr.bf16.mxu1 %v20407_v21  ;;  %19244 = vmatpush3.bf16.msra.mxu0 %v20405_v7  ;;  %v20445_v21 = vld [vmem:[%s28265_s5 + $0xca8] ss:$20 sps:$4 sm:$0xff]   ;;  %v20453_v7 = vld [vmem:[%s28265_s5 + $0xc84] ss:$20 sps:$4 sm:$0xff]  }
 0x4c7   : > { %19245 = vmatprep.subr.bf16.mxu0 %v21869_v50 }
 0x4c9   : > { %19034 = vmatpush3.bf16.msra.mxu1 %v20409_v10 }
 0x4ca   : > { %19035 = vmatprep.subr.bf16.mxu1 %v20413_v52  ;;  %19246 = vmatpush3.bf16.msra.mxu0 %v20408_v5  ;;  %v20450_v52 = vld [vmem:[%s28265_s5 + $0xe64] ss:$20 sps:$4 sm:$0xff]  }
 0x4cb   : > { %8639 = vmatprep.subr.bf16.mxu0 %v20412_v25  ;;  %v20451_v25 = vld [vmem:[%s28265_s5 + $0xc80] ss:$20 sps:$4 sm:$0xff]  }
 0x4cc   : > { %v18970_v49 = vpop.f32.mrf.mxu1 }
 0x4cd   : > { %19036 = vmatpush3.bf16.msra.mxu1 %v20414_v44  ;;  %19248 = vmatmul.mubr.msk.bf16.vlgmr.msra.gmra.mxu0 %vm5329_vm6, %v24591_v24  ;;  %v20422_v24 = vld [vmem:[%s28265_s5 + $0xf2c] ss:$20 sps:$4 sm:$0xff]  }
 0x4ce   : > { %v18971_v30 = vpop.f32.mrf.mxu1  ;;  %19037 = vmatprep.subr.bf16.mxu1 %v20418_v27  ;;  %8640 = vmatpush1.bf16.msra.mxu0 %v20410_v33  ;;  %v20459_v27 = vld [vmem:[%s28265_s5 + $0xc5c] ss:$20 sps:$4 sm:$0xff]   ;;  %v20448_v33 = vld [vmem:[%s28265_s5 + $0xe60] ss:$20 sps:$4 sm:$0xff]  }
 0x4cf   : > { %8671 = vmatprep.mubr.bf16.mxu0 %v23982_v3  ;;  %v18972_v22 = vadd.f32 %v18971_v30, %v18970_v49  ;;  %8641 = vmatprep.subr.bf16.mxu0 %v20417_v26  ;;  %v20456_v26 = vld [vmem:[%s28265_s5 + $0x10bc] ss:$20 sps:$4 sm:$0xff]  }
 0x4d0   : > { %v18973_v46 = vpop.f32.mrf.mxu1 }
 0x4d1   : > { %19038 = vmatpush3.bf16.msra.mxu1 %v20419_v19  ;;  %v5654_v20 = vadd.f32 %v18994_v6, %v18972_v22  ;;  %v20439_v6 = vld [vmem:[%s28265_s5 + $0xcd0] ss:$20 sps:$4 sm:$0xff]   ;;  %v20457_v19 = vld [vmem:[%s28265_s5 + $0xc58] ss:$20 sps:$4 sm:$0xff]  }
 0x4d2   : > { %v18974_v47 = vpop.f32.mrf.mxu1  ;;  %19039 = vmatprep.subr.bf16.mxu1 %v20423_v12  ;;  %8642 = vmatpush1.bf16.msra.mxu0 %v20415_v32  ;;  %v20465_v12 = vld [vmem:[%s28265_s5 + $0xc34] ss:$20 sps:$4 sm:$0xff]   ;;  %v20454_v22 = vld [vmem:[%s28265_s5 + $0x10b8] ss:$20 sps:$4 sm:$0xff]   ;;  %v20463_v46 = vld [vmem:[%s28265_s5 + $0xc30] ss:$20 sps:$4 sm:$0xff]  }
 0x4d3   : > { %8643 = vmatprep.subr.bf16.mxu0 %v20422_v24  ;;  %v20462_v32 = vld [vmem:[%s28265_s5 + $0x1094] ss:$20 sps:$4 sm:$0xff]   ;;  %v20471_v24 = vld [vmem:[%s28265_s5 + $0xc0c] ss:$20 sps:$4 sm:$0xff]  }
 0x4d4   : > { %v20469_v47 = vld [vmem:[%s28265_s5 + $0xc08] ss:$20 sps:$4 sm:$0xff]  }
 0x4d5   : > { %19040 = vmatpush3.bf16.msra.mxu1 %v20424_v28  ;;  %v20460_v28 = vld [vmem:[%s28265_s5 + $0x1090] ss:$20 sps:$4 sm:$0xff]  }
 0x4d6   : > { %19041 = vmatprep.subr.bf16.mxu1 %v20428_v14  ;;  %8644 = vmatpush1.bf16.msra.mxu0 %v20420_v56  ;;  %v20477_v14 = vld [vmem:[%s28265_s5 + $0xbe4] ss:$20 sps:$4 sm:$0xff]   ;;  %v20466_v56 = vld [vmem:[%s28265_s5 + $0x1068] ss:$20 sps:$4 sm:$0xff]  }
 0x4d7   : > { %8645 = vmatprep.subr.bf16.mxu0 %v20427_v9  ;;  %v20474_v9 = vld [vmem:[%s28265_s5 + $0x1044] ss:$20 sps:$4 sm:$0xff]  }
 0x4d9   : > { %19042 = vmatpush3.bf16.msra.mxu1 %v20429_v29  ;;  %v20475_v29 = vld [vmem:[%s28265_s5 + $0xbe0] ss:$20 sps:$4 sm:$0xff]  }
 0x4da   : > { %8598 = vmatprep.subr.bf16.mxu1 %v20435_v58  ;;  %8646 = vmatpush1.bf16.msra.mxu0 %v20425_v15  ;;  %v20483_v58 = vld [vmem:[%s28265_s5 + $0xe3c] ss:$20 sps:$4 sm:$0xff]   ;;  %v20472_v15 = vld [vmem:[%s28265_s5 + $0x1040] ss:$20 sps:$4 sm:$0xff]  }
 0x4db   : > { %8647 = vmatprep.subr.bf16.mxu0 %v20432_v60  ;;  %v20480_v60 = vld [vmem:[%s28265_s5 + $0x101c] ss:$20 sps:$4 sm:$0xff]  }
 0x4dc   : > { %7312 = vmatmul.mubr.bf16.vlgmr.msra.gmra.mxu1 %v24642_v23  ;;  %v20436_v23 = vld [vmem:[%s28265_s5 + $0xeb0] ss:$20 sps:$4 sm:$0xff]  }
 0x4dd   : > { %8599 = vmatpush1.bf16.msra.mxu1 %v20433_v53  ;;  %8630 = vmatprep.mubr.bf16.mxu1 %v23919_v48  ;;  %v20481_v53 = vld [vmem:[%s28265_s5 + $0xe38] ss:$20 sps:$4 sm:$0xff]  }
 0x4de   : > { %8600 = vmatprep.subr.bf16.mxu1 %v20441_v11  ;;  %8648 = vmatpush1.bf16.msra.mxu0 %v20430_v17  ;;  %v20489_v11 = vld [vmem:[%s28265_s5 + $0xe14] ss:$20 sps:$4 sm:$0xff]   ;;  %v20478_v17 = vld [vmem:[%s28265_s5 + $0x1018] ss:$20 sps:$4 sm:$0xff]  }
 0x4df   : > { %8649 = vmatprep.subr.bf16.mxu0 %v20438_v34  ;;  %v20486_v34 = vld [vmem:[%s28265_s5 + $0xff4] ss:$20 sps:$4 sm:$0xff]  }
 0x4e1   : > { %8601 = vmatpush1.bf16.msra.mxu1 %v20439_v6  ;;  %v20487_v6 = vld [vmem:[%s28265_s5 + $0xe10] ss:$20 sps:$4 sm:$0xff]  }
 0x4e2   : > { %8602 = vmatprep.subr.bf16.mxu1 %v20447_v63  ;;  %8650 = vmatpush1.bf16.msra.mxu0 %v20436_v23  ;;  %v20495_v23 = vld [vmem:[%s28265_s5 + $0xdec] ss:$20 sps:$4 sm:$0xff]  }
 0x4e3   : > { %8651 = vmatprep.subr.bf16.mxu0 %v20444_v16  ;;  %v20484_v16 = vld [vmem:[%s28265_s5 + $0xff0] ss:$20 sps:$4 sm:$0xff]  }
 0x4e4   : > { %v5693_v10 = vpop.f32.mrf.mxu1 }
 0x4e5   : > { %v25058_v5 = vadd.f32 %v5693_v10, %v5654_v20  ;;  %8603 = vmatpush1.bf16.msra.mxu1 %v20445_v21  ;;  %v20468_v20 = vld [vmem:[%s28265_s5 + $0x106c] ss:$20 sps:$4 sm:$0xff]  }
 0x4e6   : > { %v19233_v44 = vpop.f32.mrf.mxu1  ;;  %8604 = vmatprep.subr.bf16.mxu1 %v20453_v7  ;;  %8652 = vmatpush1.bf16.msra.mxu0 %v20442_v42  ;;  %v20492_v7 = vld [vmem:[%s28265_s5 + $0xfcc] ss:$20 sps:$4 sm:$0xff]   ;;  %v20493_v42 = vld [vmem:[%s28265_s5 + $0xde8] ss:$20 sps:$4 sm:$0xff]  }
 0x4e7   : > { %8653 = vmatprep.subr.bf16.mxu0 %v20450_v52  ;;  %v20501_v52 = vld [vmem:[%s28265_s5 + $0xdc4] ss:$20 sps:$4 sm:$0xff]  }
 0x4e8   : > { %v5696_v49 = vpop.f32.mrf.mxu1 }
 0x4e9   : > { %8605 = vmatpush1.bf16.msra.mxu1 %v20451_v25  ;;  %v20490_v25 = vld [vmem:[%s28265_s5 + $0xfc8] ss:$20 sps:$4 sm:$0xff]  }
 0x4ea   : > { %v19234_v30 = vpop.f32.mrf.mxu1  ;;  %8606 = vmatprep.subr.bf16.mxu1 %v20459_v27  ;;  %8654 = vmatpush1.bf16.msra.mxu0 %v20448_v33  ;;  %v20498_v27 = vld [vmem:[%s28265_s5 + $0xfa4] ss:$20 sps:$4 sm:$0xff]   ;;  %v20499_v33 = vld [vmem:[%s28265_s5 + $0xdc0] ss:$20 sps:$4 sm:$0xff]   ;;  %v20507_v49 = vld [vmem:[%s28265_s5 + $0xd9c] ss:$20 sps:$4 sm:$0xff]  }
 0x4eb   : > { %8655 = vmatprep.subr.bf16.mxu0 %v20456_v26  ;;  %v20496_v26 = vld [vmem:[%s28265_s5 + $0xfa0] ss:$20 sps:$4 sm:$0xff]   ;;  %v20505_v30 = vld [vmem:[%s28265_s5 + $0xd98] ss:$20 sps:$4 sm:$0xff]  }
 0x4ed   : > { %8607 = vmatpush1.bf16.msra.mxu1 %v20457_v19  ;;  %v20504_v19 = vld [vmem:[%s28265_s5 + $0xd04] ss:$20 sps:$4 sm:$0xff]  }
 0x4ee   : > { %8608 = vmatprep.subr.bf16.mxu1 %v20465_v12  ;;  %8656 = vmatpush2.bf16.msra.mxu0 %v20454_v22  ;;  %v20513_v12 = vld [vmem:[%s28265_s5 + $0xd74] ss:$20 sps:$4 sm:$0xff]  }
 0x4ef   : > { %8657 = vmatprep.subr.bf16.mxu0 %v20462_v32  ;;  %v20502_v22 = vld [vmem:[%s28265_s5 + $0xd00] ss:$20 sps:$4 sm:$0xff]   ;;  %v20510_v32 = vld [vmem:[%s28265_s5 + $0xcdc] ss:$20 sps:$4 sm:$0xff]  }
 0x4f1   : > { %8609 = vmatpush1.bf16.msra.mxu1 %v20463_v46  ;;  %v20511_v46 = vld [vmem:[%s28265_s5 + $0xd70] ss:$20 sps:$4 sm:$0xff]  }
 0x4f2   : > { %8610 = vmatprep.subr.bf16.mxu1 %v20471_v24  ;;  %8658 = vmatpush2.bf16.msra.mxu0 %v20460_v28  ;;  %v20519_v24 = vld [vmem:[%s28265_s5 + $0xd4c] ss:$20 sps:$4 sm:$0xff]  }
 0x4f3   : > { %8659 = vmatprep.subr.bf16.mxu0 %v20468_v20  ;;  %v20508_v28 = vld [vmem:[%s28265_s5 + $0xcd8] ss:$20 sps:$4 sm:$0xff]   ;;  %v20516_v20 = vld [vmem:[%s28265_s5 + $0xcb4] ss:$20 sps:$4 sm:$0xff]  }
 0x4f5   : > { %8611 = vmatpush1.bf16.msra.mxu1 %v20469_v47  ;;  %v20517_v47 = vld [vmem:[%s28265_s5 + $0xd48] ss:$20 sps:$4 sm:$0xff]  }
 0x4f6   : > { %8612 = vmatprep.subr.bf16.mxu1 %v20477_v14  ;;  %8660 = vmatpush2.bf16.msra.mxu0 %v20466_v56  ;;  %v20525_v14 = vld [vmem:[%s28265_s5 + $0xd24] ss:$20 sps:$4 sm:$0xff]  }
 0x4f7   : > { %8661 = vmatprep.subr.bf16.mxu0 %v20474_v9  ;;  %v20514_v56 = vld [vmem:[%s28265_s5 + $0xcb0] ss:$20 sps:$4 sm:$0xff]   ;;  %v20522_v9 = vld [vmem:[%s28265_s5 + $0xc8c] ss:$20 sps:$4 sm:$0xff]  }
 0x4f9   : > { %8613 = vmatpush1.bf16.msra.mxu1 %v20475_v29  ;;  %v20523_v29 = vld [vmem:[%s28265_s5 + $0xd20] ss:$20 sps:$4 sm:$0xff]  }
 0x4fa   : > { %8614 = vmatprep.subr.bf16.mxu1 %v20483_v58  ;;  %8662 = vmatpush2.bf16.msra.mxu0 %v20472_v15  ;;  %v20531_v15 = vld [vmem:[%s28265_s5 + $0x11ac] ss:$20 sps:$4 sm:$0xff]  }
 0x4fb   : > { %8663 = vmatprep.subr.bf16.mxu0 %v20480_v60  ;;  %v20520_v60 = vld [vmem:[%s28265_s5 + $0xc88] ss:$20 sps:$4 sm:$0xff]  }
 0x4fd   : > { %8615 = vmatpush2.bf16.msra.mxu1 %v20481_v53  ;;  %v25135_v63 = vpop.f32.mrf.mxu0 }
 0x4fe   : > { %8616 = vmatprep.subr.bf16.mxu1 %v20489_v11  ;;  %8664 = vmatpush2.bf16.msra.mxu0 %v20478_v17  ;;  %v20528_v11 = vld [vmem:[%s28265_s5 + $0xc64] ss:$20 sps:$4 sm:$0xff]   ;;  %v20529_v17 = vld [vmem:[%s28265_s5 + $0x11a8] ss:$20 sps:$4 sm:$0xff]  }
 0x4ff   : > { %v25143_v21 = vpop.f32.mrf.mxu0  ;;  %8665 = vmatprep.subr.bf16.mxu0 %v20486_v34 }
 0x501   : > { %8617 = vmatpush2.bf16.msra.mxu1 %v20487_v6  ;;  %v7031_v10 = vpop.f32.mrf.mxu0  ;;  %v20537_v6 = vld [vmem:[%s28265_s5 + $0x1184] ss:$20 sps:$4 sm:$0xff]  }
 0x502   : > { %8618 = vmatprep.subr.bf16.mxu1 %v20495_v23  ;;  %8666 = vmatpush2.bf16.msra.mxu0 %v20484_v16  ;;  %v20526_v23 = vld [vmem:[%s28265_s5 + $0xc60] ss:$20 sps:$4 sm:$0xff]   ;;  %v20543_v10 = vld [vmem:[%s28265_s5 + $0x115c] ss:$20 sps:$4 sm:$0xff]  }
 0x503   : > { %v7032_v44 = vpop.f32.mrf.mxu0  ;;  %8667 = vmatprep.subr.bf16.mxu0 %v20492_v7  ;;  %v20534_v7 = vld [vmem:[%s28265_s5 + $0xc3c] ss:$20 sps:$4 sm:$0xff]  }
 0x504   : > { %v20540_v44 = vld [vmem:[%s28265_s5 + $0xc14] ss:$20 sps:$4 sm:$0xff]  }
 0x505   : > { %8619 = vmatpush2.bf16.msra.mxu1 %v20493_v42  ;;  %v20535_v42 = vld [vmem:[%s28265_s5 + $0x1180] ss:$20 sps:$4 sm:$0xff]  }
 0x506   : > { %8620 = vmatprep.subr.bf16.mxu1 %v20501_v52  ;;  %8668 = vmatpush2.bf16.msra.mxu0 %v20490_v25  ;;  %v20532_v52 = vld [vmem:[%s28265_s5 + $0xc38] ss:$20 sps:$4 sm:$0xff]   ;;  %v25248_v25 = vld [vmem:[%s28266_s6] sm:$0x1f] }
 0x507   : > { %8669 = vmatprep.subr.bf16.mxu0 %v20498_v27  ;;  %v20541_v27 = vld [vmem:[%s28265_s5 + $0x1158] ss:$20 sps:$4 sm:$0xff]  }
 0x509   : > { %8621 = vmatpush2.bf16.msra.mxu1 %v20499_v33  ;;  %v20549_v33 = vld [vmem:[%s28265_s5 + $0x1134] ss:$20 sps:$4 sm:$0xff]  }
 0x50a   : > { %8622 = vmatprep.subr.bf16.mxu1 %v20507_v49  ;;  %8670 = vmatpush2.bf16.msra.mxu0 %v20496_v26  ;;  %v5703_v49 = vrot.slane %v25248_v25, %v23003_v2  ;;  %v20538_v26 = vld [vmem:[%s28265_s5 + $0xc10] ss:$20 sps:$4 sm:$0xff]  }
 0x50b   : > { %8721 = vmatprep.subr.bf16.mxu0 %v20504_v19 }
 0x50d   : > { %8623 = vmatpush2.bf16.msra.mxu1 %v20505_v30  ;;  %8672 = vmatmul.mubr.bf16.vlgmr.msra.gmra.mxu0 %v23975_v39  ;;  %v20546_v30 = vld [vmem:[%s28265_s5 + $0xbec] ss:$20 sps:$4 sm:$0xff]  }
 0x50e   : > { %8624 = vmatprep.subr.bf16.mxu1 %v20513_v12  ;;  %8722 = vmatpush1.bf16.msra.mxu0 %v20502_v22  ;;  %v5707_v12 = vrot.slane %v25248_v25, %v23019_v62 }
 0x50f   : > { %8753 = vmatprep.mubr.bf16.mxu0 %v23919_v48  ;;  %8723 = vmatprep.subr.bf16.mxu0 %v20510_v32  ;;  %v20547_v32 = vld [vmem:[%s28265_s5 + $0x1130] ss:$20 sps:$4 sm:$0xff]  }
 0x511   : > { %8625 = vmatpush2.bf16.msra.mxu1 %v20511_v46 }
 0x512   : > { %8626 = vmatprep.subr.bf16.mxu1 %v20519_v24  ;;  %8724 = vmatpush1.bf16.msra.mxu0 %v20508_v28  ;;  %v20555_v24 = vld [vmem:[%s28265_s5 + $0x110c] ss:$20 sps:$4 sm:$0xff]   ;;  %v5725_v28 = vadd.f32 %v5703_v49, %v24680_v40  ;;  %v20553_v40 = vld [vmem:[%s28265_s5 + $0x1108] ss:$20 sps:$4 sm:$0xff]  }
 0x513   : > { %8725 = vmatprep.subr.bf16.mxu0 %v20516_v20  ;;  %v20585_v49 = vld [vmem:[%s28265_s5 + $0xf0c] ss:$20 sps:$4 sm:$0xff]  }
 0x515   : > { %8627 = vmatpush2.bf16.msra.mxu1 %v20517_v47  ;;  %v7109_v58 = vpop.f32.mrf.mxu0 }
 0x516   : > { %8628 = vmatprep.subr.bf16.mxu1 %v20525_v14  ;;  %8726 = vmatpush1.bf16.msra.mxu0 %v20514_v56  ;;  %v20552_v56 = vld [vmem:[%s28265_s5 + $0xe44] ss:$20 sps:$4 sm:$0xff]  }
 0x517   : > { %v7111_v53 = vpop.f32.mrf.mxu0  ;;  %8727 = vmatprep.subr.bf16.mxu0 %v20522_v9  ;;  %v5726_v9 = vadd.f32 %v5707_v12, %v24689_v54  ;;  %v20591_v12 = vld [vmem:[%s28265_s5 + $0xee4] ss:$20 sps:$4 sm:$0xff]  }
 0x519   : > { %8629 = vmatpush2.bf16.msra.mxu1 %v20523_v29  ;;  %v7113_v34 = vpop.f32.mrf.mxu0 }
 0x51a   : > { %8684 = vmatprep.subr.bf16.mxu1 %v20531_v15  ;;  %8728 = vmatpush1.bf16.msra.mxu0 %v20520_v60  ;;  %v20561_v15 = vld [vmem:[%s28265_s5 + $0x10e4] ss:$20 sps:$4 sm:$0xff]   ;;  %v20550_v60 = vld [vmem:[%s28265_s5 + $0xe40] ss:$20 sps:$4 sm:$0xff]  }
 0x51b   : > { %v7114_v16 = vpop.f32.mrf.mxu0  ;;  %8729 = vmatprep.subr.bf16.mxu0 %v20528_v11  ;;  %v20559_v11 = vld [vmem:[%s28265_s5 + $0x10e0] ss:$20 sps:$4 sm:$0xff]   ;;  %v20556_v34 = vld [vmem:[%s28265_s5 + $0xe18] ss:$20 sps:$4 sm:$0xff]  }
 0x51c   : > { %8631 = vmatmul.mubr.bf16.vlgmr.msra.gmra.mxu1 %v23915_v37  ;;  %v20573_v16 = vld [vmem:[%s28265_s5 + $0xf5c] ss:$20 sps:$4 sm:$0xff]  }
 0x51d   : > { %8685 = vmatpush1.bf16.msra.mxu1 %v20529_v17  ;;  %8712 = vmatprep.mubr.bf16.mxu1 %v21868_v1  ;;  %v20567_v17 = vld [vmem:[%s28265_s5 + $0xf84] ss:$20 sps:$4 sm:$0xff]  }
 0x51e   : > { %8686 = vmatprep.subr.bf16.mxu1 %v20537_v6  ;;  %8730 = vmatpush1.bf16.msra.mxu0 %v20526_v23  ;;  %v20564_v6 = vld [vmem:[%s28265_s5 + $0xdf4] ss:$20 sps:$4 sm:$0xff]  }
 0x51f   : > { %8731 = vmatprep.subr.bf16.mxu0 %v20534_v7  ;;  %v20565_v23 = vld [vmem:[%s28265_s5 + $0xf80] ss:$20 sps:$4 sm:$0xff]   ;;  %v20562_v7 = vld [vmem:[%s28265_s5 + $0xdf0] ss:$20 sps:$4 sm:$0xff]  }
 0x521   : > { %8687 = vmatpush1.bf16.msra.mxu1 %v20535_v42  ;;  %v20570_v42 = vld [vmem:[%s28265_s5 + $0xdcc] ss:$20 sps:$4 sm:$0xff]  }
 0x522   : > { %8688 = vmatprep.subr.bf16.mxu1 %v20543_v10  ;;  %8732 = vmatpush1.bf16.msra.mxu0 %v20532_v52  ;;  %v20571_v10 = vld [vmem:[%s28265_s5 + $0xf58] ss:$20 sps:$4 sm:$0xff]   ;;  %v20579_v52 = vld [vmem:[%s28265_s5 + $0xf34] ss:$20 sps:$4 sm:$0xff]  }
 0x523   : > { %8733 = vmatprep.subr.bf16.mxu0 %v20540_v44  ;;  %v20568_v44 = vld [vmem:[%s28265_s5 + $0xdc8] ss:$20 sps:$4 sm:$0xff]  }
 0x524   : > { %v7068_v19 = vpop.f32.mrf.mxu1 }
 0x525   : > { %v7069_v22 = vadd.f32 %v7068_v19, %v25135_v63  ;;  %8689 = vmatpush1.bf16.msra.mxu1 %v20541_v27  ;;  %v20544_v63 = vld [vmem:[%s28265_s5 + $0xbe8] ss:$20 sps:$4 sm:$0xff]   ;;  %v20576_v27 = vld [vmem:[%s28265_s5 + $0xda4] ss:$20 sps:$4 sm:$0xff]  }
 0x526   : > { %v7070_v46 = vpop.f32.mrf.mxu1  ;;  %8690 = vmatprep.subr.bf16.mxu1 %v20549_v33  ;;  %8734 = vmatpush1.bf16.msra.mxu0 %v20538_v26  ;;  %v20577_v33 = vld [vmem:[%s28265_s5 + $0xf30] ss:$20 sps:$4 sm:$0xff]   ;;  %v20574_v26 = vld [vmem:[%s28265_s5 + $0xda0] ss:$20 sps:$4 sm:$0xff]  }
 0x527   : > { %v7110_v20 = vadd.f32 %v7109_v58, %v7069_v22  ;;  %v7071_v47 = vadd.f32 %v7070_v46, %v25143_v21  ;;  %8735 = vmatprep.subr.bf16.mxu0 %v20546_v30  ;;  %v20582_v19 = vld [vmem:[%s28265_s5 + $0xd7c] ss:$20 sps:$4 sm:$0xff]   ;;  %v20580_v22 = vld [vmem:[%s28265_s5 + $0xd78] ss:$20 sps:$4 sm:$0xff]   ;;  %v20589_v46 = vld [vmem:[%s28265_s5 + $0xee0] ss:$20 sps:$4 sm:$0xff]  }
 0x528   : > { %v7072_v14 = vpop.f32.mrf.mxu1  ;;  %v20583_v30 = vld [vmem:[%s28265_s5 + $0xf08] ss:$20 sps:$4 sm:$0xff]  }
 0x529   : > { %v7112_v29 = vadd.f32 %v7111_v53, %v7071_v47  ;;  %8691 = vmatpush1.bf16.msra.mxu1 %v20547_v32  ;;  %v25288_v58 = vadd.f32 %v7110_v20, %v5725_v28  ;;  %v20558_v53 = vld [vmem:[%s28265_s5 + $0xe1c] ss:$20 sps:$4 sm:$0xff]   ;;  %v20588_v32 = vld [vmem:[%s28265_s5 + $0xd54] ss:$20 sps:$4 sm:$0xff]   ;;  %v20594_v20 = vld [vmem:[%s28265_s5 + $0xd2c] ss:$20 sps:$4 sm:$0xff]  }
 0x52a   : > { %v7073_v21 = vpop.f32.mrf.mxu1  ;;  %8692 = vmatprep.subr.bf16.mxu1 %v20555_v24  ;;  %8736 = vmatpush1.bf16.msra.mxu0 %v20544_v63  ;;  %v20597_v24 = vld [vmem:[%s28265_s5 + $0xebc] ss:$20 sps:$4 sm:$0xff]   ;;  %v20595_v47 = vld [vmem:[%s28265_s5 + $0xeb8] ss:$20 sps:$4 sm:$0xff]   ;;  %v20603_v63 = vld [vmem:[%s28265_s5 + $0xe94] ss:$20 sps:$4 sm:$0xff]  }
 0x52b   : > { %v25296_v54 = vadd.f32 %v7112_v29, %v5726_v9  ;;  %8737 = vmatprep.subr.bf16.mxu0 %v20552_v56  ;;  %v20586_v28 = vld [vmem:[%s28265_s5 + $0xd50] ss:$20 sps:$4 sm:$0xff]   ;;  %v20592_v14 = vld [vmem:[%s28265_s5 + $0xd28] ss:$20 sps:$4 sm:$0xff]   ;;  %v20609_v29 = vld [vmem:[%s28265_s5 + $0xe6c] ss:$20 sps:$4 sm:$0xff]  }
 0x52c   : > { %v20600_v56 = vld [vmem:[%s28265_s5 + $0x11b4] ss:$20 sps:$4 sm:$0xff]   ;;  %v20601_v9 = vld [vmem:[%s28265_s5 + $0xe90] ss:$20 sps:$4 sm:$0xff]   ;;  %v20606_v21 = vld [vmem:[%s28265_s5 + $0x118c] ss:$20 sps:$4 sm:$0xff]  }
 0x52d   : > { %8693 = vmatpush1.bf16.msra.mxu1 %v20553_v40  ;;  %v20598_v40 = vld [vmem:[%s28265_s5 + $0x11b0] ss:$20 sps:$4 sm:$0xff]  }
 0x52e   : > { %8694 = vmatprep.subr.bf16.mxu1 %v20561_v15  ;;  %8738 = vmatpush2.bf16.msra.mxu0 %v20550_v60  ;;  %v20607_v15 = vld [vmem:[%s28265_s5 + $0xe68] ss:$20 sps:$4 sm:$0xff]   ;;  %v20615_v60 = vld [vmem:[%s28265_s5 + $0x10c4] ss:$20 sps:$4 sm:$0xff]  }
 0x52f   : > { %8739 = vmatprep.subr.bf16.mxu0 %v20558_v53  ;;  %v20604_v53 = vld [vmem:[%s28265_s5 + $0x1188] ss:$20 sps:$4 sm:$0xff]  }
 0x531   : > { %8695 = vmatpush1.bf16.msra.mxu1 %v20559_v11  ;;  %v20612_v11 = vld [vmem:[%s28265_s5 + $0x1164] ss:$20 sps:$4 sm:$0xff]  }
 0x532   : > { %8762 = vmatprep.subr.bf16.mxu1 %v20567_v17  ;;  %8740 = vmatpush2.bf16.msra.mxu0 %v20556_v34  ;;  %v20613_v17 = vld [vmem:[%s28265_s5 + $0x10c0] ss:$20 sps:$4 sm:$0xff]   ;;  %v20621_v34 = vld [vmem:[%s28265_s5 + $0x109c] ss:$20 sps:$4 sm:$0xff]  }
 0x533   : > { %8741 = vmatprep.subr.bf16.mxu0 %v20564_v6  ;;  %v20610_v6 = vld [vmem:[%s28265_s5 + $0x1160] ss:$20 sps:$4 sm:$0xff]  }
 0x534   : > { %17417 = vmatmul.mubr.msk.bf16.vlgmr.msra.gmra.mxu1 %vm5329_vm6, %v24069_v13 }
 0x535   : > { %8763 = vmatpush1.bf16.msra.mxu1 %v20565_v23  ;;  %8794 = vmatprep.mubr.bf16.mxu1 %v23982_v3  ;;  %v20618_v23 = vld [vmem:[%s28265_s5 + $0x113c] ss:$20 sps:$4 sm:$0xff]  }
 0x536   : > { %8764 = vmatprep.subr.bf16.mxu1 %v20573_v16  ;;  %8742 = vmatpush2.bf16.msra.mxu0 %v20562_v7  ;;  %v20619_v16 = vld [vmem:[%s28265_s5 + $0x1098] ss:$20 sps:$4 sm:$0xff]  }
 0x537   : > { %8743 = vmatprep.subr.bf16.mxu0 %v20570_v42  ;;  %v20627_v42 = vld [vmem:[%s28265_s5 + $0x1074] ss:$20 sps:$4 sm:$0xff]  }
 0x539   : > { %8765 = vmatpush1.bf16.msra.mxu1 %v20571_v10  ;;  %v20616_v10 = vld [vmem:[%s28265_s5 + $0x1138] ss:$20 sps:$4 sm:$0xff]  }
 0x53a   : > { %8766 = vmatprep.subr.bf16.mxu1 %v20579_v52  ;;  %8744 = vmatpush2.bf16.msra.mxu0 %v20568_v44  ;;  %v20624_v44 = vld [vmem:[%s28265_s5 + $0x1114] ss:$20 sps:$4 sm:$0xff]  }
 0x53b   : > { %8745 = vmatprep.subr.bf16.mxu0 %v20576_v27  ;;  %v20625_v27 = vld [vmem:[%s28265_s5 + $0x1070] ss:$20 sps:$4 sm:$0xff]  }
 0x53d   : > { %8767 = vmatpush1.bf16.msra.mxu1 %v20577_v33 }
 0x53e   : > { %8768 = vmatprep.subr.bf16.mxu1 %v20585_v49  ;;  %8746 = vmatpush2.bf16.msra.mxu0 %v20574_v26  ;;  %v20633_v49 = vld [vmem:[%s28265_s5 + $0x104c] ss:$20 sps:$4 sm:$0xff]   ;;  %v20622_v26 = vld [vmem:[%s28265_s5 + $0x1110] ss:$20 sps:$4 sm:$0xff]  }
 0x53f   : > { %8747 = vmatprep.subr.bf16.mxu0 %v20582_v19 }
 0x541   : > { %8769 = vmatpush1.bf16.msra.mxu1 %v20583_v30  ;;  %v20630_v30 = vld [vmem:[%s28265_s5 + $0x10ec] ss:$20 sps:$4 sm:$0xff]  }
 0x542   : > { %8770 = vmatprep.subr.bf16.mxu1 %v20591_v12  ;;  %8748 = vmatpush2.bf16.msra.mxu0 %v20580_v22  ;;  %v20631_v12 = vld [vmem:[%s28265_s5 + $0x1048] ss:$20 sps:$4 sm:$0xff]   ;;  %v20637_v22 = vld [vmem:[%s28265_s5 + $0x1024] ss:$20 sps:$4 sm:$0xff]  }
 0x543   : > { %8749 = vmatprep.subr.bf16.mxu0 %v20588_v32  ;;  %v20628_v32 = vld [vmem:[%s28265_s5 + $0x10e8] ss:$20 sps:$4 sm:$0xff]  }
 0x545   : > { %8771 = vmatpush1.bf16.msra.mxu1 %v20589_v46  ;;  %v20634_v46 = vld [vmem:[%s28265_s5 + $0x10c8] ss:$20 sps:$4 sm:$0xff]  }
 0x546   : > { %8772 = vmatprep.subr.bf16.mxu1 %v20597_v24  ;;  %8750 = vmatpush2.bf16.msra.mxu0 %v20586_v28  ;;  %v20635_v24 = vld [vmem:[%s28265_s5 + $0x1020] ss:$20 sps:$4 sm:$0xff]   ;;  %v20642_v28 = vld [vmem:[%s28265_s5 + $0xffc] ss:$20 sps:$4 sm:$0xff]  }
 0x547   : > { %8751 = vmatprep.subr.bf16.mxu0 %v20594_v20  ;;  %v20638_v20 = vld [vmem:[%s28265_s5 + $0xf88] ss:$20 sps:$4 sm:$0xff]  }
 0x549   : > { %8773 = vmatpush1.bf16.msra.mxu1 %v20595_v47 }
 0x54a   : > { %8774 = vmatprep.subr.bf16.mxu1 %v20603_v63  ;;  %8752 = vmatpush2.bf16.msra.mxu0 %v20592_v14  ;;  %v20639_v63 = vld [vmem:[%s28265_s5 + $0x10a0] ss:$20 sps:$4 sm:$0xff]  }
 0x54b   : > { %8807 = vmatprep.subr.bf16.mxu0 %v20600_v56  ;;  %v20640_v56 = vld [vmem:[%s28265_s5 + $0xff8] ss:$20 sps:$4 sm:$0xff]  }
 0x54d   : > { %8775 = vmatpush1.bf16.msra.mxu1 %v20601_v9  ;;  %8754 = vmatmul.mubr.bf16.vlgmr.msra.gmra.mxu0 %v23915_v37 }
 0x54e   : > { %8776 = vmatprep.subr.bf16.mxu1 %v20609_v29  ;;  %8808 = vmatpush1.bf16.msra.mxu0 %v20598_v40  ;;  %v20647_v29 = vld [vmem:[%s28265_s5 + $0xfd4] ss:$20 sps:$4 sm:$0xff]  }
 0x54f   : > { %8835 = vmatprep.mubr.bf16.mxu0 %v21868_v1  ;;  %8809 = vmatprep.subr.bf16.mxu0 %v20606_v21  ;;  %v20643_v21 = vld [vmem:[%s28265_s5 + $0xf60] ss:$20 sps:$4 sm:$0xff]  }
 0x551   : > { %8777 = vmatpush1.bf16.msra.mxu1 %v20607_v15 }
 0x552   : > { %8778 = vmatprep.subr.bf16.mxu1 %v20615_v60  ;;  %8810 = vmatpush1.bf16.msra.mxu0 %v20604_v53  ;;  %v20644_v60 = vld [vmem:[%s28265_s5 + $0x1078] ss:$20 sps:$4 sm:$0xff]   ;;  %v20645_v53 = vld [vmem:[%s28265_s5 + $0xfd0] ss:$20 sps:$4 sm:$0xff]  }
 0x553   : > { %8811 = vmatprep.subr.bf16.mxu0 %v20612_v11 }
 0x555   : > { %8779 = vmatpush2.bf16.msra.mxu1 %v20613_v17  ;;  %v7191_v7 = vpop.f32.mrf.mxu0  ;;  %v20648_v17 = vld [vmem:[%s28265_s5 + $0xf38] ss:$20 sps:$4 sm:$0xff]  }
 0x556   : > { %8780 = vmatprep.subr.bf16.mxu1 %v20621_v34  ;;  %8812 = vmatpush1.bf16.msra.mxu0 %v20610_v6  ;;  %v20649_v34 = vld [vmem:[%s28265_s5 + $0x1050] ss:$20 sps:$4 sm:$0xff]   ;;  %v20650_v6 = vld [vmem:[%s28265_s5 + $0xfa8] ss:$20 sps:$4 sm:$0xff]  }
 0x557   : > { %v7193_v52 = vpop.f32.mrf.mxu0  ;;  %8813 = vmatprep.subr.bf16.mxu0 %v20618_v23  ;;  %v20655_v23 = vld [vmem:[%s28265_s5 + $0xe48] ss:$20 sps:$4 sm:$0xff]  }
 0x559   : > { %8781 = vmatpush2.bf16.msra.mxu1 %v20619_v16  ;;  %v7195_v33 = vpop.f32.mrf.mxu0  ;;  %v20653_v16 = vld [vmem:[%s28265_s5 + $0xf10] ss:$20 sps:$4 sm:$0xff]  }
 0x55a   : > { %8782 = vmatprep.subr.bf16.mxu1 %v20627_v42  ;;  %8814 = vmatpush1.bf16.msra.mxu0 %v20616_v10  ;;  %v20657_v42 = vld [vmem:[%s28265_s5 + $0xd08] ss:$20 sps:$4 sm:$0xff]   ;;  %v20659_v10 = vld [vmem:[%s28265_s5 + $0xe20] ss:$20 sps:$4 sm:$0xff]  }
 0x55b   : > { %v7196_v19 = vpop.f32.mrf.mxu0  ;;  %8815 = vmatprep.subr.bf16.mxu0 %v20624_v44  ;;  %v20658_v44 = vld [vmem:[%s28265_s5 + $0x1000] ss:$20 sps:$4 sm:$0xff]  }
 0x55d   : > { %8783 = vmatpush2.bf16.msra.mxu1 %v20625_v27  ;;  %v20661_v27 = vld [vmem:[%s28265_s5 + $0xce0] ss:$20 sps:$4 sm:$0xff]  }
 0x55e   : > { %8784 = vmatprep.subr.bf16.mxu1 %v20633_v49  ;;  %8816 = vmatpush1.bf16.msra.mxu0 %v20622_v26  ;;  %v20663_v49 = vld [vmem:[%s28265_s5 + $0xdf8] ss:$20 sps:$4 sm:$0xff]   ;;  %v20660_v26 = vld [vmem:[%s28265_s5 + $0xec0] ss:$20 sps:$4 sm:$0xff]  }
 0x55f   : > { %8817 = vmatprep.subr.bf16.mxu0 %v20630_v30 }
 0x561   : > { %8785 = vmatpush2.bf16.msra.mxu1 %v20631_v12  ;;  %v5711_v12 = vrot.slane %v25248_v25, %v1054_v8 }
 0x562   : > { %8786 = vmatprep.subr.bf16.mxu1 %v20637_v22  ;;  %8818 = vmatpush1.bf16.msra.mxu0 %v20628_v32  ;;  %v20665_v22 = vld [vmem:[%s28265_s5 + $0xcb8] ss:$20 sps:$4 sm:$0xff]  }
 0x563   : > { %19078 = vmatprep.subr.bf16.mxu0 %v20634_v46  ;;  %v20667_v46 = vld [vmem:[%s28265_s5 + $0xdd0] ss:$20 sps:$4 sm:$0xff]  }
 0x564   : > { %v7150_v47 = vpop.f32.mrf.mxu1 }
 0x565   : > { %v25474_v14 = vadd.f32 %v7191_v7, %v7150_v47  ;;  %8787 = vmatpush2.bf16.msra.mxu1 %v20635_v24  ;;  %17418 = vmatmul.mubr.msk.bf16.vlgmr.msra.gmra.mxu0 %vm5329_vm6, %v24069_v13  ;;  %v20654_v7 = vld [vmem:[%s28265_s5 + $0x1028] ss:$20 sps:$4 sm:$0xff]   ;;  %v20664_v24 = vld [vmem:[%s28265_s5 + $0xe98] ss:$20 sps:$4 sm:$0xff]   ;;  %v20666_v47 = vld [vmem:[%s28265_s5 + $0xfb0] ss:$20 sps:$4 sm:$0xff]  }
 0x566   : > { %v7152_v9 = vpop.f32.mrf.mxu1  ;;  %8788 = vmatprep.subr.bf16.mxu1 %v20642_v28  ;;  %19079 = vmatpush3.bf16.msra.mxu0 %v20638_v20  ;;  %v5715_v28 = vrot.slane %v25248_v25, %v1058_v59 }
 0x567   : > { %8916 = vmatprep.mubr.bf16.mxu0 %v23982_v3  ;;  %v25485_v40 = vadd.f32 %v7193_v52, %v7152_v9  ;;  %19080 = vmatprep.subr.bf16.mxu0 %v20639_v63  ;;  %v20652_v3 = vld [vmem:[%s28265_s5 + $0xfac] ss:$20 sps:$4 sm:$0xff]   ;;  %v20656_v52 = vld [vmem:[%s28265_s5 + $0xee8] ss:$20 sps:$4 sm:$0xff]   ;;  %v5727_v63 = vadd.f32 %v5711_v12, %v24892_v41  ;;  %v20669_v9 = vld [vmem:[%s28265_s5 + $0xc90] ss:$20 sps:$4 sm:$0xff]  }
 0x568   : > { %v7154_v15 = vpop.f32.mrf.mxu1  ;;  %v5728_v41 = vadd.f32 %v5715_v28, %v24898_v43  ;;  %v20692_v12 = vld [vmem:[%s28265_s5 + $0x124c] ss:$20 sps:$4 sm:$0xff]   ;;  %v20696_v28 = vld [vmem:[%s28265_s5 + $0x1224] ss:$20 sps:$4 sm:$0xff]  }
 0x569   : > { %8789 = vmatpush2.bf16.msra.mxu1 %v20640_v56 }
 0x56a   : > { %v7155_v11 = vpop.f32.mrf.mxu1  ;;  %8790 = vmatprep.subr.bf16.mxu1 %v20647_v29  ;;  %19081 = vmatpush3.bf16.msra.mxu0 %v20643_v21  ;;  %v4108_v29 = vpack.c.bf16 %v23898_v57, %v23898_v57  ;;  %v20673_v21 = vld [vmem:[%s28265_s5 + $0xda8] ss:$20 sps:$4 sm:$0xff]   ;;  %v20672_v57 = vld [vmem:[%s28265_s5 + $0x12ec] ss:$20 sps:$4 sm:$0xff]  }
 0x56b   : > { %19082 = vmatprep.subr.bf16.mxu0 %v20644_v60  ;;  %v20668_v60 = vld [vmem:[%s28265_s5 + $0xe70] ss:$20 sps:$4 sm:$0xff]  }
 0x56c   : > { %v9213_v43 = vrot.slane %v4108_v29, 5  ;;  %v20705_v29 = vld [vmem:[%s28265_s5 + $0x1140] ss:$20 sps:$4 sm:$0xff]  }
 0x56d   : > { %8791 = vmatpush2.bf16.msra.mxu1 %v20645_v53 }
 0x56e   : > { %8792 = vmatprep.subr.bf16.mxu1 %v20652_v3  ;;  %19083 = vmatpush3.bf16.msra.mxu0 %v20648_v17  ;;  %v20674_v3 = vld [vmem:[%s28265_s5 + $0xc68] ss:$20 sps:$4 sm:$0xff]  }
 0x56f   : > { %19084 = vmatprep.subr.bf16.mxu0 %v20649_v34  ;;  %v20678_v34 = vld [vmem:[%s28265_s5 + $0xd80] ss:$20 sps:$4 sm:$0xff]  }
 0x571   : > { %8793 = vmatpush2.bf16.msra.mxu1 %v20650_v6  ;;  %v20670_v6 = vld [vmem:[%s28265_s5 + $0x12e8] ss:$20 sps:$4 sm:$0xff]  }
 0x572   : > { %19056 = vmatprep.subr.bf16.mxu1 %v20655_v23  ;;  %19085 = vmatpush3.bf16.msra.mxu0 %v20653_v16  ;;  %v20677_v23 = vld [vmem:[%s28265_s5 + $0x12c4] ss:$20 sps:$4 sm:$0xff]   ;;  %v20679_v16 = vld [vmem:[%s28265_s5 + $0xc40] ss:$20 sps:$4 sm:$0xff]  }
 0x573   : > { %19086 = vmatprep.subr.bf16.mxu0 %v20654_v7 }
 0x574   : > { %8795 = vmatmul.mubr.bf16.vlgmr.msra.gmra.mxu1 %v23975_v39 }
 0x575   : > { %19057 = vmatpush3.bf16.msra.mxu1 %v20657_v42  ;;  %8876 = vmatprep.mubr.bf16.mxu1 %v23919_v48  ;;  %v19021_v33 = vpop.f32.mrf.mxu0  ;;  %v20662_v48 = vld [vmem:[%s28265_s5 + $0xfd8] ss:$20 sps:$4 sm:$0xff]  }
 0x576   : > { %19058 = vmatprep.subr.bf16.mxu1 %v20659_v10  ;;  %19087 = vmatpush3.bf16.msra.mxu0 %v20656_v52  ;;  %v20683_v42 = vld [vmem:[%s28265_s5 + $0xd58] ss:$20 sps:$4 sm:$0xff]   ;;  %v20675_v10 = vld [vmem:[%s28265_s5 + $0x12c0] ss:$20 sps:$4 sm:$0xff]  }
 0x577   : > { %v19022_v19 = vpop.f32.mrf.mxu0  ;;  %19088 = vmatprep.subr.bf16.mxu0 %v20658_v44  ;;  %v20684_v52 = vld [vmem:[%s28265_s5 + $0xc18] ss:$20 sps:$4 sm:$0xff]   ;;  %v20688_v44 = vld [vmem:[%s28265_s5 + $0xd30] ss:$20 sps:$4 sm:$0xff]  }
 0x578   : > { %v25543_v30 = vadd.f32 %v19022_v19, %v19021_v33  ;;  %v20687_v33 = vld [vmem:[%s28265_s5 + $0x1274] ss:$20 sps:$4 sm:$0xff]   ;;  %v20685_v19 = vld [vmem:[%s28265_s5 + $0x1270] ss:$20 sps:$4 sm:$0xff]  }
 0x579   : > { %19059 = vmatpush3.bf16.msra.mxu1 %v20661_v27  ;;  %v19024_v32 = vpop.f32.mrf.mxu0  ;;  %v20680_v27 = vld [vmem:[%s28265_s5 + $0x1298] ss:$20 sps:$4 sm:$0xff]  }
 0x57a   : > { %19060 = vmatprep.subr.bf16.mxu1 %v20663_v49  ;;  %19089 = vmatpush3.bf16.msra.mxu0 %v20660_v26  ;;  %v20689_v49 = vld [vmem:[%s28265_s5 + $0xbf0] ss:$20 sps:$4 sm:$0xff]  }
 0x57b   : > { %v19025_v8 = vpop.f32.mrf.mxu0  ;;  %19090 = vmatprep.subr.bf16.mxu0 %v20662_v48 }
 0x57c   : > { %v7232_v20 = vpop.f32.mrf.mxu1  ;;  %v20697_v8 = vld [vmem:[%s28265_s5 + $0x1190] ss:$20 sps:$4 sm:$0xff]  }
 0x57d   : > { %v7233_v56 = vadd.f32 %v7232_v20, %v25474_v14  ;;  %19061 = vmatpush3.bf16.msra.mxu1 %v20665_v22  ;;  %v20693_v22 = vld [vmem:[%s28265_s5 + $0x11b8] ss:$20 sps:$4 sm:$0xff]   ;;  %v20694_v20 = vld [vmem:[%s28265_s5 + $0x1220] ss:$20 sps:$4 sm:$0xff]  }
 0x57e   : > { %v7234_v59 = vpop.f32.mrf.mxu1  ;;  %19062 = vmatprep.subr.bf16.mxu1 %v20667_v46  ;;  %19091 = vmatpush3.bf16.msra.mxu0 %v20664_v24  ;;  %v20690_v46 = vld [vmem:[%s28265_s5 + $0x1248] ss:$20 sps:$4 sm:$0xff]  }
 0x57f   : > { %v25573_v15 = vadd.f32 %v7233_v56, %v5727_v63  ;;  %v7235_v14 = vadd.f32 %v7234_v59, %v25485_v40  ;;  %19092 = vmatprep.subr.bf16.mxu0 %v20666_v47  ;;  %v9212_v40 = vrot.slane %v23884_v55, 5  ;;  %v20701_v47 = vld [vmem:[%s28265_s5 + $0x1168] ss:$20 sps:$4 sm:$0xff]   ;;  %v20698_v63 = vld [vmem:[%s28265_s5 + $0x11f8] ss:$20 sps:$4 sm:$0xff]  }
 0x580   : > { %v7236_v53 = vpop.f32.mrf.mxu1 }
 0x581   : > { %v25583_v11 = vadd.f32 %v7235_v14, %v5728_v41  ;;  %19063 = vmatpush3.bf16.msra.mxu1 %v20669_v9  ;;  %v25603_v7 = vsel %vm9208_vm8, %v9212_v40, %v9213_v43  ;;  %v20704_v9 = vld [vmem:[%s28265_s5 + $0x11d4] ss:$20 sps:$4 sm:$0xff]   ;;  %v20702_v14 = vld [vmem:[%s28265_s5 + $0x11d0] ss:$20 sps:$4 sm:$0xff]   ;;  %v20708_v53 = vld [vmem:[%s28265_s5 + $0x142c] ss:$20 sps:$4 sm:$0xff]  }
 0x582   : > { %v7237_v17 = vpop.f32.mrf.mxu1  ;;  %19064 = vmatprep.subr.bf16.mxu1 %v20673_v21  ;;  %19093 = vmatpush3.bf16.msra.mxu0 %v20668_v60  ;;  %v5719_v21 = vrot.slane %v25248_v25, %v1062_v61  ;;  %v20706_v43 = vld [vmem:[%s28265_s5 + $0x1428] ss:$20 sps:$4 sm:$0xff]   ;;  %v20713_v40 = vld [vmem:[%s28265_s5 + $0x10f0] ss:$20 sps:$4 sm:$0xff]  }
 0x583   : > { %10219 = vmatprep.subr.bf16.mxu0 %v20672_v57  ;;  %v4110_v17 = vpack.c.bf16 %v23956_v38, %v23956_v38  ;;  %v20710_v38 = vld [vmem:[%s28265_s5 + $0x1400] ss:$20 sps:$4 sm:$0xff]  }
 0x584   : > { %v5729_v25 = vadd.f32 %v5719_v21, %v25058_v5  ;;  %v20753_v21 = vld [vmem:[%s28265_s5 + $0x1478] ss:$20 sps:$4 sm:$0xff]  }
 0x585   : > { %19065 = vmatpush3.bf16.msra.mxu1 %v20674_v3  ;;  %8917 = vmatmul.mubr.bf16.vlgmr.msra.gmra.mxu0 %v23975_v39  ;;  %v20682_v39 = vld [vmem:[%s28265_s5 + $0x129c] ss:$20 sps:$4 sm:$0xff]  }
 0x586   : > { %19066 = vmatprep.subr.bf16.mxu1 %v20678_v34  ;;  %10220 = vmatpush1.bf16.msra.mxu0 %v20670_v6  ;;  %v20719_v34 = vld [vmem:[%s28265_s5 + $0x156c] ss:$20 sps:$4 sm:$0xff]   ;;  %v9219_v6 = vrot.slane %v4110_v17, 5  ;;  %v20762_v17 = vld [vmem:[%s28265_s5 + $0x1748] ss:$20 sps:$4 sm:$0xff]  }
 0x587   : > { %10251 = vmatprep.mubr.bf16.mxu0 %v25603_v7  ;;  %10221 = vmatprep.subr.bf16.mxu0 %v20677_v23  ;;  %v20716_v23 = vld [vmem:[%s28265_s5 + $0x13dc] ss:$20 sps:$4 sm:$0xff]  }
 0x589   : > { %19067 = vmatpush3.bf16.msra.mxu1 %v20679_v16  ;;  %v9218_v16 = vrot.slane %v23935_v18, 5 }
 0x58a   : > { %19068 = vmatprep.subr.bf16.mxu1 %v20683_v42  ;;  %10222 = vmatpush1.bf16.msra.mxu0 %v20675_v10  ;;  %v20717_v42 = vld [vmem:[%s28265_s5 + $0x1568] ss:$20 sps:$4 sm:$0xff]   ;;  %v20725_v10 = vld [vmem:[%s28265_s5 + $0x1544] ss:$20 sps:$4 sm:$0xff]  }
 0x58b   : > { %10223 = vmatprep.subr.bf16.mxu0 %v20682_v39  ;;  %v20714_v39 = vld [vmem:[%s28265_s5 + $0x13d8] ss:$20 sps:$4 sm:$0xff]  }
 0x58d   : > { %19069 = vmatpush3.bf16.msra.mxu1 %v20684_v52  ;;  %v7353_v26 = vpop.f32.mrf.mxu0  ;;  %v25724_v52 = vsel %vm9208_vm8, %v9218_v16, %v9219_v6  ;;  %v20768_v6 = vld [vmem:[%s28265_s5 + $0x1720] ss:$20 sps:$4 sm:$0xff]   ;;  %v20776_v16 = vld [vmem:[%s28265_s5 + $0x16fc] ss:$20 sps:$4 sm:$0xff]  }
 0x58e   : > { %19070 = vmatprep.subr.bf16.mxu1 %v20688_v44  ;;  %10224 = vmatpush1.bf16.msra.mxu0 %v20680_v27  ;;  %v20722_v44 = vld [vmem:[%s28265_s5 + $0x13b4] ss:$20 sps:$4 sm:$0xff]  }
 0x58f   : > { %v19249_v48 = vpop.f32.mrf.mxu0  ;;  %10225 = vmatprep.subr.bf16.mxu0 %v20687_v33  ;;  %v20723_v27 = vld [vmem:[%s28265_s5 + $0x1540] ss:$20 sps:$4 sm:$0xff]   ;;  %v20731_v33 = vld [vmem:[%s28265_s5 + $0x151c] ss:$20 sps:$4 sm:$0xff]  }
 0x590   : > { %v20726_v48 = vld [vmem:[%s28265_s5 + $0x1388] ss:$20 sps:$4 sm:$0xff]  }
 0x591   : > { %19071 = vmatpush3.bf16.msra.mxu1 %v20689_v49  ;;  %v7356_v32 = vpop.f32.mrf.mxu0  ;;  %v20728_v49 = vld [vmem:[%s28265_s5 + $0x138c] ss:$20 sps:$4 sm:$0xff]  }
 0x592   : > { %19251 = vmatprep.subr.bf16.mxu1 %v21869_v50  ;;  %10226 = vmatpush1.bf16.msra.mxu0 %v20685_v19  ;;  %v20737_v19 = vld [vmem:[%s28265_s5 + $0x14f4] ss:$20 sps:$4 sm:$0xff]   ;;  %v20743_v32 = vld [vmem:[%s28265_s5 + $0x14cc] ss:$20 sps:$4 sm:$0xff]  }
 0x593   : > { %v19250_v24 = vpop.f32.mrf.mxu0  ;;  %10227 = vmatprep.subr.bf16.mxu0 %v20692_v12  ;;  %v20734_v12 = vld [vmem:[%s28265_s5 + $0x1364] ss:$20 sps:$4 sm:$0xff]  }
 0x594   : > { %8877 = vmatmul.mubr.bf16.vlgmr.msra.gmra.mxu1 %v23915_v37  ;;  %v20700_v37 = vld [vmem:[%s28265_s5 + $0x11fc] ss:$20 sps:$4 sm:$0xff]  }
 0x595   : > { %19252 = vmatpush3.bf16.msra.mxu1 %v20693_v22  ;;  %19263 = vmatprep.mubr.msk.bf16.mxu1 %vm21870_vm7, %v21869_v50  ;;  %v20735_v22 = vld [vmem:[%s28265_s5 + $0x14f0] ss:$20 sps:$4 sm:$0xff]  }
 0x596   : > { %19253 = vmatprep.subr.bf16.mxu1 %v21869_v50  ;;  %10228 = vmatpush1.bf16.msra.mxu0 %v20690_v46  ;;  %v20732_v46 = vld [vmem:[%s28265_s5 + $0x1360] ss:$20 sps:$4 sm:$0xff]   ;;  %v20740_v24 = vld [vmem:[%s28265_s5 + $0x133c] ss:$20 sps:$4 sm:$0xff]  }
 0x597   : > { %10229 = vmatprep.subr.bf16.mxu0 %v20696_v28  ;;  %v20741_v28 = vld [vmem:[%s28265_s5 + $0x14c8] ss:$20 sps:$4 sm:$0xff]  }
 0x599   : > { %19254 = vmatpush3.bf16.msra.mxu1 %v20697_v8  ;;  %v20749_v8 = vld [vmem:[%s28265_s5 + $0x14a4] ss:$20 sps:$4 sm:$0xff]  }
 0x59a   : > { %19255 = vmatprep.subr.bf16.mxu1 %v21869_v50  ;;  %10230 = vmatpush1.bf16.msra.mxu0 %v20694_v20  ;;  %v20738_v20 = vld [vmem:[%s28265_s5 + $0x1338] ss:$20 sps:$4 sm:$0xff]  }
 0x59b   : > { %10231 = vmatprep.subr.bf16.mxu0 %v20700_v37  ;;  %v20746_v37 = vld [vmem:[%s28265_s5 + $0x1314] ss:$20 sps:$4 sm:$0xff]  }
 0x59c   : > { %v19043_v56 = vpop.f32.mrf.mxu1 }
 0x59d   : > { %19256 = vmatpush3.bf16.msra.mxu1 %v20701_v47  ;;  %v4107_v47 = vpack.c.bf16 %v23889_v4, %v23889_v4  ;;  %v20752_v4 = vld [vmem:[%s28265_s5 + $0x179c] ss:$20 sps:$4 sm:$0xff]  }
 0x59e   : > { %v19044_v59 = vpop.f32.mrf.mxu1  ;;  %19257 = vmatprep.subr.bf16.mxu1 %v21869_v50  ;;  %10232 = vmatpush1.bf16.msra.mxu0 %v20698_v63  ;;  %v20747_v63 = vld [vmem:[%s28265_s5 + $0x14a0] ss:$20 sps:$4 sm:$0xff]  }
 0x59f   : > { %v19045_v41 = vadd.f32 %v19044_v59, %v19043_v56  ;;  %10233 = vmatprep.subr.bf16.mxu0 %v20704_v9  ;;  %v20755_v56 = vld [vmem:[%s28265_s5 + $0x147c] ss:$20 sps:$4 sm:$0xff]   ;;  %v9210_v59 = vrot.slane %v4107_v47, 5 }
 0x5a0   : > { %v19046_v60 = vpop.f32.mrf.mxu1  ;;  %v20744_v9 = vld [vmem:[%s28265_s5 + $0x1310] ss:$20 sps:$4 sm:$0xff]  }
 0x5a1   : > { %v7314_v57 = vadd.f32 %v19045_v41, %v25543_v30  ;;  %19258 = vmatpush3.bf16.msra.mxu1 %v20705_v29  ;;  %v20712_v30 = vld [vmem:[%s28265_s5 + $0x1404] ss:$20 sps:$4 sm:$0xff]   ;;  %v9209_v29 = vrot.slane %v23882_v35, 5  ;;  %v20761_v41 = vld [vmem:[%s28265_s5 + $0x1454] ss:$20 sps:$4 sm:$0xff]  }
 0x5a2   : > { %v19047_v61 = vpop.f32.mrf.mxu1  ;;  %19259 = vmatprep.subr.bf16.mxu1 %v21869_v50  ;;  %10234 = vmatpush1.bf16.msra.mxu0 %v20702_v14  ;;  %v20750_v14 = vld [vmem:[%s28265_s5 + $0x1798] ss:$20 sps:$4 sm:$0xff]   ;;  %v20758_v60 = vld [vmem:[%s28265_s5 + $0x1774] ss:$20 sps:$4 sm:$0xff]  }
 0x5a3   : > { %v7354_v3 = vadd.f32 %v7353_v26, %v7314_v57  ;;  %10235 = vmatprep.subr.bf16.mxu0 %v20708_v53  ;;  %v20729_v26 = vld [vmem:[%s28265_s5 + $0x1518] ss:$20 sps:$4 sm:$0xff]   ;;  %v25806_v53 = vsel %vm9208_vm8, %v9209_v29, %v9210_v59  ;;  %v20759_v57 = vld [vmem:[%s28265_s5 + $0x1450] ss:$20 sps:$4 sm:$0xff]  }
 0x5a4   : > { %v20756_v61 = vld [vmem:[%s28265_s5 + $0x1770] ss:$20 sps:$4 sm:$0xff]   ;;  %v20801_v59 = vld [vmem:[%s28265_s5 + $0x15b8] ss:$20 sps:$4 sm:$0xff]  }
 0x5a5   : > { %19260 = vmatpush3.bf16.msra.mxu1 %v20709_v51  ;;  %v25699_v5 = vadd.f32 %v7354_v3, %v5729_v25  ;;  %v20767_v51 = vld [vmem:[%s28265_s5 + $0x16ac] ss:$20 sps:$4 sm:$0xff]   ;;  %v20765_v3 = vld [vmem:[%s28265_s5 + $0x16a8] ss:$20 sps:$4 sm:$0xff]   ;;  %v20800_v29 = vld [vmem:[%s28265_s5 + $0x1524] ss:$20 sps:$4 sm:$0xff]  }
 0x5a6   : > { %19261 = vmatprep.subr.bf16.mxu1 %v21869_v50  ;;  %10236 = vmatpush2.bf16.msra.mxu0 %v20706_v43  ;;  %v20764_v25 = vld [vmem:[%s28265_s5 + $0x174c] ss:$20 sps:$4 sm:$0xff]   ;;  %v20773_v43 = vld [vmem:[%s28265_s5 + $0x1684] ss:$20 sps:$4 sm:$0xff]  }
 0x5a7   : > { %10237 = vmatprep.subr.bf16.mxu0 %v20712_v30  ;;  %v20770_v30 = vld [vmem:[%s28265_s5 + $0x1724] ss:$20 sps:$4 sm:$0xff]  }
 0x5a9   : > { %19262 = vmatpush3.bf16.msra.mxu1 %v20713_v40  ;;  %v20771_v40 = vld [vmem:[%s28265_s5 + $0x1680] ss:$20 sps:$4 sm:$0xff]  }
 0x5aa   : > { %10260 = vmatprep.subr.bf16.mxu1 %v20719_v34  ;;  %10238 = vmatpush2.bf16.msra.mxu0 %v20710_v38  ;;  %v20779_v38 = vld [vmem:[%s28265_s5 + $0x165c] ss:$20 sps:$4 sm:$0xff]  }
 0x5ab   : > { %10239 = vmatprep.subr.bf16.mxu0 %v20716_v23 }
 0x5ac   : > { %19264 = vmatmul.mubr.msk.bf16.vlgmr.msra.gmra.mxu1 %vm5329_vm6, %v24069_v13  ;;  %v20720_v13 = vld [vmem:[%s28265_s5 + $0x13b0] ss:$20 sps:$4 sm:$0xff]  }
 0x5ad   : > { %10261 = vmatpush1.bf16.msra.mxu1 %v20717_v42  ;;  %10292 = vmatprep.mubr.bf16.mxu1 %v25724_v52  ;;  %v20777_v42 = vld [vmem:[%s28265_s5 + $0x1658] ss:$20 sps:$4 sm:$0xff]  }
 0x5ae   : > { %10262 = vmatprep.subr.bf16.mxu1 %v20725_v10  ;;  %10240 = vmatpush2.bf16.msra.mxu0 %v20714_v39  ;;  %v20785_v39 = vld [vmem:[%s28265_s5 + $0x1634] ss:$20 sps:$4 sm:$0xff]  }
 0x5af   : > { %10241 = vmatprep.subr.bf16.mxu0 %v20722_v44  ;;  %v20774_v44 = vld [vmem:[%s28265_s5 + $0x16f8] ss:$20 sps:$4 sm:$0xff]  }
 0x5b1   : > { %10263 = vmatpush1.bf16.msra.mxu1 %v20723_v27 }
 0x5b2   : > { %10264 = vmatprep.subr.bf16.mxu1 %v20731_v33  ;;  %10242 = vmatpush2.bf16.msra.mxu0 %v20720_v13  ;;  %v20782_v33 = vld [vmem:[%s28265_s5 + $0x16d4] ss:$20 sps:$4 sm:$0xff]   ;;  %v20783_v13 = vld [vmem:[%s28265_s5 + $0x1630] ss:$20 sps:$4 sm:$0xff]  }
 0x5b3   : > { %10243 = vmatprep.subr.bf16.mxu0 %v20728_v49  ;;  %v20791_v49 = vld [vmem:[%s28265_s5 + $0x160c] ss:$20 sps:$4 sm:$0xff]  }
 0x5b5   : > { %10265 = vmatpush1.bf16.msra.mxu1 %v20729_v26  ;;  %v4111_v26 = vpack.c.bf16 %v24023_v45, %v24023_v45  ;;  %v20797_v45 = vld [vmem:[%s28265_s5 + $0x15e4] ss:$20 sps:$4 sm:$0xff]  }
 0x5b6   : > { %10266 = vmatprep.subr.bf16.mxu1 %v20737_v19  ;;  %10244 = vmatpush2.bf16.msra.mxu0 %v20726_v48  ;;  %v20780_v19 = vld [vmem:[%s28265_s5 + $0x16d0] ss:$20 sps:$4 sm:$0xff]   ;;  %v20788_v48 = vld [vmem:[%s28265_s5 + $0x1574] ss:$20 sps:$4 sm:$0xff]  }
 0x5b7   : > { %10245 = vmatprep.subr.bf16.mxu0 %v20734_v12  ;;  %v9221_v12 = vrot.slane %v24037_v31, 5 }
 0x5b9   : > { %10267 = vmatpush1.bf16.msra.mxu1 %v20735_v22  ;;  %v20789_v22 = vld [vmem:[%s28265_s5 + $0x1608] ss:$20 sps:$4 sm:$0xff]  }
 0x5ba   : > { %10268 = vmatprep.subr.bf16.mxu1 %v20743_v32  ;;  %10246 = vmatpush2.bf16.msra.mxu0 %v20732_v46  ;;  %v9222_v32 = vrot.slane %v4111_v26, 5  ;;  %v20786_v46 = vld [vmem:[%s28265_s5 + $0x1570] ss:$20 sps:$4 sm:$0xff]  }
 0x5bb   : > { %10247 = vmatprep.subr.bf16.mxu0 %v20740_v24 }
 0x5bd   : > { %10269 = vmatpush1.bf16.msra.mxu1 %v20741_v28  ;;  %v20794_v28 = vld [vmem:[%s28265_s5 + $0x154c] ss:$20 sps:$4 sm:$0xff]  }
 0x5be   : > { %10270 = vmatprep.subr.bf16.mxu1 %v20749_v8  ;;  %10248 = vmatpush2.bf16.msra.mxu0 %v20738_v20  ;;  %v25886_v8 = vsel %vm9208_vm8, %v9221_v12, %v9222_v32  ;;  %v20836_v32 = vld [vmem:[%s28265_s5 + $0x16b4] ss:$20 sps:$4 sm:$0xff]  }
 0x5bf   : > { %10249 = vmatprep.subr.bf16.mxu0 %v20746_v37  ;;  %v20795_v37 = vld [vmem:[%s28265_s5 + $0x15e0] ss:$20 sps:$4 sm:$0xff]  }
 0x5c1   : > { %10271 = vmatpush1.bf16.msra.mxu1 %v20747_v63  ;;  %v20803_v63 = vld [vmem:[%s28265_s5 + $0x15bc] ss:$20 sps:$4 sm:$0xff]  }
 0x5c2   : > { %10272 = vmatprep.subr.bf16.mxu1 %v20755_v56  ;;  %10250 = vmatpush2.bf16.msra.mxu0 %v20744_v9  ;;  %v20792_v9 = vld [vmem:[%s28265_s5 + $0x1548] ss:$20 sps:$4 sm:$0xff]  }
 0x5c3   : > { %10305 = vmatprep.subr.bf16.mxu0 %v20752_v4 }
 0x5c5   : > { %10273 = vmatpush1.bf16.msra.mxu1 %v20753_v21  ;;  %10252 = vmatmul.mubr.bf16.vlgmr.msra.gmra.mxu0 %v25806_v53 }
 0x5c6   : > { %10274 = vmatprep.subr.bf16.mxu1 %v20761_v41  ;;  %10306 = vmatpush1.bf16.msra.mxu0 %v20750_v14  ;;  %v20809_v41 = vld [vmem:[%s28265_s5 + $0x1594] ss:$20 sps:$4 sm:$0xff]   ;;  %v4109_v14 = vpack.c.bf16 %v23943_v0, %v23943_v0 }
 0x5c7   : > { %10333 = vmatprep.mubr.bf16.mxu0 %v21868_v1  ;;  %10307 = vmatprep.subr.bf16.mxu0 %v20758_v60  ;;  %v20798_v60 = vld [vmem:[%s28265_s5 + $0x1520] ss:$20 sps:$4 sm:$0xff]  }
 0x5c8   : > { %v20815_v0 = vld [vmem:[%s28265_s5 + $0x12f4] ss:$20 sps:$4 sm:$0xff]  }
 0x5c9   : > { %10275 = vmatpush1.bf16.msra.mxu1 %v20759_v57  ;;  %v20806_v57 = vld [vmem:[%s28265_s5 + $0x14fc] ss:$20 sps:$4 sm:$0xff]  }
 0x5ca   : > { %10276 = vmatprep.subr.bf16.mxu1 %v20767_v51  ;;  %10308 = vmatpush1.bf16.msra.mxu0 %v20756_v61  ;;  %v20807_v51 = vld [vmem:[%s28265_s5 + $0x1590] ss:$20 sps:$4 sm:$0xff]   ;;  %v9215_v61 = vrot.slane %v23933_v36, 5 }
 0x5cb   : > { %10309 = vmatprep.subr.bf16.mxu0 %v20764_v25  ;;  %v9216_v25 = vrot.slane %v4109_v14, 5  ;;  %v20852_v14 = vld [vmem:[%s28265_s5 + $0x1638] ss:$20 sps:$4 sm:$0xff]  }
 0x5cd   : > { %10277 = vmatpush2.bf16.msra.mxu1 %v20765_v3  ;;  %v8673_v34 = vpop.f32.mrf.mxu0  ;;  %v20804_v3 = vld [vmem:[%s28265_s5 + $0x14f8] ss:$20 sps:$4 sm:$0xff]  }
 0x5ce   : > { %10278 = vmatprep.subr.bf16.mxu1 %v20773_v43  ;;  %10310 = vmatpush1.bf16.msra.mxu0 %v20762_v17  ;;  %v20812_v43 = vld [vmem:[%s28265_s5 + $0x14d4] ss:$20 sps:$4 sm:$0xff]   ;;  %v20813_v17 = vld [vmem:[%s28265_s5 + $0x12f0] ss:$20 sps:$4 sm:$0xff]  }
 0x5cf   : > { %v8675_v23 = vpop.f32.mrf.mxu0  ;;  %10311 = vmatprep.subr.bf16.mxu0 %v20770_v30  ;;  %v20821_v30 = vld [vmem:[%s28265_s5 + $0x12cc] ss:$20 sps:$4 sm:$0xff]  }
 0x5d1   : > { %10279 = vmatpush2.bf16.msra.mxu1 %v20771_v40  ;;  %v8677_v10 = vpop.f32.mrf.mxu0  ;;  %v25937_v40 = vsel %vm9208_vm8, %v9215_v61, %v9216_v25  ;;  %v20866_v61 = vld [vmem:[%s28265_s5 + $0x15ec] ss:$20 sps:$4 sm:$0xff]   ;;  %v20867_v25 = vld [vmem:[%s28265_s5 + $0x1408] ss:$20 sps:$4 sm:$0xff]  }
 0x5d2   : > { %10280 = vmatprep.subr.bf16.mxu1 %v20779_v38  ;;  %10312 = vmatpush1.bf16.msra.mxu0 %v20768_v6  ;;  %v20818_v38 = vld [vmem:[%s28265_s5 + $0x14ac] ss:$20 sps:$4 sm:$0xff]   ;;  %v20819_v6 = vld [vmem:[%s28265_s5 + $0x12c8] ss:$20 sps:$4 sm:$0xff]  }
 0x5d3   : > { %v8678_v27 = vpop.f32.mrf.mxu0  ;;  %10313 = vmatprep.subr.bf16.mxu0 %v20776_v16  ;;  %v20816_v16 = vld [vmem:[%s28265_s5 + $0x14a8] ss:$20 sps:$4 sm:$0xff]   ;;  %v20825_v10 = vld [vmem:[%s28265_s5 + $0x12a0] ss:$20 sps:$4 sm:$0xff]  }
 0x5d5   : > { %10281 = vmatpush2.bf16.msra.mxu1 %v20777_v42  ;;  %v20824_v42 = vld [vmem:[%s28265_s5 + $0x1484] ss:$20 sps:$4 sm:$0xff]  }
 0x5d6   : > { %10282 = vmatprep.subr.bf16.mxu1 %v20785_v39  ;;  %10314 = vmatpush1.bf16.msra.mxu0 %v20774_v44  ;;  %v20833_v39 = vld [vmem:[%s28265_s5 + $0x127c] ss:$20 sps:$4 sm:$0xff]   ;;  %v20822_v44 = vld [vmem:[%s28265_s5 + $0x1480] ss:$20 sps:$4 sm:$0xff]  }
 0x5d7   : > { %10315 = vmatprep.subr.bf16.mxu0 %v20782_v33  ;;  %v20830_v33 = vld [vmem:[%s28265_s5 + $0x145c] ss:$20 sps:$4 sm:$0xff]  }
 0x5d9   : > { %10283 = vmatpush2.bf16.msra.mxu1 %v20783_v13 }
 0x5da   : > { %10284 = vmatprep.subr.bf16.mxu1 %v20791_v49  ;;  %10316 = vmatpush1.bf16.msra.mxu0 %v20780_v19  ;;  %v20831_v49 = vld [vmem:[%s28265_s5 + $0x1278] ss:$20 sps:$4 sm:$0xff]   ;;  %v20839_v19 = vld [vmem:[%s28265_s5 + $0x1254] ss:$20 sps:$4 sm:$0xff]  }
 0x5db   : > { %10383 = vmatprep.subr.bf16.mxu0 %v20788_v48 }
 0x5dc   : > { %v8632_v24 = vpop.f32.mrf.mxu1 }
 0x5dd   : > { %v8674_v20 = vadd.f32 %v8673_v34, %v8632_v24  ;;  %10285 = vmatpush2.bf16.msra.mxu1 %v20789_v22  ;;  %17838 = vmatmul.mubr.msk.bf16.vlgmr.msra.gmra.mxu0 %vm5329_vm6, %v25886_v8  ;;  %v20810_v34 = vld [vmem:[%s28265_s5 + $0x14d0] ss:$20 sps:$4 sm:$0xff]   ;;  %v20828_v22 = vld [vmem:[%s28265_s5 + $0x1458] ss:$20 sps:$4 sm:$0xff]  }
 0x5de   : > { %v8634_v47 = vpop.f32.mrf.mxu1  ;;  %10286 = vmatprep.subr.bf16.mxu1 %v20797_v45  ;;  %10384 = vmatpush1.bf16.msra.mxu0 %v20786_v46 }
 0x5df   : > { %10415 = vmatprep.mubr.bf16.mxu0 %v25724_v52  ;;  %v8676_v56 = vadd.f32 %v8675_v23, %v8634_v47  ;;  %10385 = vmatprep.subr.bf16.mxu0 %v20794_v28  ;;  %v20827_v23 = vld [vmem:[%s28265_s5 + $0x12a4] ss:$20 sps:$4 sm:$0xff]   ;;  %v20845_v28 = vld [vmem:[%s28265_s5 + $0x122c] ss:$20 sps:$4 sm:$0xff]  }
 0x5e0   : > { %v8636_v4 = vpop.f32.mrf.mxu1  ;;  %v20851_v47 = vld [vmem:[%s28265_s5 + $0x1204] ss:$20 sps:$4 sm:$0xff]  }
 0x5e1   : > { %10287 = vmatpush2.bf16.msra.mxu1 %v20795_v37  ;;  %v20843_v37 = vld [vmem:[%s28265_s5 + $0x1228] ss:$20 sps:$4 sm:$0xff]  }
 0x5e2   : > { %v8637_v21 = vpop.f32.mrf.mxu1  ;;  %10288 = vmatprep.subr.bf16.mxu1 %v20803_v63  ;;  %10386 = vmatpush1.bf16.msra.mxu0 %v20792_v9  ;;  %v20840_v63 = vld [vmem:[%s28265_s5 + $0x1688] ss:$20 sps:$4 sm:$0xff]   ;;  %v20849_v9 = vld [vmem:[%s28265_s5 + $0x1200] ss:$20 sps:$4 sm:$0xff]  }
 0x5e3   : > { %10387 = vmatprep.subr.bf16.mxu0 %v20800_v29  ;;  %v20857_v4 = vld [vmem:[%s28265_s5 + $0x11dc] ss:$20 sps:$4 sm:$0xff]   ;;  %v20846_v29 = vld [vmem:[%s28265_s5 + $0x1660] ss:$20 sps:$4 sm:$0xff]   ;;  %v20855_v21 = vld [vmem:[%s28265_s5 + $0x11d8] ss:$20 sps:$4 sm:$0xff]  }
 0x5e5   : > { %10289 = vmatpush2.bf16.msra.mxu1 %v20801_v59  ;;  %v20854_v59 = vld [vmem:[%s28265_s5 + $0x163c] ss:$20 sps:$4 sm:$0xff]  }
 0x5e6   : > { %10290 = vmatprep.subr.bf16.mxu1 %v20809_v41  ;;  %10388 = vmatpush1.bf16.msra.mxu0 %v20798_v60  ;;  %v20863_v41 = vld [vmem:[%s28265_s5 + $0x1434] ss:$20 sps:$4 sm:$0xff]  }
 0x5e7   : > { %10389 = vmatprep.subr.bf16.mxu0 %v20806_v57  ;;  %v20860_v60 = vld [vmem:[%s28265_s5 + $0x1614] ss:$20 sps:$4 sm:$0xff]   ;;  %v20861_v57 = vld [vmem:[%s28265_s5 + $0x1430] ss:$20 sps:$4 sm:$0xff]  }
 0x5e9   : > { %10291 = vmatpush2.bf16.msra.mxu1 %v20807_v51  ;;  %v20869_v51 = vld [vmem:[%s28265_s5 + $0x140c] ss:$20 sps:$4 sm:$0xff]  }
 0x5ea   : > { %10342 = vmatprep.subr.bf16.mxu1 %v20815_v0  ;;  %10390 = vmatpush1.bf16.msra.mxu0 %v20804_v3  ;;  %v20858_v0 = vld [vmem:[%s28265_s5 + $0x1610] ss:$20 sps:$4 sm:$0xff]  }
 0x5eb   : > { %10391 = vmatprep.subr.bf16.mxu0 %v20812_v43  ;;  %v20875_v43 = vld [vmem:[%s28265_s5 + $0x13e4] ss:$20 sps:$4 sm:$0xff]  }
 0x5ec   : > { %10293 = vmatmul.mubr.bf16.vlgmr.msra.gmra.mxu1 %v25937_v40 }
 0x5ed   : > { %10343 = vmatpush1.bf16.msra.mxu1 %v20813_v17  ;;  %10374 = vmatprep.mubr.bf16.mxu1 %v25603_v7  ;;  %v20864_v17 = vld [vmem:[%s28265_s5 + $0x15e8] ss:$20 sps:$4 sm:$0xff]  }
 0x5ee   : > { %10344 = vmatprep.subr.bf16.mxu1 %v20821_v30  ;;  %10392 = vmatpush1.bf16.msra.mxu0 %v20810_v34  ;;  %v20872_v34 = vld [vmem:[%s28265_s5 + $0x15c4] ss:$20 sps:$4 sm:$0xff]  }
 0x5ef   : > { %10393 = vmatprep.subr.bf16.mxu0 %v20818_v38  ;;  %v20873_v38 = vld [vmem:[%s28265_s5 + $0x13e0] ss:$20 sps:$4 sm:$0xff]  }
 0x5f1   : > { %10345 = vmatpush1.bf16.msra.mxu1 %v20819_v6 }
 0x5f2   : > { %10346 = vmatprep.subr.bf16.mxu1 %v20827_v23  ;;  %10394 = vmatpush1.bf16.msra.mxu0 %v20816_v16  ;;  %v20881_v23 = vld [vmem:[%s28265_s5 + $0x13bc] ss:$20 sps:$4 sm:$0xff]   ;;  %v20870_v16 = vld [vmem:[%s28265_s5 + $0x15c0] ss:$20 sps:$4 sm:$0xff]  }
 0x5f3   : > { %10395 = vmatprep.subr.bf16.mxu0 %v20824_v42 }
 0x5f4   : > { %v8714_v27 = vpop.f32.mrf.mxu1 }
 0x5f5   : > { %v8715_v13 = vadd.f32 %v8714_v27, %v8674_v20  ;;  %10347 = vmatpush1.bf16.msra.mxu1 %v20825_v10  ;;  %v20834_v20 = vld [vmem:[%s28265_s5 + $0x16b0] ss:$20 sps:$4 sm:$0xff]   ;;  %v20876_v27 = vld [vmem:[%s28265_s5 + $0x1598] ss:$20 sps:$4 sm:$0xff]  }
 0x5f6   : > { %v8716_v26 = vpop.f32.mrf.mxu1  ;;  %10348 = vmatprep.subr.bf16.mxu1 %v20833_v39  ;;  %10396 = vmatpush1.bf16.msra.mxu0 %v20822_v44  ;;  %v20878_v10 = vld [vmem:[%s28265_s5 + $0x159c] ss:$20 sps:$4 sm:$0xff]   ;;  %v20879_v39 = vld [vmem:[%s28265_s5 + $0x13b8] ss:$20 sps:$4 sm:$0xff]   ;;  %v20885_v44 = vld [vmem:[%s28265_s5 + $0x1394] ss:$20 sps:$4 sm:$0xff]  }
 0x5f7   : > { %v25978_v48 = vadd.f32 %v8715_v13, %v25288_v58  ;;  %v8717_v12 = vadd.f32 %v8716_v26, %v8676_v56  ;;  %10397 = vmatprep.subr.bf16.mxu0 %v20830_v33  ;;  %v20837_v58 = vld [vmem:[%s28265_s5 + $0x1250] ss:$20 sps:$4 sm:$0xff]   ;;  %v20882_v33 = vld [vmem:[%s28265_s5 + $0x1438] ss:$20 sps:$4 sm:$0xff]  }
 0x5f8   : > { %v8718_v45 = vpop.f32.mrf.mxu1  ;;  %v20848_v56 = vld [vmem:[%s28265_s5 + $0x1664] ss:$20 sps:$4 sm:$0xff]  }
 0x5f9   : > { %v25987_v46 = vadd.f32 %v8717_v12, %v25296_v54  ;;  %10349 = vmatpush1.bf16.msra.mxu1 %v20831_v49  ;;  %v20842_v54 = vld [vmem:[%s28265_s5 + $0x168c] ss:$20 sps:$4 sm:$0xff]   ;;  %v20883_v13 = vld [vmem:[%s28265_s5 + $0x1390] ss:$20 sps:$4 sm:$0xff]   ;;  %v20888_v12 = vld [vmem:[%s28265_s5 + $0x1368] ss:$20 sps:$4 sm:$0xff]  }
 0x5fa   : > { %v8719_v24 = vpop.f32.mrf.mxu1  ;;  %10350 = vmatprep.subr.bf16.mxu1 %v20839_v19  ;;  %10398 = vmatpush1.bf16.msra.mxu0 %v20828_v22  ;;  %v20890_v49 = vld [vmem:[%s28265_s5 + $0x136c] ss:$20 sps:$4 sm:$0xff]   ;;  %v20887_v19 = vld [vmem:[%s28265_s5 + $0x1410] ss:$20 sps:$4 sm:$0xff]  }
 0x5fb   : > { %10399 = vmatprep.subr.bf16.mxu0 %v20836_v32  ;;  %v20886_v26 = vld [vmem:[%s28265_s5 + $0x12f8] ss:$20 sps:$4 sm:$0xff]   ;;  %v20891_v45 = vld [vmem:[%s28265_s5 + $0x12d0] ss:$20 sps:$4 sm:$0xff]   ;;  %v20892_v32 = vld [vmem:[%s28265_s5 + $0x13e8] ss:$20 sps:$4 sm:$0xff]  }
 0x5fc   : > { %v20895_v22 = vld [vmem:[%s28265_s5 + $0x1344] ss:$20 sps:$4 sm:$0xff]   ;;  %v20900_v24 = vld [vmem:[%s28265_s5 + $0x131c] ss:$20 sps:$4 sm:$0xff]  }
 0x5fd   : > { %10351 = vmatpush1.bf16.msra.mxu1 %v20837_v58  ;;  %v20893_v58 = vld [vmem:[%s28265_s5 + $0x1340] ss:$20 sps:$4 sm:$0xff]  }
 0x5fe   : > { %10352 = vmatprep.subr.bf16.mxu1 %v20845_v28  ;;  %10400 = vmatpush2.bf16.msra.mxu0 %v20834_v20  ;;  %v20897_v28 = vld [vmem:[%s28265_s5 + $0x13c0] ss:$20 sps:$4 sm:$0xff]   ;;  %v20898_v20 = vld [vmem:[%s28265_s5 + $0x1318] ss:$20 sps:$4 sm:$0xff]  }
 0x5ff   : > { %10401 = vmatprep.subr.bf16.mxu0 %v20842_v54 }
 0x601   : > { %10353 = vmatpush1.bf16.msra.mxu1 %v20843_v37  ;;  %v20905_v37 = vld [vmem:[%s28265_s5 + $0x17a4] ss:$20 sps:$4 sm:$0xff]  }
 0x602   : > { %10354 = vmatprep.subr.bf16.mxu1 %v20851_v47  ;;  %10402 = vmatpush2.bf16.msra.mxu0 %v20840_v63  ;;  %v20901_v47 = vld [vmem:[%s28265_s5 + $0x1280] ss:$20 sps:$4 sm:$0xff]  }
 0x603   : > { %10403 = vmatprep.subr.bf16.mxu0 %v20848_v56  ;;  %v20902_v56 = vld [vmem:[%s28265_s5 + $0x1398] ss:$20 sps:$4 sm:$0xff]  }
 0x605   : > { %10355 = vmatpush1.bf16.msra.mxu1 %v20849_v9  ;;  %v20903_v9 = vld [vmem:[%s28265_s5 + $0x17a0] ss:$20 sps:$4 sm:$0xff]  }
 0x606   : > { %10356 = vmatprep.subr.bf16.mxu1 %v20857_v4  ;;  %10404 = vmatpush2.bf16.msra.mxu0 %v20846_v29  ;;  %v20910_v29 = vld [vmem:[%s28265_s5 + $0x177c] ss:$20 sps:$4 sm:$0xff]  }
 0x607   : > { %10405 = vmatprep.subr.bf16.mxu0 %v20854_v59  ;;  %v20906_v59 = vld [vmem:[%s28265_s5 + $0x1258] ss:$20 sps:$4 sm:$0xff]  }
 0x609   : > { %10357 = vmatpush1.bf16.msra.mxu1 %v20855_v21 }
 0x60a   : > { %10358 = vmatprep.subr.bf16.mxu1 %v20863_v41  ;;  %10406 = vmatpush2.bf16.msra.mxu0 %v20852_v14  ;;  %v20907_v41 = vld [vmem:[%s28265_s5 + $0x1370] ss:$20 sps:$4 sm:$0xff]   ;;  %v20908_v14 = vld [vmem:[%s28265_s5 + $0x1778] ss:$20 sps:$4 sm:$0xff]  }
 0x60b   : > { %10407 = vmatprep.subr.bf16.mxu0 %v20860_v60  ;;  %v20915_v60 = vld [vmem:[%s28265_s5 + $0x1754] ss:$20 sps:$4 sm:$0xff]  }
 0x60d   : > { %10359 = vmatpush2.bf16.msra.mxu1 %v20861_v57  ;;  %v26052_v3 = vpop.f32.mrf.mxu0  ;;  %v20911_v57 = vld [vmem:[%s28265_s5 + $0x1230] ss:$20 sps:$4 sm:$0xff]  }
 0x60e   : > { %10360 = vmatprep.subr.bf16.mxu1 %v20869_v51  ;;  %10408 = vmatpush2.bf16.msra.mxu0 %v20858_v0  ;;  %v20912_v51 = vld [vmem:[%s28265_s5 + $0x1348] ss:$20 sps:$4 sm:$0xff]   ;;  %v20913_v0 = vld [vmem:[%s28265_s5 + $0x1750] ss:$20 sps:$4 sm:$0xff]  }
 0x60f   : > { %v26060_v30 = vpop.f32.mrf.mxu0  ;;  %10409 = vmatprep.subr.bf16.mxu0 %v20866_v61  ;;  %v20920_v61 = vld [vmem:[%s28265_s5 + $0x172c] ss:$20 sps:$4 sm:$0xff]  }
 0x611   : > { %10361 = vmatpush2.bf16.msra.mxu1 %v20867_v25  ;;  %v8759_v6 = vpop.f32.mrf.mxu0  ;;  %v20916_v25 = vld [vmem:[%s28265_s5 + $0x1208] ss:$20 sps:$4 sm:$0xff]  }
 0x612   : > { %10362 = vmatprep.subr.bf16.mxu1 %v20875_v43  ;;  %10410 = vmatpush2.bf16.msra.mxu0 %v20864_v17  ;;  %v20917_v17 = vld [vmem:[%s28265_s5 + $0x1320] ss:$20 sps:$4 sm:$0xff]  }
 0x613   : > { %v8760_v42 = vpop.f32.mrf.mxu0  ;;  %10411 = vmatprep.subr.bf16.mxu0 %v20872_v34 }
 0x615   : > { %10363 = vmatpush2.bf16.msra.mxu1 %v20873_v38  ;;  %v20918_v38 = vld [vmem:[%s28265_s5 + $0x1728] ss:$20 sps:$4 sm:$0xff]  }
 0x616   : > { %10364 = vmatprep.subr.bf16.mxu1 %v20881_v23  ;;  %10412 = vmatpush2.bf16.msra.mxu0 %v20870_v16  ;;  %v20924_v23 = vld [vmem:[%s28265_s5 + $0x1704] ss:$20 sps:$4 sm:$0xff]  }
 0x617   : > { %10413 = vmatprep.subr.bf16.mxu0 %v20878_v10  ;;  %v20921_v10 = vld [vmem:[%s28265_s5 + $0x11e0] ss:$20 sps:$4 sm:$0xff]  }
 0x619   : > { %10365 = vmatpush2.bf16.msra.mxu1 %v20879_v39 }
 0x61a   : > { %10366 = vmatprep.subr.bf16.mxu1 %v20885_v44  ;;  %10414 = vmatpush2.bf16.msra.mxu0 %v20876_v27  ;;  %v20922_v44 = vld [vmem:[%s28265_s5 + $0x1700] ss:$20 sps:$4 sm:$0xff]  }
 0x61b   : > { %19107 = vmatprep.subr.bf16.mxu0 %v20882_v33 }
 0x61d   : > { %10367 = vmatpush2.bf16.msra.mxu1 %v20883_v13  ;;  %10416 = vmatmul.mubr.bf16.vlgmr.msra.gmra.mxu0 %v25937_v40  ;;  %v20925_v13 = vld [vmem:[%s28265_s5 + $0x17a8] ss:$20 sps:$4 sm:$0xff]  }
 0x61e   : > { %10368 = vmatprep.subr.bf16.mxu1 %v20890_v49  ;;  %19108 = vmatpush3.bf16.msra.mxu0 %v20886_v26  ;;  %v20930_v26 = vld [vmem:[%s28265_s5 + $0x16b8] ss:$20 sps:$4 sm:$0xff]  }
 0x61f   : > { %10497 = vmatprep.mubr.bf16.mxu0 %v25603_v7  ;;  %19109 = vmatprep.subr.bf16.mxu0 %v20887_v19  ;;  %v20896_v7 = vld [vmem:[%s28265_s5 + $0x12a8] ss:$20 sps:$4 sm:$0xff]   ;;  %v20933_v19 = vld [vmem:[%s28265_s5 + $0x1690] ss:$20 sps:$4 sm:$0xff]  }
 0x621   : > { %10369 = vmatpush2.bf16.msra.mxu1 %v20888_v12  ;;  %v20931_v12 = vld [vmem:[%s28265_s5 + $0x1758] ss:$20 sps:$4 sm:$0xff]  }
 0x622   : > { %10370 = vmatprep.subr.bf16.mxu1 %v20895_v22  ;;  %19110 = vmatpush3.bf16.msra.mxu0 %v20891_v45  ;;  %v20935_v22 = vld [vmem:[%s28265_s5 + $0x1550] ss:$20 sps:$4 sm:$0xff]  }
 0x623   : > { %19111 = vmatprep.subr.bf16.mxu0 %v20892_v32  ;;  %v20936_v32 = vld [vmem:[%s28265_s5 + $0x1668] ss:$20 sps:$4 sm:$0xff]  }
 0x625   : > { %10371 = vmatpush2.bf16.msra.mxu1 %v20893_v58  ;;  %v8837_v54 = vpop.f32.mrf.mxu0  ;;  %v20934_v58 = vld [vmem:[%s28265_s5 + $0x1730] ss:$20 sps:$4 sm:$0xff]  }
 0x626   : > { %10372 = vmatprep.subr.bf16.mxu1 %v20900_v24  ;;  %19112 = vmatpush3.bf16.msra.mxu0 %v20896_v7 }
 0x627   : > { %v8839_v63 = vpop.f32.mrf.mxu0  ;;  %19113 = vmatprep.subr.bf16.mxu0 %v20897_v28 }
 0x629   : > { %10373 = vmatpush2.bf16.msra.mxu1 %v20898_v20  ;;  %v8841_v4 = vpop.f32.mrf.mxu0  ;;  %v20939_v20 = vld [vmem:[%s28265_s5 + $0x1640] ss:$20 sps:$4 sm:$0xff]  }
 0x62a   : > { %10428 = vmatprep.subr.bf16.mxu1 %v20905_v37  ;;  %19114 = vmatpush3.bf16.msra.mxu0 %v20901_v47  ;;  %v20941_v47 = vld [vmem:[%s28265_s5 + $0x1500] ss:$20 sps:$4 sm:$0xff]   ;;  %v20946_v4 = vld [vmem:[%s28265_s5 + $0x14d8] ss:$20 sps:$4 sm:$0xff]  }
 0x62b   : > { %v8842_v21 = vpop.f32.mrf.mxu0  ;;  %19115 = vmatprep.subr.bf16.mxu0 %v20902_v56  ;;  %v20940_v56 = vld [vmem:[%s28265_s5 + $0x16e0] ss:$20 sps:$4 sm:$0xff]  }
 0x62c   : > { %10375 = vmatmul.mubr.bf16.vlgmr.msra.gmra.mxu1 %v25806_v53 }
 0x62d   : > { %10429 = vmatpush1.bf16.msra.mxu1 %v20903_v9  ;;  %10456 = vmatprep.mubr.bf16.mxu1 %v21868_v1  ;;  %v20944_v9 = vld [vmem:[%s28265_s5 + $0x1b5c] ss:$20 sps:$4 sm:$0xff]  }
 0x62e   : > { %10430 = vmatprep.subr.bf16.mxu1 %v20910_v29  ;;  %19116 = vmatpush3.bf16.msra.mxu0 %v20906_v59  ;;  %v20950_v29 = vld [vmem:[%s28265_s5 + $0x15f0] ss:$20 sps:$4 sm:$0xff]   ;;  %v20942_v59 = vld [vmem:[%s28265_s5 + $0x1b58] ss:$20 sps:$4 sm:$0xff]  }
 0x62f   : > { %19117 = vmatprep.subr.bf16.mxu0 %v20907_v41  ;;  %v20949_v41 = vld [vmem:[%s28265_s5 + $0x1b34] ss:$20 sps:$4 sm:$0xff]  }
 0x631   : > { %10431 = vmatpush1.bf16.msra.mxu1 %v20908_v14  ;;  %v26276_v14 = vrot.slane %v23935_v18, 1  ;;  %v20947_v18 = vld [vmem:[%s28265_s5 + $0x1b30] ss:$20 sps:$4 sm:$0xff]  }
 0x632   : > { %10432 = vmatprep.subr.bf16.mxu1 %v20915_v60  ;;  %19118 = vmatpush3.bf16.msra.mxu0 %v20911_v57  ;;  %v20951_v60 = vld [vmem:[%s28265_s5 + $0x14b0] ss:$20 sps:$4 sm:$0xff]  }
 0x633   : > { %19119 = vmatprep.subr.bf16.mxu0 %v20912_v51  ;;  %v20955_v51 = vld [vmem:[%s28265_s5 + $0x15c8] ss:$20 sps:$4 sm:$0xff]  }
 0x634   : > { %v8796_v43 = vpop.f32.mrf.mxu1 }
 0x635   : > { %v8797_v34 = vadd.f32 %v8796_v43, %v26052_v3  ;;  %10433 = vmatpush1.bf16.msra.mxu1 %v20913_v0 }
 0x636   : > { %v8798_v6 = vpop.f32.mrf.mxu1  ;;  %10434 = vmatprep.subr.bf16.mxu1 %v20920_v61  ;;  %19120 = vmatpush3.bf16.msra.mxu0 %v20916_v25  ;;  %v20956_v25 = vld [vmem:[%s28265_s5 + $0x1488] ss:$20 sps:$4 sm:$0xff]  }
 0x637   : > { %v8838_v16 = vadd.f32 %v8837_v54, %v8797_v34  ;;  %v8799_v42 = vadd.f32 %v8798_v6, %v26060_v30  ;;  %19121 = vmatprep.subr.bf16.mxu0 %v20917_v17  ;;  %v20928_v30 = vld [vmem:[%s28265_s5 + $0x16dc] ss:$20 sps:$4 sm:$0xff]   ;;  %v20960_v34 = vld [vmem:[%s28265_s5 + $0x15a0] ss:$20 sps:$4 sm:$0xff]   ;;  %v20959_v6 = vld [vmem:[%s28265_s5 + $0x1ae4] ss:$20 sps:$4 sm:$0xff]  }
 0x638   : > { %v8800_v3 = vpop.f32.mrf.mxu1  ;;  %v20937_v54 = vld [vmem:[%s28265_s5 + $0x1708] ss:$20 sps:$4 sm:$0xff]  }
 0x639   : > { %v8840_v39 = vadd.f32 %v8839_v63, %v8799_v42  ;;  %10435 = vmatpush1.bf16.msra.mxu1 %v20918_v38  ;;  %v26192_v27 = vadd.f32 %v8838_v16, %v25573_v15  ;;  %v20926_v15 = vld [vmem:[%s28265_s5 + $0x16d8] ss:$20 sps:$4 sm:$0xff]   ;;  %v20952_v38 = vld [vmem:[%s28265_s5 + $0x1b08] ss:$20 sps:$4 sm:$0xff]   ;;  %v20957_v42 = vld [vmem:[%s28265_s5 + $0x1ae0] ss:$20 sps:$4 sm:$0xff]  }
 0x63a   : > { %v8801_v33 = vpop.f32.mrf.mxu1  ;;  %10436 = vmatprep.subr.bf16.mxu1 %v20924_v23  ;;  %19122 = vmatpush3.bf16.msra.mxu0 %v20921_v10  ;;  %v20945_v63 = vld [vmem:[%s28265_s5 + $0x1618] ss:$20 sps:$4 sm:$0xff]   ;;  %v20961_v23 = vld [vmem:[%s28265_s5 + $0x1460] ss:$20 sps:$4 sm:$0xff]   ;;  %v20967_v16 = vld [vmem:[%s28265_s5 + $0x18dc] ss:$20 sps:$4 sm:$0xff]  }
 0x63b   : > { %v26201_v49 = vadd.f32 %v8840_v39, %v25583_v11  ;;  %19267 = vmatprep.subr.bf16.mxu0 %v21869_v50  ;;  %v20929_v11 = vld [vmem:[%s28265_s5 + $0x1780] ss:$20 sps:$4 sm:$0xff]   ;;  %v20964_v10 = vld [vmem:[%s28265_s5 + $0x1abc] ss:$20 sps:$4 sm:$0xff]   ;;  %v20965_v3 = vld [vmem:[%s28265_s5 + $0x18d8] ss:$20 sps:$4 sm:$0xff]  }
 0x63c   : > { %v20973_v39 = vld [vmem:[%s28265_s5 + $0x18b4] ss:$20 sps:$4 sm:$0xff]   ;;  %v26327_v33 = vrot.slane %v23884_v55, 1  ;;  %v20979_v55 = vld [vmem:[%s28265_s5 + $0x188c] ss:$20 sps:$4 sm:$0xff]  }
 0x63d   : > { %10437 = vmatpush1.bf16.msra.mxu1 %v20922_v44  ;;  %10498 = vmatmul.mubr.bf16.vlgmr.msra.gmra.mxu0 %v25806_v53  ;;  %v20932_v53 = vld [vmem:[%s28265_s5 + $0x1578] ss:$20 sps:$4 sm:$0xff]  }
 0x63e   : > { %10438 = vmatprep.subr.bf16.mxu1 %v20928_v30  ;;  %19268 = vmatpush3.bf16.msra.mxu0 %v20925_v13  ;;  %v20962_v44 = vld [vmem:[%s28265_s5 + $0x1ab8] ss:$20 sps:$4 sm:$0xff]   ;;  %v20970_v30 = vld [vmem:[%s28265_s5 + $0x1a94] ss:$20 sps:$4 sm:$0xff]   ;;  %v20971_v13 = vld [vmem:[%s28265_s5 + $0x18b0] ss:$20 sps:$4 sm:$0xff]  }
 0x63f   : > { %19279 = vmatprep.mubr.msk.bf16.mxu0 %vm21870_vm7, %v21869_v50  ;;  %19269 = vmatprep.subr.bf16.mxu0 %v21869_v50 }
 0x641   : > { %10439 = vmatpush1.bf16.msra.mxu1 %v20926_v15  ;;  %v20976_v15 = vld [vmem:[%s28265_s5 + $0x1a6c] ss:$20 sps:$4 sm:$0xff]  }
 0x642   : > { %19129 = vmatprep.subr.bf16.mxu1 %v20930_v26  ;;  %19270 = vmatpush3.bf16.msra.mxu0 %v20929_v11  ;;  %v20977_v26 = vld [vmem:[%s28265_s5 + $0x1888] ss:$20 sps:$4 sm:$0xff]   ;;  %v20985_v11 = vld [vmem:[%s28265_s5 + $0x1864] ss:$20 sps:$4 sm:$0xff]  }
 0x643   : > { %19271 = vmatprep.subr.bf16.mxu0 %v21869_v50 }
 0x644   : > { %17839 = vmatmul.mubr.msk.bf16.vlgmr.msra.gmra.mxu1 %vm5329_vm6, %v25886_v8 }
 0x645   : > { %19130 = vmatpush3.bf16.msra.mxu1 %v20932_v53  ;;  %10537 = vmatprep.mubr.bf16.mxu1 %v25724_v52  ;;  %v19094_v45 = vpop.f32.mrf.mxu0  ;;  %v20938_v52 = vld [vmem:[%s28265_s5 + $0x1528] ss:$20 sps:$4 sm:$0xff]  }
 0x646   : > { %19131 = vmatprep.subr.bf16.mxu1 %v20933_v19  ;;  %19272 = vmatpush3.bf16.msra.mxu0 %v20931_v12  ;;  %v20974_v53 = vld [vmem:[%s28265_s5 + $0x1a68] ss:$20 sps:$4 sm:$0xff]   ;;  %v20982_v12 = vld [vmem:[%s28265_s5 + $0x1a44] ss:$20 sps:$4 sm:$0xff]  }
 0x647   : > { %v19095_v24 = vpop.f32.mrf.mxu0  ;;  %19273 = vmatprep.subr.bf16.mxu0 %v21869_v50 }
 0x648   : > { %v19096_v7 = vadd.f32 %v19095_v24, %v19094_v45  ;;  %v20983_v45 = vld [vmem:[%s28265_s5 + $0x1860] ss:$20 sps:$4 sm:$0xff]  }
 0x649   : > { %19132 = vmatpush3.bf16.msra.mxu1 %v20935_v22  ;;  %v19097_v28 = vpop.f32.mrf.mxu0 }
 0x64a   : > { %19133 = vmatprep.subr.bf16.mxu1 %v20936_v32  ;;  %19274 = vmatpush3.bf16.msra.mxu0 %v20934_v58  ;;  %v20991_v58 = vld [vmem:[%s28265_s5 + $0x183c] ss:$20 sps:$4 sm:$0xff]  }
 0x64b   : > { %v19098_v37 = vpop.f32.mrf.mxu0  ;;  %19275 = vmatprep.subr.bf16.mxu0 %v21869_v50  ;;  %v20988_v28 = vld [vmem:[%s28265_s5 + $0x1c9c] ss:$20 sps:$4 sm:$0xff]  }
 0x64c   : > { %v20986_v37 = vld [vmem:[%s28265_s5 + $0x1c98] ss:$20 sps:$4 sm:$0xff]  }
 0x64d   : > { %19134 = vmatpush3.bf16.msra.mxu1 %v20938_v52 }
 0x64e   : > { %19135 = vmatprep.subr.bf16.mxu1 %v20939_v20  ;;  %19276 = vmatpush3.bf16.msra.mxu0 %v20937_v54  ;;  %v20989_v20 = vld [vmem:[%s28265_s5 + $0x1838] ss:$20 sps:$4 sm:$0xff]  }
 0x64f   : > { %19277 = vmatprep.subr.bf16.mxu0 %v21869_v50 }
 0x651   : > { %19136 = vmatpush3.bf16.msra.mxu1 %v20941_v47  ;;  %v20994_v47 = vld [vmem:[%s28265_s5 + $0x1c74] ss:$20 sps:$4 sm:$0xff]  }
 0x652   : > { %19137 = vmatprep.subr.bf16.mxu1 %v20945_v63  ;;  %19278 = vmatpush3.bf16.msra.mxu0 %v20940_v56  ;;  %v20995_v63 = vld [vmem:[%s28265_s5 + $0x1810] ss:$20 sps:$4 sm:$0xff]   ;;  %v21003_v56 = vld [vmem:[%s28265_s5 + $0x17ec] ss:$20 sps:$4 sm:$0xff]  }
 0x653   : > { %11860 = vmatprep.subr.bf16.mxu0 %v20944_v9  ;;  %v20992_v9 = vld [vmem:[%s28265_s5 + $0x1c70] ss:$20 sps:$4 sm:$0xff]  }
 0x654   : > { %v19072_v21 = vpop.f32.mrf.mxu1 }
 0x655   : > { %19138 = vmatpush3.bf16.msra.mxu1 %v20946_v4  ;;  %19280 = vmatmul.mubr.msk.bf16.vlgmr.msra.gmra.mxu0 %vm5329_vm6, %v25886_v8  ;;  %v20954_v8 = vld [vmem:[%s28265_s5 + $0x1b0c] ss:$20 sps:$4 sm:$0xff]  }
 0x656   : > { %v19073_v57 = vpop.f32.mrf.mxu1  ;;  %19139 = vmatprep.subr.bf16.mxu1 %v20950_v29  ;;  %11861 = vmatpush1.bf16.msra.mxu0 %v20942_v59  ;;  %v21000_v4 = vld [vmem:[%s28265_s5 + $0x1c4c] ss:$20 sps:$4 sm:$0xff]   ;;  %v21001_v29 = vld [vmem:[%s28265_s5 + $0x17e8] ss:$20 sps:$4 sm:$0xff]   ;;  %v21009_v59 = vld [vmem:[%s28265_s5 + $0x17c4] ss:$20 sps:$4 sm:$0xff]  }
 0x657   : > { %11892 = vmatprep.mubr.bf16.mxu0 %v26276_v14  ;;  %v19074_v0 = vadd.f32 %v19073_v57, %v19072_v21  ;;  %11862 = vmatprep.subr.bf16.mxu0 %v20949_v41  ;;  %v20998_v21 = vld [vmem:[%s28265_s5 + $0x1c48] ss:$20 sps:$4 sm:$0xff]   ;;  %v21006_v41 = vld [vmem:[%s28265_s5 + $0x1c24] ss:$20 sps:$4 sm:$0xff]  }
 0x658   : > { %v19075_v61 = vpop.f32.mrf.mxu1  ;;  %v21015_v57 = vld [vmem:[%s28265_s5 + $0x1a1c] ss:$20 sps:$4 sm:$0xff]  }
 0x659   : > { %19140 = vmatpush3.bf16.msra.mxu1 %v20951_v60  ;;  %v8919_v43 = vadd.f32 %v19096_v7, %v19074_v0  ;;  %v20980_v7 = vld [vmem:[%s28265_s5 + $0x1a40] ss:$20 sps:$4 sm:$0xff]   ;;  %v21012_v0 = vld [vmem:[%s28265_s5 + $0x1bfc] ss:$20 sps:$4 sm:$0xff]  }
 0x65a   : > { %v19076_v17 = vpop.f32.mrf.mxu1  ;;  %19141 = vmatprep.subr.bf16.mxu1 %v20955_v51  ;;  %11863 = vmatpush1.bf16.msra.mxu0 %v20947_v18  ;;  %v21007_v60 = vld [vmem:[%s28265_s5 + $0x17c0] ss:$20 sps:$4 sm:$0xff]   ;;  %v21013_v18 = vld [vmem:[%s28265_s5 + $0x1a18] ss:$20 sps:$4 sm:$0xff]  }
 0x65b   : > { %11864 = vmatprep.subr.bf16.mxu0 %v20954_v8  ;;  %v21004_v51 = vld [vmem:[%s28265_s5 + $0x1c20] ss:$20 sps:$4 sm:$0xff]   ;;  %v21010_v8 = vld [vmem:[%s28265_s5 + $0x1bf8] ss:$20 sps:$4 sm:$0xff]  }
 0x65c   : > { %v21021_v61 = vld [vmem:[%s28265_s5 + $0x19f4] ss:$20 sps:$4 sm:$0xff]  }
 0x65d   : > { %19142 = vmatpush3.bf16.msra.mxu1 %v20956_v25  ;;  %v21018_v25 = vld [vmem:[%s28265_s5 + $0x1bd4] ss:$20 sps:$4 sm:$0xff]  }
 0x65e   : > { %19143 = vmatprep.subr.bf16.mxu1 %v20960_v34  ;;  %11865 = vmatpush1.bf16.msra.mxu0 %v20952_v38  ;;  %v21027_v34 = vld [vmem:[%s28265_s5 + $0x19cc] ss:$20 sps:$4 sm:$0xff]   ;;  %v21016_v38 = vld [vmem:[%s28265_s5 + $0x1bd0] ss:$20 sps:$4 sm:$0xff]  }
 0x65f   : > { %11866 = vmatprep.subr.bf16.mxu0 %v20959_v6 }
 0x661   : > { %19144 = vmatpush3.bf16.msra.mxu1 %v20961_v23  ;;  %v21024_v23 = vld [vmem:[%s28265_s5 + $0x1bac] ss:$20 sps:$4 sm:$0xff]  }
 0x662   : > { %11819 = vmatprep.subr.bf16.mxu1 %v20967_v16  ;;  %11867 = vmatpush1.bf16.msra.mxu0 %v20957_v42  ;;  %v21025_v16 = vld [vmem:[%s28265_s5 + $0x19c8] ss:$20 sps:$4 sm:$0xff]  }
 0x663   : > { %11868 = vmatprep.subr.bf16.mxu0 %v20964_v10  ;;  %v21033_v10 = vld [vmem:[%s28265_s5 + $0x19a4] ss:$20 sps:$4 sm:$0xff]  }
 0x664   : > { %10538 = vmatmul.mubr.bf16.vlgmr.msra.gmra.mxu1 %v25937_v40  ;;  %v20968_v40 = vld [vmem:[%s28265_s5 + $0x1a90] ss:$20 sps:$4 sm:$0xff]  }
 0x665   : > { %11820 = vmatpush1.bf16.msra.mxu1 %v20965_v3  ;;  %11851 = vmatprep.mubr.bf16.mxu1 %v26327_v33  ;;  %v21022_v3 = vld [vmem:[%s28265_s5 + $0x1ba8] ss:$20 sps:$4 sm:$0xff]  }
 0x666   : > { %11821 = vmatprep.subr.bf16.mxu1 %v20973_v39  ;;  %11869 = vmatpush1.bf16.msra.mxu0 %v20962_v44  ;;  %v21030_v44 = vld [vmem:[%s28265_s5 + $0x1b84] ss:$20 sps:$4 sm:$0xff]  }
 0x667   : > { %11870 = vmatprep.subr.bf16.mxu0 %v20970_v30  ;;  %v21031_v30 = vld [vmem:[%s28265_s5 + $0x19a0] ss:$20 sps:$4 sm:$0xff]  }
 0x669   : > { %11822 = vmatpush1.bf16.msra.mxu1 %v20971_v13  ;;  %v21039_v13 = vld [vmem:[%s28265_s5 + $0x197c] ss:$20 sps:$4 sm:$0xff]  }
 0x66a   : > { %11823 = vmatprep.subr.bf16.mxu1 %v20979_v55  ;;  %11871 = vmatpush1.bf16.msra.mxu0 %v20968_v40  ;;  %v21028_v55 = vld [vmem:[%s28265_s5 + $0x1b80] ss:$20 sps:$4 sm:$0xff]   ;;  %v21036_v40 = vld [vmem:[%s28265_s5 + $0x18e4] ss:$20 sps:$4 sm:$0xff]  }
 0x66b   : > { %11872 = vmatprep.subr.bf16.mxu0 %v20976_v15  ;;  %v21037_v15 = vld [vmem:[%s28265_s5 + $0x1978] ss:$20 sps:$4 sm:$0xff]  }
 0x66c   : > { %v8958_v19 = vpop.f32.mrf.mxu1 }
 0x66d   : > { %v8959_v22 = vadd.f32 %v8958_v19, %v8919_v43  ;;  %11824 = vmatpush1.bf16.msra.mxu1 %v20977_v26  ;;  %v21019_v43 = vld [vmem:[%s28265_s5 + $0x19f0] ss:$20 sps:$4 sm:$0xff]   ;;  %v21045_v26 = vld [vmem:[%s28265_s5 + $0x1954] ss:$20 sps:$4 sm:$0xff]  }
 0x66e   : > { %v19265_v32 = vpop.f32.mrf.mxu1  ;;  %11825 = vmatprep.subr.bf16.mxu1 %v20985_v11  ;;  %11873 = vmatpush1.bf16.msra.mxu0 %v20974_v53  ;;  %v21034_v11 = vld [vmem:[%s28265_s5 + $0x18e0] ss:$20 sps:$4 sm:$0xff]   ;;  %v26483_v53 = vrot.slane %v23933_v36, 1  ;;  %v21042_v19 = vld [vmem:[%s28265_s5 + $0x18bc] ss:$20 sps:$4 sm:$0xff]  }
 0x66f   : > { %v26365_v24 = vadd.f32 %v8959_v22, %v25699_v5  ;;  %11874 = vmatprep.subr.bf16.mxu0 %v20982_v12  ;;  %v20997_v5 = vld [vmem:[%s28265_s5 + $0x1814] ss:$20 sps:$4 sm:$0xff]   ;;  %v21043_v12 = vld [vmem:[%s28265_s5 + $0x1950] ss:$20 sps:$4 sm:$0xff]   ;;  %v21051_v22 = vld [vmem:[%s28265_s5 + $0x192c] ss:$20 sps:$4 sm:$0xff]  }
 0x670   : > { %v8961_v52 = vpop.f32.mrf.mxu1  ;;  %v21040_v36 = vld [vmem:[%s28265_s5 + $0x18b8] ss:$20 sps:$4 sm:$0xff]   ;;  %v21049_v32 = vld [vmem:[%s28265_s5 + $0x1928] ss:$20 sps:$4 sm:$0xff]  }
 0x671   : > { %11826 = vmatpush1.bf16.msra.mxu1 %v20983_v45  ;;  %v21048_v45 = vld [vmem:[%s28265_s5 + $0x1894] ss:$20 sps:$4 sm:$0xff]   ;;  %v21054_v52 = vld [vmem:[%s28265_s5 + $0x186c] ss:$20 sps:$4 sm:$0xff]  }
 0x672   : > { %v19266_v54 = vpop.f32.mrf.mxu1  ;;  %11827 = vmatprep.subr.bf16.mxu1 %v20991_v58  ;;  %11875 = vmatpush1.bf16.msra.mxu0 %v20980_v7  ;;  %v21057_v58 = vld [vmem:[%s28265_s5 + $0x1904] ss:$20 sps:$4 sm:$0xff]  }
 0x673   : > { %11876 = vmatprep.subr.bf16.mxu0 %v20988_v28  ;;  %v21046_v7 = vld [vmem:[%s28265_s5 + $0x1890] ss:$20 sps:$4 sm:$0xff]   ;;  %v21055_v28 = vld [vmem:[%s28265_s5 + $0x1900] ss:$20 sps:$4 sm:$0xff]  }
 0x674   : > { %v21063_v54 = vld [vmem:[%s28265_s5 + $0x1d8c] ss:$20 sps:$4 sm:$0xff]  }
 0x675   : > { %11828 = vmatpush1.bf16.msra.mxu1 %v20989_v20 }
 0x676   : > { %11829 = vmatprep.subr.bf16.mxu1 %v20997_v5  ;;  %11877 = vmatpush2.bf16.msra.mxu0 %v20986_v37  ;;  %v21052_v5 = vld [vmem:[%s28265_s5 + $0x1868] ss:$20 sps:$4 sm:$0xff]  }
 0x677   : > { %11878 = vmatprep.subr.bf16.mxu0 %v20994_v47  ;;  %v21060_v47 = vld [vmem:[%s28265_s5 + $0x1844] ss:$20 sps:$4 sm:$0xff]  }
 0x679   : > { %11830 = vmatpush1.bf16.msra.mxu1 %v20995_v63  ;;  %v21061_v63 = vld [vmem:[%s28265_s5 + $0x1d88] ss:$20 sps:$4 sm:$0xff]  }
 0x67a   : > { %11831 = vmatprep.subr.bf16.mxu1 %v21003_v56  ;;  %11879 = vmatpush2.bf16.msra.mxu0 %v20992_v9  ;;  %v26530_v9 = vrot.slane %v23882_v35, 1  ;;  %v21067_v35 = vld [vmem:[%s28265_s5 + $0x1d60] ss:$20 sps:$4 sm:$0xff]  }
 0x67b   : > { %11880 = vmatprep.subr.bf16.mxu0 %v21000_v4  ;;  %v21069_v4 = vld [vmem:[%s28265_s5 + $0x1d64] ss:$20 sps:$4 sm:$0xff]  }
 0x67d   : > { %11832 = vmatpush1.bf16.msra.mxu1 %v21001_v29  ;;  %v21058_v29 = vld [vmem:[%s28265_s5 + $0x1840] ss:$20 sps:$4 sm:$0xff]  }
 0x67e   : > { %11833 = vmatprep.subr.bf16.mxu1 %v21009_v59  ;;  %11881 = vmatpush2.bf16.msra.mxu0 %v20998_v21  ;;  %v21066_v21 = vld [vmem:[%s28265_s5 + $0x181c] ss:$20 sps:$4 sm:$0xff]  }
 0x67f   : > { %11882 = vmatprep.subr.bf16.mxu0 %v21006_v41  ;;  %v21075_v41 = vld [vmem:[%s28265_s5 + $0x1d3c] ss:$20 sps:$4 sm:$0xff]  }
 0x681   : > { %11834 = vmatpush1.bf16.msra.mxu1 %v21007_v60  ;;  %v21064_v60 = vld [vmem:[%s28265_s5 + $0x1818] ss:$20 sps:$4 sm:$0xff]  }
 0x682   : > { %11835 = vmatprep.subr.bf16.mxu1 %v21015_v57  ;;  %11883 = vmatpush2.bf16.msra.mxu0 %v21004_v51  ;;  %v21072_v57 = vld [vmem:[%s28265_s5 + $0x17f4] ss:$20 sps:$4 sm:$0xff]   ;;  %v21073_v51 = vld [vmem:[%s28265_s5 + $0x1d38] ss:$20 sps:$4 sm:$0xff]  }
 0x683   : > { %11884 = vmatprep.subr.bf16.mxu0 %v21012_v0  ;;  %v21081_v0 = vld [vmem:[%s28265_s5 + $0x1d14] ss:$20 sps:$4 sm:$0xff]  }
 0x685   : > { %11836 = vmatpush2.bf16.msra.mxu1 %v21013_v18  ;;  %v26436_v17 = vpop.f32.mrf.mxu0  ;;  %v21070_v18 = vld [vmem:[%s28265_s5 + $0x17f0] ss:$20 sps:$4 sm:$0xff]  }
 0x686   : > { %11837 = vmatprep.subr.bf16.mxu1 %v21021_v61  ;;  %11885 = vmatpush2.bf16.msra.mxu0 %v21010_v8  ;;  %v21078_v8 = vld [vmem:[%s28265_s5 + $0x17cc] ss:$20 sps:$4 sm:$0xff]  }
 0x687   : > { %v26444_v6 = vpop.f32.mrf.mxu0  ;;  %11886 = vmatprep.subr.bf16.mxu0 %v21018_v25 }
 0x689   : > { %11838 = vmatpush2.bf16.msra.mxu1 %v21019_v43  ;;  %v10257_v42 = vpop.f32.mrf.mxu0  ;;  %v21079_v43 = vld [vmem:[%s28265_s5 + $0x1d10] ss:$20 sps:$4 sm:$0xff]  }
 0x68a   : > { %11839 = vmatprep.subr.bf16.mxu1 %v21027_v34  ;;  %11887 = vmatpush2.bf16.msra.mxu0 %v21016_v38  ;;  %v21087_v38 = vld [vmem:[%s28265_s5 + $0x1cec] ss:$20 sps:$4 sm:$0xff]   ;;  %v21076_v42 = vld [vmem:[%s28265_s5 + $0x17c8] ss:$20 sps:$4 sm:$0xff]  }
 0x68b   : > { %v10258_v39 = vpop.f32.mrf.mxu0  ;;  %11888 = vmatprep.subr.bf16.mxu0 %v21024_v23 }
 0x68c   : > { %v21085_v39 = vld [vmem:[%s28265_s5 + $0x1ce8] ss:$20 sps:$4 sm:$0xff]  }
 0x68d   : > { %11840 = vmatpush2.bf16.msra.mxu1 %v21025_v16 }
 0x68e   : > { %11841 = vmatprep.subr.bf16.mxu1 %v21033_v10  ;;  %11889 = vmatpush2.bf16.msra.mxu0 %v21022_v3  ;;  %v21084_v10 = vld [vmem:[%s28265_s5 + $0x1a24] ss:$20 sps:$4 sm:$0xff]  }
 0x68f   : > { %11890 = vmatprep.subr.bf16.mxu0 %v21030_v44 }
 0x691   : > { %11842 = vmatpush2.bf16.msra.mxu1 %v21031_v30  ;;  %v21093_v30 = vld [vmem:[%s28265_s5 + $0x1cc4] ss:$20 sps:$4 sm:$0xff]  }
 0x692   : > { %11843 = vmatprep.subr.bf16.mxu1 %v21039_v13  ;;  %11891 = vmatpush2.bf16.msra.mxu0 %v21028_v55  ;;  %v21082_v13 = vld [vmem:[%s28265_s5 + $0x1a20] ss:$20 sps:$4 sm:$0xff]  }
 0x693   : > { %11942 = vmatprep.subr.bf16.mxu0 %v21036_v40  ;;  %v21091_v40 = vld [vmem:[%s28265_s5 + $0x1cc0] ss:$20 sps:$4 sm:$0xff]  }
 0x695   : > { %11844 = vmatpush2.bf16.msra.mxu1 %v21037_v15  ;;  %11893 = vmatmul.mubr.bf16.vlgmr.msra.gmra.mxu0 %v26483_v53  ;;  %v21099_v15 = vld [vmem:[%s28265_s5 + $0x1b64] ss:$20 sps:$4 sm:$0xff]  }
 0x696   : > { %11845 = vmatprep.subr.bf16.mxu1 %v21045_v26  ;;  %11943 = vmatpush1.bf16.msra.mxu0 %v21034_v11  ;;  %v21096_v26 = vld [vmem:[%s28265_s5 + $0x19d4] ss:$20 sps:$4 sm:$0xff]  }
 0x697   : > { %11974 = vmatprep.mubr.bf16.mxu0 %v26327_v33  ;;  %11944 = vmatprep.subr.bf16.mxu0 %v21042_v19  ;;  %v21097_v11 = vld [vmem:[%s28265_s5 + $0x1b60] ss:$20 sps:$4 sm:$0xff]   ;;  %v26615_v19 = vrot.slane %v24037_v31, 1  ;;  %v21103_v31 = vld [vmem:[%s28265_s5 + $0x1b38] ss:$20 sps:$4 sm:$0xff]  }
 0x699   : > { %11846 = vmatpush2.bf16.msra.mxu1 %v21043_v12  ;;  %v21105_v12 = vld [vmem:[%s28265_s5 + $0x1b3c] ss:$20 sps:$4 sm:$0xff]  }
 0x69a   : > { %11847 = vmatprep.subr.bf16.mxu1 %v21051_v22  ;;  %11945 = vmatpush1.bf16.msra.mxu0 %v21040_v36  ;;  %v21094_v22 = vld [vmem:[%s28265_s5 + $0x19d0] ss:$20 sps:$4 sm:$0xff]   ;;  %v21102_v36 = vld [vmem:[%s28265_s5 + $0x19ac] ss:$20 sps:$4 sm:$0xff]  }
 0x69b   : > { %11946 = vmatprep.subr.bf16.mxu0 %v21048_v45  ;;  %v21111_v45 = vld [vmem:[%s28265_s5 + $0x1b14] ss:$20 sps:$4 sm:$0xff]  }
 0x69d   : > { %11848 = vmatpush2.bf16.msra.mxu1 %v21049_v32  ;;  %v10335_v20 = vpop.f32.mrf.mxu0  ;;  %v21100_v32 = vld [vmem:[%s28265_s5 + $0x19a8] ss:$20 sps:$4 sm:$0xff]  }
 0x69e   : > { %11849 = vmatprep.subr.bf16.mxu1 %v21057_v58  ;;  %11947 = vmatpush1.bf16.msra.mxu0 %v21046_v7  ;;  %v21108_v58 = vld [vmem:[%s28265_s5 + $0x1984] ss:$20 sps:$4 sm:$0xff]  }
 0x69f   : > { %v10337_v37 = vpop.f32.mrf.mxu0  ;;  %11948 = vmatprep.subr.bf16.mxu0 %v21054_v52  ;;  %v21109_v7 = vld [vmem:[%s28265_s5 + $0x1b10] ss:$20 sps:$4 sm:$0xff]   ;;  %v21117_v52 = vld [vmem:[%s28265_s5 + $0x1aec] ss:$20 sps:$4 sm:$0xff]  }
 0x6a1   : > { %11850 = vmatpush2.bf16.msra.mxu1 %v21055_v28  ;;  %v10339_v56 = vpop.f32.mrf.mxu0  ;;  %v21106_v28 = vld [vmem:[%s28265_s5 + $0x1980] ss:$20 sps:$4 sm:$0xff]  }
 0x6a2   : > { %11905 = vmatprep.subr.bf16.mxu1 %v21063_v54  ;;  %11949 = vmatpush1.bf16.msra.mxu0 %v21052_v5  ;;  %v21115_v54 = vld [vmem:[%s28265_s5 + $0x1ae8] ss:$20 sps:$4 sm:$0xff]   ;;  %v21123_v5 = vld [vmem:[%s28265_s5 + $0x1ac4] ss:$20 sps:$4 sm:$0xff]  }
 0x6a3   : > { %v10340_v59 = vpop.f32.mrf.mxu0  ;;  %11950 = vmatprep.subr.bf16.mxu0 %v21060_v47  ;;  %v21120_v47 = vld [vmem:[%s28265_s5 + $0x1934] ss:$20 sps:$4 sm:$0xff]   ;;  %v21129_v56 = vld [vmem:[%s28265_s5 + $0x1a9c] ss:$20 sps:$4 sm:$0xff]  }
 0x6a4   : > { %11852 = vmatmul.mubr.bf16.vlgmr.msra.gmra.mxu1 %v26530_v9  ;;  %v21127_v59 = vld [vmem:[%s28265_s5 + $0x1a98] ss:$20 sps:$4 sm:$0xff]  }
 0x6a5   : > { %11906 = vmatpush1.bf16.msra.mxu1 %v21061_v63  ;;  %11933 = vmatprep.mubr.bf16.mxu1 %v21868_v1  ;;  %v21121_v63 = vld [vmem:[%s28265_s5 + $0x1ac0] ss:$20 sps:$4 sm:$0xff]  }
 0x6a6   : > { %11907 = vmatprep.subr.bf16.mxu1 %v21069_v4  ;;  %11951 = vmatpush1.bf16.msra.mxu0 %v21058_v29  ;;  %v21118_v4 = vld [vmem:[%s28265_s5 + $0x1930] ss:$20 sps:$4 sm:$0xff]   ;;  %v21126_v29 = vld [vmem:[%s28265_s5 + $0x190c] ss:$20 sps:$4 sm:$0xff]  }
 0x6a7   : > { %11952 = vmatprep.subr.bf16.mxu0 %v21066_v21  ;;  %v21135_v21 = vld [vmem:[%s28265_s5 + $0x1a74] ss:$20 sps:$4 sm:$0xff]  }
 0x6a9   : > { %11908 = vmatpush1.bf16.msra.mxu1 %v21067_v35  ;;  %v21124_v35 = vld [vmem:[%s28265_s5 + $0x1908] ss:$20 sps:$4 sm:$0xff]  }
 0x6aa   : > { %11909 = vmatprep.subr.bf16.mxu1 %v21075_v41  ;;  %11953 = vmatpush1.bf16.msra.mxu0 %v21064_v60  ;;  %v21132_v41 = vld [vmem:[%s28265_s5 + $0x1d94] ss:$20 sps:$4 sm:$0xff]   ;;  %v21133_v60 = vld [vmem:[%s28265_s5 + $0x1a70] ss:$20 sps:$4 sm:$0xff]  }
 0x6ab   : > { %11954 = vmatprep.subr.bf16.mxu0 %v21072_v57  ;;  %v21141_v57 = vld [vmem:[%s28265_s5 + $0x1a4c] ss:$20 sps:$4 sm:$0xff]  }
 0x6ac   : > { %v10294_v61 = vpop.f32.mrf.mxu1 }
 0x6ad   : > { %v10295_v25 = vadd.f32 %v10294_v61, %v26436_v17  ;;  %11910 = vmatpush1.bf16.msra.mxu1 %v21073_v51  ;;  %v21130_v51 = vld [vmem:[%s28265_s5 + $0x1d90] ss:$20 sps:$4 sm:$0xff]  }
 0x6ae   : > { %v10296_v34 = vpop.f32.mrf.mxu1  ;;  %11911 = vmatprep.subr.bf16.mxu1 %v21081_v0  ;;  %11955 = vmatpush1.bf16.msra.mxu0 %v21070_v18  ;;  %v21138_v0 = vld [vmem:[%s28265_s5 + $0x1d6c] ss:$20 sps:$4 sm:$0xff]   ;;  %v21139_v18 = vld [vmem:[%s28265_s5 + $0x1a48] ss:$20 sps:$4 sm:$0xff]   ;;  %v21147_v61 = vld [vmem:[%s28265_s5 + $0x1ca4] ss:$20 sps:$4 sm:$0xff]  }
 0x6af   : > { %v10336_v23 = vadd.f32 %v10335_v20, %v10295_v25  ;;  %v10297_v16 = vadd.f32 %v10296_v34, %v26444_v6  ;;  %11956 = vmatprep.subr.bf16.mxu0 %v21078_v8  ;;  %v21114_v20 = vld [vmem:[%s28265_s5 + $0x195c] ss:$20 sps:$4 sm:$0xff]   ;;  %v21144_v25 = vld [vmem:[%s28265_s5 + $0x1d44] ss:$20 sps:$4 sm:$0xff]  }
 0x6b0   : > { %v10298_v17 = vpop.f32.mrf.mxu1  ;;  %v21136_v8 = vld [vmem:[%s28265_s5 + $0x1d68] ss:$20 sps:$4 sm:$0xff]  }
 0x6b1   : > { %v10338_v3 = vadd.f32 %v10337_v37, %v10297_v16  ;;  %11912 = vmatpush1.bf16.msra.mxu1 %v21079_v43  ;;  %v26585_v44 = vadd.f32 %v10336_v23, %v25978_v48  ;;  %v21090_v48 = vld [vmem:[%s28265_s5 + $0x19fc] ss:$20 sps:$4 sm:$0xff]   ;;  %v21112_v37 = vld [vmem:[%s28265_s5 + $0x1958] ss:$20 sps:$4 sm:$0xff]   ;;  %v21145_v43 = vld [vmem:[%s28265_s5 + $0x1ca0] ss:$20 sps:$4 sm:$0xff]  }
 0x6b2   : > { %v10299_v6 = vpop.f32.mrf.mxu1  ;;  %11913 = vmatprep.subr.bf16.mxu1 %v21087_v38  ;;  %11957 = vmatpush1.bf16.msra.mxu0 %v21076_v42  ;;  %v21153_v34 = vld [vmem:[%s28265_s5 + $0x1c7c] ss:$20 sps:$4 sm:$0xff]   ;;  %v21142_v38 = vld [vmem:[%s28265_s5 + $0x1d40] ss:$20 sps:$4 sm:$0xff]   ;;  %v21151_v16 = vld [vmem:[%s28265_s5 + $0x1c78] ss:$20 sps:$4 sm:$0xff]  }
 0x6b3   : > { %v26594_v55 = vadd.f32 %v10338_v3, %v25987_v46  ;;  %11958 = vmatprep.subr.bf16.mxu0 %v21084_v10  ;;  %v21088_v46 = vld [vmem:[%s28265_s5 + $0x19f8] ss:$20 sps:$4 sm:$0xff]   ;;  %v21150_v23 = vld [vmem:[%s28265_s5 + $0x1d1c] ss:$20 sps:$4 sm:$0xff]   ;;  %v21159_v17 = vld [vmem:[%s28265_s5 + $0x1c54] ss:$20 sps:$4 sm:$0xff]  }
 0x6b4   : > { %v21148_v10 = vld [vmem:[%s28265_s5 + $0x1d18] ss:$20 sps:$4 sm:$0xff]   ;;  %v21157_v6 = vld [vmem:[%s28265_s5 + $0x1c50] ss:$20 sps:$4 sm:$0xff]  }
 0x6b5   : > { %11914 = vmatpush1.bf16.msra.mxu1 %v21085_v39  ;;  %v21156_v39 = vld [vmem:[%s28265_s5 + $0x1cf4] ss:$20 sps:$4 sm:$0xff]  }
 0x6b6   : > { %11915 = vmatprep.subr.bf16.mxu1 %v21093_v30  ;;  %11959 = vmatpush2.bf16.msra.mxu0 %v21082_v13  ;;  %v21165_v13 = vld [vmem:[%s28265_s5 + $0x1c2c] ss:$20 sps:$4 sm:$0xff]  }
 0x6b7   : > { %11960 = vmatprep.subr.bf16.mxu0 %v21090_v48  ;;  %v21154_v48 = vld [vmem:[%s28265_s5 + $0x1cf0] ss:$20 sps:$4 sm:$0xff]  }
 0x6b9   : > { %11916 = vmatpush1.bf16.msra.mxu1 %v21091_v40 }
 0x6ba   : > { %11983 = vmatprep.subr.bf16.mxu1 %v21099_v15  ;;  %11961 = vmatpush2.bf16.msra.mxu0 %v21088_v46  ;;  %v21162_v15 = vld [vmem:[%s28265_s5 + $0x1ccc] ss:$20 sps:$4 sm:$0xff]   ;;  %v21163_v46 = vld [vmem:[%s28265_s5 + $0x1c28] ss:$20 sps:$4 sm:$0xff]  }
 0x6bb   : > { %11962 = vmatprep.subr.bf16.mxu0 %v21096_v26  ;;  %v21169_v26 = vld [vmem:[%s28265_s5 + $0x1c04] ss:$20 sps:$4 sm:$0xff]  }
 0x6bc   : > { %18259 = vmatmul.mubr.msk.bf16.vlgmr.msra.gmra.mxu1 %vm5329_vm6, %v26615_v19 }
 0x6bd   : > { %11984 = vmatpush1.bf16.msra.mxu1 %v21097_v11  ;;  %12015 = vmatprep.mubr.bf16.mxu1 %v26276_v14  ;;  %v21160_v11 = vld [vmem:[%s28265_s5 + $0x1cc8] ss:$20 sps:$4 sm:$0xff]  }
 0x6be   : > { %11985 = vmatprep.subr.bf16.mxu1 %v21105_v12  ;;  %11963 = vmatpush2.bf16.msra.mxu0 %v21094_v22  ;;  %v21166_v12 = vld [vmem:[%s28265_s5 + $0x1ca8] ss:$20 sps:$4 sm:$0xff]   ;;  %v21167_v22 = vld [vmem:[%s28265_s5 + $0x1c00] ss:$20 sps:$4 sm:$0xff]  }
 0x6bf   : > { %11964 = vmatprep.subr.bf16.mxu0 %v21102_v36  ;;  %v21174_v36 = vld [vmem:[%s28265_s5 + $0x1bdc] ss:$20 sps:$4 sm:$0xff]  }
 0x6c1   : > { %11986 = vmatpush1.bf16.msra.mxu1 %v21103_v31  ;;  %v21170_v31 = vld [vmem:[%s28265_s5 + $0x1b68] ss:$20 sps:$4 sm:$0xff]  }
 0x6c2   : > { %11987 = vmatprep.subr.bf16.mxu1 %v21111_v45  ;;  %11965 = vmatpush2.bf16.msra.mxu0 %v21100_v32  ;;  %v21171_v32 = vld [vmem:[%s28265_s5 + $0x1c80] ss:$20 sps:$4 sm:$0xff]  }
 0x6c3   : > { %11966 = vmatprep.subr.bf16.mxu0 %v21108_v58 }
 0x6c5   : > { %11988 = vmatpush1.bf16.msra.mxu1 %v21109_v7  ;;  %v21172_v7 = vld [vmem:[%s28265_s5 + $0x1bd8] ss:$20 sps:$4 sm:$0xff]  }
 0x6c6   : > { %11989 = vmatprep.subr.bf16.mxu1 %v21117_v52  ;;  %11967 = vmatpush2.bf16.msra.mxu0 %v21106_v28  ;;  %v21179_v28 = vld [vmem:[%s28265_s5 + $0x1bb4] ss:$20 sps:$4 sm:$0xff]  }
 0x6c7   : > { %11968 = vmatprep.subr.bf16.mxu0 %v21114_v20 }
 0x6c9   : > { %11990 = vmatpush1.bf16.msra.mxu1 %v21115_v54  ;;  %v21175_v54 = vld [vmem:[%s28265_s5 + $0x1b40] ss:$20 sps:$4 sm:$0xff]  }
 0x6ca   : > { %11991 = vmatprep.subr.bf16.mxu1 %v21123_v5  ;;  %11969 = vmatpush2.bf16.msra.mxu0 %v21112_v37  ;;  %v21176_v37 = vld [vmem:[%s28265_s5 + $0x1c58] ss:$20 sps:$4 sm:$0xff]  }
 0x6cb   : > { %11970 = vmatprep.subr.bf16.mxu0 %v21120_v47  ;;  %v21177_v47 = vld [vmem:[%s28265_s5 + $0x1bb0] ss:$20 sps:$4 sm:$0xff]  }
 0x6cd   : > { %11992 = vmatpush1.bf16.msra.mxu1 %v21121_v63 }
 0x6ce   : > { %11993 = vmatprep.subr.bf16.mxu1 %v21129_v56  ;;  %11971 = vmatpush2.bf16.msra.mxu0 %v21118_v4  ;;  %v21180_v56 = vld [vmem:[%s28265_s5 + $0x1b18] ss:$20 sps:$4 sm:$0xff]   ;;  %v21181_v4 = vld [vmem:[%s28265_s5 + $0x1c30] ss:$20 sps:$4 sm:$0xff]  }
 0x6cf   : > { %11972 = vmatprep.subr.bf16.mxu0 %v21126_v29  ;;  %v21182_v29 = vld [vmem:[%s28265_s5 + $0x1b88] ss:$20 sps:$4 sm:$0xff]  }
 0x6d1   : > { %11994 = vmatpush1.bf16.msra.mxu1 %v21127_v59  ;;  %v21187_v59 = vld [vmem:[%s28265_s5 + $0x1a28] ss:$20 sps:$4 sm:$0xff]  }
 0x6d2   : > { %11995 = vmatprep.subr.bf16.mxu1 %v21135_v21  ;;  %11973 = vmatpush2.bf16.msra.mxu0 %v21124_v35  ;;  %v21185_v21 = vld [vmem:[%s28265_s5 + $0x1af0] ss:$20 sps:$4 sm:$0xff]   ;;  %v21186_v35 = vld [vmem:[%s28265_s5 + $0x1c08] ss:$20 sps:$4 sm:$0xff]  }
 0x6d3   : > { %12028 = vmatprep.subr.bf16.mxu0 %v21132_v41  ;;  %v21189_v41 = vld [vmem:[%s28265_s5 + $0x18e8] ss:$20 sps:$4 sm:$0xff]  }
 0x6d5   : > { %11996 = vmatpush1.bf16.msra.mxu1 %v21133_v60  ;;  %11975 = vmatmul.mubr.bf16.vlgmr.msra.gmra.mxu0 %v26530_v9  ;;  %v21191_v60 = vld [vmem:[%s28265_s5 + $0x1a00] ss:$20 sps:$4 sm:$0xff]  }
 0x6d6   : > { %11997 = vmatprep.subr.bf16.mxu1 %v21141_v57  ;;  %12029 = vmatpush1.bf16.msra.mxu0 %v21130_v51  ;;  %v21188_v57 = vld [vmem:[%s28265_s5 + $0x1ac8] ss:$20 sps:$4 sm:$0xff]   ;;  %v21190_v51 = vld [vmem:[%s28265_s5 + $0x1be0] ss:$20 sps:$4 sm:$0xff]  }
 0x6d7   : > { %12056 = vmatprep.mubr.bf16.mxu0 %v21868_v1  ;;  %12030 = vmatprep.subr.bf16.mxu0 %v21138_v0  ;;  %v21193_v0 = vld [vmem:[%s28265_s5 + $0x18c0] ss:$20 sps:$4 sm:$0xff]  }
 0x6d9   : > { %11998 = vmatpush1.bf16.msra.mxu1 %v21139_v18 }
 0x6da   : > { %11999 = vmatprep.subr.bf16.mxu1 %v21147_v61  ;;  %12031 = vmatpush1.bf16.msra.mxu0 %v21136_v8  ;;  %v21195_v61 = vld [vmem:[%s28265_s5 + $0x19d8] ss:$20 sps:$4 sm:$0xff]   ;;  %v21192_v8 = vld [vmem:[%s28265_s5 + $0x1aa0] ss:$20 sps:$4 sm:$0xff]  }
 0x6db   : > { %12032 = vmatprep.subr.bf16.mxu0 %v21144_v25 }
 0x6dd   : > { %12000 = vmatpush2.bf16.msra.mxu1 %v21145_v43  ;;  %v10417_v42 = vpop.f32.mrf.mxu0 }
 0x6de   : > { %12001 = vmatprep.subr.bf16.mxu1 %v21153_v34  ;;  %12033 = vmatpush1.bf16.msra.mxu0 %v21142_v38  ;;  %v21197_v34 = vld [vmem:[%s28265_s5 + $0x1898] ss:$20 sps:$4 sm:$0xff]  }
 0x6df   : > { %v10419_v3 = vpop.f32.mrf.mxu0  ;;  %12034 = vmatprep.subr.bf16.mxu0 %v21150_v23  ;;  %v21199_v23 = vld [vmem:[%s28265_s5 + $0x19b0] ss:$20 sps:$4 sm:$0xff]  }
 0x6e1   : > { %12002 = vmatpush2.bf16.msra.mxu1 %v21151_v16  ;;  %v10421_v30 = vpop.f32.mrf.mxu0  ;;  %v21196_v16 = vld [vmem:[%s28265_s5 + $0x1a78] ss:$20 sps:$4 sm:$0xff]  }
 0x6e2   : > { %12003 = vmatprep.subr.bf16.mxu1 %v21159_v17  ;;  %12035 = vmatpush1.bf16.msra.mxu0 %v21148_v10  ;;  %v21198_v10 = vld [vmem:[%s28265_s5 + $0x1b90] ss:$20 sps:$4 sm:$0xff]   ;;  %v21202_v30 = vld [vmem:[%s28265_s5 + $0x1988] ss:$20 sps:$4 sm:$0xff]  }
 0x6e3   : > { %v10422_v40 = vpop.f32.mrf.mxu0  ;;  %12036 = vmatprep.subr.bf16.mxu0 %v21156_v39  ;;  %v21201_v39 = vld [vmem:[%s28265_s5 + $0x1870] ss:$20 sps:$4 sm:$0xff]  }
 0x6e4   : > { %v21200_v40 = vld [vmem:[%s28265_s5 + $0x1a50] ss:$20 sps:$4 sm:$0xff]  }
 0x6e5   : > { %12004 = vmatpush2.bf16.msra.mxu1 %v21157_v6 }
 0x6e6   : > { %12005 = vmatprep.subr.bf16.mxu1 %v21165_v13  ;;  %12037 = vmatpush1.bf16.msra.mxu0 %v21154_v48 }
 0x6e7   : > { %12038 = vmatprep.subr.bf16.mxu0 %v21162_v15 }
 0x6e9   : > { %12006 = vmatpush2.bf16.msra.mxu1 %v21163_v46 }
 0x6ea   : > { %12007 = vmatprep.subr.bf16.mxu1 %v21169_v26  ;;  %12039 = vmatpush1.bf16.msra.mxu0 %v21160_v11  ;;  %v21203_v26 = vld [vmem:[%s28265_s5 + $0x1848] ss:$20 sps:$4 sm:$0xff]  }
 0x6eb   : > { %19180 = vmatprep.subr.bf16.mxu0 %v21166_v12  ;;  %v21205_v12 = vld [vmem:[%s28265_s5 + $0x1820] ss:$20 sps:$4 sm:$0xff]  }
 0x6ec   : > { %v10376_v45 = vpop.f32.mrf.mxu1 }
 0x6ed   : > { %v26775_v58 = vadd.f32 %v10417_v42, %v10376_v45  ;;  %12008 = vmatpush2.bf16.msra.mxu1 %v21167_v22  ;;  %18260 = vmatmul.mubr.msk.bf16.vlgmr.msra.gmra.mxu0 %vm5329_vm6, %v26615_v19  ;;  %v21207_v22 = vld [vmem:[%s28265_s5 + $0x17f8] ss:$20 sps:$4 sm:$0xff]  }
 0x6ee   : > { %v10378_v52 = vpop.f32.mrf.mxu1  ;;  %12009 = vmatprep.subr.bf16.mxu1 %v21174_v36  ;;  %19181 = vmatpush3.bf16.msra.mxu0 %v21170_v31  ;;  %v21208_v36 = vld [vmem:[%s28265_s5 + $0x1910] ss:$20 sps:$4 sm:$0xff]  }
 0x6ef   : > { %12137 = vmatprep.mubr.bf16.mxu0 %v26276_v14  ;;  %v10420_v20 = vadd.f32 %v10419_v3, %v10378_v52  ;;  %19182 = vmatprep.subr.bf16.mxu0 %v21171_v32  ;;  %v21184_v14 = vld [vmem:[%s28265_s5 + $0x1b8c] ss:$20 sps:$4 sm:$0xff]   ;;  %v21211_v52 = vld [vmem:[%s28265_s5 + $0x1d70] ss:$20 sps:$4 sm:$0xff]  }
 0x6f0   : > { %v10380_v5 = vpop.f32.mrf.mxu1  ;;  %v21210_v32 = vld [vmem:[%s28265_s5 + $0x1d98] ss:$20 sps:$4 sm:$0xff]  }
 0x6f1   : > { %12010 = vmatpush2.bf16.msra.mxu1 %v21172_v7 }
 0x6f2   : > { %v10381_v63 = vpop.f32.mrf.mxu1  ;;  %12011 = vmatprep.subr.bf16.mxu1 %v21179_v28  ;;  %19183 = vmatpush3.bf16.msra.mxu0 %v21175_v54  ;;  %v21212_v28 = vld [vmem:[%s28265_s5 + $0x1d48] ss:$20 sps:$4 sm:$0xff]  }
 0x6f3   : > { %19184 = vmatprep.subr.bf16.mxu0 %v21176_v37  ;;  %v21214_v63 = vld [vmem:[%s28265_s5 + $0x1cf8] ss:$20 sps:$4 sm:$0xff]  }
 0x6f5   : > { %12012 = vmatpush2.bf16.msra.mxu1 %v21177_v47 }
 0x6f6   : > { %12013 = vmatprep.subr.bf16.mxu1 %v21184_v14  ;;  %19185 = vmatpush3.bf16.msra.mxu0 %v21180_v56 }
 0x6f7   : > { %19186 = vmatprep.subr.bf16.mxu0 %v21181_v4  ;;  %v21215_v4 = vld [vmem:[%s28265_s5 + $0x1cd0] ss:$20 sps:$4 sm:$0xff]  }
 0x6f9   : > { %12014 = vmatpush2.bf16.msra.mxu1 %v21182_v29 }
 0x6fa   : > { %19158 = vmatprep.subr.bf16.mxu1 %v21187_v59  ;;  %19187 = vmatpush3.bf16.msra.mxu0 %v21185_v21 }
 0x6fb   : > { %19188 = vmatprep.subr.bf16.mxu0 %v21186_v35 }
 0x6fc   : > { %12016 = vmatmul.mubr.bf16.vlgmr.msra.gmra.mxu1 %v26483_v53 }
 0x6fd   : > { %19159 = vmatpush3.bf16.msra.mxu1 %v21189_v41  ;;  %12097 = vmatprep.mubr.bf16.mxu1 %v26327_v33  ;;  %v19123_v18 = vpop.f32.mrf.mxu0  ;;  %v21194_v33 = vld [vmem:[%s28265_s5 + $0x1bb8] ss:$20 sps:$4 sm:$0xff]  }
 0x6fe   : > { %19160 = vmatprep.subr.bf16.mxu1 %v21191_v60  ;;  %19189 = vmatpush3.bf16.msra.mxu0 %v21188_v57 }
 0x6ff   : > { %v19124_v25 = vpop.f32.mrf.mxu0  ;;  %19190 = vmatprep.subr.bf16.mxu0 %v21190_v51 }
 0x700   : > { %v26842_v43 = vadd.f32 %v19124_v25, %v19123_v18 }
 0x701   : > { %19161 = vmatpush3.bf16.msra.mxu1 %v21193_v0  ;;  %v19126_v38 = vpop.f32.mrf.mxu0 }
 0x702   : > { %19162 = vmatprep.subr.bf16.mxu1 %v21195_v61  ;;  %19191 = vmatpush3.bf16.msra.mxu0 %v21192_v8 }
 0x703   : > { %v19127_v42 = vpop.f32.mrf.mxu0  ;;  %19192 = vmatprep.subr.bf16.mxu0 %v21194_v33 }
 0x704   : > { %v10458_v17 = vpop.f32.mrf.mxu1 }
 0x705   : > { %v10459_v3 = vadd.f32 %v10458_v17, %v26775_v58  ;;  %19163 = vmatpush3.bf16.msra.mxu1 %v21197_v34 }
 0x706   : > { %v10460_v6 = vpop.f32.mrf.mxu1  ;;  %19164 = vmatprep.subr.bf16.mxu1 %v21199_v23  ;;  %19193 = vmatpush3.bf16.msra.mxu0 %v21196_v16 }
 0x707   : > { %v26864_v13 = vadd.f32 %v10459_v3, %v26192_v27  ;;  %v10461_v48 = vadd.f32 %v10460_v6, %v10420_v20  ;;  %19194 = vmatprep.subr.bf16.mxu0 %v21198_v10  ;;  %v21204_v27 = vld [vmem:[%s28265_s5 + $0x1960] ss:$20 sps:$4 sm:$0xff]  }
 0x708   : > { %v10462_v15 = vpop.f32.mrf.mxu1 }
 0x709   : > { %v26870_v46 = vadd.f32 %v10461_v48, %v26201_v49  ;;  %19165 = vmatpush3.bf16.msra.mxu1 %v21201_v39  ;;  %v21206_v49 = vld [vmem:[%s28265_s5 + $0x1938] ss:$20 sps:$4 sm:$0xff]  }
 0x70a   : > { %v10463_v11 = vpop.f32.mrf.mxu1  ;;  %19166 = vmatprep.subr.bf16.mxu1 %v21202_v30  ;;  %19195 = vmatpush3.bf16.msra.mxu0 %v21200_v40 }
 0x70d   : > { %19167 = vmatpush3.bf16.msra.mxu1 %v21203_v26  ;;  %12138 = vmatmul.mubr.bf16.vlgmr.msra.gmra.mxu0 %v26483_v53  ;;  %v21209_v53 = vld [vmem:[%s28265_s5 + $0x17d0] ss:$20 sps:$4 sm:$0xff]  }
 0x70e   : > { %19168 = vmatprep.subr.bf16.mxu1 %v21204_v27  ;;  %12291 = vmatprep.mubr.bf16.mxu0 %v21868_v1 }
 0x711   : > { %19169 = vmatpush3.bf16.msra.mxu1 %v21205_v12 }
 0x712   : > { %19170 = vmatprep.subr.bf16.mxu1 %v21206_v49 }
 0x715   : > { %19171 = vmatpush3.bf16.msra.mxu1 %v21207_v22  ;;  %v10579_v31 = vpop.f32.mrf.mxu0 }
 0x716   : > { %19172 = vmatprep.subr.bf16.mxu1 %v21208_v36 }
 0x717   : > { %v19281_v45 = vpop.f32.mrf.mxu0 }
 0x719   : > { %19173 = vmatpush3.bf16.msra.mxu1 %v21209_v53  ;;  %v10582_v58 = vpop.f32.mrf.mxu0 }
 0x71a   : > { %19283 = vmatprep.subr.bf16.mxu1 %v21869_v50 }
 0x71b   : > { %v19282_v7 = vpop.f32.mrf.mxu0 }
 0x71c   : > { %12098 = vmatmul.mubr.bf16.vlgmr.msra.gmra.mxu1 %v26530_v9  ;;  %v21213_v9 = vld [vmem:[%s28265_s5 + $0x1d20] ss:$20 sps:$4 sm:$0xff]  }
 0x71d   : > { %19284 = vmatpush3.bf16.msra.mxu1 %v21210_v32  ;;  %19295 = vmatprep.mubr.msk.bf16.mxu1 %vm21870_vm7, %v21869_v50  ;;  %v26941_v32 = vld [vmem:[%s28262_s2] sm:$0xf] }
 0x71e   : > { %19285 = vmatprep.subr.bf16.mxu1 %v21869_v50 }
 0x721   : > { %19286 = vmatpush3.bf16.msra.mxu1 %v21211_v52 }
 0x722   : > { %19287 = vmatprep.subr.bf16.mxu1 %v21869_v50 }
 0x724   : > { %v19145_v20 = vpop.f32.mrf.mxu1 }
 0x725   : > { %19288 = vmatpush3.bf16.msra.mxu1 %v21212_v28 }
 0x726   : > { %v19146_v54 = vpop.f32.mrf.mxu1  ;;  %19289 = vmatprep.subr.bf16.mxu1 %v21869_v50 }
 0x727   : > { %v19147_v5 = vadd.f32 %v19146_v54, %v19145_v20 }
 0x728   : > { %v19148_v37 = vpop.f32.mrf.mxu1 }
 0x729   : > { %v10540_v47 = vadd.f32 %v19147_v5, %v26842_v43  ;;  %19290 = vmatpush3.bf16.msra.mxu1 %v21213_v9 }
 0x72a   : > { %v19149_v14 = vpop.f32.mrf.mxu1  ;;  %19291 = vmatprep.subr.bf16.mxu1 %v21869_v50 }
 0x72b   : > { %v10580_v56 = vadd.f32 %v10579_v31, %v10540_v47 }
 0x72d   : > { %19292 = vmatpush3.bf16.msra.mxu1 %v21214_v63  ;;  %v26923_v29 = vadd.f32 %v10580_v56, %v26365_v24 }
 0x72e   : > { %19293 = vmatprep.subr.bf16.mxu1 %v21869_v50 }
 0x731   : > { %19294 = vmatpush3.bf16.msra.mxu1 %v21215_v4 }
 0x732   : > { %19299 = vmatprep.subr.bf16.mxu1 %v21869_v50 }
 0x734   : > { %19296 = vmatmul.mubr.msk.bf16.vlgmr.msra.gmra.mxu1 %vm5329_vm6, %v26615_v19 }
 0x735   : > { %19301 = vmatprep.mubr.msk.bf16.mxu1 %vm21870_vm7, %v21869_v50 }
 0x755   : > { %v11894_v59 = vpop.f32.mrf.mxu0 }
 0x757   : > { %v11896_v21 = vpop.f32.mrf.mxu0 }
 0x759   : > { %v11898_v35 = vpop.f32.mrf.mxu0 }
 0x75b   : > { %v11899_v41 = vpop.f32.mrf.mxu0 }
 0x764   : > { %v11853_v60 = vpop.f32.mrf.mxu1 }
 0x765   : > { %v11895_v0 = vadd.f32 %v11894_v59, %v11853_v60 }
 0x766   : > { %v11855_v57 = vpop.f32.mrf.mxu1 }
 0x767   : > { %v11897_v61 = vadd.f32 %v11896_v21, %v11855_v57 }
 0x768   : > { %v11857_v51 = vpop.f32.mrf.mxu1 }
 0x76a   : > { %v11858_v24 = vpop.f32.mrf.mxu1 }
 0x77c   : > { %v11935_v18 = vpop.f32.mrf.mxu1 }
 0x77d   : > { %v11936_v8 = vadd.f32 %v11935_v18, %v11895_v0 }
 0x77e   : > { %v11937_v25 = vpop.f32.mrf.mxu1 }
 0x77f   : > { %v12185_v33 = vadd.f32 %v11936_v8, %v26585_v44  ;;  %v11938_v43 = vadd.f32 %v11937_v25, %v11897_v61 }
 0x780   : > { %v11939_v19 = vpop.f32.mrf.mxu1 }
 0x781   : > { %v12195_v34 = vmin.f32 %v12185_v33, 0.0  ;;  %v12186_v50 = vadd.f32 %v11938_v43, %v26594_v55  ;;  %vm12190_vm9 = vcmp.gt.f32.partialorder %v12185_v33, 0.0  ;;  %v21871_v55 = vmov 65535  }
 0x782   : > { %v11940_v38 = vpop.f32.mrf.mxu1  ;;  %v12242_v11 = vsel %vm9208_vm8, 4294967295, %v21871_v55  ;;  %v21272_v55 = vld [vmem:[%s28267_s7 + $0x34] ss:$8 sps:$4 sm:$0xff]  }
 0x783   : > { %v12200_v23 = vmul.f32 1.442695, %v12195_v34  ;;  %v12196_v16 = vmin.f32 %v12186_v50, 0.0  ;;  %vm12191_vm10 = vcmp.gt.f32.partialorder %v12186_v50, 0.0  ;;  %v26934_v53 = vsel %vm12241_vm11, %v12242_v11, 0 }
 0x785   : > { %21784 = vpow2.f32 %v12200_v23  ;;  %v12202_v42 = vmul.f32 1.442695, %v12196_v16 }
 0x787   : > { %21786 = vpow2.f32 %v12202_v42 }
 0x792   : > { %v21785_v17 = vpop.eup %21784 }
 0x793   : > { %v18262_v10 = vadd.f32 -1.0, %v21785_v17  ;;  %v21248_v17 = vld [vmem:[%s28267_s7 + $0x74] ss:$8 sps:$4 sm:$0xff]  }
 0x794   : > { %v21787_v3 = vpop.eup %21786 }
 0x795   : > { %v12215_v39 = vmul.f32 1.6732632, %v18262_v10  ;;  %v18263_v6 = vadd.f32 -1.0, %v21787_v3  ;;  %v11976_v30 = vpop.f32.mrf.mxu0 }
 0x797   : > { %v12220_v48 = vsel %vm12190_vm9, %v12185_v33, %v12215_v39  ;;  %v12216_v44 = vmul.f32 1.6732632, %v18263_v6  ;;  %v11978_v15 = vpop.f32.mrf.mxu0  ;;  %v21246_v39 = vld [vmem:[%s28267_s7 + $0x70] ss:$8 sps:$4 sm:$0xff]   ;;  %v21254_v6 = vld [vmem:[%s28267_s7 + $0x64] ss:$8 sps:$4 sm:$0xff]  }
 0x798   : > { %v12225_v40 = vmul.f32 1.050701, %v12220_v48  ;;  %v21260_v48 = vld [vmem:[%s28267_s7 + $0x54] ss:$8 sps:$4 sm:$0xff]  }
 0x799   : > { %v12221_v26 = vsel %vm12191_vm10, %v12186_v50, %v12216_v44  ;;  %v11980_v27 = vpop.f32.mrf.mxu0  ;;  %v21258_v44 = vld [vmem:[%s28267_s7 + $0x50] ss:$8 sps:$4 sm:$0xff]  }
 0x79a   : > { %v12226_v12 = vmul.f32 1.050701, %v12221_v26  ;;  %v12230_v49 = vpack.c.bf16 %v12225_v40, %v12225_v40  ;;  %v21266_v40 = vld [vmem:[%s28267_s7 + $0x44] ss:$8 sps:$4 sm:$0xff]   ;;  %v21264_v26 = vld [vmem:[%s28267_s7 + $0x40] ss:$8 sps:$4 sm:$0xff]  }
 0x79b   : > { %v11981_v22 = vpop.f32.mrf.mxu0 }
 0x79c   : > { %v12231_v36 = vpack.c.bf16 %v12226_v12, %v12226_v12  ;;  %v12245_v45 = vand.u32 %v26934_v53, %v12230_v49  ;;  %v21270_v12 = vld [vmem:[%s28267_s7 + $0x30] ss:$8 sps:$4 sm:$0xff]  }
 0x79e   : > { %v12248_v31 = vand.u32 %v26934_v53, %v12231_v36 }
 0x7a0   : > { %12273 = vmatprep.subr.bf16.mxu0 %v12248_v31 }
 0x7a1   : > { %12274 = vmatpush1.bf16.msra.mxu0 %v12245_v45 }
 0x7a4   : > { %18267 = vmatmul.mubr.msk.bf16.vlgmr.msra.gmra.mxu0 %vm12236_vm12, %v26941_v32 }
 0x7a5   : > { %12332 = vmatprep.mubr.bf16.mxu0 %v21868_v1 }
 0x7ad   : > { %v12058_v58 = vpop.f32.mrf.mxu0 }
 0x7af   : > { %v12060_v7 = vpop.f32.mrf.mxu0 }
 0x7b1   : > { %v12062_v52 = vpop.f32.mrf.mxu0 }
 0x7b3   : > { %v12063_v28 = vpop.f32.mrf.mxu0 }
 0x7bc   : > { %v12017_v20 = vpop.f32.mrf.mxu1 }
 0x7bd   : > { %v12018_v9 = vadd.f32 %v12017_v20, %v11976_v30  ;;  %v21252_v30 = vld [vmem:[%s28267_s7 + $0x60] ss:$8 sps:$4 sm:$0xff]  }
 0x7be   : > { %v12019_v54 = vpop.f32.mrf.mxu1 }
 0x7bf   : > { %v12059_v5 = vadd.f32 %v12058_v58, %v12018_v9  ;;  %v12020_v37 = vadd.f32 %v12019_v54, %v11978_v15 }
 0x7c0   : > { %v12021_v47 = vpop.f32.mrf.mxu1 }
 0x7c1   : > { %v12187_v63 = vadd.f32 %v12059_v5, %v26864_v13  ;;  %v12061_v14 = vadd.f32 %v12060_v7, %v12020_v37  ;;  %v21218_v47 = vld [vmem:[%s28267_s7 + $0x174] ss:$8 sps:$4 sm:$0xff]  }
 0x7c2   : > { %v12022_v56 = vpop.f32.mrf.mxu1 }
 0x7c3   : > { %v12197_v4 = vmin.f32 %v12187_v63, 0.0  ;;  %v12188_v59 = vadd.f32 %v12061_v14, %v26870_v46  ;;  %vm12192_vm13 = vcmp.gt.f32.partialorder %v12187_v63, 0.0  ;;  %v21221_v14 = vld [vmem:[%s28267_s7 + $0x164] ss:$8 sps:$4 sm:$0xff]   ;;  %v21219_v56 = vld [vmem:[%s28267_s7 + $0x160] ss:$8 sps:$4 sm:$0xff]  }
 0x7c5   : > { %v12204_v21 = vmul.f32 1.442695, %v12197_v4  ;;  %v12198_v35 = vmin.f32 %v12188_v59, 0.0  ;;  %vm12193_vm14 = vcmp.gt.f32.partialorder %v12188_v59, 0.0  ;;  %v21222_v4 = vld [vmem:[%s28267_s7 + $0x150] ss:$8 sps:$4 sm:$0xff]  }
 0x7c7   : > { %21788 = vpow2.f32 %v12204_v21  ;;  %v12206_v41 = vmul.f32 1.442695, %v12198_v35  ;;  %v21276_v21 = vld [vmem:[%s28267_s7 + $0x20] ss:$8 sps:$4 sm:$0xff]  }
 0x7c8   : > { %v21225_v35 = vld [vmem:[%s28267_s7 + $0x140] ss:$8 sps:$4 sm:$0xff]  }
 0x7c9   : > { %21790 = vpow2.f32 %v12206_v41  ;;  %v21230_v41 = vld [vmem:[%s28267_s7 + $0x134] ss:$8 sps:$4 sm:$0xff]  }
 0x7cd   : > { %v19196_v60 = vpop.f32.mrf.mxu0 }
 0x7cf   : > { %v19197_v57 = vpop.f32.mrf.mxu0 }
 0x7d0   : > { %v19198_v11 = vadd.f32 %v19197_v57, %v19196_v60  ;;  %v21284_v60 = vld [vmem:[%s28267_s7 + $0x14] ss:$8 sps:$4 sm:$0xff]   ;;  %v21282_v57 = vld [vmem:[%s28267_s7 + $0x10] ss:$8 sps:$4 sm:$0xff]  }
 0x7d1   : > { %v19199_v51 = vpop.f32.mrf.mxu0 }
 0x7d2   : > { %v21228_v51 = vld [vmem:[%s28267_s7 + $0x130] ss:$8 sps:$4 sm:$0xff]  }
 0x7d3   : > { %v19200_v0 = vpop.f32.mrf.mxu0 }
 0x7d4   : > { %v21789_v24 = vpop.eup %21788  ;;  %v21290_v0 = vld [vmem:[%s28267_s7 + $0x4] ss:$8 sps:$4 sm:$0xff]  }
 0x7d5   : > { %v18264_v18 = vadd.f32 -1.0, %v21789_v24  ;;  %v21233_v24 = vld [vmem:[%s28267_s7 + $0x124] ss:$8 sps:$4 sm:$0xff]  }
 0x7d6   : > { %v21791_v61 = vpop.eup %21790 }
 0x7d7   : > { %v12217_v8 = vmul.f32 1.6732632, %v18264_v18  ;;  %v18265_v25 = vadd.f32 -1.0, %v21791_v61  ;;  %v21288_v18 = vld [vmem:[%s28267_s7] ss:$8 sps:$4 sm:$0xff]  }
 0x7d8   : > { %v21231_v61 = vld [vmem:[%s28267_s7 + $0x120] ss:$8 sps:$4 sm:$0xff]  }
 0x7d9   : > { %v12222_v13 = vsel %vm12192_vm13, %v12187_v63, %v12217_v8  ;;  %v12218_v33 = vmul.f32 1.6732632, %v18265_v25  ;;  %v21236_v8 = vld [vmem:[%s28267_s7 + $0x114] ss:$8 sps:$4 sm:$0xff]  }
 0x7da   : > { %v12227_v43 = vmul.f32 1.050701, %v12222_v13  ;;  %v21296_v25 = vld [vmem:[%s28267_s7 + $0xf4] ss:$8 sps:$4 sm:$0xff]   ;;  %v21294_v13 = vld [vmem:[%s28267_s7 + $0xf0] ss:$8 sps:$4 sm:$0xff]  }
 0x7db   : > { %v12223_v46 = vsel %vm12193_vm14, %v12188_v59, %v12218_v33  ;;  %v21278_v59 = vld [vmem:[%s28267_s7 + $0x24] ss:$8 sps:$4 sm:$0xff]   ;;  %v21234_v33 = vld [vmem:[%s28267_s7 + $0x110] ss:$8 sps:$4 sm:$0xff]  }
 0x7dc   : > { %v19174_v19 = vpop.f32.mrf.mxu1  ;;  %v12228_v34 = vmul.f32 1.050701, %v12223_v46  ;;  %v12232_v50 = vpack.c.bf16 %v12227_v43, %v12227_v43  ;;  %v21239_v43 = vld [vmem:[%s28267_s7 + $0x104] ss:$8 sps:$4 sm:$0xff]  }
 0x7dd   : > { %v21302_v46 = vld [vmem:[%s28267_s7 + $0xe4] ss:$8 sps:$4 sm:$0xff]  }
 0x7de   : > { %v19175_v38 = vpop.f32.mrf.mxu1  ;;  %v12233_v23 = vpack.c.bf16 %v12228_v34, %v12228_v34  ;;  %v12251_v10 = vand.u32 %v26934_v53, %v12232_v50  ;;  %v21237_v34 = vld [vmem:[%s28267_s7 + $0x100] ss:$8 sps:$4 sm:$0xff]   ;;  %v21242_v50 = vld [vmem:[%s28267_s7 + $0x1f4] ss:$8 sps:$4 sm:$0xff]  }
 0x7df   : > { %v19176_v15 = vadd.f32 %v19175_v38, %v19174_v19  ;;  %v21300_v19 = vld [vmem:[%s28267_s7 + $0xe0] ss:$8 sps:$4 sm:$0xff]   ;;  %v21308_v38 = vld [vmem:[%s28267_s7 + $0xd4] ss:$8 sps:$4 sm:$0xff]  }
 0x7e0   : > { %v19177_v16 = vpop.f32.mrf.mxu1  ;;  %v12254_v42 = vand.u32 %v26934_v53, %v12233_v23  ;;  %v21306_v23 = vld [vmem:[%s28267_s7 + $0xd0] ss:$8 sps:$4 sm:$0xff]  }
 0x7e1   : > { %v12140_v27 = vadd.f32 %v19198_v11, %v19176_v15  ;;  %v21240_v16 = vld [vmem:[%s28267_s7 + $0x1f0] ss:$8 sps:$4 sm:$0xff]   ;;  %v21324_v15 = vld [vmem:[%s28267_s7 + $0xa0] ss:$8 sps:$4 sm:$0xff]   ;;  %v21332_v11 = vld [vmem:[%s28267_s7 + $0x94] ss:$8 sps:$4 sm:$0xff]  }
 0x7e2   : > { %v19178_v3 = vpop.f32.mrf.mxu1  ;;  %12314 = vmatprep.subr.bf16.mxu0 %v12254_v42  ;;  %v21245_v42 = vld [vmem:[%s28267_s7 + $0x1e4] ss:$8 sps:$4 sm:$0xff]  }
 0x7e3   : > { %12315 = vmatpush1.bf16.msra.mxu0 %v12251_v10  ;;  %v21312_v10 = vld [vmem:[%s28267_s7 + $0xc0] ss:$8 sps:$4 sm:$0xff]  }
 0x7e4   : > { %12799 = vmatprep.subr.bf16.mxu0 %v21248_v17  ;;  %v21314_v17 = vld [vmem:[%s28267_s7 + $0xc4] ss:$8 sps:$4 sm:$0xff]   ;;  %v21243_v3 = vld [vmem:[%s28267_s7 + $0x1e0] ss:$8 sps:$4 sm:$0xff]  }
 0x7e6   : > { %18268 = vmatmul.mubr.msk.bf16.vlgmr.msra.gmra.mxu0 %vm12236_vm12, %v26941_v32 }
 0x7e7   : > { %12800 = vmatpush1.bf16.msra.mxu0 %v21246_v39  ;;  %v21251_v39 = vld [vmem:[%s28267_s7 + $0x1d4] ss:$8 sps:$4 sm:$0xff]  }
 0x7e8   : > { %12801 = vmatprep.subr.bf16.mxu0 %v21254_v6  ;;  %v21320_v6 = vld [vmem:[%s28267_s7 + $0xb4] ss:$8 sps:$4 sm:$0xff]  }
 0x7eb   : > { %12802 = vmatpush1.bf16.msra.mxu0 %v21252_v30  ;;  %v21318_v30 = vld [vmem:[%s28267_s7 + $0xb0] ss:$8 sps:$4 sm:$0xff]  }
 0x7ec   : > { %12803 = vmatprep.subr.bf16.mxu0 %v21260_v48  ;;  %v21249_v48 = vld [vmem:[%s28267_s7 + $0x1d0] ss:$8 sps:$4 sm:$0xff]  }
 0x7ef   : > { %12804 = vmatpush1.bf16.msra.mxu0 %v21258_v44  ;;  %v21257_v44 = vld [vmem:[%s28267_s7 + $0x1c4] ss:$8 sps:$4 sm:$0xff]  }
 0x7f0   : > { %12805 = vmatprep.subr.bf16.mxu0 %v21266_v40  ;;  %v21326_v40 = vld [vmem:[%s28267_s7 + $0xa4] ss:$8 sps:$4 sm:$0xff]  }
 0x7f3   : > { %12806 = vmatpush1.bf16.msra.mxu0 %v21264_v26  ;;  %v21255_v26 = vld [vmem:[%s28267_s7 + $0x1c0] ss:$8 sps:$4 sm:$0xff]  }
 0x7f4   : > { %v12179_v49 = vpop.f32.mrf.mxu1  ;;  %12807 = vmatprep.subr.bf16.mxu0 %v21272_v55  ;;  %v21263_v55 = vld [vmem:[%s28267_s7 + $0x1b4] ss:$8 sps:$4 sm:$0xff]  }
 0x7f5   : > { %v12180_v22 = vadd.f32 %v12179_v49, %v12140_v27  ;;  %v21330_v27 = vld [vmem:[%s28267_s7 + $0x90] ss:$8 sps:$4 sm:$0xff]   ;;  %v21269_v49 = vld [vmem:[%s28267_s7 + $0x1a4] ss:$8 sps:$4 sm:$0xff]  }
 0x7f6   : > { %v19297_v36 = vpop.f32.mrf.mxu1 }
 0x7f7   : > { %v12189_v31 = vadd.f32 %v12180_v22, %v26923_v29  ;;  %12808 = vmatpush1.bf16.msra.mxu0 %v21270_v12  ;;  %v21216_v29 = vld [vmem:[%s28267_s7 + $0x170] ss:$8 sps:$4 sm:$0xff]   ;;  %v21338_v22 = vld [vmem:[%s28267_s7 + $0x84] ss:$8 sps:$4 sm:$0xff]   ;;  %v21336_v36 = vld [vmem:[%s28267_s7 + $0x80] ss:$8 sps:$4 sm:$0xff]  }
 0x7f8   : > { %v12182_v45 = vpop.f32.mrf.mxu1  ;;  %12809 = vmatprep.subr.bf16.mxu0 %v21278_v59  ;;  %v21261_v12 = vld [vmem:[%s28267_s7 + $0x1b0] ss:$8 sps:$4 sm:$0xff]  }
 0x7f9   : > { %v12199_v58 = vmin.f32 %v12189_v31, 0.0  ;;  %vm12194_vm15 = vcmp.gt.f32.partialorder %v12189_v31, 0.0  ;;  %v21275_v45 = vld [vmem:[%s28267_s7 + $0x194] ss:$8 sps:$4 sm:$0xff]  }
 0x7fa   : > { %v19298_v7 = vpop.f32.mrf.mxu1 }
 0x7fb   : > { %v12208_v52 = vmul.f32 1.442695, %v12199_v58  ;;  %12810 = vmatpush1.bf16.msra.mxu0 %v21276_v21  ;;  %v21273_v58 = vld [vmem:[%s28267_s7 + $0x190] ss:$8 sps:$4 sm:$0xff]   ;;  %v21281_v7 = vld [vmem:[%s28267_s7 + $0x184] ss:$8 sps:$4 sm:$0xff]  }
 0x7fc   : > { %12811 = vmatprep.subr.bf16.mxu0 %v21284_v60 }
 0x7fd   : > { %21792 = vpow2.f32 %v12208_v52  ;;  %v21344_v52 = vld [vmem:[%s28267_s7 + $0x214] ss:$8 sps:$4 sm:$0xff]  }
 0x7ff   : > { %12812 = vmatpush1.bf16.msra.mxu0 %v21282_v57 }
 0x800   : > { %12813 = vmatprep.subr.bf16.mxu0 %v21290_v0 }
 0x803   : > { %12814 = vmatpush1.bf16.msra.mxu0 %v21288_v18 }
 0x804   : > { %12815 = vmatprep.subr.bf16.mxu0 %v21296_v25 }
 0x807   : > { %12816 = vmatpush2.bf16.msra.mxu0 %v21294_v13  ;;  %v21291_v13 = vld [vmem:[%s28267_s7 + $0x280] ss:$8 sps:$4 sm:$0xff]  }
 0x808   : > { %12817 = vmatprep.subr.bf16.mxu0 %v21302_v46  ;;  %v21299_v46 = vld [vmem:[%s28267_s7 + $0x274] ss:$8 sps:$4 sm:$0xff]  }
 0x80a   : > { %v21793_v28 = vpop.eup %21792 }
 0x80b   : > { %v18266_v20 = vadd.f32 -1.0, %v21793_v28  ;;  %12818 = vmatpush2.bf16.msra.mxu0 %v21300_v19  ;;  %v21279_v28 = vld [vmem:[%s28267_s7 + $0x180] ss:$8 sps:$4 sm:$0xff]  }
 0x80c   : > { %12819 = vmatprep.subr.bf16.mxu0 %v21308_v38  ;;  %v21305_v38 = vld [vmem:[%s28267_s7 + $0x264] ss:$8 sps:$4 sm:$0xff]  }
 0x80d   : > { %v12219_v9 = vmul.f32 1.6732632, %v18266_v20  ;;  %v21287_v20 = vld [vmem:[%s28267_s7 + $0x294] ss:$8 sps:$4 sm:$0xff]  }
 0x80f   : > { %v12224_v54 = vsel %vm12194_vm15, %v12189_v31, %v12219_v9  ;;  %12820 = vmatpush2.bf16.msra.mxu0 %v21306_v23  ;;  %v21267_v31 = vld [vmem:[%s28267_s7 + $0x1a0] ss:$8 sps:$4 sm:$0xff]  }
 0x810   : > { %v12229_v5 = vmul.f32 1.050701, %v12224_v54  ;;  %12821 = vmatprep.subr.bf16.mxu0 %v21314_v17  ;;  %v21303_v23 = vld [vmem:[%s28267_s7 + $0x260] ss:$8 sps:$4 sm:$0xff]   ;;  %v21317_v17 = vld [vmem:[%s28267_s7 + $0x244] ss:$8 sps:$4 sm:$0xff]  }
 0x812   : > { %v12234_v37 = vpack.c.bf16 %v12229_v5, %v12229_v5 }
 0x813   : > { %12822 = vmatpush2.bf16.msra.mxu0 %v21312_v10  ;;  %v21315_v10 = vld [vmem:[%s28267_s7 + $0x240] ss:$8 sps:$4 sm:$0xff]  }
 0x814   : > { %v12257_v63 = vand.u32 %v26934_v53, %v12234_v37  ;;  %v21224_v53 = vld [vmem:[%s28267_s7 + $0x154] ss:$8 sps:$4 sm:$0xff]   ;;  %12823 = vmatprep.subr.bf16.mxu0 %v21320_v6  ;;  %v21329_v6 = vld [vmem:[%s28267_s7 + $0x224] ss:$8 sps:$4 sm:$0xff]  }
 0x816   : > { %19300 = vmatpush3.bf16.msra.mxu1 %v12257_v63 }
 0x817   : > { %12840 = vmatprep.subr.bf16.mxu1 %v21218_v47  ;;  %12824 = vmatpush2.bf16.msra.mxu0 %v21318_v30  ;;  %v21342_v47 = vld [vmem:[%s28267_s7 + $0x210] ss:$8 sps:$4 sm:$0xff]   ;;  %v21327_v30 = vld [vmem:[%s28267_s7 + $0x220] ss:$8 sps:$4 sm:$0xff]  }
 0x818   : > { %12825 = vmatprep.subr.bf16.mxu0 %v21326_v40  ;;  %v21341_v40 = vld [vmem:[%s28267_s7 + $0x304] ss:$8 sps:$4 sm:$0xff]  }
 0x819   : > { %19302 = vmatmul.mubr.msk.bf16.vlgmr.msra.gmra.mxu1 %vm12236_vm12, %v26941_v32  ;;  %v21227_v32 = vld [vmem:[%s28267_s7 + $0x144] ss:$8 sps:$4 sm:$0xff]  }
 0x81a   : > { %12841 = vmatpush1.bf16.msra.mxu1 %v21216_v29  ;;  %v21350_v29 = vld [vmem:[%s28267_s7 + $0x204] ss:$8 sps:$4 sm:$0xff]  }
 0x81b   : > { %12842 = vmatprep.subr.bf16.mxu1 %v21221_v14  ;;  %12826 = vmatpush2.bf16.msra.mxu0 %v21324_v15  ;;  %v21339_v15 = vld [vmem:[%s28267_s7 + $0x300] ss:$8 sps:$4 sm:$0xff]  }
 0x81c   : > { %12827 = vmatprep.subr.bf16.mxu0 %v21332_v11  ;;  %v21353_v11 = vld [vmem:[%s28267_s7 + $0x2e4] ss:$8 sps:$4 sm:$0xff]  }
 0x81e   : > { %12843 = vmatpush1.bf16.msra.mxu1 %v21219_v56  ;;  %v21348_v56 = vld [vmem:[%s28267_s7 + $0x200] ss:$8 sps:$4 sm:$0xff]  }
 0x81f   : > { %12844 = vmatprep.subr.bf16.mxu1 %v21224_v53  ;;  %12828 = vmatpush2.bf16.msra.mxu0 %v21330_v27  ;;  %v21359_v53 = vld [vmem:[%s28267_s7 + $0x394] ss:$8 sps:$4 sm:$0xff]   ;;  %v21351_v27 = vld [vmem:[%s28267_s7 + $0x2e0] ss:$8 sps:$4 sm:$0xff]  }
 0x820   : > { %12829 = vmatprep.subr.bf16.mxu0 %v21338_v22  ;;  %v21354_v22 = vld [vmem:[%s28267_s7 + $0x2d0] ss:$8 sps:$4 sm:$0xff]  }
 0x822   : > { %12845 = vmatpush1.bf16.msra.mxu1 %v21222_v4 }
 0x823   : > { %12846 = vmatprep.subr.bf16.mxu1 %v21227_v32  ;;  %12830 = vmatpush2.bf16.msra.mxu0 %v21336_v36  ;;  %v21357_v36 = vld [vmem:[%s28267_s7 + $0x390] ss:$8 sps:$4 sm:$0xff]  }
 0x824   : > { %12893 = vmatprep.subr.bf16.mxu0 %v21344_v52 }
 0x826   : > { %12847 = vmatpush1.bf16.msra.mxu1 %v21225_v35 }
 0x827   : > { %12848 = vmatprep.subr.bf16.mxu1 %v21230_v41  ;;  %v21285_v41 = vld [vmem:[%s28267_s7 + $0x290] ss:$8 sps:$4 sm:$0xff]  }
 0x82a   : > { %12849 = vmatpush1.bf16.msra.mxu1 %v21228_v51  ;;  %v21293_v51 = vld [vmem:[%s28267_s7 + $0x284] ss:$8 sps:$4 sm:$0xff]  }
 0x82b   : > { %12850 = vmatprep.subr.bf16.mxu1 %v21233_v24 }
 0x82e   : > { %12851 = vmatpush1.bf16.msra.mxu1 %v21231_v61 }
 0x82f   : > { %12852 = vmatprep.subr.bf16.mxu1 %v21236_v8 }
 0x832   : > { %12853 = vmatpush1.bf16.msra.mxu1 %v21234_v33 }
 0x833   : > { %12854 = vmatprep.subr.bf16.mxu1 %v21239_v43 }
 0x836   : > { %12855 = vmatpush1.bf16.msra.mxu1 %v21237_v34 }
 0x837   : > { %12856 = vmatprep.subr.bf16.mxu1 %v21242_v50  ;;  %v21297_v50 = vld [vmem:[%s28267_s7 + $0x270] ss:$8 sps:$4 sm:$0xff]  }
 0x83a   : > { %12857 = vmatpush2.bf16.msra.mxu1 %v21240_v16  ;;  %v21311_v16 = vld [vmem:[%s28267_s7 + $0x254] ss:$8 sps:$4 sm:$0xff]  }
 0x83b   : > { %12858 = vmatprep.subr.bf16.mxu1 %v21245_v42  ;;  %v21309_v42 = vld [vmem:[%s28267_s7 + $0x250] ss:$8 sps:$4 sm:$0xff]  }
 0x83e   : > { %12859 = vmatpush2.bf16.msra.mxu1 %v21243_v3  ;;  %v21323_v3 = vld [vmem:[%s28267_s7 + $0x234] ss:$8 sps:$4 sm:$0xff]  }
 0x83f   : > { %12860 = vmatprep.subr.bf16.mxu1 %v21251_v39  ;;  %v21321_v39 = vld [vmem:[%s28267_s7 + $0x230] ss:$8 sps:$4 sm:$0xff]  }
 0x842   : > { %12861 = vmatpush2.bf16.msra.mxu1 %v21249_v48  ;;  %v21335_v48 = vld [vmem:[%s28267_s7 + $0x314] ss:$8 sps:$4 sm:$0xff]  }
 0x843   : > { %12862 = vmatprep.subr.bf16.mxu1 %v21257_v44  ;;  %v21333_v44 = vld [vmem:[%s28267_s7 + $0x310] ss:$8 sps:$4 sm:$0xff]  }
 0x846   : > { %12863 = vmatpush2.bf16.msra.mxu1 %v21255_v26  ;;  %v21347_v26 = vld [vmem:[%s28267_s7 + $0x2f4] ss:$8 sps:$4 sm:$0xff]  }
 0x847   : > { %12864 = vmatprep.subr.bf16.mxu1 %v21263_v55  ;;  %v21345_v55 = vld [vmem:[%s28267_s7 + $0x2f0] ss:$8 sps:$4 sm:$0xff]  }
 0x84a   : > { %12865 = vmatpush2.bf16.msra.mxu1 %v21261_v12  ;;  %v21356_v12 = vld [vmem:[%s28267_s7 + $0x2d4] ss:$8 sps:$4 sm:$0xff]  }
 0x84b   : > { %12866 = vmatprep.subr.bf16.mxu1 %v21269_v49 }
 0x84e   : > { %12867 = vmatpush2.bf16.msra.mxu1 %v21267_v31 }
 0x84f   : > { %12868 = vmatprep.subr.bf16.mxu1 %v21275_v45  ;;  %v21362_v45 = vld [vmem:[%s28267_s7 + $0x2c4] ss:$8 sps:$4 sm:$0xff]  }
 0x852   : > { %12869 = vmatpush2.bf16.msra.mxu1 %v21273_v58  ;;  %v21365_v58 = vld [vmem:[%s28267_s7 + $0x384] ss:$8 sps:$4 sm:$0xff]  }
 0x853   : > { %12870 = vmatprep.subr.bf16.mxu1 %v21281_v7 }
 0x856   : > { %12871 = vmatpush2.bf16.msra.mxu1 %v21279_v28  ;;  %v21360_v28 = vld [vmem:[%s28267_s7 + $0x2c0] ss:$8 sps:$4 sm:$0xff]  }
 0x857   : > { %13361 = vmatprep.subr.bf16.mxu1 %v21287_v20  ;;  %v21363_v20 = vld [vmem:[%s28267_s7 + $0x380] ss:$8 sps:$4 sm:$0xff]  }
 0x864   : > { %v12293_v9 = vpop.f32.mrf.mxu0 }
 0x865   : > { %v27154_v54 = vpack.c.bf16 %v12293_v9, %v12293_v9 }
 0x866   : > { %v12295_v5 = vpop.f32.mrf.mxu0 }
 0x867   : > { %v27156_v37 = vpack.c.bf16 %v12295_v5, %v12295_v5  ;;  %v21368_v5 = vld [vmem:[%s28267_s7 + $0x2b4] ss:$8 sps:$4 sm:$0xff]  }
 0x868   : > { %v12297_v63 = vpop.f32.mrf.mxu0 }
 0x869   : > { %12831 = vmatprep.mubr.bf16.mxu0 %v27156_v37  ;;  %v13010_v60 = vrot.slane %v27156_v37, 2 }
 0x86a   : > { %v12298_v14 = vpop.f32.mrf.mxu0  ;;  %12832 = vmatmul.mubr.bf16.vlgmr.msra.gmra.mxu0 %v27154_v54 }
 0x86b   : > { %12894 = vmatpush1.bf16.msra.mxu0 %v21342_v47  ;;  %12913 = vmatprep.mubr.bf16.mxu0 %v21868_v1  ;;  %v21371_v47 = vld [vmem:[%s28267_s7 + $0x374] ss:$8 sps:$4 sm:$0xff]   ;;  %v21369_v14 = vld [vmem:[%s28267_s7 + $0x370] ss:$8 sps:$4 sm:$0xff]  }
 0x86c   : > { %12895 = vmatprep.subr.bf16.mxu0 %v21350_v29  ;;  %v21366_v29 = vld [vmem:[%s28267_s7 + $0x2b0] ss:$8 sps:$4 sm:$0xff]  }
 0x86f   : > { %12896 = vmatpush1.bf16.msra.mxu0 %v21348_v56  ;;  %v21374_v56 = vld [vmem:[%s28267_s7 + $0x2a4] ss:$8 sps:$4 sm:$0xff]  }
 0x870   : > { %13402 = vmatprep.subr.bf16.mxu0 %v21359_v53  ;;  %v21377_v53 = vld [vmem:[%s28267_s7 + $0x364] ss:$8 sps:$4 sm:$0xff]  }
 0x8a6   : > { %v12334_v4 = vpop.f32.mrf.mxu0 }
 0x8a7   : > { %v27173_v32 = vpack.c.bf16 %v12334_v4, %v12334_v4  ;;  %v21372_v4 = vld [vmem:[%s28267_s7 + $0x2a0] ss:$8 sps:$4 sm:$0xff]  }
 0x8a8   : > { %v12336_v59 = vpop.f32.mrf.mxu0 }
 0x8a9   : > { %v13570_v21 = vshrl.u32 %v27173_v32, 16  ;;  %v27176_v35 = vpack.c.bf16 %v12336_v59, %v12336_v59  ;;  %v13572_v57 = vshll.u32 %v27173_v32, 16  ;;  %v21375_v59 = vld [vmem:[%s28267_s7 + $0x360] ss:$8 sps:$4 sm:$0xff]  }
 0x8aa   : > { %v12338_v24 = vpop.f32.mrf.mxu0 }
 0x8ab   : > { %12872 = vmatprep.mubr.bf16.mxu1 %v27176_v35  ;;  %v13577_v0 = vshrl.u32 %v27176_v35, 16  ;;  %v13579_v18 = vshll.u32 %v27176_v35, 16  ;;  %v27192_v8 = vrot.slane %v13570_v21, 2  ;;  %v27196_v25 = vrot.slane %v13572_v57, 3  ;;  %v21381_v24 = vld [vmem:[%s28267_s7 + $0x430] ss:$8 sps:$4 sm:$0xff]  }
 0x8ac   : > { %12873 = vmatmul.mubr.bf16.vlgmr.msra.gmra.mxu1 %v27173_v32  ;;  %v12339_v61 = vpop.f32.mrf.mxu0  ;;  %v13012_v9 = vrot.slane %v27176_v35, 2 }
 0x8ad   : > { %13362 = vmatpush1.bf16.msra.mxu1 %v21285_v41  ;;  %13393 = vmatprep.mubr.bf16.mxu1 %v13010_v60  ;;  %v27203_v33 = vrot.slane %v13577_v0, 2  ;;  %v27207_v43 = vrot.slane %v13579_v18, 3  ;;  %v14138_v19 = vor.u32 %v27196_v25, %v27192_v8  ;;  %v21380_v41 = vld [vmem:[%s28267_s7 + $0x354] ss:$8 sps:$4 sm:$0xff]   ;;  %v13009_v61 = vrot.slane %v27154_v54, 2 }
 0x8ae   : > { %13363 = vmatprep.subr.bf16.mxu1 %v21293_v51  ;;  %v21383_v60 = vld [vmem:[%s28267_s7 + $0x434] ss:$8 sps:$4 sm:$0xff]   ;;  %v21378_v51 = vld [vmem:[%s28267_s7 + $0x350] ss:$8 sps:$4 sm:$0xff]  }
 0x8af   : > { %v14141_v34 = vor.u32 %v27207_v43, %v27203_v33  ;;  %v21572_v33 = vld [vmem:[%s28267_s7 + $0x6f4] ss:$8 sps:$4 sm:$0xff]   ;;  %v21573_v43 = vld [vmem:[%s28267_s7 + $0x7b0] ss:$8 sps:$4 sm:$0xff]  }
 0x8b0   : > { %v21671_v8 = vld [vmem:[%s28267_s7 + $0xa34] ss:$8 sps:$4 sm:$0xff]   ;;  %v21666_v25 = vld [vmem:[%s28267_s7 + $0x8d0] ss:$8 sps:$4 sm:$0xff]  }
 0x8b1   : > { %13364 = vmatpush1.bf16.msra.mxu1 %v21291_v13  ;;  %v21386_v13 = vld [vmem:[%s28267_s7 + $0x344] ss:$8 sps:$4 sm:$0xff]  }
 0x8b2   : > { %13365 = vmatprep.subr.bf16.mxu1 %v21299_v46  ;;  %v21389_v46 = vld [vmem:[%s28267_s7 + $0x424] ss:$8 sps:$4 sm:$0xff]  }
 0x8b5   : > { %13366 = vmatpush1.bf16.msra.mxu1 %v21297_v50  ;;  %v21384_v50 = vld [vmem:[%s28267_s7 + $0x340] ss:$8 sps:$4 sm:$0xff]  }
 0x8b6   : > { %13367 = vmatprep.subr.bf16.mxu1 %v21305_v38  ;;  %v21387_v38 = vld [vmem:[%s28267_s7 + $0x420] ss:$8 sps:$4 sm:$0xff]  }
 0x8b9   : > { %13368 = vmatpush1.bf16.msra.mxu1 %v21303_v23  ;;  %v21392_v23 = vld [vmem:[%s28267_s7 + $0x334] ss:$8 sps:$4 sm:$0xff]  }
 0x8ba   : > { %13369 = vmatprep.subr.bf16.mxu1 %v21311_v16  ;;  %v21395_v16 = vld [vmem:[%s28267_s7 + $0x5b4] ss:$8 sps:$4 sm:$0xff]  }
 0x8bd   : > { %13370 = vmatpush1.bf16.msra.mxu1 %v21309_v42  ;;  %v13581_v42 = vrot.slane %v13579_v18, 1  ;;  %v21401_v18 = vld [vmem:[%s28267_s7 + $0x5a4] ss:$8 sps:$4 sm:$0xff]  }
 0x8be   : > { %13371 = vmatprep.subr.bf16.mxu1 %v21317_v17  ;;  %v21390_v17 = vld [vmem:[%s28267_s7 + $0x330] ss:$8 sps:$4 sm:$0xff]  }
 0x8c1   : > { %13372 = vmatpush1.bf16.msra.mxu1 %v21315_v10  ;;  %v21393_v10 = vld [vmem:[%s28267_s7 + $0x5b0] ss:$8 sps:$4 sm:$0xff]  }
 0x8c2   : > { %13373 = vmatprep.subr.bf16.mxu1 %v21323_v3 }
 0x8c5   : > { %13374 = vmatpush1.bf16.msra.mxu1 %v21321_v39  ;;  %v21398_v39 = vld [vmem:[%s28267_s7 + $0x324] ss:$8 sps:$4 sm:$0xff]  }
 0x8c6   : > { %13375 = vmatprep.subr.bf16.mxu1 %v21329_v6  ;;  %v13582_v6 = vor.u32 %v13581_v42, %v13577_v0  ;;  %v21407_v0 = vld [vmem:[%s28267_s7 + $0x594] ss:$8 sps:$4 sm:$0xff]   ;;  %v21453_v42 = vld [vmem:[%s28267_s7 + $0x610] ss:$8 sps:$4 sm:$0xff]  }
 0x8c9   : > { %13376 = vmatpush1.bf16.msra.mxu1 %v21327_v30  ;;  %v21396_v30 = vld [vmem:[%s28267_s7 + $0x320] ss:$8 sps:$4 sm:$0xff]  }
 0x8ca   : > { %13377 = vmatprep.subr.bf16.mxu1 %v21335_v48  ;;  %v21399_v48 = vld [vmem:[%s28267_s7 + $0x5a0] ss:$8 sps:$4 sm:$0xff]  }
 0x8cd   : > { %13378 = vmatpush2.bf16.msra.mxu1 %v21333_v44  ;;  %v21404_v44 = vld [vmem:[%s28267_s7 + $0x414] ss:$8 sps:$4 sm:$0xff]  }
 0x8ce   : > { %13379 = vmatprep.subr.bf16.mxu1 %v21341_v40  ;;  %v21402_v40 = vld [vmem:[%s28267_s7 + $0x410] ss:$8 sps:$4 sm:$0xff]  }
 0x8d1   : > { %13380 = vmatpush2.bf16.msra.mxu1 %v21339_v15  ;;  %v21405_v15 = vld [vmem:[%s28267_s7 + $0x590] ss:$8 sps:$4 sm:$0xff]  }
 0x8d2   : > { %13381 = vmatprep.subr.bf16.mxu1 %v21347_v26  ;;  %v21410_v26 = vld [vmem:[%s28267_s7 + $0x404] ss:$8 sps:$4 sm:$0xff]  }
 0x8d5   : > { %13382 = vmatpush2.bf16.msra.mxu1 %v21345_v55  ;;  %v21413_v55 = vld [vmem:[%s28267_s7 + $0x584] ss:$8 sps:$4 sm:$0xff]  }
 0x8d6   : > { %13383 = vmatprep.subr.bf16.mxu1 %v21353_v11  ;;  %v21408_v11 = vld [vmem:[%s28267_s7 + $0x400] ss:$8 sps:$4 sm:$0xff]  }
 0x8d9   : > { %13384 = vmatpush2.bf16.msra.mxu1 %v21351_v27  ;;  %v12375_v49 = vpop.f32.mrf.mxu1  ;;  %v21411_v27 = vld [vmem:[%s28267_s7 + $0x580] ss:$8 sps:$4 sm:$0xff]  }
 0x8da   : > { %v27282_v31 = vpack.c.bf16 %v12375_v49, %v12375_v49  ;;  %13385 = vmatprep.subr.bf16.mxu1 %v21356_v12  ;;  %v21416_v12 = vld [vmem:[%s28267_s7 + $0x3f4] ss:$8 sps:$4 sm:$0xff]  }
 0x8db   : > { %v19303_v7 = vpop.f32.mrf.mxu1  ;;  %v21419_v49 = vld [vmem:[%s28267_s7 + $0x574] ss:$8 sps:$4 sm:$0xff]  }
 0x8dc   : > { %18338 = vmatmul.mubr.msk.bf16.vlgmr.msra.gmra.mxu0 %vm12795_vm0, %v27282_v31  ;;  %v13013_v3 = vrot.slane %v27282_v31, 2  ;;  %v21420_v7 = vld [vmem:[%s28267_s7 + $0x3e0] ss:$8 sps:$4 sm:$0xff]  }
 0x8dd   : > { %13386 = vmatpush2.bf16.msra.mxu1 %v21354_v22  ;;  %13403 = vmatpush1.bf16.msra.mxu0 %v21357_v36  ;;  %v12378_v52 = vpop.f32.mrf.mxu1  ;;  %v21414_v22 = vld [vmem:[%s28267_s7 + $0x3f0] ss:$8 sps:$4 sm:$0xff]  }
 0x8de   : > { %13387 = vmatprep.subr.bf16.mxu1 %v21362_v45  ;;  %13404 = vmatprep.subr.bf16.mxu0 %v21365_v58  ;;  %v21417_v36 = vld [vmem:[%s28267_s7 + $0x570] ss:$8 sps:$4 sm:$0xff]   ;;  %v21422_v45 = vld [vmem:[%s28267_s7 + $0x3e4] ss:$8 sps:$4 sm:$0xff]   ;;  %v21423_v52 = vld [vmem:[%s28267_s7 + $0x560] ss:$8 sps:$4 sm:$0xff]  }
 0x8df   : > { %v19304_v63 = vpop.f32.mrf.mxu1  ;;  %13434 = vmatprep.mubr.bf16.mxu0 %v13012_v9  ;;  %v21425_v58 = vld [vmem:[%s28267_s7 + $0x564] ss:$8 sps:$4 sm:$0xff]   ;;  %v21426_v9 = vld [vmem:[%s28267_s7 + $0x3d0] ss:$8 sps:$4 sm:$0xff]  }
 0x8e0   : > { %v21437_v63 = vld [vmem:[%s28267_s7 + $0x544] ss:$8 sps:$4 sm:$0xff]  }
 0x8e1   : > { %13388 = vmatpush2.bf16.msra.mxu1 %v21360_v28  ;;  %13405 = vmatpush1.bf16.msra.mxu0 %v21363_v20  ;;  %v21428_v28 = vld [vmem:[%s28267_s7 + $0x3d4] ss:$8 sps:$4 sm:$0xff]  }
 0x8e2   : > { %13389 = vmatprep.subr.bf16.mxu1 %v21368_v5  ;;  %13406 = vmatprep.subr.bf16.mxu0 %v21371_v47  ;;  %v21431_v20 = vld [vmem:[%s28267_s7 + $0x554] ss:$8 sps:$4 sm:$0xff]   ;;  %v21429_v5 = vld [vmem:[%s28267_s7 + $0x550] ss:$8 sps:$4 sm:$0xff]   ;;  %v21434_v47 = vld [vmem:[%s28267_s7 + $0x3c4] ss:$8 sps:$4 sm:$0xff]  }
 0x8e5   : > { %13390 = vmatpush2.bf16.msra.mxu1 %v21366_v29  ;;  %13407 = vmatpush1.bf16.msra.mxu0 %v21369_v14  ;;  %v21432_v29 = vld [vmem:[%s28267_s7 + $0x3c0] ss:$8 sps:$4 sm:$0xff]  }
 0x8e6   : > { %13391 = vmatprep.subr.bf16.mxu1 %v21374_v56  ;;  %13408 = vmatprep.subr.bf16.mxu0 %v21377_v53  ;;  %v21435_v14 = vld [vmem:[%s28267_s7 + $0x540] ss:$8 sps:$4 sm:$0xff]   ;;  %v21440_v56 = vld [vmem:[%s28267_s7 + $0x3b4] ss:$8 sps:$4 sm:$0xff]  }
 0x8e7   : > { %v21443_v53 = vld [vmem:[%s28267_s7 + $0x634] ss:$8 sps:$4 sm:$0xff]  }
 0x8e9   : > { %13392 = vmatpush2.bf16.msra.mxu1 %v21372_v4  ;;  %13409 = vmatpush1.bf16.msra.mxu0 %v21375_v59  ;;  %v21438_v4 = vld [vmem:[%s28267_s7 + $0x3b0] ss:$8 sps:$4 sm:$0xff]  }
 0x8ea   : > { %13410 = vmatprep.subr.bf16.mxu0 %v21380_v41  ;;  %13455 = vmatprep.subr.bf16.mxu1 %v21383_v60  ;;  %v21441_v59 = vld [vmem:[%s28267_s7 + $0x630] ss:$8 sps:$4 sm:$0xff]   ;;  %v21446_v41 = vld [vmem:[%s28267_s7 + $0x3a4] ss:$8 sps:$4 sm:$0xff]  }
 0x8eb   : > { %v21449_v60 = vld [vmem:[%s28267_s7 + $0x624] ss:$8 sps:$4 sm:$0xff]  }
 0x8ec   : > { %13394 = vmatmul.mubr.bf16.vlgmr.msra.gmra.mxu1 %v13009_v61  ;;  %v21447_v61 = vld [vmem:[%s28267_s7 + $0x620] ss:$8 sps:$4 sm:$0xff]  }
 0x8ed   : > { %13411 = vmatpush1.bf16.msra.mxu0 %v21378_v51  ;;  %13456 = vmatpush1.bf16.msra.mxu1 %v21381_v24  ;;  %v13565_v51 = vshll.u32 %v27156_v37, 16  ;;  %v21444_v24 = vld [vmem:[%s28267_s7 + $0x3a0] ss:$8 sps:$4 sm:$0xff]  }
 0x8ee   : > { %13412 = vmatprep.subr.bf16.mxu0 %v21386_v13  ;;  %13457 = vmatprep.subr.bf16.mxu1 %v21389_v46  ;;  %v21452_v13 = vld [vmem:[%s28267_s7 + $0x4b4] ss:$8 sps:$4 sm:$0xff]  }
 0x8ef   : > { %13475 = vmatprep.mubr.bf16.mxu1 %v21868_v1  ;;  %v21455_v46 = vld [vmem:[%s28267_s7 + $0x614] ss:$8 sps:$4 sm:$0xff]  }
 0x8f1   : > { %13413 = vmatpush1.bf16.msra.mxu0 %v21384_v50  ;;  %13458 = vmatpush1.bf16.msra.mxu1 %v21387_v38  ;;  %v13563_v50 = vshrl.u32 %v27156_v37, 16  ;;  %v13567_v38 = vrot.slane %v13565_v51, 1 }
 0x8f2   : > { %13414 = vmatprep.subr.bf16.mxu0 %v21392_v23  ;;  %13977 = vmatprep.subr.bf16.mxu1 %v21395_v16  ;;  %v21450_v23 = vld [vmem:[%s28267_s7 + $0x4b0] ss:$8 sps:$4 sm:$0xff]   ;;  %v13011_v16 = vrot.slane %v27173_v32, 2 }
 0x8f4   : > { %18475 = vmatmul.mubr.msk.bf16.vlgmr.msra.gmra.mxu1 %vm12795_vm0, %v13013_v3  ;;  %v21461_v3 = vld [vmem:[%s28267_s7 + $0x604] ss:$8 sps:$4 sm:$0xff]  }
 0x8f5   : > { %13415 = vmatpush1.bf16.msra.mxu0 %v21390_v17  ;;  %13978 = vmatpush1.bf16.msra.mxu1 %v21393_v10  ;;  %v21458_v17 = vld [vmem:[%s28267_s7 + $0x4a4] ss:$8 sps:$4 sm:$0xff]   ;;  %v13568_v10 = vor.u32 %v13567_v38, %v13563_v50  ;;  %v21512_v38 = vld [vmem:[%s28267_s7 + $0x514] ss:$8 sps:$4 sm:$0xff]  }
 0x8f6   : > { %14009 = vmatprep.mubr.bf16.mxu1 %v13582_v6  ;;  %13416 = vmatprep.subr.bf16.mxu0 %v21398_v39  ;;  %v21456_v39 = vld [vmem:[%s28267_s7 + $0x4a0] ss:$8 sps:$4 sm:$0xff]   ;;  %v21464_v6 = vld [vmem:[%s28267_s7 + $0x494] ss:$8 sps:$4 sm:$0xff]  }
 0x8f7   : > { %13979 = vmatprep.subr.bf16.mxu1 %v21401_v18  ;;  %v21459_v18 = vld [vmem:[%s28267_s7 + $0x600] ss:$8 sps:$4 sm:$0xff]  }
 0x8f9   : > { %13417 = vmatpush1.bf16.msra.mxu0 %v21396_v30  ;;  %13980 = vmatpush1.bf16.msra.mxu1 %v21399_v48  ;;  %v21467_v30 = vld [vmem:[%s28267_s7 + $0x5f4] ss:$8 sps:$4 sm:$0xff]   ;;  %v21462_v48 = vld [vmem:[%s28267_s7 + $0x490] ss:$8 sps:$4 sm:$0xff]  }
 0x8fa   : > { %13418 = vmatprep.subr.bf16.mxu0 %v21404_v44  ;;  %13981 = vmatprep.subr.bf16.mxu1 %v21407_v0  ;;  %v21465_v44 = vld [vmem:[%s28267_s7 + $0x5f0] ss:$8 sps:$4 sm:$0xff]   ;;  %v21470_v0 = vld [vmem:[%s28267_s7 + $0x484] ss:$8 sps:$4 sm:$0xff]  }
 0x8fd   : > { %13419 = vmatpush2.bf16.msra.mxu0 %v21402_v40  ;;  %13982 = vmatpush1.bf16.msra.mxu1 %v21405_v15  ;;  %v21473_v40 = vld [vmem:[%s28267_s7 + $0x5e4] ss:$8 sps:$4 sm:$0xff]   ;;  %v21468_v15 = vld [vmem:[%s28267_s7 + $0x480] ss:$8 sps:$4 sm:$0xff]  }
 0x8fe   : > { %13420 = vmatprep.subr.bf16.mxu0 %v21410_v26  ;;  %13983 = vmatprep.subr.bf16.mxu1 %v21413_v55  ;;  %v21471_v26 = vld [vmem:[%s28267_s7 + $0x5e0] ss:$8 sps:$4 sm:$0xff]   ;;  %v21476_v55 = vld [vmem:[%s28267_s7 + $0x474] ss:$8 sps:$4 sm:$0xff]  }
 0x901   : > { %13421 = vmatpush2.bf16.msra.mxu0 %v21408_v11  ;;  %13984 = vmatpush1.bf16.msra.mxu1 %v21411_v27  ;;  %v21479_v11 = vld [vmem:[%s28267_s7 + $0x5d4] ss:$8 sps:$4 sm:$0xff]   ;;  %v21474_v27 = vld [vmem:[%s28267_s7 + $0x470] ss:$8 sps:$4 sm:$0xff]  }
 0x902   : > { %13422 = vmatprep.subr.bf16.mxu0 %v21416_v12  ;;  %13985 = vmatprep.subr.bf16.mxu1 %v21419_v49  ;;  %v21477_v12 = vld [vmem:[%s28267_s7 + $0x5d0] ss:$8 sps:$4 sm:$0xff]   ;;  %v21482_v49 = vld [vmem:[%s28267_s7 + $0x464] ss:$8 sps:$4 sm:$0xff]  }
 0x905   : > { %13423 = vmatpush2.bf16.msra.mxu0 %v21414_v22  ;;  %13986 = vmatpush1.bf16.msra.mxu1 %v21417_v36  ;;  %v21485_v36 = vld [vmem:[%s28267_s7 + $0x5c4] ss:$8 sps:$4 sm:$0xff]  }
 0x906   : > { %13424 = vmatprep.subr.bf16.mxu0 %v21422_v45  ;;  %13987 = vmatprep.subr.bf16.mxu1 %v21425_v58  ;;  %v21480_v58 = vld [vmem:[%s28267_s7 + $0x460] ss:$8 sps:$4 sm:$0xff]  }
 0x909   : > { %13425 = vmatpush2.bf16.msra.mxu0 %v21420_v7  ;;  %13988 = vmatpush1.bf16.msra.mxu1 %v21423_v52  ;;  %v21483_v7 = vld [vmem:[%s28267_s7 + $0x5c0] ss:$8 sps:$4 sm:$0xff]   ;;  %v21488_v52 = vld [vmem:[%s28267_s7 + $0x454] ss:$8 sps:$4 sm:$0xff]  }
 0x90a   : > { %13426 = vmatprep.subr.bf16.mxu0 %v21428_v28  ;;  %13989 = vmatprep.subr.bf16.mxu1 %v21431_v20  ;;  %v13574_v20 = vrot.slane %v13572_v57, 1  ;;  %v21489_v57 = vld [vmem:[%s28267_s7 + $0x6d0] ss:$8 sps:$4 sm:$0xff]  }
 0x90d   : > { %13427 = vmatpush2.bf16.msra.mxu0 %v21426_v9  ;;  %13990 = vmatpush1.bf16.msra.mxu1 %v21429_v5  ;;  %v21491_v9 = vld [vmem:[%s28267_s7 + $0x6d4] ss:$8 sps:$4 sm:$0xff]   ;;  %v14133_v5 = vrot.slane %v13563_v50, 2  ;;  %v21507_v50 = vld [vmem:[%s28267_s7 + $0x6a0] ss:$8 sps:$4 sm:$0xff]  }
 0x90e   : > { %13428 = vmatprep.subr.bf16.mxu0 %v21434_v47  ;;  %13991 = vmatprep.subr.bf16.mxu1 %v21437_v63  ;;  %v14134_v47 = vrot.slane %v13565_v51, 3  ;;  %v21498_v51 = vld [vmem:[%s28267_s7 + $0x530] ss:$8 sps:$4 sm:$0xff]  }
 0x911   : > { %13429 = vmatpush2.bf16.msra.mxu0 %v21432_v29  ;;  %13992 = vmatpush1.bf16.msra.mxu1 %v21435_v14  ;;  %v21486_v29 = vld [vmem:[%s28267_s7 + $0x450] ss:$8 sps:$4 sm:$0xff]   ;;  %v13575_v14 = vor.u32 %v13574_v20, %v13570_v21  ;;  %v21495_v21 = vld [vmem:[%s28267_s7 + $0x6c0] ss:$8 sps:$4 sm:$0xff]   ;;  %v21548_v20 = vld [vmem:[%s28267_s7 + $0x654] ss:$8 sps:$4 sm:$0xff]  }
 0x912   : > { %13430 = vmatprep.subr.bf16.mxu0 %v21440_v56  ;;  %13993 = vmatprep.subr.bf16.mxu1 %v21443_v53  ;;  %v21494_v56 = vld [vmem:[%s28267_s7 + $0x444] ss:$8 sps:$4 sm:$0xff]  }
 0x913   : > { %v21497_v53 = vld [vmem:[%s28267_s7 + $0x6c4] ss:$8 sps:$4 sm:$0xff]  }
 0x915   : > { %13431 = vmatpush2.bf16.msra.mxu0 %v21438_v4  ;;  %13994 = vmatpush2.bf16.msra.mxu1 %v21441_v59  ;;  %v14135_v4 = vor.u32 %v14134_v47, %v14133_v5  ;;  %v21492_v59 = vld [vmem:[%s28267_s7 + $0x440] ss:$8 sps:$4 sm:$0xff]   ;;  %v21546_v5 = vld [vmem:[%s28267_s7 + $0x650] ss:$8 sps:$4 sm:$0xff]   ;;  %v13585_v47 = vshll.u32 %v27282_v31, 16 }
 0x916   : > { %13432 = vmatprep.subr.bf16.mxu0 %v21446_v41  ;;  %13995 = vmatprep.subr.bf16.mxu1 %v21449_v60  ;;  %v21500_v41 = vld [vmem:[%s28267_s7 + $0x534] ss:$8 sps:$4 sm:$0xff]  }
 0x917   : > { %v21503_v60 = vld [vmem:[%s28267_s7 + $0x6b4] ss:$8 sps:$4 sm:$0xff]  }
 0x919   : > { %13433 = vmatpush2.bf16.msra.mxu0 %v21444_v24  ;;  %13996 = vmatpush2.bf16.msra.mxu1 %v21447_v61  ;;  %v21501_v24 = vld [vmem:[%s28267_s7 + $0x6b0] ss:$8 sps:$4 sm:$0xff]   ;;  %v21506_v61 = vld [vmem:[%s28267_s7 + $0x524] ss:$8 sps:$4 sm:$0xff]  }
 0x91a   : > { %13936 = vmatprep.subr.bf16.mxu0 %v21452_v13  ;;  %13997 = vmatprep.subr.bf16.mxu1 %v21455_v46  ;;  %v21509_v13 = vld [vmem:[%s28267_s7 + $0x6a4] ss:$8 sps:$4 sm:$0xff]   ;;  %v21504_v46 = vld [vmem:[%s28267_s7 + $0x520] ss:$8 sps:$4 sm:$0xff]  }
 0x91c   : > { %13435 = vmatmul.mubr.bf16.vlgmr.msra.gmra.mxu0 %v13011_v16  ;;  %v21510_v16 = vld [vmem:[%s28267_s7 + $0x510] ss:$8 sps:$4 sm:$0xff]  }
 0x91d   : > { %13937 = vmatpush1.bf16.msra.mxu0 %v21450_v23  ;;  %13968 = vmatprep.mubr.bf16.mxu0 %v13568_v10  ;;  %v21515_v23 = vld [vmem:[%s28267_s7 + $0x694] ss:$8 sps:$4 sm:$0xff]   ;;  %v21521_v10 = vld [vmem:[%s28267_s7 + $0x684] ss:$8 sps:$4 sm:$0xff]  }
 0x91e   : > { %13998 = vmatpush2.bf16.msra.mxu1 %v21453_v42  ;;  %13938 = vmatprep.subr.bf16.mxu0 %v21458_v17  ;;  %v21513_v42 = vld [vmem:[%s28267_s7 + $0x690] ss:$8 sps:$4 sm:$0xff]   ;;  %v21518_v17 = vld [vmem:[%s28267_s7 + $0x504] ss:$8 sps:$4 sm:$0xff]  }
 0x91f   : > { %13999 = vmatprep.subr.bf16.mxu1 %v21461_v3  ;;  %v21516_v3 = vld [vmem:[%s28267_s7 + $0x500] ss:$8 sps:$4 sm:$0xff]  }
 0x921   : > { %13939 = vmatpush1.bf16.msra.mxu0 %v21456_v39  ;;  %v21519_v39 = vld [vmem:[%s28267_s7 + $0x680] ss:$8 sps:$4 sm:$0xff]  }
 0x922   : > { %14000 = vmatpush2.bf16.msra.mxu1 %v21459_v18  ;;  %13940 = vmatprep.subr.bf16.mxu0 %v21464_v6  ;;  %v21524_v18 = vld [vmem:[%s28267_s7 + $0x4f4] ss:$8 sps:$4 sm:$0xff]  }
 0x923   : > { %14001 = vmatprep.subr.bf16.mxu1 %v21467_v30  ;;  %v21527_v6 = vld [vmem:[%s28267_s7 + $0x674] ss:$8 sps:$4 sm:$0xff]   ;;  %v21522_v30 = vld [vmem:[%s28267_s7 + $0x4f0] ss:$8 sps:$4 sm:$0xff]  }
 0x925   : > { %13941 = vmatpush1.bf16.msra.mxu0 %v21462_v48  ;;  %v21525_v48 = vld [vmem:[%s28267_s7 + $0x670] ss:$8 sps:$4 sm:$0xff]  }
 0x926   : > { %14002 = vmatpush2.bf16.msra.mxu1 %v21465_v44  ;;  %13942 = vmatprep.subr.bf16.mxu0 %v21470_v0  ;;  %v21530_v44 = vld [vmem:[%s28267_s7 + $0x4e4] ss:$8 sps:$4 sm:$0xff]  }
 0x927   : > { %14003 = vmatprep.subr.bf16.mxu1 %v21473_v40  ;;  %v21533_v0 = vld [vmem:[%s28267_s7 + $0x664] ss:$8 sps:$4 sm:$0xff]   ;;  %v21528_v40 = vld [vmem:[%s28267_s7 + $0x4e0] ss:$8 sps:$4 sm:$0xff]  }
 0x929   : > { %13943 = vmatpush1.bf16.msra.mxu0 %v21468_v15  ;;  %v21531_v15 = vld [vmem:[%s28267_s7 + $0x660] ss:$8 sps:$4 sm:$0xff]  }
 0x92a   : > { %14004 = vmatpush2.bf16.msra.mxu1 %v21471_v26  ;;  %13944 = vmatprep.subr.bf16.mxu0 %v21476_v55  ;;  %v27543_v22 = vpop.f32.mrf.mxu0  ;;  %v21536_v26 = vld [vmem:[%s28267_s7 + $0x4d4] ss:$8 sps:$4 sm:$0xff]  }
 0x92b   : > { %14005 = vmatprep.subr.bf16.mxu1 %v21479_v11  ;;  %v21539_v55 = vld [vmem:[%s28267_s7 + $0x754] ss:$8 sps:$4 sm:$0xff]   ;;  %v21534_v11 = vld [vmem:[%s28267_s7 + $0x4d0] ss:$8 sps:$4 sm:$0xff]  }
 0x92c   : > { %v27548_v45 = vpop.f32.mrf.mxu0 }
 0x92d   : > { %13945 = vmatpush1.bf16.msra.mxu0 %v21474_v27  ;;  %v13558_v27 = vshll.u32 %v27154_v54, 16 }
 0x92e   : > { %14006 = vmatpush2.bf16.msra.mxu1 %v21477_v12  ;;  %13946 = vmatprep.subr.bf16.mxu0 %v21482_v49  ;;  %v12837_v28 = vpop.f32.mrf.mxu0  ;;  %v21537_v12 = vld [vmem:[%s28267_s7 + $0x750] ss:$8 sps:$4 sm:$0xff]   ;;  %v21542_v49 = vld [vmem:[%s28267_s7 + $0x4c4] ss:$8 sps:$4 sm:$0xff]  }
 0x92f   : > { %14007 = vmatprep.subr.bf16.mxu1 %v21485_v36  ;;  %v21545_v36 = vld [vmem:[%s28267_s7 + $0x744] ss:$8 sps:$4 sm:$0xff]   ;;  %v13560_v28 = vrot.slane %v13558_v27, 1 }
 0x930   : > { %v12838_v63 = vpop.f32.mrf.mxu0 }
 0x931   : > { %13947 = vmatpush1.bf16.msra.mxu0 %v21480_v58  ;;  %v21540_v58 = vld [vmem:[%s28267_s7 + $0x4c0] ss:$8 sps:$4 sm:$0xff]  }
 0x932   : > { %14008 = vmatpush2.bf16.msra.mxu1 %v21483_v7  ;;  %13948 = vmatprep.subr.bf16.mxu0 %v21488_v52  ;;  %v13556_v7 = vshrl.u32 %v27154_v54, 16  ;;  %v21543_v52 = vld [vmem:[%s28267_s7 + $0x740] ss:$8 sps:$4 sm:$0xff]  }
 0x933   : > { %14492 = vmatprep.subr.bf16.mxu1 %v21491_v9  ;;  %v21551_v9 = vld [vmem:[%s28267_s7 + $0x734] ss:$8 sps:$4 sm:$0xff]  }
 0x934   : > { %v13561_v63 = vor.u32 %v13560_v28, %v13556_v7 }
 0x935   : > { %14010 = vmatmul.mubr.bf16.vlgmr.msra.gmra.mxu1 %v13575_v14  ;;  %13949 = vmatpush1.bf16.msra.mxu0 %v21486_v29  ;;  %v21549_v29 = vld [vmem:[%s28267_s7 + $0x730] ss:$8 sps:$4 sm:$0xff]   ;;  %v21557_v14 = vld [vmem:[%s28267_s7 + $0x724] ss:$8 sps:$4 sm:$0xff]  }
 0x936   : > { %14493 = vmatpush1.bf16.msra.mxu1 %v21489_v57  ;;  %14524 = vmatprep.mubr.bf16.mxu1 %v14135_v4  ;;  %v21554_v57 = vld [vmem:[%s28267_s7 + $0x644] ss:$8 sps:$4 sm:$0xff]   ;;  %v21555_v4 = vld [vmem:[%s28267_s7 + $0x720] ss:$8 sps:$4 sm:$0xff]  }
 0x937   : > { %13950 = vmatprep.subr.bf16.mxu0 %v21494_v56  ;;  %14494 = vmatprep.subr.bf16.mxu1 %v21497_v53  ;;  %v21552_v56 = vld [vmem:[%s28267_s7 + $0x640] ss:$8 sps:$4 sm:$0xff]   ;;  %v13587_v53 = vrot.slane %v13585_v47, 1 }
 0x939   : > { %13951 = vmatpush1.bf16.msra.mxu0 %v21492_v59  ;;  %v21563_v59 = vld [vmem:[%s28267_s7 + $0x7d4] ss:$8 sps:$4 sm:$0xff]  }
 0x93a   : > { %14495 = vmatpush1.bf16.msra.mxu1 %v21495_v21  ;;  %13952 = vmatprep.subr.bf16.mxu0 %v21500_v41  ;;  %v21560_v21 = vld [vmem:[%s28267_s7 + $0x714] ss:$8 sps:$4 sm:$0xff]   ;;  %v13583_v41 = vshrl.u32 %v27282_v31, 16 }
 0x93b   : > { %14496 = vmatprep.subr.bf16.mxu1 %v21503_v60  ;;  %v21561_v60 = vld [vmem:[%s28267_s7 + $0x7d0] ss:$8 sps:$4 sm:$0xff]  }
 0x93d   : > { %13953 = vmatpush2.bf16.msra.mxu0 %v21498_v51  ;;  %v13588_v51 = vor.u32 %v13587_v53, %v13583_v41  ;;  %v21617_v53 = vld [vmem:[%s28267_s7 + $0x9c4] ss:$8 sps:$4 sm:$0xff]  }
 0x93e   : > { %14497 = vmatpush1.bf16.msra.mxu1 %v21501_v24  ;;  %13954 = vmatprep.subr.bf16.mxu0 %v21506_v61  ;;  %v21558_v24 = vld [vmem:[%s28267_s7 + $0x710] ss:$8 sps:$4 sm:$0xff]   ;;  %v21569_v61 = vld [vmem:[%s28267_s7 + $0x7c4] ss:$8 sps:$4 sm:$0xff]  }
 0x93f   : > { %14498 = vmatprep.subr.bf16.mxu1 %v21509_v13  ;;  %v21566_v13 = vld [vmem:[%s28267_s7 + $0x704] ss:$8 sps:$4 sm:$0xff]  }
 0x941   : > { %13955 = vmatpush2.bf16.msra.mxu0 %v21504_v46  ;;  %v21567_v46 = vld [vmem:[%s28267_s7 + $0x7c0] ss:$8 sps:$4 sm:$0xff]  }
 0x942   : > { %14499 = vmatpush1.bf16.msra.mxu1 %v21507_v50  ;;  %13956 = vmatprep.subr.bf16.mxu0 %v21512_v38  ;;  %v21564_v50 = vld [vmem:[%s28267_s7 + $0x700] ss:$8 sps:$4 sm:$0xff]   ;;  %v21575_v38 = vld [vmem:[%s28267_s7 + $0x7b4] ss:$8 sps:$4 sm:$0xff]  }
 0x943   : > { %14500 = vmatprep.subr.bf16.mxu1 %v21515_v23  ;;  %v21581_v23 = vld [vmem:[%s28267_s7 + $0x7a4] ss:$8 sps:$4 sm:$0xff]  }
 0x945   : > { %13957 = vmatpush2.bf16.msra.mxu0 %v21510_v16  ;;  %v21578_v16 = vld [vmem:[%s28267_s7 + $0x6e4] ss:$8 sps:$4 sm:$0xff]  }
 0x946   : > { %14501 = vmatpush1.bf16.msra.mxu1 %v21513_v42  ;;  %13958 = vmatprep.subr.bf16.mxu0 %v21518_v17  ;;  %v21579_v17 = vld [vmem:[%s28267_s7 + $0x7a0] ss:$8 sps:$4 sm:$0xff]  }
 0x947   : > { %14502 = vmatprep.subr.bf16.mxu1 %v21521_v10  ;;  %v21576_v10 = vld [vmem:[%s28267_s7 + $0x6e0] ss:$8 sps:$4 sm:$0xff]  }
 0x949   : > { %13959 = vmatpush2.bf16.msra.mxu0 %v21516_v3  ;;  %v21584_v3 = vld [vmem:[%s28267_s7 + $0x794] ss:$8 sps:$4 sm:$0xff]  }
 0x94a   : > { %14503 = vmatpush1.bf16.msra.mxu1 %v21519_v39  ;;  %13960 = vmatprep.subr.bf16.mxu0 %v21524_v18  ;;  %v14130_v18 = vrot.slane %v13556_v7, 2  ;;  %v21594_v7 = vld [vmem:[%s28267_s7 + $0x770] ss:$8 sps:$4 sm:$0xff]  }
 0x94b   : > { %14504 = vmatprep.subr.bf16.mxu1 %v21527_v6  ;;  %v14131_v6 = vrot.slane %v13558_v27, 3  ;;  %v21591_v27 = vld [vmem:[%s28267_s7 + $0x860] ss:$8 sps:$4 sm:$0xff]  }
 0x94d   : > { %13961 = vmatpush2.bf16.msra.mxu0 %v21522_v30  ;;  %v21587_v30 = vld [vmem:[%s28267_s7 + $0x874] ss:$8 sps:$4 sm:$0xff]  }
 0x94e   : > { %14505 = vmatpush1.bf16.msra.mxu1 %v21525_v48  ;;  %13962 = vmatprep.subr.bf16.mxu0 %v21530_v44  ;;  %v21582_v44 = vld [vmem:[%s28267_s7 + $0x790] ss:$8 sps:$4 sm:$0xff]  }
 0x94f   : > { %14506 = vmatprep.subr.bf16.mxu1 %v21533_v0  ;;  %v21585_v0 = vld [vmem:[%s28267_s7 + $0x870] ss:$8 sps:$4 sm:$0xff]  }
 0x951   : > { %13963 = vmatpush2.bf16.msra.mxu0 %v21528_v40  ;;  %v21590_v40 = vld [vmem:[%s28267_s7 + $0x784] ss:$8 sps:$4 sm:$0xff]  }
 0x952   : > { %14507 = vmatpush1.bf16.msra.mxu1 %v21531_v15  ;;  %13964 = vmatprep.subr.bf16.mxu0 %v21536_v26  ;;  %v14132_v26 = vor.u32 %v14131_v6, %v14130_v18  ;;  %v21642_v18 = vld [vmem:[%s28267_s7 + $0x7f0] ss:$8 sps:$4 sm:$0xff]  }
 0x953   : > { %14508 = vmatprep.subr.bf16.mxu1 %v21539_v55  ;;  %v21593_v55 = vld [vmem:[%s28267_s7 + $0x864] ss:$8 sps:$4 sm:$0xff]   ;;  %v21645_v6 = vld [vmem:[%s28267_s7 + $0xa70] ss:$8 sps:$4 sm:$0xff]  }
 0x955   : > { %13965 = vmatpush2.bf16.msra.mxu0 %v21534_v11  ;;  %v21588_v11 = vld [vmem:[%s28267_s7 + $0x780] ss:$8 sps:$4 sm:$0xff]  }
 0x956   : > { %14509 = vmatpush2.bf16.msra.mxu1 %v21537_v12  ;;  %13966 = vmatprep.subr.bf16.mxu0 %v21542_v49  ;;  %v21596_v12 = vld [vmem:[%s28267_s7 + $0x774] ss:$8 sps:$4 sm:$0xff]   ;;  %v14142_v49 = vrot.slane %v13583_v41, 2 }
 0x957   : > { %14510 = vmatprep.subr.bf16.mxu1 %v21545_v36  ;;  %v14143_v36 = vrot.slane %v13585_v47, 3  ;;  %v21600_v47 = vld [vmem:[%s28267_s7 + $0x760] ss:$8 sps:$4 sm:$0xff]   ;;  %v21623_v41 = vld [vmem:[%s28267_s7 + $0x9b4] ss:$8 sps:$4 sm:$0xff]  }
 0x959   : > { %13967 = vmatpush2.bf16.msra.mxu0 %v21540_v58  ;;  %v21599_v58 = vld [vmem:[%s28267_s7 + $0x9f4] ss:$8 sps:$4 sm:$0xff]   ;;  %v14144_v28 = vor.u32 %v14143_v36, %v14142_v49  ;;  %v21662_v36 = vld [vmem:[%s28267_s7 + $0x8e4] ss:$8 sps:$4 sm:$0xff]  }
 0x95a   : > { %14511 = vmatpush2.bf16.msra.mxu1 %v21543_v52  ;;  %14030 = vmatprep.subr.bf16.mxu0 %v21548_v20  ;;  %v21597_v52 = vld [vmem:[%s28267_s7 + $0x9f0] ss:$8 sps:$4 sm:$0xff]   ;;  %v21602_v20 = vld [vmem:[%s28267_s7 + $0x764] ss:$8 sps:$4 sm:$0xff]  }
 0x95b   : > { %14512 = vmatprep.subr.bf16.mxu1 %v21551_v9  ;;  %v21605_v9 = vld [vmem:[%s28267_s7 + $0x9e4] ss:$8 sps:$4 sm:$0xff]  }
 0x95c   : > { %13969 = vmatmul.mubr.bf16.vlgmr.msra.gmra.mxu0 %v13561_v63  ;;  %v21603_v63 = vld [vmem:[%s28267_s7 + $0x9e0] ss:$8 sps:$4 sm:$0xff]  }
 0x95d   : > { %14031 = vmatpush1.bf16.msra.mxu0 %v21546_v5  ;;  %14050 = vmatprep.mubr.bf16.mxu0 %v21868_v1  ;;  %v14689_v5 = vrot.slane %v27176_v35, 1  ;;  %v21611_v35 = vld [vmem:[%s28267_s7 + $0x9d4] ss:$8 sps:$4 sm:$0xff]  }
 0x95e   : > { %14513 = vmatpush2.bf16.msra.mxu1 %v21549_v29  ;;  %14032 = vmatprep.subr.bf16.mxu0 %v21554_v57  ;;  %v21608_v29 = vld [vmem:[%s28267_s7 + $0x854] ss:$8 sps:$4 sm:$0xff]   ;;  %v21606_v57 = vld [vmem:[%s28267_s7 + $0x850] ss:$8 sps:$4 sm:$0xff]  }
 0x95f   : > { %14514 = vmatprep.subr.bf16.mxu1 %v21557_v14  ;;  %v21609_v14 = vld [vmem:[%s28267_s7 + $0x9d0] ss:$8 sps:$4 sm:$0xff]  }
 0x961   : > { %14033 = vmatpush1.bf16.msra.mxu0 %v21552_v56  ;;  %v21614_v56 = vld [vmem:[%s28267_s7 + $0x844] ss:$8 sps:$4 sm:$0xff]  }
 0x962   : > { %14515 = vmatpush2.bf16.msra.mxu1 %v21555_v4  ;;  %14533 = vmatprep.subr.bf16.mxu0 %v21563_v59  ;;  %v21612_v4 = vld [vmem:[%s28267_s7 + $0x840] ss:$8 sps:$4 sm:$0xff]  }
 0x963   : > { %14516 = vmatprep.subr.bf16.mxu1 %v21560_v21  ;;  %v21615_v59 = vld [vmem:[%s28267_s7 + $0x9c0] ss:$8 sps:$4 sm:$0xff]   ;;  %v21620_v21 = vld [vmem:[%s28267_s7 + $0x834] ss:$8 sps:$4 sm:$0xff]  }
 0x964   : > { %18612 = vmatmul.mubr.msk.bf16.vlgmr.msra.gmra.mxu0 %vm12795_vm0, %v13588_v51  ;;  %v21621_v51 = vld [vmem:[%s28267_s7 + $0x9b0] ss:$8 sps:$4 sm:$0xff]  }
 0x965   : > { %14534 = vmatpush1.bf16.msra.mxu0 %v21561_v60  ;;  %14565 = vmatprep.mubr.bf16.mxu0 %v14141_v34  ;;  %v21570_v34 = vld [vmem:[%s28267_s7 + $0x6f0] ss:$8 sps:$4 sm:$0xff]  }
 0x966   : > { %14517 = vmatpush2.bf16.msra.mxu1 %v21558_v24  ;;  %14535 = vmatprep.subr.bf16.mxu0 %v21569_v61  ;;  %v21618_v60 = vld [vmem:[%s28267_s7 + $0x830] ss:$8 sps:$4 sm:$0xff]   ;;  %v21626_v24 = vld [vmem:[%s28267_s7 + $0x824] ss:$8 sps:$4 sm:$0xff]  }
 0x967   : > { %14518 = vmatprep.subr.bf16.mxu1 %v21566_v13  ;;  %v21629_v61 = vld [vmem:[%s28267_s7 + $0x9a4] ss:$8 sps:$4 sm:$0xff]   ;;  %v21624_v13 = vld [vmem:[%s28267_s7 + $0x820] ss:$8 sps:$4 sm:$0xff]  }
 0x969   : > { %14536 = vmatpush1.bf16.msra.mxu0 %v21567_v46  ;;  %v21627_v46 = vld [vmem:[%s28267_s7 + $0x9a0] ss:$8 sps:$4 sm:$0xff]  }
 0x96a   : > { %14519 = vmatpush2.bf16.msra.mxu1 %v21564_v50  ;;  %14537 = vmatprep.subr.bf16.mxu0 %v21575_v38  ;;  %v21632_v50 = vld [vmem:[%s28267_s7 + $0x814] ss:$8 sps:$4 sm:$0xff]  }
 0x96b   : > { %14520 = vmatprep.subr.bf16.mxu1 %v21572_v33  ;;  %v21635_v38 = vld [vmem:[%s28267_s7 + $0x994] ss:$8 sps:$4 sm:$0xff]   ;;  %v21630_v33 = vld [vmem:[%s28267_s7 + $0x810] ss:$8 sps:$4 sm:$0xff]  }
 0x96c   : > { %v27763_v42 = vpop.f32.mrf.mxu1 }
 0x96d   : > { %14538 = vmatpush1.bf16.msra.mxu0 %v21573_v43  ;;  %v21633_v43 = vld [vmem:[%s28267_s7 + $0x990] ss:$8 sps:$4 sm:$0xff]  }
 0x96e   : > { %14521 = vmatpush2.bf16.msra.mxu1 %v21570_v34  ;;  %14539 = vmatprep.subr.bf16.mxu0 %v21581_v23  ;;  %v27774_v39 = vpop.f32.mrf.mxu1  ;;  %v21638_v34 = vld [vmem:[%s28267_s7 + $0x804] ss:$8 sps:$4 sm:$0xff]  }
 0x96f   : > { %14522 = vmatprep.subr.bf16.mxu1 %v21578_v16  ;;  %v21641_v23 = vld [vmem:[%s28267_s7 + $0x984] ss:$8 sps:$4 sm:$0xff]   ;;  %v21636_v16 = vld [vmem:[%s28267_s7 + $0x800] ss:$8 sps:$4 sm:$0xff]  }
 0x970   : > { %v12878_v48 = vpop.f32.mrf.mxu1 }
 0x971   : > { %14540 = vmatpush1.bf16.msra.mxu0 %v21579_v17  ;;  %v21639_v17 = vld [vmem:[%s28267_s7 + $0x980] ss:$8 sps:$4 sm:$0xff]   ;;  %v12875_v48 = vadd.f32 %v27763_v42, %v27543_v22  ;;  %v21656_v42 = vld [vmem:[%s28267_s7 + $0x8f4] ss:$8 sps:$4 sm:$0xff]  }
 0x972   : > { %14523 = vmatpush2.bf16.msra.mxu1 %v21576_v10  ;;  %14541 = vmatprep.subr.bf16.mxu0 %v21584_v3  ;;  %v12879_v15 = vpop.f32.mrf.mxu1  ;;  %v21644_v10 = vld [vmem:[%s28267_s7 + $0x7f4] ss:$8 sps:$4 sm:$0xff]   ;;  %v21651_v22 = vld [vmem:[%s28267_s7 + $0xa60] ss:$8 sps:$4 sm:$0xff]  }
 0x973   : > { %14586 = vmatprep.subr.bf16.mxu1 %v21587_v30  ;;  %v21647_v3 = vld [vmem:[%s28267_s7 + $0xa74] ss:$8 sps:$4 sm:$0xff]   ;;  %v21650_v30 = vld [vmem:[%s28267_s7 + $0x7e4] ss:$8 sps:$4 sm:$0xff]  }
 0x975   : > { %14525 = vmatmul.mubr.bf16.vlgmr.msra.gmra.mxu1 %v14132_v26  ;;  %14542 = vmatpush1.bf16.msra.mxu0 %v21582_v44  ;;  %v21653_v44 = vld [vmem:[%s28267_s7 + $0xa64] ss:$8 sps:$4 sm:$0xff]   ;;  %v21648_v26 = vld [vmem:[%s28267_s7 + $0x7e0] ss:$8 sps:$4 sm:$0xff]  }
 0x976   : > { %14587 = vmatpush1.bf16.msra.mxu1 %v21585_v0  ;;  %14543 = vmatprep.subr.bf16.mxu0 %v21590_v40  ;;  %v12877_v40 = vadd.f32 %v27774_v39, %v27548_v45  ;;  %v21659_v45 = vld [vmem:[%s28267_s7 + $0xa54] ss:$8 sps:$4 sm:$0xff]  }
 0x977   : > { %14588 = vmatprep.subr.bf16.mxu1 %v21593_v55  ;;  %14606 = vmatprep.mubr.bf16.mxu1 %v21868_v1 }
 0x979   : > { %14544 = vmatpush1.bf16.msra.mxu0 %v21588_v11 }
 0x97a   : > { %14589 = vmatpush1.bf16.msra.mxu1 %v21591_v27  ;;  %14545 = vmatprep.subr.bf16.mxu0 %v21596_v12  ;;  %v21654_v27 = vld [vmem:[%s28267_s7 + $0x8f0] ss:$8 sps:$4 sm:$0xff]  }
 0x97b   : > { %15079 = vmatprep.subr.bf16.mxu1 %v21599_v58  ;;  %v21657_v12 = vld [vmem:[%s28267_s7 + $0xa50] ss:$8 sps:$4 sm:$0xff]   ;;  %v14687_v58 = vrot.slane %v27156_v37, 1  ;;  %v21663_v37 = vld [vmem:[%s28267_s7 + $0xa40] ss:$8 sps:$4 sm:$0xff]  }
 0x97d   : > { %18749 = vmatmul.mubr.msk.bf16.vlgmr.msra.gmra.mxu1 %vm12795_vm0, %v14144_v28  ;;  %14546 = vmatpush1.bf16.msra.mxu0 %v21594_v7  ;;  %v21665_v7 = vld [vmem:[%s28267_s7 + $0xa44] ss:$8 sps:$4 sm:$0xff]   ;;  %v21668_v28 = vld [vmem:[%s28267_s7 + $0x8d4] ss:$8 sps:$4 sm:$0xff]  }
 0x97e   : > { %15080 = vmatpush1.bf16.msra.mxu1 %v21597_v52  ;;  %15111 = vmatprep.mubr.bf16.mxu1 %v14689_v5  ;;  %v21660_v52 = vld [vmem:[%s28267_s7 + $0x8e0] ss:$8 sps:$4 sm:$0xff]  }
 0x97f   : > { %14547 = vmatprep.subr.bf16.mxu0 %v21602_v20  ;;  %15081 = vmatprep.subr.bf16.mxu1 %v21605_v9  ;;  %v21674_v20 = vld [vmem:[%s28267_s7 + $0x8c4] ss:$8 sps:$4 sm:$0xff]  }
 0x980   : > { %v21677_v9 = vld [vmem:[%s28267_s7 + $0xa24] ss:$8 sps:$4 sm:$0xff]  }
 0x981   : > { %14548 = vmatpush1.bf16.msra.mxu0 %v21600_v47  ;;  %v21672_v47 = vld [vmem:[%s28267_s7 + $0x8c0] ss:$8 sps:$4 sm:$0xff]  }
 0x982   : > { %15082 = vmatpush1.bf16.msra.mxu1 %v21603_v63  ;;  %14549 = vmatprep.subr.bf16.mxu0 %v21608_v29  ;;  %v21675_v29 = vld [vmem:[%s28267_s7 + $0xa20] ss:$8 sps:$4 sm:$0xff]  }
 0x983   : > { %15083 = vmatprep.subr.bf16.mxu1 %v21611_v35  ;;  %v21680_v35 = vld [vmem:[%s28267_s7 + $0x8b4] ss:$8 sps:$4 sm:$0xff]  }
 0x985   : > { %14550 = vmatpush2.bf16.msra.mxu0 %v21606_v57  ;;  %v21683_v57 = vld [vmem:[%s28267_s7 + $0xa14] ss:$8 sps:$4 sm:$0xff]  }
 0x986   : > { %15084 = vmatpush1.bf16.msra.mxu1 %v21609_v14  ;;  %14551 = vmatprep.subr.bf16.mxu0 %v21614_v56  ;;  %v21678_v56 = vld [vmem:[%s28267_s7 + $0x8b0] ss:$8 sps:$4 sm:$0xff]  }
 0x987   : > { %15085 = vmatprep.subr.bf16.mxu1 %v21617_v53 }
 0x989   : > { %14552 = vmatpush2.bf16.msra.mxu0 %v21612_v4  ;;  %v21681_v4 = vld [vmem:[%s28267_s7 + $0xa10] ss:$8 sps:$4 sm:$0xff]  }
 0x98a   : > { %15086 = vmatpush1.bf16.msra.mxu1 %v21615_v59  ;;  %14553 = vmatprep.subr.bf16.mxu0 %v21620_v21  ;;  %v21686_v59 = vld [vmem:[%s28267_s7 + $0x8a4] ss:$8 sps:$4 sm:$0xff]  }
 0x98b   : > { %15087 = vmatprep.subr.bf16.mxu1 %v21623_v41  ;;  %v21689_v21 = vld [vmem:[%s28267_s7 + $0xa04] ss:$8 sps:$4 sm:$0xff]  }
 0x98d   : > { %14554 = vmatpush2.bf16.msra.mxu0 %v21618_v60  ;;  %v21684_v60 = vld [vmem:[%s28267_s7 + $0x8a0] ss:$8 sps:$4 sm:$0xff]  }
 0x98e   : > { %15088 = vmatpush1.bf16.msra.mxu1 %v21621_v51  ;;  %14555 = vmatprep.subr.bf16.mxu0 %v21626_v24  ;;  %v21687_v24 = vld [vmem:[%s28267_s7 + $0xa00] ss:$8 sps:$4 sm:$0xff]  }
 0x98f   : > { %15089 = vmatprep.subr.bf16.mxu1 %v21629_v61  ;;  %v21692_v61 = vld [vmem:[%s28267_s7 + $0x894] ss:$8 sps:$4 sm:$0xff]  }
 0x991   : > { %14556 = vmatpush2.bf16.msra.mxu0 %v21624_v13 }
 0x992   : > { %15090 = vmatpush1.bf16.msra.mxu1 %v21627_v46  ;;  %14557 = vmatprep.subr.bf16.mxu0 %v21632_v50  ;;  %v21690_v46 = vld [vmem:[%s28267_s7 + $0x890] ss:$8 sps:$4 sm:$0xff]  }
 0x993   : > { %15091 = vmatprep.subr.bf16.mxu1 %v21635_v38  ;;  %v21695_v38 = vld [vmem:[%s28267_s7 + $0x884] ss:$8 sps:$4 sm:$0xff]  }
 0x995   : > { %14558 = vmatpush2.bf16.msra.mxu0 %v21630_v33  ;;  %v14688_v33 = vrot.slane %v27173_v32, 1  ;;  %v21701_v32 = vld [vmem:[%s28267_s7 + $0x964] ss:$8 sps:$4 sm:$0xff]  }
 0x996   : > { %15092 = vmatpush1.bf16.msra.mxu1 %v21633_v43  ;;  %14559 = vmatprep.subr.bf16.mxu0 %v21638_v34  ;;  %v21693_v43 = vld [vmem:[%s28267_s7 + $0x880] ss:$8 sps:$4 sm:$0xff]   ;;  %v21698_v34 = vld [vmem:[%s28267_s7 + $0x974] ss:$8 sps:$4 sm:$0xff]  }
 0x997   : > { %15093 = vmatprep.subr.bf16.mxu1 %v21641_v23  ;;  %v21696_v23 = vld [vmem:[%s28267_s7 + $0x970] ss:$8 sps:$4 sm:$0xff]  }
 0x999   : > { %14560 = vmatpush2.bf16.msra.mxu0 %v21636_v16  ;;  %v21699_v16 = vld [vmem:[%s28267_s7 + $0x960] ss:$8 sps:$4 sm:$0xff]  }
 0x99a   : > { %15094 = vmatpush1.bf16.msra.mxu1 %v21639_v17  ;;  %14561 = vmatprep.subr.bf16.mxu0 %v21644_v10  ;;  %v21704_v17 = vld [vmem:[%s28267_s7 + $0x954] ss:$8 sps:$4 sm:$0xff]   ;;  %v21702_v10 = vld [vmem:[%s28267_s7 + $0x950] ss:$8 sps:$4 sm:$0xff]  }
 0x99b   : > { %15095 = vmatprep.subr.bf16.mxu1 %v21647_v3  ;;  %v21707_v3 = vld [vmem:[%s28267_s7 + $0x944] ss:$8 sps:$4 sm:$0xff]  }
 0x99c   : > { %v12915_v0 = vpop.f32.mrf.mxu0 }
 0x99d   : > { %v27924_v15 = vadd.f32 %v12915_v0, %v12875_v48  ;;  %14562 = vmatpush2.bf16.msra.mxu0 %v21642_v18  ;;  %v21705_v18 = vld [vmem:[%s28267_s7 + $0x940] ss:$8 sps:$4 sm:$0xff]   ;;  %v21713_v48 = vld [vmem:[%s28267_s7 + $0x924] ss:$8 sps:$4 sm:$0xff]   ;;  %v21716_v0 = vld [vmem:[%s28267_s7 + $0x914] ss:$8 sps:$4 sm:$0xff]  }
 0x99e   : > { %15096 = vmatpush2.bf16.msra.mxu1 %v21645_v6  ;;  %v12917_v55 = vpop.f32.mrf.mxu0  ;;  %14563 = vmatprep.subr.bf16.mxu0 %v21650_v30  ;;  %v21710_v6 = vld [vmem:[%s28267_s7 + $0x934] ss:$8 sps:$4 sm:$0xff]   ;;  %v21708_v30 = vld [vmem:[%s28267_s7 + $0x930] ss:$8 sps:$4 sm:$0xff]  }
 0x99f   : > { %v27935_v11 = vadd.f32 %v12917_v55, %v12877_v40  ;;  %15097 = vmatprep.subr.bf16.mxu1 %v21653_v44  ;;  %v21711_v44 = vld [vmem:[%s28267_s7 + $0x920] ss:$8 sps:$4 sm:$0xff]   ;;  %v21719_v55 = vld [vmem:[%s28267_s7 + $0x904] ss:$8 sps:$4 sm:$0xff]  }
 0x9a0   : > { %v12919_v39 = vpop.f32.mrf.mxu0  ;;  %v12386_v40 = vld [vmem:[%s28268_s8] sm:$0x3] }
 0x9a1   : > { %14564 = vmatpush2.bf16.msra.mxu0 %v21648_v26  ;;  %v21714_v26 = vld [vmem:[%s28267_s7 + $0x910] ss:$8 sps:$4 sm:$0xff]  }
 0x9a2   : > { %15098 = vmatpush2.bf16.msra.mxu1 %v21651_v22  ;;  %15038 = vmatprep.subr.bf16.mxu0 %v21656_v42  ;;  %v12920_v49 = vpop.f32.mrf.mxu0  ;;  %v12926_v22 = vrot.slane %v12386_v40, %v23003_v2 }
 0x9a3   : > { %15099 = vmatprep.subr.bf16.mxu1 %v21659_v45  ;;  %v12930_v45 = vrot.slane %v12386_v40, %v23019_v62  ;;  %v21722_v49 = vld [vmem:[%s28267_s7 + $0xa94] ss:$8 sps:$4 sm:$0xff]  }
 0x9a4   : > { %14566 = vmatmul.mubr.bf16.vlgmr.msra.gmra.mxu0 %v14138_v19  ;;  %v21669_v19 = vld [vmem:[%s28267_s7 + $0xa30] ss:$8 sps:$4 sm:$0xff]  }
 0x9a5   : > { %15039 = vmatpush1.bf16.msra.mxu0 %v21654_v27  ;;  %15070 = vmatprep.mubr.bf16.mxu0 %v14687_v58  ;;  %v21717_v27 = vld [vmem:[%s28267_s7 + $0x900] ss:$8 sps:$4 sm:$0xff]   ;;  %v12934_v62 = vadd.f32 %v12930_v45, %v27935_v11  ;;  %v21743_v40 = vld [vmem:[%s28269_s9 + $0xd8] sm:$0xff]  }
 0x9a6   : > { %15100 = vmatpush2.bf16.msra.mxu1 %v21657_v12  ;;  %15040 = vmatprep.subr.bf16.mxu0 %v21662_v36  ;;  %v12933_v36 = vadd.f32 %v12926_v22, %v27924_v15  ;;  %v21725_v15 = vld [vmem:[%s28267_s7 + $0xa84] ss:$8 sps:$4 sm:$0xff]   ;;  %v21723_v11 = vld [vmem:[%s28267_s7 + $0xa80] ss:$8 sps:$4 sm:$0xff]  }
 0x9a7   : > { %15101 = vmatprep.subr.bf16.mxu1 %v21665_v7 }
 0x9a9   : > { %15041 = vmatpush1.bf16.msra.mxu0 %v21660_v52 }
 0x9aa   : > { %15102 = vmatpush2.bf16.msra.mxu1 %v21663_v37  ;;  %15042 = vmatprep.subr.bf16.mxu0 %v21668_v28  ;;  %v21720_v37 = vld [vmem:[%s28267_s7 + $0xa90] ss:$8 sps:$4 sm:$0xff]  }
 0x9ab   : > { %15103 = vmatprep.subr.bf16.mxu1 %v21671_v8 }
 0x9ac   : > { %v27980_v5 = vpop.f32.mrf.mxu1 }
 0x9ad   : > { %15043 = vmatpush1.bf16.msra.mxu0 %v21666_v25  ;;  %v14686_v25 = vrot.slane %v27154_v54, 1 }
 0x9ae   : > { %15104 = vmatpush2.bf16.msra.mxu1 %v21669_v19  ;;  %v27985_v63 = vpop.f32.mrf.mxu1  ;;  %15044 = vmatprep.subr.bf16.mxu0 %v21674_v20  ;;  %v14690_v20 = vrot.slane %v27282_v31, 1  ;;  %v21728_v31 = vld [vmem:[%s28269_s9 + $0x30] sm:$0xff]  }
 0x9af   : > { %15105 = vmatprep.subr.bf16.mxu1 %v21677_v9 }
 0x9b0   : > { %v13399_v14 = vpop.f32.mrf.mxu1 }
 0x9b1   : > { %15045 = vmatpush1.bf16.msra.mxu0 %v21672_v47  ;;  %v21731_v14 = vld [vmem:[%s28269_s9 + $0x98] sm:$0xff]  }
 0x9b2   : > { %15106 = vmatpush2.bf16.msra.mxu1 %v21675_v29  ;;  %v13400_v53 = vpop.f32.mrf.mxu1  ;;  %15046 = vmatprep.subr.bf16.mxu0 %v21680_v35  ;;  %v21727_v29 = vld [vmem:[%s28269_s9 + $0xa8] sm:$0xff]   ;;  %v21729_v35 = vld [vmem:[%s28269_s9 + $0xa0] sm:$0xff]  }
 0x9b3   : > { %15107 = vmatprep.subr.bf16.mxu1 %v21683_v57  ;;  %v21730_v57 = vld [vmem:[%s28269_s9 + $0x28] sm:$0xff]  }
 0x9b4   : > { %v13477_v41 = vpop.f32.mrf.mxu1 }
 0x9b5   : > { %15047 = vmatpush1.bf16.msra.mxu0 %v21678_v56 }
 0x9b6   : > { %15108 = vmatpush2.bf16.msra.mxu1 %v21681_v4  ;;  %v13479_v51 = vpop.f32.mrf.mxu1  ;;  %15048 = vmatprep.subr.bf16.mxu0 %v21686_v59 }
 0x9b7   : > { %15109 = vmatprep.subr.bf16.mxu1 %v21689_v21 }
 0x9b8   : > { %v13481_v13 = vpop.f32.mrf.mxu1 }
 0x9b9   : > { %15049 = vmatpush1.bf16.msra.mxu0 %v21684_v60 }
 0x9ba   : > { %15110 = vmatpush2.bf16.msra.mxu1 %v21687_v24  ;;  %v13482_v50 = vpop.f32.mrf.mxu1  ;;  %15050 = vmatprep.subr.bf16.mxu0 %v21692_v61  ;;  %v21732_v24 = vld [vmem:[%s28269_s9 + $0x20] sm:$0xff]  }
 0x9bb   : > { %15297 = vmatprep.subr.bf16.mxu1 %v21868_v1  ;;  %v21733_v50 = vld [vmem:[%s28269_s9 + $0x90] sm:$0xff]  }
 0x9bd   : > { %15112 = vmatmul.mubr.bf16.vlgmr.msra.gmra.mxu1 %v14688_v33  ;;  %15051 = vmatpush1.bf16.msra.mxu0 %v21690_v46  ;;  %v21734_v33 = vld [vmem:[%s28269_s9 + $0x18] sm:$0xff]  }
 0x9be   : > { %15052 = vmatprep.subr.bf16.mxu0 %v21695_v38 }
 0x9c1   : > { %15053 = vmatpush1.bf16.msra.mxu0 %v21693_v43 }
 0x9c2   : > { %15054 = vmatprep.subr.bf16.mxu0 %v21698_v34 }
 0x9c5   : > { %15055 = vmatpush2.bf16.msra.mxu0 %v21696_v23  ;;  %v21735_v23 = vld [vmem:[%s28269_s9 + $0x88] sm:$0xff]  }
 0x9c6   : > { %15056 = vmatprep.subr.bf16.mxu0 %v21701_v32  ;;  %v21736_v32 = vld [vmem:[%s28269_s9 + $0x10] sm:$0xff]  }
 0x9c9   : > { %15057 = vmatpush2.bf16.msra.mxu0 %v21699_v16  ;;  %v21737_v16 = vld [vmem:[%s28269_s9 + $0x80] sm:$0xff]  }
 0x9ca   : > { %15058 = vmatprep.subr.bf16.mxu0 %v21704_v17  ;;  %v21738_v17 = vld [vmem:[%s28269_s9 + $0x8] sm:$0xff]  }
 0x9cd   : > { %15059 = vmatpush2.bf16.msra.mxu0 %v21702_v10  ;;  %v21739_v10 = vld [vmem:[%s28269_s9 + $0x78] sm:$0xff]  }
 0x9ce   : > { %15060 = vmatprep.subr.bf16.mxu0 %v21707_v3 }
 0x9d1   : > { %15061 = vmatpush2.bf16.msra.mxu0 %v21705_v18  ;;  %v21740_v18 = vld [vmem:[%s28269_s9] sm:$0xff]  }
 0x9d2   : > { %15062 = vmatprep.subr.bf16.mxu0 %v21710_v6 }
 0x9d5   : > { %15063 = vmatpush2.bf16.msra.mxu0 %v21708_v30  ;;  %v21741_v30 = vld [vmem:[%s28269_s9 + $0x70] sm:$0xff]  }
 0x9d6   : > { %15064 = vmatprep.subr.bf16.mxu0 %v21713_v48 }
 0x9d9   : > { %15065 = vmatpush2.bf16.msra.mxu0 %v21711_v44  ;;  %v21742_v44 = vld [vmem:[%s28269_s9 + $0x68] sm:$0xff]  }
 0x9da   : > { %15066 = vmatprep.subr.bf16.mxu0 %v21716_v0 }
 0x9dc   : > { %v13436_v42 = vpop.f32.mrf.mxu0 }
 0x9dd   : > { %v13437_v39 = vadd.f32 %v13436_v42, %v27980_v5  ;;  %15067 = vmatpush2.bf16.msra.mxu0 %v21714_v26  ;;  %v21745_v42 = vld [vmem:[%s28269_s9 + $0xd0] sm:$0xff]  }
 0x9de   : > { %v13438_v12 = vpop.f32.mrf.mxu0  ;;  %15068 = vmatprep.subr.bf16.mxu0 %v21719_v55  ;;  %v21744_v55 = vld [vmem:[%s28269_s9 + $0x60] sm:$0xff]  }
 0x9df   : > { %v13478_v58 = vadd.f32 %v13477_v41, %v13437_v39  ;;  %v13439_v2 = vadd.f32 %v13438_v12, %v27985_v63  ;;  %v21726_v63 = vld [vmem:[%s28269_s9 + $0x38] sm:$0xff]   ;;  %v21747_v12 = vld [vmem:[%s28269_s9 + $0xc8] sm:$0xff]  }
 0x9e0   : > { %v13440_v7 = vpop.f32.mrf.mxu0  ;;  %15298 = vmatpush1.bf16.msra.mxu1 %v21726_v63  ;;  %v21746_v39 = vld [vmem:[%s28269_s9 + $0x58] sm:$0xff]  }
 0x9e1   : > { %v13480_v52 = vadd.f32 %v13479_v51, %v13439_v2  ;;  %15069 = vmatpush2.bf16.msra.mxu0 %v21717_v27  ;;  %v13484_v28 = vadd.f32 %v13478_v58, %v12933_v36  ;;  %15299 = vmatprep.subr.bf16.mxu1 %v21868_v1  ;;  %v21749_v36 = vld [vmem:[%s28269_s9 + $0xc0] sm:$0xff]   ;;  %v21750_v58 = vld [vmem:[%s28269_s9 + $0x48] sm:$0xff]   ;;  %v21751_v2 = vld [vmem:[%s28269_s9 + $0xb8] sm:$0xff]  }
 0x9e2   : > { %v13441_v8 = vpop.f32.mrf.mxu0  ;;  %15132 = vmatprep.subr.bf16.mxu0 %v21722_v49  ;;  %v21748_v49 = vld [vmem:[%s28269_s9 + $0x50] sm:$0xff]   ;;  %v21752_v7 = vld [vmem:[%s28269_s9 + $0x40] sm:$0xff]  }
 0x9e3   : > { %v13485_v19 = vadd.f32 %v13480_v52, %v12934_v62  ;;  %v21753_v62 = vld [vmem:[%s28269_s9 + $0xb0] sm:$0xff]  }
 0x9e4   : > { %15071 = vmatmul.mubr.bf16.vlgmr.msra.gmra.mxu0 %v14686_v25  ;;  %15300 = vmatpush1.bf16.msra.mxu1 %v21728_v31 }
 0x9e5   : > { %15133 = vmatpush1.bf16.msra.mxu0 %v21720_v37  ;;  %15152 = vmatprep.mubr.bf16.mxu0 %v21868_v1 }
 0x9e6   : > { %15134 = vmatprep.subr.bf16.mxu0 %v21725_v15  ;;  %15301 = vmatprep.subr.bf16.mxu1 %v21868_v1 }
 0x9e8   : > { %15302 = vmatpush1.bf16.msra.mxu1 %v21730_v57 }
 0x9e9   : > { %15135 = vmatpush1.bf16.msra.mxu0 %v21723_v11  ;;  %15303 = vmatprep.subr.bf16.mxu1 %v21868_v1 }
 0x9ea   : > { %15460 = vmatprep.subr.bf16.mxu0 %v21868_v1 }
 0x9ec   : > { %18886 = vmatmul.mubr.msk.bf16.vlgmr.msra.gmra.mxu0 %vm12795_vm0, %v14690_v20  ;;  %15304 = vmatpush1.bf16.msra.mxu1 %v21732_v24 }
 0x9ed   : > { %15461 = vmatpush1.bf16.msra.mxu0 %v21727_v29  ;;  %15305 = vmatprep.subr.bf16.mxu1 %v21868_v1 }
 0x9ee   : > { %15462 = vmatprep.subr.bf16.mxu0 %v21868_v1 }
 0x9f0   : > { %15306 = vmatpush1.bf16.msra.mxu1 %v21734_v33 }
 0x9f1   : > { %15463 = vmatpush1.bf16.msra.mxu0 %v21729_v35  ;;  %15307 = vmatprep.subr.bf16.mxu1 %v21868_v1 }
 0x9f2   : > { %15464 = vmatprep.subr.bf16.mxu0 %v21868_v1 }
 0x9f4   : > { %15308 = vmatpush1.bf16.msra.mxu1 %v21736_v32 }
 0x9f5   : > { %v14011_v54 = vpop.f32.mrf.mxu1  ;;  %15465 = vmatpush1.bf16.msra.mxu0 %v21731_v14  ;;  %15309 = vmatprep.subr.bf16.mxu1 %v21868_v1 }
 0x9f6   : > { %15466 = vmatprep.subr.bf16.mxu0 %v21868_v1 }
 0x9f7   : > { %v14013_v9 = vpop.f32.mrf.mxu1 }
 0x9f8   : > { %15310 = vmatpush1.bf16.msra.mxu1 %v21738_v17 }
 0x9f9   : > { %v14015_v5 = vpop.f32.mrf.mxu1  ;;  %15467 = vmatpush1.bf16.msra.mxu0 %v21733_v50  ;;  %15311 = vmatprep.subr.bf16.mxu1 %v21868_v1 }
 0x9fa   : > { %15468 = vmatprep.subr.bf16.mxu0 %v21868_v1 }
 0x9fb   : > { %v14016_v47 = vpop.f32.mrf.mxu1 }
 0x9fc   : > { %15312 = vmatpush1.bf16.msra.mxu1 %v21740_v18 }
 0x9fd   : > { %15469 = vmatpush1.bf16.msra.mxu0 %v21735_v23  ;;  %15317 = vmatprep.subr.bf16.mxu1 %v21868_v1 }
 0x9fe   : > { %15470 = vmatprep.subr.bf16.mxu0 %v21868_v1 }
 0xa00   : > { %15318 = vmatpush2.bf16.msra.mxu1 %v21742_v44 }
 0xa01   : > { %15471 = vmatpush1.bf16.msra.mxu0 %v21737_v16  ;;  %15319 = vmatprep.subr.bf16.mxu1 %v21868_v1 }
 0xa02   : > { %15472 = vmatprep.subr.bf16.mxu0 %v21868_v1 }
 0xa04   : > { %15320 = vmatpush2.bf16.msra.mxu1 %v21744_v55 }
 0xa05   : > { %15473 = vmatpush1.bf16.msra.mxu0 %v21739_v10  ;;  %15321 = vmatprep.subr.bf16.mxu1 %v21868_v1 }
 0xa06   : > { %15474 = vmatprep.subr.bf16.mxu0 %v21868_v1 }
 0xa08   : > { %15322 = vmatpush2.bf16.msra.mxu1 %v21746_v39 }
 0xa09   : > { %15475 = vmatpush1.bf16.msra.mxu0 %v21741_v30  ;;  %15323 = vmatprep.subr.bf16.mxu1 %v21868_v1 }
 0xa0a   : > { %15480 = vmatprep.subr.bf16.mxu0 %v21868_v1 }
 0xa0c   : > { %15324 = vmatpush2.bf16.msra.mxu1 %v21748_v49 }
 0xa0d   : > { %15481 = vmatpush2.bf16.msra.mxu0 %v21743_v40  ;;  %15325 = vmatprep.subr.bf16.mxu1 %v21868_v1 }
 0xa0e   : > { %15482 = vmatprep.subr.bf16.mxu0 %v21868_v1 }
 0xa10   : > { %15326 = vmatpush2.bf16.msra.mxu1 %v21750_v58 }
 0xa11   : > { %15483 = vmatpush2.bf16.msra.mxu0 %v21745_v42  ;;  %15327 = vmatprep.subr.bf16.mxu1 %v21868_v1 }
 0xa12   : > { %15484 = vmatprep.subr.bf16.mxu0 %v21868_v1 }
 0xa14   : > { %15328 = vmatpush2.bf16.msra.mxu1 %v21752_v7 }
 0xa15   : > { %15485 = vmatpush2.bf16.msra.mxu0 %v21747_v12 }
 0xa16   : > { %15486 = vmatprep.subr.bf16.mxu0 %v21868_v1 }
 0xa19   : > { %15487 = vmatpush2.bf16.msra.mxu0 %v21749_v36 }
 0xa1a   : > { %15488 = vmatprep.subr.bf16.mxu0 %v21868_v1 }
 0xa1c   : > { %v13970_v56 = vpop.f32.mrf.mxu0 }
 0xa1d   : > { %v14012_v53 = vadd.f32 %v14011_v54, %v13970_v56  ;;  %15489 = vmatpush2.bf16.msra.mxu0 %v21751_v2 }
 0xa1e   : > { %v13972_v4 = vpop.f32.mrf.mxu0  ;;  %15490 = vmatprep.subr.bf16.mxu0 %v21868_v1 }
 0xa1f   : > { %v14014_v59 = vadd.f32 %v14013_v9, %v13972_v4 }
 0xa20   : > { %v13974_v21 = vpop.f32.mrf.mxu0 }
 0xa21   : > { %15491 = vmatpush2.bf16.msra.mxu0 %v21753_v62 }
 0xa22   : > { %v13975_v41 = vpop.f32.mrf.mxu0 }
 0xa24   : > { %v14052_v60 = vpop.f32.mrf.mxu0 }
 0xa25   : > { %v14053_v51 = vadd.f32 %v14052_v60, %v14012_v53 }
 0xa26   : > { %v14054_v61 = vpop.f32.mrf.mxu0 }
 0xa27   : > { %v28129_v13 = vadd.f32 %v14053_v51, %v13484_v28  ;;  %v14055_v46 = vadd.f32 %v14054_v61, %v14014_v59 }
 0xa28   : > { %v14056_v38 = vpop.f32.mrf.mxu0 }
 0xa29   : > { %v28138_v43 = vadd.f32 %v14055_v46, %v13485_v19 }
 0xa2a   : > { %v14057_v34 = vpop.f32.mrf.mxu0 }
 0xa35   : > { %v14526_v3 = vpop.f32.mrf.mxu1 }
 0xa37   : > { %v14528_v6 = vpop.f32.mrf.mxu1 }
 0xa39   : > { %v14530_v48 = vpop.f32.mrf.mxu1 }
 0xa3a   : > { %v15181_v48 = vld [vmem:[%s28270_s10] sm:$0x1] }
 0xa3b   : > { %v14531_v0 = vpop.f32.mrf.mxu1 }
 0xa3d   : > { %v14608_v26 = vpop.f32.mrf.mxu1 }
 0xa3f   : > { %v14610_v22 = vpop.f32.mrf.mxu1 }
 0xa41   : > { %v14612_v45 = vpop.f32.mrf.mxu1 }
 0xa43   : > { %v14613_v27 = vpop.f32.mrf.mxu1 }
 0xa64   : > { %v14567_v52 = vpop.f32.mrf.mxu0 }
 0xa65   : > { %v14568_v37 = vadd.f32 %v14567_v52, %v14526_v3 }
 0xa66   : > { %v14569_v28 = vpop.f32.mrf.mxu0 }
 0xa67   : > { %v14609_v8 = vadd.f32 %v14608_v26, %v14568_v37  ;;  %v14570_v25 = vadd.f32 %v14569_v28, %v14528_v6 }
 0xa68   : > { %v14571_v15 = vpop.f32.mrf.mxu0 }
 0xa69   : > { %v14611_v19 = vadd.f32 %v14610_v22, %v14570_v25  ;;  %v14615_v11 = vadd.f32 %v14609_v8, %v28129_v13 }
 0xa6a   : > { %v14572_v20 = vpop.f32.mrf.mxu0 }
 0xa6b   : > { %v14616_v54 = vadd.f32 %v14611_v19, %v28138_v43 }
 0xa7d   : > { %v15113_v9 = vpop.f32.mrf.mxu1 }
 0xa7f   : > { %v15115_v1 = vpop.f32.mrf.mxu1 }
 0xa81   : > { %v15117_v5 = vpop.f32.mrf.mxu1 }
 0xa83   : > { %v15118_v47 = vpop.f32.mrf.mxu1 }
 0xaa4   : > { %v15072_v63 = vpop.f32.mrf.mxu0 }
 0xaa5   : > { %v15114_v57 = vadd.f32 %v15113_v9, %v15072_v63 }
 0xaa6   : > { %v15074_v29 = vpop.f32.mrf.mxu0 }
 0xaa7   : > { %v15116_v56 = vadd.f32 %v15115_v1, %v15074_v29 }
 0xaa8   : > { %v15076_v31 = vpop.f32.mrf.mxu0 }
 0xaaa   : > { %v15077_v35 = vpop.f32.mrf.mxu0 }
 0xaac   : > { %v15154_v14 = vpop.f32.mrf.mxu0 }
 0xaad   : > { %v15155_v53 = vadd.f32 %v15154_v14, %v15114_v57 }
 0xaae   : > { %v15156_v4 = vpop.f32.mrf.mxu0 }
 0xaaf   : > { %v15161_v59 = vadd.f32 %v15155_v53, %v14615_v11  ;;  %v15157_v21 = vadd.f32 %v15156_v4, %v15116_v56 }
 0xab0   : > { %v15158_v41 = vpop.f32.mrf.mxu0 }
 0xab1   : > { %v15165_v60 = vmin.f32 %v15161_v59, 0.0  ;;  %v15162_v51 = vadd.f32 %v15157_v21, %v14616_v54  ;;  %vm15163_vm1 = vcmp.gt.f32.partialorder %v15161_v59, 0.0 }
 0xab2   : > { %v15159_v24 = vpop.f32.mrf.mxu0 }
 0xab3   : > { %v15167_v61 = vmul.f32 1.442695, %v15165_v60  ;;  %v15166_v13 = vmin.f32 %v15162_v51, 0.0  ;;  %vm15164_vm2 = vcmp.gt.f32.partialorder %v15162_v51, 0.0 }
 0xab5   : > { %21794 = vpow2.f32 %v15167_v61  ;;  %v15169_v46 = vmul.f32 1.442695, %v15166_v13 }
 0xab7   : > { %21796 = vpow2.f32 %v15169_v46 }
 0xac2   : > { %v21795_v50 = vpop.eup %21794 }
 0xac3   : > { %v18887_v38 = vadd.f32 -1.0, %v21795_v50 }
 0xac4   : > { %v21797_v33 = vpop.eup %21796 }
 0xac5   : > { %v15173_v43 = vmul.f32 1.6732632, %v18887_v38  ;;  %v18888_v34 = vadd.f32 -1.0, %v21797_v33 }
 0xac7   : > { %v15175_v23 = vsel %vm15163_vm1, %v15161_v59, %v15173_v43  ;;  %v15174_v32 = vmul.f32 1.6732632, %v18888_v34 }
 0xac8   : > { %v15177_v16 = vmul.f32 1.050701, %v15175_v23 }
 0xac9   : > { %v15176_v17 = vsel %vm15164_vm2, %v15162_v51, %v15174_v32 }
 0xaca   : > { %v15178_v10 = vmul.f32 1.050701, %v15176_v17  ;;  %v15179_v3 = vpack.c.bf16 %v15177_v16, %v15177_v16 }
 0xacc   : > { %v15180_v18 = vpack.c.bf16 %v15178_v10, %v15178_v10  ;;  %v15368_v30 = vshrl.u32 %v15179_v3, 16 }
 0xace   : > { %18903 = vmatprep.mubr.msk.bf16.mxu1 %vm5329_vm6, %v15180_v18  ;;  %v15370_v6 = vshrl.u32 %v15180_v18, 16 }
 0xacf   : > { %15330 = vmatmul.mubr.bf16.vlgmr.msra.gmra.mxu1 %v15179_v3 }
 0xad0   : > { %18946 = vmatprep.mubr.msk.bf16.mxu0 %vm5329_vm6, %v15370_v6 }
 0xad1   : > { %15493 = vmatmul.mubr.bf16.vlgmr.msra.gmra.mxu0 %v15368_v30 }
 0xb8f   : > { %v15331_v44 = vpop.f32.mrf.mxu1 }
 0xb90   : > { %v15337_v0 = vadd.f32 %v15331_v44, %v15181_v48 }
 0xb91   : > { %v15333_v40 = vpop.f32.mrf.mxu1  ;;  %v15494_v26 = vpop.f32.mrf.mxu0 }
 0xb92   : > { %v15500_v55 = vadd.f32 %v15494_v26, %v15337_v0 }
 0xb93   : > { %v15334_v22 = vpop.f32.mrf.mxu1  ;;  %v15496_v42 = vpop.f32.mrf.mxu0 }
 0xb94   : > { %v15502_v45 = vsel %vm15501_vm3, %v15500_v55, -inf }
 0xb95   : > { %v15497_v39 = vpop.f32.mrf.mxu0  ;;  %15503 = vmax.xlane.f32.xlu0 %v15502_v45  ;;  %v15335_v27 = vpop.f32.mrf.mxu1 }
 0xb97   : > { %v15498_v12 = vpop.f32.mrf.mxu0 }
 0xc1e   : > { %v15504_v49 = vpop.xlane.xlu0 %15503 }
 0xc1f   : > { %v15505_v36 = vsub.f32 %v15500_v55, %v15504_v49 }
 0xc21   : > { %v15506_v58 = vmul.f32 1.442695, %v15505_v36 }
 0xc23   : > { %21798 = vpow2.f32 %v15506_v58 }
 0xc30   : > { %v21799_v2 = vpop.eup %21798 }
 0xc31   : > { %v15508_v7 = vsel %vm15501_vm3, %v21799_v2, 0.0 }
 0xc32   : > { %15509 = vadd.xlane.f32.xlu0 %v15508_v7 }
 0xcbb   : > { %v15510_v62 = vpop.xlane.xlu0 %15509 }
 0xcbc   : > { %21800 = vrcp.f32 %v15510_v62 }
 0xcc9   : > { %v21801_v52 = vpop.eup %21800 }
 0xcca   : > { %v15512_v37 = vmul.f32 %v21801_v52, %v21799_v2 }
 0xccc   : > { %15513 = vst.msk [vmem:[%s378_s29] sm:$0x1] %vm15501_vm3, %v15512_v37 }
 0xccd   : > { %21819 = shalt.err (!%p21816_p3)
}
 0xcce   : > { %s21820_s25 = scalar_lea.hbm %s15525_s13, 16  ;;  %s21824_s29 = scalar_lea.hbm %s28271_s11, 32 }
 0xccf   : > { %p21821_p4 = scmp.ne.s32.totalorder %s15525_s13, %s21820_s25  ;;  %p21825_p9 = scmp.lt.s32.totalorder %s15525_s13, %s28271_s11 }
 0xcd0   : > { %p21826_p10 = scmp.lt.s32.totalorder %s21824_s29, %s21820_s25 }
 0xcd1   : > { %p21822_p7 = pnand %p21821_p4, %p21971_p5 }
 0xcd2   : > { %p21827_p11 = por %p21826_p10, %p21825_p9 }
 0xcd3   : > { %p21823_p8 = pneg %p21822_p7 }
 0xcd5   : > { %p21828_p12 = pnand %p21827_p11, %p21823_p8 }
 0xcd7   : > { %21831 = shalt.err (!%p21828_p12)
}
 0xcd8   : > { %19307 = dma.vmem_to_hbm [thread:$0]  (%p21971_p5), %s15528_s30, 16, %s15525_s13, %s15515_s14  }
 0xcd9 PF: > { %p19313_p13 = scmp.ge.s32.totalorder %s21866_s20, 2  ;;  %s15539_s24 = sand.u32 1, %s21854_s17  }
 0xcda   : > { %s15540_s19 = scalar_lea.sflag [#allocation3], %s15539_s24 }
 0xcdb   : > { %p19310_p0 = pnand %p19313_p13, %p21975_p6 }
 0xcdd   : > { %p19311_p1 = pneg %p19310_p0 }
 0xcdf   : > { %21849 = dma.done.wait (%p19311_p1), %s15540_s19, 16  }
 0xce0   : > { %21851 = vsyncadd (%p19311_p1), %s15540_s19, 4294967280  ;;  %s28277_s15 = sld [smem:[#allocation5_spill]]  ;;  %p21_p2 = scmp.ge.s32.totalorder %s21958_s23, 4  }
 0xce1   : > { %s28278_s19 = sld [smem:[#allocation6_spill]]  ;;  %s28279_s17 = smov %s21858_s18 }
 0xce2   : > { %s28281_s20 = smov %s21958_s23  ;;  %23 = sbr.rel (!%p21_p2) target bundleno = 3 (0x3), region = 112 }
 0xce6   : > { %s28280_s18 = smov %s28277_s15 }
 0xce7   :  { %15544 = vsyncpa [#allocation3], 1 }
 0xce8   :  { %15546 = vsyncpa [#allocation3 + $0x1], 1 }

</bundles_post_ra>
